<compile_context>
chip_gen: v6e
topology: v6e:2x2x1
jax: 0.10.0
libtpu: 0.0.40
codegen_flags: <defaults>
</compile_context>

<pallas_src>
import jax
import jax.numpy as jnp
from jax.experimental import pallas as pl
from jax.experimental.pallas import tpu as pltpu


# PCEN module defaults (nn.Parameters are stored as logs and exponentiated in
# forward, so at init they equal these constants).
PCEN_EPS = 1e-6
PCEN_S = 0.025
PCEN_ALPHA = 0.98
PCEN_DELTA = 2.0
PCEN_R = 0.5

KSIZE = 7          # conv kernel size
C1 = 15            # layer1 out channels
C2 = 30            # layer2 out channels
HIDDEN = 200
NUM_CLASSES = 2
LANE = 128


def _round_up(x, m):
    return (x + m - 1) // m * m


# -----------------------------------------------------------------------------
# PCEN front-end
# -----------------------------------------------------------------------------
def _pcen_kernel(a_ref, x_ref, o_ref):
    """One (W, TL) column tile: M = A @ X on the MXU, then vectorised
    normalisation (sqrt / exp / log on the EUP over the full block)."""
    x = x_ref[...]                                              # (W, TL) f32
    m = jnp.dot(a_ref[...], x, preferred_element_type=jnp.float32)
    # (x * (M+eps)^(-alpha) + delta)^0.5 - delta^0.5   (r = 0.5 -> sqrt)
    inv = jnp.exp((-PCEN_ALPHA) * jnp.log(m + PCEN_EPS))
    o_ref[...] = jnp.sqrt(x * inv + PCEN_DELTA) - PCEN_DELTA ** PCEN_R


def pcen(x_nchw):
    """PCENTransform.forward (eval).  (N,1,H,W) -> (N,1,H,W).

    Time axis W on sublanes, (N*H) on 128-wide lane tiles.  The smoother is a
    linear operator, so the recurrence (with M[0] = s*x[0], i.e. zero initial
    state, exactly as in the PyTorch reference) is computed as one small MXU
    matmul M = A @ X per tile — no serial dependency chain left.
    """
    # TODO(synk): learnable PCEN log-parameters are baked in as compile-time
    # constants at their init values (exp(log_s)=s etc.).
    N, C, H, W = x_nchw.shape
    assert C == 1
    xt = jnp.transpose(x_nchw.reshape(N, H, W), (2, 0, 1)).reshape(W, N * H)
    L = N * H
    Lp = _round_up(L, LANE)
    TL = Lp if Lp <= 512 else 512          # wider tiles amortise per-step cost
    Lp = _round_up(Lp, TL)
    xp = jnp.pad(xt, ((0, 0), (0, Lp - L)))

    # Lower-triangular smoothing operator A[t,k] = s*(1-s)^(t-k), k <= t.
    t_idx = jnp.arange(W)[:, None]
    k_idx = jnp.arange(W)[None, :]
    d = t_idx - k_idx
    A = jnp.where(
        d >= 0,
        PCEN_S * jnp.power(1.0 - PCEN_S, jnp.maximum(d, 0).astype(jnp.float32)),
        0.0,
    ).astype(jnp.float32)

    out = pl.pallas_call(
        _pcen_kernel,
        out_shape=jax.ShapeDtypeStruct((W, Lp), jnp.float32),
        grid=(Lp // TL,),
        in_specs=[pl.BlockSpec((W, W), lambda i: (0, 0)),     # A resident
                  pl.BlockSpec((W, TL), lambda i: (0, i))],
        out_specs=pl.BlockSpec((W, TL), lambda i: (0, i)),
        compiler_params=pltpu.CompilerParams(
            dimension_semantics=("parallel",)),
    )(A, xp)
    out = out[:, :L].reshape(W, N, H)
    return jnp.transpose(out, (1, 2, 0)).reshape(N, 1, H, W)


# -----------------------------------------------------------------------------
# Fused Conv2d + folded BatchNorm + ReLU + MaxPool2d(2)
# -----------------------------------------------------------------------------
def _conv_pool_kernel(p0_ref, p1_ref, p2_ref, p3_ref, w_ref, b_ref, o_ref):
    """relu(max_{2x2 pool offsets}(patches @ w) + b) for one row tile.

    Exact fusion: BN scale is folded into w, and bias-add / ReLU commute with
    the max over the four pool offsets.  w/b are zero-padded to 128 output
    lanes so the store is unmasked (lane-dense); padded lanes stay zero.
    """
    w = w_ref[...]                                             # (Kdim, 128) bf16
    acc = jnp.dot(p0_ref[...], w, preferred_element_type=jnp.float32)
    acc = jnp.maximum(acc, jnp.dot(p1_ref[...], w,
                                   preferred_element_type=jnp.float32))
    acc = jnp.maximum(acc, jnp.dot(p2_ref[...], w,
                                   preferred_element_type=jnp.float32))
    acc = jnp.maximum(acc, jnp.dot(p3_ref[...], w,
                                   preferred_element_type=jnp.float32))
    o_ref[...] = jnp.maximum(acc + b_ref[...], 0.0).astype(o_ref.dtype)


def _im2col_pool_patches(x, k):
    """Four stride-2 im2col patch matrices (bf16), one per 2x2 pool offset.

    x: (N,H,W,C) NHWC.  Conv is k x k, stride 1, VALID; pool is 2x2/2 (floor).
    Returns [p00,p01,p10,p11], each (N*Hp*Wp, k*k*C), and (N,Hp,Wp).
    Column order is (dy, dx, c) — the synthetic weights below use the same
    flat layout.
    """
    # TODO(synk): the four patch matrices still round-trip HBM via XLA; an
    # in-kernel im2col from the raw NHWC activation would remove that glue but
    # risks strided-slice VMEM copies, so it is left to a follow-up.
    N, H, W, C = x.shape
    Ho, Wo = H - k + 1, W - k + 1
    Hp, Wp = Ho // 2, Wo // 2
    patches = []
    for py in (0, 1):
        for px in (0, 1):
            cols = []
            for dy in range(k):
                for dx in range(k):
                    cols.append(x[:, py + dy: py + dy + 2 * Hp: 2,
                                  px + dx: px + dx + 2 * Wp: 2, :])
            p = jnp.concatenate(cols, axis=-1).reshape(N * Hp * Wp, k * k * C)
            patches.append(p.astype(jnp.bfloat16))
    return patches, (N, Hp, Wp)


def conv_bn_relu_pool(x_nhwc, w_eff, b_eff, *, tile_m):
    """Conv2d(k=7,s=1) + folded BN + ReLU + MaxPool2d(2) in one pallas_call.

    w_eff: (k*k*Cin, Cout) with BN scale folded; b_eff: (Cout,) folded bias.
    Tiled over output rows ("parallel"); weights/bias stay resident in VMEM.
    Output channels are padded to 128 lanes inside the kernel (unmasked
    stores) and sliced back here.
    """
    Kdim, Cout = w_eff.shape
    patches, (N, Hp, Wp) = _im2col_pool_patches(x_nhwc, KSIZE)
    M = patches[0].shape[0]
    Mp = _round_up(M, tile_m)
    patches = [jnp.pad(p, ((0, Mp - M), (0, 0))) for p in patches]

    Cp = _round_up(Cout, LANE)
    w_p = jnp.pad(w_eff, ((0, 0), (0, Cp - Cout))).astype(jnp.bfloat16)
    b_p = jnp.pad(b_eff.reshape(1, Cout).astype(jnp.float32),
                  ((0, 0), (0, Cp - Cout)))

    out = pl.pallas_call(
        _conv_pool_kernel,
        out_shape=jax.ShapeDtypeStruct((Mp, Cp), jnp.bfloat16),
        grid=(Mp // tile_m,),
        in_specs=[pl.BlockSpec((tile_m, Kdim), lambda i: (i, 0))] * 4
        + [pl.BlockSpec((Kdim, Cp), lambda i: (0, 0)),
           pl.BlockSpec((1, Cp), lambda i: (0, 0))],
        out_specs=pl.BlockSpec((tile_m, Cp), lambda i: (i, 0)),
        compiler_params=pltpu.CompilerParams(
            dimension_semantics=("parallel",)),
    )(*patches, w_p, b_p)
    return out[:M, :Cout].reshape(N, Hp, Wp, Cout)


# -----------------------------------------------------------------------------
# Fused classifier: fc1 + ReLU + (Dropout eval) + fc2 + sigmoid
# -----------------------------------------------------------------------------
def _classifier_kernel(x_ref, w1_ref, b1_ref, w2_ref, b2_ref, o_ref):
    h = jnp.dot(x_ref[...], w1_ref[...], preferred_element_type=jnp.float32)
    h = jnp.maximum(h + b1_ref[...], 0.0)
    # TODO(synk): Dropout(p=0.5) between fc1 and fc2 is identity in eval mode.
    y = jnp.dot(h, w2_ref[...], preferred_element_type=jnp.float32)
    o_ref[...] = jax.nn.sigmoid(y + b2_ref[...])


def classifier(feat, w1, b1, w2, b2):
    """M=2 is sublane-starved; fuse both layers in one call, no tiling.
    feat / w1 are bf16 (the 1.45 MB w1 read dominates), accumulation is f32."""
    Nb, F = feat.shape
    Hd = w1.shape[1]
    Nc = w2.shape[1]
    return pl.pallas_call(
        _classifier_kernel,
        out_shape=jax.ShapeDtypeStruct((Nb, Nc), jnp.float32),
        grid=(1,),
        in_specs=[
            pl.BlockSpec((Nb, F), lambda i: (0, 0)),
            pl.BlockSpec((F, Hd), lambda i: (0, 0)),
            pl.BlockSpec((1, Hd), lambda i: (0, 0)),
            pl.BlockSpec((Hd, Nc), lambda i: (0, 0)),
            pl.BlockSpec((1, Nc), lambda i: (0, 0)),
        ],
        out_specs=pl.BlockSpec((Nb, Nc), lambda i: (0, 0)),
    )(feat, w1, b1.reshape(1, Hd), w2, b2.reshape(1, Nc))


# -----------------------------------------------------------------------------
# Parameters (synthetic, deterministic; shapes match the PyTorch module)
# -----------------------------------------------------------------------------
def fold_bn(gamma, beta, mean, var, eps=1e-5):
    scale = gamma / jnp.sqrt(var + eps)
    bias = beta - mean * scale
    return scale, bias


def init_params(key):
    keys = iter(jax.random.split(key, 32))

    def nrm(shape, std):
        return std * jax.random.normal(next(keys), shape, jnp.float32)

    def bn(c):
        gamma = 1.0 + 0.1 * jax.random.normal(next(keys), (c,), jnp.float32)
        beta = 0.1 * jax.random.normal(next(keys), (c,), jnp.float32)
        mean = 0.1 * jax.random.normal(next(keys), (c,), jnp.float32)
        var = 1.0 + 0.1 * jnp.abs(jax.random.normal(next(keys), (c,),
                                                    jnp.float32))
        return fold_bn(gamma, beta, mean, var)

    # TODO(synk): no checkpoint is loaded; weights are synthetic but the
    # layer shapes / BN-eval folding match the PyTorch module exactly.  (A real
    # checkpoint would need (Cout,Cin,kH,kW) -> (kH*kW*Cin, Cout) transposes.)
    p = {}
    # layer1: Conv2d(1, 15, 7) + BatchNorm2d(15)
    w1 = nrm((KSIZE * KSIZE * 1, C1), 0.05)
    cb1 = nrm((C1,), 0.05)
    s1, bb1 = bn(C1)
    p["conv1_w"] = w1 * s1[None, :]
    p["conv1_b"] = cb1 * s1 + bb1
    # layer2: Conv2d(15, 30, 7) + BatchNorm2d(30)
    w2 = nrm((KSIZE * KSIZE * C1, C2), 0.05)
    cb2 = nrm((C2,), 0.05)
    s2, bb2 = bn(C2)
    p["conv2_w"] = w2 * s2[None, :]
    p["conv2_b"] = cb2 * s2 + bb2
    # classifier (fc1 weight stored bf16: halves its HBM read)
    p["fc1_w"] = nrm((11 * 11 * C2, HIDDEN), 0.02).astype(jnp.bfloat16)
    p["fc1_b"] = nrm((HIDDEN,), 0.02)
    p["fc2_w"] = nrm((HIDDEN, NUM_CLASSES), 0.02)
    p["fc2_b"] = nrm((NUM_CLASSES,), 0.02)
    return p


# -----------------------------------------------------------------------------
# Forward pass
# -----------------------------------------------------------------------------
@jax.jit
def christoph_cnn_with_pcen_forward(params, x_nchw):
    x = pcen(x_nchw.astype(jnp.float32))                 # PCEN front-end
    # TODO(synk): Dropout(0.5) on the PCEN output is identity in eval mode.
    x = jnp.transpose(x, (0, 2, 3, 1))                   # NCHW -> NHWC (C=1)
    # layer1: Conv(1->15,k7)+BN+ReLU+MaxPool2 fused; M=1682 -> grid of 2 tiles
    x = conv_bn_relu_pool(x, params["conv1_w"], params["conv1_b"], tile_m=1024)
    # layer2: Conv(15->30,k7)+BN+ReLU+MaxPool2 fused; M=242 -> grid of 2 tiles
    x = conv_bn_relu_pool(x, params["conv2_w"], params["conv2_b"], tile_m=128)
    # flatten in PyTorch NCHW order: (N, C, H, W) -> (N, C*H*W)
    N, Hp, Wp, C = x.shape
    feat = jnp.transpose(x, (0, 3, 1, 2)).reshape(N, C * Hp * Wp)
    # fc1 -> ReLU -> Dropout(eval) -> fc2 -> sigmoid (fused in one kernel)
    return classifier(feat.astype(jnp.bfloat16),
                      params["fc1_w"], params["fc1_b"],
                      params["fc2_w"], params["fc2_b"])


if __name__ == "__main__":
    key = jax.random.PRNGKey(0)
    pkey, xkey = jax.random.split(key)
    params = init_params(pkey)
    # (batch=2, 1 channel, 64x64 spectrogram): after the two conv+pool layers
    # the feature map is 11x11x30, matching nn.Linear(11*11*30, 200).
    # Non-negative input (spectrogram magnitudes) keeps PCEN well-defined.
    x = jax.random.uniform(xkey, (2, 1, 64, 64), jnp.float32)
    out = christoph_cnn_with_pcen_forward(params, x)
    out = jax.block_until_ready(out)
    assert out.shape == (2, NUM_CLASSES), out.shape
    assert bool(jnp.all(jnp.isfinite(out)))
    assert bool(jnp.all((out >= 0.0) & (out <= 1.0)))    # sigmoid output
    print("KERNEL_OK")
</pallas_src>

<mosaic_0001>
module attributes {stable_mosaic.version = 11 : i64} {
  func.func @_pcen_kernel(%arg0: i32, %arg1: memref<64x64xf32, #tpu.memory_space<vmem>>, %arg2: memref<64x128xf32, #tpu.memory_space<vmem>>, %arg3: memref<64x128xf32, #tpu.memory_space<vmem>>) attributes {dimension_semantics = [#tpu.dimension_semantics<parallel>], iteration_bounds = array<i64: 1>, scalar_prefetch = 0 : i64, scratch_operands = 0 : i64, tpu.core_type = #tpu.core_type<tc>, window_params = [{pipeline_mode = #tpu.pipeline_mode<synchronous>, transform_indices = @transform_0, window_bounds = array<i64: 64, 64>}, {transform_indices = @transform_1, window_bounds = array<i64: 64, 128>}, {transform_indices = @transform_2, window_bounds = array<i64: 64, 128>}]} {
    %c0 = arith.constant 0 : index
    %c0_0 = arith.constant 0 : index
    %0 = vector.load %arg2[%c0, %c0_0] : memref<64x128xf32, #tpu.memory_space<vmem>>, vector<64x128xf32>
    %c0_1 = arith.constant 0 : index
    %c0_2 = arith.constant 0 : index
    %1 = vector.load %arg1[%c0_1, %c0_2] : memref<64x64xf32, #tpu.memory_space<vmem>>, vector<64x64xf32>
    %cst = arith.constant dense<0.000000e+00> : vector<64x128xf32>
    %2 = tpu.matmul %1, %0, %cst {dimension_numbers = #tpu.dot_dimension_numbers<[1], [0], [0], [1], [0, 0, 1, 1], [], []>} : vector<64x64xf32>, vector<64x128xf32>, vector<64x128xf32> -> vector<64x128xf32>
    %cst_3 = arith.constant 9.99999997E-7 : f32
    %3 = vector.broadcast %cst_3 : f32 to vector<64x128xf32>
    %4 = arith.addf %2, %3 : vector<64x128xf32>
    %5 = math.log %4 : vector<64x128xf32>
    %cst_4 = arith.constant -9.800000e-01 : f32
    %6 = vector.broadcast %cst_4 : f32 to vector<64x128xf32>
    %7 = arith.mulf %6, %5 : vector<64x128xf32>
    %8 = math.exp %7 : vector<64x128xf32>
    %9 = arith.mulf %0, %8 : vector<64x128xf32>
    %cst_5 = arith.constant 2.000000e+00 : f32
    %10 = vector.broadcast %cst_5 : f32 to vector<64x128xf32>
    %11 = arith.addf %9, %10 : vector<64x128xf32>
    %12 = math.sqrt %11 : vector<64x128xf32>
    %cst_6 = arith.constant 1.41421354 : f32
    %13 = vector.broadcast %cst_6 : f32 to vector<64x128xf32>
    %14 = arith.subf %12, %13 : vector<64x128xf32>
    %c0_7 = arith.constant 0 : index
    %c0_8 = arith.constant 0 : index
    %15 = vector.load %arg3[%c0_7, %c0_8] : memref<64x128xf32, #tpu.memory_space<vmem>>, vector<64x128xf32>
    tpu.vector_store %arg3[%c0_7, %c0_8], %14 {strides = array<i32>} : memref<64x128xf32, #tpu.memory_space<vmem>>, vector<64x128xf32>,
    return
  }
  func.func @transform_0(%arg0: i32) -> (i32, i32) {
    %c0_i32 = arith.constant 0 : i32
    %c0_i32_0 = arith.constant 0 : i32
    %c0_i32_1 = arith.constant 0 : i32
    return %c0_i32, %c0_i32_0 : i32, i32
  }
  func.func @transform_1(%arg0: i32) -> (i32, i32) {
    %c0_i32 = arith.constant 0 : i32
    %c0_i32_0 = arith.constant 0 : i32
    return %c0_i32, %arg0 : i32, i32
  }
  func.func @transform_2(%arg0: i32) -> (i32, i32) {
    %c0_i32 = arith.constant 0 : i32
    %c0_i32_0 = arith.constant 0 : i32
    return %c0_i32, %arg0 : i32, i32
  }
}

module attributes {stable_mosaic.version = 11 : i64} {
  func.func @_conv_pool_kernel(%arg0: i32, %arg1: memref<1024x49xbf16, #tpu.memory_space<vmem>>, %arg2: memref<1024x49xbf16, #tpu.memory_space<vmem>>, %arg3: memref<1024x49xbf16, #tpu.memory_space<vmem>>, %arg4: memref<1024x49xbf16, #tpu.memory_space<vmem>>, %arg5: memref<49x128xbf16, #tpu.memory_space<vmem>>, %arg6: memref<1x128xf32, #tpu.memory_space<vmem>>, %arg7: memref<1024x128xbf16, #tpu.memory_space<vmem>>) attributes {dimension_semantics = [#tpu.dimension_semantics<parallel>], iteration_bounds = array<i64: 2>, scalar_prefetch = 0 : i64, scratch_operands = 0 : i64, tpu.core_type = #tpu.core_type<tc>, window_params = [{transform_indices = @transform_0, window_bounds = array<i64: 1024, 49>}, {transform_indices = @transform_1, window_bounds = array<i64: 1024, 49>}, {transform_indices = @transform_2, window_bounds = array<i64: 1024, 49>}, {transform_indices = @transform_3, window_bounds = array<i64: 1024, 49>}, {pipeline_mode = #tpu.pipeline_mode<synchronous>, transform_indices = @transform_4, window_bounds = array<i64: 49, 128>}, {pipeline_mode = #tpu.pipeline_mode<synchronous>, transform_indices = @transform_5, window_bounds = array<i64: 1, 128>}, {transform_indices = @transform_6, window_bounds = array<i64: 1024, 128>}]} {
    %c0 = arith.constant 0 : index
    %c0_0 = arith.constant 0 : index
    %0 = vector.load %arg5[%c0, %c0_0] : memref<49x128xbf16, #tpu.memory_space<vmem>>, vector<49x128xbf16>
    %c0_1 = arith.constant 0 : index
    %c0_2 = arith.constant 0 : index
    %1 = vector.load %arg1[%c0_1, %c0_2] : memref<1024x49xbf16, #tpu.memory_space<vmem>>, vector<1024x49xbf16>
    %cst = arith.constant dense<0.000000e+00> : vector<1024x128xf32>
    %2 = tpu.matmul %1, %0, %cst {dimension_numbers = #tpu.dot_dimension_numbers<[1], [0], [0], [1], [0, 0, 1, 1], [], []>} : vector<1024x49xbf16>, vector<49x128xbf16>, vector<1024x128xf32> -> vector<1024x128xf32>
    %c0_3 = arith.constant 0 : index
    %c0_4 = arith.constant 0 : index
    %3 = vector.load %arg2[%c0_3, %c0_4] : memref<1024x49xbf16, #tpu.memory_space<vmem>>, vector<1024x49xbf16>
    %cst_5 = arith.constant dense<0.000000e+00> : vector<1024x128xf32>
    %4 = tpu.matmul %3, %0, %cst_5 {dimension_numbers = #tpu.dot_dimension_numbers<[1], [0], [0], [1], [0, 0, 1, 1], [], []>} : vector<1024x49xbf16>, vector<49x128xbf16>, vector<1024x128xf32> -> vector<1024x128xf32>
    %5 = arith.maximumf %2, %4 : vector<1024x128xf32>
    %c0_6 = arith.constant 0 : index
    %c0_7 = arith.constant 0 : index
    %6 = vector.load %arg3[%c0_6, %c0_7] : memref<1024x49xbf16, #tpu.memory_space<vmem>>, vector<1024x49xbf16>
    %cst_8 = arith.constant dense<0.000000e+00> : vector<1024x128xf32>
    %7 = tpu.matmul %6, %0, %cst_8 {dimension_numbers = #tpu.dot_dimension_numbers<[1], [0], [0], [1], [0, 0, 1, 1], [], []>} : vector<1024x49xbf16>, vector<49x128xbf16>, vector<1024x128xf32> -> vector<1024x128xf32>
    %8 = arith.maximumf %5, %7 : vector<1024x128xf32>
    %c0_9 = arith.constant 0 : index
    %c0_10 = arith.constant 0 : index
    %9 = vector.load %arg4[%c0_9, %c0_10] : memref<1024x49xbf16, #tpu.memory_space<vmem>>, vector<1024x49xbf16>
    %cst_11 = arith.constant dense<0.000000e+00> : vector<1024x128xf32>
    %10 = tpu.matmul %9, %0, %cst_11 {dimension_numbers = #tpu.dot_dimension_numbers<[1], [0], [0], [1], [0, 0, 1, 1], [], []>} : vector<1024x49xbf16>, vector<49x128xbf16>, vector<1024x128xf32> -> vector<1024x128xf32>
    %11 = arith.maximumf %8, %10 : vector<1024x128xf32>
    %c0_12 = arith.constant 0 : index
    %c0_13 = arith.constant 0 : index
    %12 = vector.load %arg6[%c0_12, %c0_13] : memref<1x128xf32, #tpu.memory_space<vmem>>, vector<1x128xf32>
    %13 = vector.broadcast %12 : vector<1x128xf32> to vector<1024x128xf32>
    %14 = arith.addf %11, %13 : vector<1024x128xf32>
    %cst_14 = arith.constant 0.000000e+00 : f32
    %15 = vector.broadcast %cst_14 : f32 to vector<1024x128xf32>
    %16 = arith.maximumf %14, %15 : vector<1024x128xf32>
    %17 = arith.truncf %16 : vector<1024x128xf32> to vector<1024x128xbf16>
    %c0_15 = arith.constant 0 : index
    %c0_16 = arith.constant 0 : index
    %18 = vector.load %arg7[%c0_15, %c0_16] : memref<1024x128xbf16, #tpu.memory_space<vmem>>, vector<1024x128xbf16>
    tpu.vector_store %arg7[%c0_15, %c0_16], %17 {strides = array<i32>} : memref<1024x128xbf16, #tpu.memory_space<vmem>>, vector<1024x128xbf16>,
    return
  }
  func.func @transform_0(%arg0: i32) -> (i32, i32) {
    %c0_i32 = arith.constant 0 : i32
    %c0_i32_0 = arith.constant 0 : i32
    return %arg0, %c0_i32 : i32, i32
  }
  func.func @transform_1(%arg0: i32) -> (i32, i32) {
    %c0_i32 = arith.constant 0 : i32
    %c0_i32_0 = arith.constant 0 : i32
    return %arg0, %c0_i32 : i32, i32
  }
  func.func @transform_2(%arg0: i32) -> (i32, i32) {
    %c0_i32 = arith.constant 0 : i32
    %c0_i32_0 = arith.constant 0 : i32
    return %arg0, %c0_i32 : i32, i32
  }
  func.func @transform_3(%arg0: i32) -> (i32, i32) {
    %c0_i32 = arith.constant 0 : i32
    %c0_i32_0 = arith.constant 0 : i32
    return %arg0, %c0_i32 : i32, i32
  }
  func.func @transform_4(%arg0: i32) -> (i32, i32) {
    %c0_i32 = arith.constant 0 : i32
    %c0_i32_0 = arith.constant 0 : i32
    %c0_i32_1 = arith.constant 0 : i32
    return %c0_i32, %c0_i32_0 : i32, i32
  }
  func.func @transform_5(%arg0: i32) -> (i32, i32) {
    %c0_i32 = arith.constant 0 : i32
    %c0_i32_0 = arith.constant 0 : i32
    %c0_i32_1 = arith.constant 0 : i32
    return %c0_i32, %c0_i32_0 : i32, i32
  }
  func.func @transform_6(%arg0: i32) -> (i32, i32) {
    %c0_i32 = arith.constant 0 : i32
    %c0_i32_0 = arith.constant 0 : i32
    return %arg0, %c0_i32 : i32, i32
  }
}

module attributes {stable_mosaic.version = 11 : i64} {
  func.func @_conv_pool_kernel(%arg0: i32, %arg1: memref<128x735xbf16, #tpu.memory_space<vmem>>, %arg2: memref<128x735xbf16, #tpu.memory_space<vmem>>, %arg3: memref<128x735xbf16, #tpu.memory_space<vmem>>, %arg4: memref<128x735xbf16, #tpu.memory_space<vmem>>, %arg5: memref<735x128xbf16, #tpu.memory_space<vmem>>, %arg6: memref<1x128xf32, #tpu.memory_space<vmem>>, %arg7: memref<128x128xbf16, #tpu.memory_space<vmem>>) attributes {dimension_semantics = [#tpu.dimension_semantics<parallel>], iteration_bounds = array<i64: 2>, scalar_prefetch = 0 : i64, scratch_operands = 0 : i64, tpu.core_type = #tpu.core_type<tc>, window_params = [{transform_indices = @transform_0, window_bounds = array<i64: 128, 735>}, {transform_indices = @transform_1, window_bounds = array<i64: 128, 735>}, {transform_indices = @transform_2, window_bounds = array<i64: 128, 735>}, {transform_indices = @transform_3, window_bounds = array<i64: 128, 735>}, {pipeline_mode = #tpu.pipeline_mode<synchronous>, transform_indices = @transform_4, window_bounds = array<i64: 735, 128>}, {pipeline_mode = #tpu.pipeline_mode<synchronous>, transform_indices = @transform_5, window_bounds = array<i64: 1, 128>}, {transform_indices = @transform_6, window_bounds = array<i64: 128, 128>}]} {
    %c0 = arith.constant 0 : index
    %c0_0 = arith.constant 0 : index
    %0 = vector.load %arg5[%c0, %c0_0] : memref<735x128xbf16, #tpu.memory_space<vmem>>, vector<735x128xbf16>
    %c0_1 = arith.constant 0 : index
    %c0_2 = arith.constant 0 : index
    %1 = vector.load %arg1[%c0_1, %c0_2] : memref<128x735xbf16, #tpu.memory_space<vmem>>, vector<128x735xbf16>
    %cst = arith.constant dense<0.000000e+00> : vector<128x128xf32>
    %2 = tpu.matmul %1, %0, %cst {dimension_numbers = #tpu.dot_dimension_numbers<[1], [0], [0], [1], [0, 0, 1, 1], [], []>} : vector<128x735xbf16>, vector<735x128xbf16>, vector<128x128xf32> -> vector<128x128xf32>
    %c0_3 = arith.constant 0 : index
    %c0_4 = arith.constant 0 : index
    %3 = vector.load %arg2[%c0_3, %c0_4] : memref<128x735xbf16, #tpu.memory_space<vmem>>, vector<128x735xbf16>
    %cst_5 = arith.constant dense<0.000000e+00> : vector<128x128xf32>
    %4 = tpu.matmul %3, %0, %cst_5 {dimension_numbers = #tpu.dot_dimension_numbers<[1], [0], [0], [1], [0, 0, 1, 1], [], []>} : vector<128x735xbf16>, vector<735x128xbf16>, vector<128x128xf32> -> vector<128x128xf32>
    %5 = arith.maximumf %2, %4 : vector<128x128xf32>
    %c0_6 = arith.constant 0 : index
    %c0_7 = arith.constant 0 : index
    %6 = vector.load %arg3[%c0_6, %c0_7] : memref<128x735xbf16, #tpu.memory_space<vmem>>, vector<128x735xbf16>
    %cst_8 = arith.constant dense<0.000000e+00> : vector<128x128xf32>
    %7 = tpu.matmul %6, %0, %cst_8 {dimension_numbers = #tpu.dot_dimension_numbers<[1], [0], [0], [1], [0, 0, 1, 1], [], []>} : vector<128x735xbf16>, vector<735x128xbf16>, vector<128x128xf32> -> vector<128x128xf32>
    %8 = arith.maximumf %5, %7 : vector<128x128xf32>
    %c0_9 = arith.constant 0 : index
    %c0_10 = arith.constant 0 : index
    %9 = vector.load %arg4[%c0_9, %c0_10] : memref<128x735xbf16, #tpu.memory_space<vmem>>, vector<128x735xbf16>
    %cst_11 = arith.constant dense<0.000000e+00> : vector<128x128xf32>
    %10 = tpu.matmul %9, %0, %cst_11 {dimension_numbers = #tpu.dot_dimension_numbers<[1], [0], [0], [1], [0, 0, 1, 1], [], []>} : vector<128x735xbf16>, vector<735x128xbf16>, vector<128x128xf32> -> vector<128x128xf32>
    %11 = arith.maximumf %8, %10 : vector<128x128xf32>
    %c0_12 = arith.constant 0 : index
    %c0_13 = arith.constant 0 : index
    %12 = vector.load %arg6[%c0_12, %c0_13] : memref<1x128xf32, #tpu.memory_space<vmem>>, vector<1x128xf32>
    %13 = vector.broadcast %12 : vector<1x128xf32> to vector<128x128xf32>
    %14 = arith.addf %11, %13 : vector<128x128xf32>
    %cst_14 = arith.constant 0.000000e+00 : f32
    %15 = vector.broadcast %cst_14 : f32 to vector<128x128xf32>
    %16 = arith.maximumf %14, %15 : vector<128x128xf32>
    %17 = arith.truncf %16 : vector<128x128xf32> to vector<128x128xbf16>
    %c0_15 = arith.constant 0 : index
    %c0_16 = arith.constant 0 : index
    %18 = vector.load %arg7[%c0_15, %c0_16] : memref<128x128xbf16, #tpu.memory_space<vmem>>, vector<128x128xbf16>
    tpu.vector_store %arg7[%c0_15, %c0_16], %17 {strides = array<i32>} : memref<128x128xbf16, #tpu.memory_space<vmem>>, vector<128x128xbf16>,
    return
  }
  func.func @transform_0(%arg0: i32) -> (i32, i32) {
    %c0_i32 = arith.constant 0 : i32
    %c0_i32_0 = arith.constant 0 : i32
    return %arg0, %c0_i32 : i32, i32
  }
  func.func @transform_1(%arg0: i32) -> (i32, i32) {
    %c0_i32 = arith.constant 0 : i32
    %c0_i32_0 = arith.constant 0 : i32
    return %arg0, %c0_i32 : i32, i32
  }
  func.func @transform_2(%arg0: i32) -> (i32, i32) {
    %c0_i32 = arith.constant 0 : i32
    %c0_i32_0 = arith.constant 0 : i32
    return %arg0, %c0_i32 : i32, i32
  }
  func.func @transform_3(%arg0: i32) -> (i32, i32) {
    %c0_i32 = arith.constant 0 : i32
    %c0_i32_0 = arith.constant 0 : i32
    return %arg0, %c0_i32 : i32, i32
  }
  func.func @transform_4(%arg0: i32) -> (i32, i32) {
    %c0_i32 = arith.constant 0 : i32
    %c0_i32_0 = arith.constant 0 : i32
    %c0_i32_1 = arith.constant 0 : i32
    return %c0_i32, %c0_i32_0 : i32, i32
  }
  func.func @transform_5(%arg0: i32) -> (i32, i32) {
    %c0_i32 = arith.constant 0 : i32
    %c0_i32_0 = arith.constant 0 : i32
    %c0_i32_1 = arith.constant 0 : i32
    return %c0_i32, %c0_i32_0 : i32, i32
  }
  func.func @transform_6(%arg0: i32) -> (i32, i32) {
    %c0_i32 = arith.constant 0 : i32
    %c0_i32_0 = arith.constant 0 : i32
    return %arg0, %c0_i32 : i32, i32
  }
}

module attributes {stable_mosaic.version = 11 : i64} {
  func.func @_classifier_kernel(%arg0: i32, %arg1: memref<2x3630xbf16, #tpu.memory_space<vmem>>, %arg2: memref<3630x200xbf16, #tpu.memory_space<vmem>>, %arg3: memref<1x200xf32, #tpu.memory_space<vmem>>, %arg4: memref<200x2xf32, #tpu.memory_space<vmem>>, %arg5: memref<1x2xf32, #tpu.memory_space<vmem>>, %arg6: memref<2x2xf32, #tpu.memory_space<vmem>>) attributes {dimension_semantics = [#tpu.dimension_semantics<arbitrary>], iteration_bounds = array<i64: 1>, scalar_prefetch = 0 : i64, scratch_operands = 0 : i64, tpu.core_type = #tpu.core_type<tc>, window_params = [{pipeline_mode = #tpu.pipeline_mode<synchronous>, transform_indices = @transform_0, window_bounds = array<i64: 2, 3630>}, {pipeline_mode = #tpu.pipeline_mode<synchronous>, transform_indices = @transform_1, window_bounds = array<i64: 3630, 200>}, {pipeline_mode = #tpu.pipeline_mode<synchronous>, transform_indices = @transform_2, window_bounds = array<i64: 1, 200>}, {pipeline_mode = #tpu.pipeline_mode<synchronous>, transform_indices = @transform_3, window_bounds = array<i64: 200, 2>}, {pipeline_mode = #tpu.pipeline_mode<synchronous>, transform_indices = @transform_4, window_bounds = array<i64: 1, 2>}, {pipeline_mode = #tpu.pipeline_mode<synchronous>, transform_indices = @transform_5, window_bounds = array<i64: 2, 2>}]} {
    %c0 = arith.constant 0 : index
    %c0_0 = arith.constant 0 : index
    %0 = vector.load %arg1[%c0, %c0_0] : memref<2x3630xbf16, #tpu.memory_space<vmem>>, vector<2x3630xbf16>
    %c0_1 = arith.constant 0 : index
    %c0_2 = arith.constant 0 : index
    %1 = vector.load %arg2[%c0_1, %c0_2] : memref<3630x200xbf16, #tpu.memory_space<vmem>>, vector<3630x200xbf16>
    %cst = arith.constant dense<0.000000e+00> : vector<2x200xf32>
    %2 = tpu.matmul %0, %1, %cst {dimension_numbers = #tpu.dot_dimension_numbers<[1], [0], [0], [1], [0, 0, 1, 1], [], []>} : vector<2x3630xbf16>, vector<3630x200xbf16>, vector<2x200xf32> -> vector<2x200xf32>
    %c0_3 = arith.constant 0 : index
    %c0_4 = arith.constant 0 : index
    %3 = vector.load %arg3[%c0_3, %c0_4] : memref<1x200xf32, #tpu.memory_space<vmem>>, vector<1x200xf32>
    %4 = vector.broadcast %3 : vector<1x200xf32> to vector<2x200xf32>
    %5 = arith.addf %2, %4 : vector<2x200xf32>
    %cst_5 = arith.constant 0.000000e+00 : f32
    %6 = vector.broadcast %cst_5 : f32 to vector<2x200xf32>
    %7 = arith.maximumf %5, %6 : vector<2x200xf32>
    %c0_6 = arith.constant 0 : index
    %c0_7 = arith.constant 0 : index
    %8 = vector.load %arg4[%c0_6, %c0_7] : memref<200x2xf32, #tpu.memory_space<vmem>>, vector<200x2xf32>
    %cst_8 = arith.constant dense<0.000000e+00> : vector<2x2xf32>
    %9 = tpu.matmul %7, %8, %cst_8 {dimension_numbers = #tpu.dot_dimension_numbers<[1], [0], [0], [1], [0, 0, 1, 1], [], []>} : vector<2x200xf32>, vector<200x2xf32>, vector<2x2xf32> -> vector<2x2xf32>
    %c0_9 = arith.constant 0 : index
    %c0_10 = arith.constant 0 : index
    %10 = vector.load %arg5[%c0_9, %c0_10] : memref<1x2xf32, #tpu.memory_space<vmem>>, vector<1x2xf32>
    %11 = vector.broadcast %10 : vector<1x2xf32> to vector<2x2xf32>
    %12 = arith.addf %9, %11 : vector<2x2xf32>
    %13 = arith.negf %12 : vector<2x2xf32>
    %14 = math.exp %13 : vector<2x2xf32>
    %cst_11 = arith.constant 1.000000e+00 : f32
    %15 = vector.broadcast %cst_11 : f32 to vector<2x2xf32>
    %16 = arith.addf %15, %14 : vector<2x2xf32>
    %17 = arith.divf %15, %16 : vector<2x2xf32>
    %c0_12 = arith.constant 0 : index
    %c0_13 = arith.constant 0 : index
    %18 = vector.load %arg6[%c0_12, %c0_13] : memref<2x2xf32, #tpu.memory_space<vmem>>, vector<2x2xf32>
    tpu.vector_store %arg6[%c0_12, %c0_13], %17 {strides = array<i32>} : memref<2x2xf32, #tpu.memory_space<vmem>>, vector<2x2xf32>,
    return
  }
  func.func @transform_0(%arg0: i32) -> (i32, i32) {
    %c0_i32 = arith.constant 0 : i32
    %c0_i32_0 = arith.constant 0 : i32
    %c0_i32_1 = arith.constant 0 : i32
    return %c0_i32, %c0_i32_0 : i32, i32
  }
  func.func @transform_1(%arg0: i32) -> (i32, i32) {
    %c0_i32 = arith.constant 0 : i32
    %c0_i32_0 = arith.constant 0 : i32
    %c0_i32_1 = arith.constant 0 : i32
    return %c0_i32, %c0_i32_0 : i32, i32
  }
  func.func @transform_2(%arg0: i32) -> (i32, i32) {
    %c0_i32 = arith.constant 0 : i32
    %c0_i32_0 = arith.constant 0 : i32
    %c0_i32_1 = arith.constant 0 : i32
    return %c0_i32, %c0_i32_0 : i32, i32
  }
  func.func @transform_3(%arg0: i32) -> (i32, i32) {
    %c0_i32 = arith.constant 0 : i32
    %c0_i32_0 = arith.constant 0 : i32
    %c0_i32_1 = arith.constant 0 : i32
    return %c0_i32, %c0_i32_0 : i32, i32
  }
  func.func @transform_4(%arg0: i32) -> (i32, i32) {
    %c0_i32 = arith.constant 0 : i32
    %c0_i32_0 = arith.constant 0 : i32
    %c0_i32_1 = arith.constant 0 : i32
    return %c0_i32, %c0_i32_0 : i32, i32
  }
  func.func @transform_5(%arg0: i32) -> (i32, i32) {
    %c0_i32 = arith.constant 0 : i32
    %c0_i32_0 = arith.constant 0 : i32
    %c0_i32_1 = arith.constant 0 : i32
    return %c0_i32, %c0_i32_0 : i32, i32
  }
}

</mosaic_0001>

<bundles_post_ra>
// kernel: christoph_cnn_with_pcen_forward.4
= control target key start
LH: loop header
LB: loop body
LE: loop exit
PB: predicated region body
PF: predicated region fallthrough
CT: control target
= control target key end

     0   :  { %vm27_vm0 = vcmask 523264   ;;  %s605_s1 = inlined_call_operand.vmem [shape: f32[64,128], index: 1, kind: input, shape index: {}]   ;;  %s606_s0 = inlined_call_operand.vmem [shape: f32[64,64], index: 0, kind: input, shape index: {}]   ;;  %s607_s2 = inlined_call_operand.vmem [shape: f32[64,128], index: 2, kind: output, shape index: {}]  }
   0x1   :  { %v431_v0 = vld [vmem:[%s605_s1 + $0x38] sm:$0xff]  ;;  %v436_v1 = vld [vmem:[%s605_s1 + $0x30] sm:$0xff]  ;;  %v445_v2 = vld [vmem:[%s605_s1 + $0x28] sm:$0xff] }
   0x2   :  { %321 = vmatprep.subr.mxu0 %v431_v0  ;;  %349 = vmatprep.subr.mxu1 %v431_v0  ;;  %v454_v3 = vld [vmem:[%s605_s1 + $0x20] sm:$0xff]  ;;  %v463_v4 = vld [vmem:[%s605_s1 + $0x18] sm:$0xff]  ;;  %v472_v5 = vld [vmem:[%s605_s1 + $0x10] sm:$0xff] }
   0x3   :  { %322 = vmatpush3.msra.mxu0 %v431_v0  ;;  %357 = vmatpush3.msra.mxu1 %v431_v0  ;;  %v481_v6 = vld [vmem:[%s605_s1 + $0x8] sm:$0xff]  ;;  %v490_v7 = vld [vmem:[%s605_s1] sm:$0xff]  ;;  %v21_v12 = vld [vmem:[%s606_s0 + $0x10] sm:$0xff] }
   0x4   :  { %323 = vmatprep.subr.mxu0 %v436_v1  ;;  %350 = vmatprep.subr.mxu1 %v436_v1  ;;  %v19_v8 = vld [vmem:[%s606_s0] sm:$0xff]  ;;  %v20_v10 = vld [vmem:[%s606_s0 + $0x8] sm:$0xff]  ;;  %v25_v13 = vld [vmem:[%s606_s0 + $0x30] sm:$0xff] }
   0x5   :  { %324 = vmatpush3.msra.mxu0 %v436_v1  ;;  %358 = vmatpush3.msra.mxu1 %v436_v1  ;;  %v23_v9 = vld [vmem:[%s606_s0 + $0x20] sm:$0xff]  ;;  %v24_v11 = vld [vmem:[%s606_s0 + $0x28] sm:$0xff]  ;;  %v22_v14 = vld [vmem:[%s606_s0 + $0x18] sm:$0xff] }
   0x6   :  { %325 = vmatprep.subr.mxu0 %v445_v2  ;;  %351 = vmatprep.subr.mxu1 %v445_v2  ;;  %v26_v15 = vld [vmem:[%s606_s0 + $0x38] sm:$0xff] }
   0x7   :  { %326 = vmatpush3.msra.mxu0 %v445_v2  ;;  %359 = vmatpush3.msra.mxu1 %v445_v2 }
   0x8   :  { %327 = vmatprep.subr.mxu0 %v454_v3  ;;  %352 = vmatprep.subr.mxu1 %v454_v3 }
   0x9   :  { %328 = vmatpush3.msra.mxu0 %v454_v3  ;;  %360 = vmatpush3.msra.mxu1 %v454_v3 }
   0xa   :  { %329 = vmatprep.subr.mxu0 %v463_v4  ;;  %353 = vmatprep.subr.mxu1 %v463_v4 }
   0xb   :  { %330 = vmatpush3.msra.mxu0 %v463_v4  ;;  %361 = vmatpush3.msra.mxu1 %v463_v4 }
   0xc   :  { %331 = vmatprep.subr.mxu0 %v472_v5  ;;  %354 = vmatprep.subr.mxu1 %v472_v5 }
   0xd   :  { %332 = vmatpush3.msra.mxu0 %v472_v5  ;;  %362 = vmatpush3.msra.mxu1 %v472_v5 }
   0xe   :  { %333 = vmatprep.subr.mxu0 %v481_v6  ;;  %355 = vmatprep.subr.mxu1 %v481_v6 }
   0xf   :  { %334 = vmatpush3.msra.mxu0 %v481_v6  ;;  %363 = vmatpush3.msra.mxu1 %v481_v6 }
  0x10   :  { %335 = vmatprep.subr.mxu0 %v490_v7  ;;  %356 = vmatprep.subr.mxu1 %v490_v7 }
  0x11   :  { %336 = vmatpush3.msra.mxu0 %v490_v7  ;;  %364 = vmatpush3.msra.mxu1 %v490_v7 }
  0x12   :  { %337 = vmatprep.mubr.msk.f32.mxu0 %vm27_vm0, %v19_v8  ;;  %343 = vmatprep.mubr.msk.f32.mxu1 %vm27_vm0, %v23_v9 }
  0x13   :  { %338 = vmatmul.mubr.msk.f32.vlgmr.msra.gmra.mxu0 %vm27_vm0, %v20_v10  ;;  %344 = vmatmul.mubr.msk.f32.vlgmr.msra.gmra.mxu1 %vm27_vm0, %v24_v11 }
  0x14   :  { %340 = vmatprep.mubr.msk.f32.mxu0 %vm27_vm0, %v21_v12  ;;  %346 = vmatprep.mubr.msk.f32.mxu1 %vm27_vm0, %v25_v13 }
  0x17   :  { %341 = vmatmul.mubr.msk.f32.gmra.mxu0 %vm27_vm0, %v22_v14  ;;  %347 = vmatmul.mubr.msk.f32.gmra.mxu1 %vm27_vm0, %v26_v15 }
  0xd3   :  { %v339_v16 = vpop.f32.mrf.mxu0  ;;  %v345_v17 = vpop.f32.mrf.mxu1 }
  0xd4   :  { %v124_v18 = vadd.f32 1e-06, %v339_v16  ;;  %v144_v19 = vadd.f32 1e-06, %v345_v17 }
  0xd5   :  { %v118_v20 = vpop.f32.mrf.mxu0  ;;  %v138_v21 = vpop.f32.mrf.mxu1 }
  0xd6   :  { %365 = vlog2.f32 %v124_v18  ;;  %v119_v22 = vadd.f32 1e-06, %v118_v20  ;;  %v139_v23 = vadd.f32 1e-06, %v138_v21 }
  0xd7   :  { %367 = vlog2.f32 %v144_v19  ;;  %v342_v24 = vpop.f32.mrf.mxu0  ;;  %v348_v25 = vpop.f32.mrf.mxu1 }
  0xd8   :  { %369 = vlog2.f32 %v119_v22  ;;  %v134_v26 = vadd.f32 1e-06, %v342_v24  ;;  %v154_v27 = vadd.f32 1e-06, %v348_v25 }
  0xd9   :  { %371 = vlog2.f32 %v139_v23  ;;  %v128_v28 = vpop.f32.mrf.mxu0  ;;  %v148_v29 = vpop.f32.mrf.mxu1 }
  0xda   :  { %373 = vlog2.f32 %v134_v26  ;;  %v129_v30 = vadd.f32 1e-06, %v128_v28  ;;  %v149_v31 = vadd.f32 1e-06, %v148_v29 }
  0xdb   :  { %375 = vlog2.f32 %v154_v27 }
  0xdc   :  { %377 = vlog2.f32 %v129_v30 }
  0xdd   :  { %379 = vlog2.f32 %v149_v31 }
  0xe3   :  { %v366_v32 = vpop.eup %365 }
  0xe4   :  { %v368_v33 = vpop.eup %367  ;;  %v160_v34 = vmul.f32 0.6931472, %v366_v32 }
  0xe5   :  { %v370_v35 = vpop.eup %369  ;;  %v168_v36 = vmul.f32 0.6931472, %v368_v33 }
  0xe6   :  { %v372_v37 = vpop.eup %371  ;;  %v174_v38 = vmul.f32 -0.98, %v160_v34  ;;  %v158_v39 = vmul.f32 0.6931472, %v370_v35 }
  0xe7   :  { %v374_v40 = vpop.eup %373  ;;  %v178_v41 = vmul.f32 -0.98, %v168_v36  ;;  %v166_v42 = vmul.f32 0.6931472, %v372_v37 }
  0xe8   :  { %v376_v43 = vpop.eup %375  ;;  %v183_v44 = vmul.f32 1.442695, %v174_v38  ;;  %v173_v45 = vmul.f32 -0.98, %v158_v39  ;;  %v164_v46 = vmul.f32 0.6931472, %v374_v40 }
  0xe9   :  { %v378_v47 = vpop.eup %377  ;;  %v191_v48 = vmul.f32 1.442695, %v178_v41  ;;  %v177_v49 = vmul.f32 -0.98, %v166_v42  ;;  %v172_v50 = vmul.f32 0.6931472, %v376_v43 }
  0xea   :  { %v380_v51 = vpop.eup %379  ;;  %381 = vpow2.f32 %v183_v44  ;;  %v181_v52 = vmul.f32 1.442695, %v173_v45  ;;  %v176_v53 = vmul.f32 -0.98, %v164_v46  ;;  %v162_v54 = vmul.f32 0.6931472, %v378_v47 }
  0xeb   :  { %383 = vpow2.f32 %v191_v48  ;;  %v189_v55 = vmul.f32 1.442695, %v177_v49  ;;  %v180_v56 = vmul.f32 -0.98, %v172_v50  ;;  %v170_v57 = vmul.f32 0.6931472, %v380_v51 }
  0xec   :  { %385 = vpow2.f32 %v181_v52  ;;  %v187_v58 = vmul.f32 1.442695, %v176_v53  ;;  %v175_v59 = vmul.f32 -0.98, %v162_v54 }
  0xed   :  { %387 = vpow2.f32 %v189_v55  ;;  %v195_v60 = vmul.f32 1.442695, %v180_v56  ;;  %v179_v61 = vmul.f32 -0.98, %v170_v57 }
  0xee   :  { %389 = vpow2.f32 %v187_v58  ;;  %v185_v62 = vmul.f32 1.442695, %v175_v59 }
  0xef   :  { %391 = vpow2.f32 %v195_v60  ;;  %v193_v63 = vmul.f32 1.442695, %v179_v61 }
  0xf0   :  { %393 = vpow2.f32 %v185_v62 }
  0xf1   :  { %395 = vpow2.f32 %v193_v63 }
  0xf7   :  { %v382_v8 = vpop.eup %381 }
  0xf8   :  { %v384_v9 = vpop.eup %383  ;;  %v198_v10 = vmul.f32 %v382_v8, %v481_v6 }
  0xf9   :  { %v386_v11 = vpop.eup %385  ;;  %v202_v12 = vmul.f32 %v384_v9, %v445_v2 }
  0xfa   :  { %v388_v13 = vpop.eup %387  ;;  %v206_v14 = vadd.f32 2.0, %v198_v10  ;;  %v197_v15 = vmul.f32 %v386_v11, %v490_v7 }
  0xfb   :  { %v390_v16 = vpop.eup %389  ;;  %v210_v17 = vadd.f32 2.0, %v202_v12  ;;  %v201_v18 = vmul.f32 %v388_v13, %v454_v3 }
  0xfc   :  { %v392_v19 = vpop.eup %391  ;;  %397 = vrsqrt.f32 %v206_v14  ;;  %v205_v22 = vadd.f32 2.0, %v197_v15  ;;  %v200_v6 = vmul.f32 %v390_v16, %v463_v4  ;;  %vm222_vm1 = vcmp.eq.f32.partialorder %v206_v14, inf }
  0xfd   :  { %v394_v20 = vpop.eup %393  ;;  %399 = vrsqrt.f32 %v210_v17  ;;  %v209_v23 = vadd.f32 2.0, %v201_v18  ;;  %v204_v24 = vmul.f32 %v392_v19, %v431_v0  ;;  %vm224_vm2 = vcmp.eq.f32.partialorder %v206_v14, 0.0 }
  0xfe   :  { %v396_v21 = vpop.eup %395  ;;  %v199_v2 = vmul.f32 %v394_v20, %v472_v5  ;;  %401 = vrsqrt.f32 %v205_v22  ;;  %v540_v7 = vadd.f32 2.0, %v200_v6  ;;  %v225_v5 = vand.u32 2147483648, %v206_v14 }
  0xff   :  { %v203_v25 = vmul.f32 %v396_v21, %v436_v1  ;;  %403 = vrsqrt.f32 %v209_v23  ;;  %v542_v3 = vadd.f32 2.0, %v204_v24  ;;  %vm250_vm3 = vcmp.eq.f32.partialorder %v210_v17, inf }
 0x100   :  { %v544_v26 = vadd.f32 2.0, %v199_v2  ;;  %405 = vrsqrt.f32 %v540_v7  ;;  %vm252_vm4 = vcmp.eq.f32.partialorder %v210_v17, 0.0  ;;  %v253_v30 = vand.u32 2147483648, %v210_v17 }
 0x101   :  { %v546_v27 = vadd.f32 2.0, %v203_v25  ;;  %407 = vrsqrt.f32 %v542_v3  ;;  %vm215_vm5 = vcmp.eq.f32.partialorder %v205_v22, inf  ;;  %vm217_vm6 = vcmp.eq.f32.partialorder %v205_v22, 0.0 }
 0x102   :  { %409 = vrsqrt.f32 %v544_v26  ;;  %v218_v38 = vand.u32 2147483648, %v205_v22  ;;  %vm243_vm7 = vcmp.eq.f32.partialorder %v209_v23, inf  ;;  %vm245_vm8 = vcmp.eq.f32.partialorder %v209_v23, 0.0 }
 0x103   :  { %411 = vrsqrt.f32 %v546_v27  ;;  %v246_v42 = vand.u32 2147483648, %v209_v23  ;;  %vm236_vm9 = vcmp.eq.f32.partialorder %v540_v7, inf  ;;  %vm238_vm10 = vcmp.eq.f32.partialorder %v540_v7, 0.0 }
 0x104   :  { %v239_v46 = vand.u32 2147483648, %v540_v7  ;;  %vm264_vm11 = vcmp.eq.f32.partialorder %v542_v3, inf  ;;  %vm266_vm12 = vcmp.eq.f32.partialorder %v542_v3, 0.0  ;;  %v267_v54 = vand.u32 2147483648, %v542_v3 }
 0x105   :  { %vm229_vm13 = vcmp.eq.f32.partialorder %v544_v26, inf  ;;  %vm231_vm14 = vcmp.eq.f32.partialorder %v544_v26, 0.0  ;;  %v232_v58 = vand.u32 2147483648, %v544_v26  ;;  %vm257_vm15 = vcmp.eq.f32.partialorder %v546_v27, inf }
 0x106   :  { %v260_v9 = vand.u32 2147483648, %v546_v27  ;;  %vm259_vm0 = vcmp.eq.f32.partialorder %v546_v27, 0.0 }
 0x109   :  { %v398_v0 = vpop.eup %397 }
 0x10a   :  { %v400_v1 = vpop.eup %399  ;;  %v221_v4 = vmul.f32 %v398_v0, %v206_v14 }
 0x10b   :  { %v249_v28 = vmul.f32 %v400_v1, %v210_v17  ;;  %v402_v31 = vpop.eup %401 }
 0x10c   :  { %v223_v29 = vsel %vm222_vm1, %v206_v14, %v221_v4  ;;  %v404_v34 = vpop.eup %403  ;;  %v214_v37 = vmul.f32 %v402_v31, %v205_v22 }
 0x10d   :  { %v226_v32 = vsel %vm224_vm2, %v225_v5, %v223_v29  ;;  %v251_v33 = vsel %vm250_vm3, %v210_v17, %v249_v28  ;;  %v242_v40 = vmul.f32 %v404_v34, %v209_v23  ;;  %v406_v43 = vpop.eup %405 }
 0x10e   :  { %v298_v35 = vadd.f32 -1.4142135, %v226_v32  ;;  %v254_v36 = vsel %vm252_vm4, %v253_v30, %v251_v33  ;;  %v216_v41 = vsel %vm215_vm5, %v205_v22, %v214_v37  ;;  %v408_v47 = vpop.eup %407  ;;  %v235_v50 = vmul.f32 %v406_v43, %v540_v7 }
 0x10f   :  { %v302_v39 = vadd.f32 -1.4142135, %v254_v36  ;;  %v219_v44 = vsel %vm217_vm6, %v218_v38, %v216_v41  ;;  %v244_v45 = vsel %vm243_vm7, %v209_v23, %v242_v40  ;;  %v410_v51 = vpop.eup %409  ;;  %v263_v53 = vmul.f32 %v408_v47, %v542_v3 }
 0x110   :  { %278 = vst [vmem:[%s607_s2 + $0x8] sm:$0xff] %v298_v35  ;;  %v297_v48 = vadd.f32 -1.4142135, %v219_v44  ;;  %v247_v49 = vsel %vm245_vm8, %v246_v42, %v244_v45  ;;  %v412_v55 = vpop.eup %411  ;;  %v237_v56 = vsel %vm236_vm9, %v540_v7, %v235_v50  ;;  %v228_v57 = vmul.f32 %v410_v51, %v544_v26 }
 0x111   :  { %282 = vst [vmem:[%s607_s2 + $0x28] sm:$0xff] %v302_v39  ;;  %v301_v52 = vadd.f32 -1.4142135, %v247_v49  ;;  %v240_v59 = vsel %vm238_vm10, %v239_v46, %v237_v56  ;;  %v265_v60 = vsel %vm264_vm11, %v542_v3, %v263_v53  ;;  %v256_v61 = vmul.f32 %v412_v55, %v546_v27 }
 0x112   :  { %277 = vst [vmem:[%s607_s2] sm:$0xff] %v297_v48  ;;  %v300_v62 = vadd.f32 -1.4142135, %v240_v59  ;;  %v268_v63 = vsel %vm266_vm12, %v267_v54, %v265_v60  ;;  %v230_v8 = vsel %vm229_vm13, %v544_v26, %v228_v57 }
 0x113   :  { %281 = vst [vmem:[%s607_s2 + $0x20] sm:$0xff] %v301_v52  ;;  %v304_v10 = vadd.f32 -1.4142135, %v268_v63  ;;  %v233_v11 = vsel %vm231_vm14, %v232_v58, %v230_v8  ;;  %v258_v12 = vsel %vm257_vm15, %v546_v27, %v256_v61 }
 0x114   :  { %280 = vst [vmem:[%s607_s2 + $0x18] sm:$0xff] %v300_v62  ;;  %v299_v13 = vadd.f32 -1.4142135, %v233_v11  ;;  %v261_v14 = vsel %vm259_vm0, %v260_v9, %v258_v12 }
 0x115   :  { %284 = vst [vmem:[%s607_s2 + $0x38] sm:$0xff] %v304_v10  ;;  %v303_v15 = vadd.f32 -1.4142135, %v261_v14 }
 0x116   :  { %279 = vst [vmem:[%s607_s2 + $0x10] sm:$0xff] %v299_v13 }
 0x117   :  { %283 = vst [vmem:[%s607_s2 + $0x30] sm:$0xff] %v303_v15 }

// kernel: christoph_cnn_with_pcen_forward.5
= control target key start
LH: loop header
LB: loop body
LE: loop exit
PB: predicated region body
PF: predicated region fallthrough
CT: control target
= control target key end

     0   :  { %s8779_s21 = smov 0   ;;  %s10700_s0 = inlined_call_operand.vmem [shape: bf16[2048,49], index: 0, kind: input, shape index: {}]   ;;  %s10701_s1 = inlined_call_operand.vmem [shape: bf16[2048,49], index: 1, kind: input, shape index: {}]   ;;  %s10702_s2 = inlined_call_operand.vmem [shape: bf16[2048,49], index: 2, kind: input, shape index: {}]   ;;  %s10703_s3 = inlined_call_operand.vmem [shape: bf16[2048,49], index: 3, kind: input, shape index: {}]   ;;  %s10704_s4 = inlined_call_operand.vmem [shape: bf16[49,128], index: 4, kind: input, shape index: {}]   ;;  %s10705_s5 = inlined_call_operand.vmem [shape: f32[1,128], index: 5, kind: input, shape index: {}]   ;;  %s10706_s6 = inlined_call_operand.vmem [shape: bf16[2048,128], index: 6, kind: output, shape index: {}]  }
   0x1 LB: > { %s6476_s22 = sadd.s32 4294967295, %s8741_s21   ;;  %p6480_p0 = scmp.ge.s32.totalorder %s8741_s21, 1  ;;  %s8741_s21 = sphi %s8779_s21, %s16_s21  }
   0x2   : > { %p246_p1 = scmp.lt.s32.totalorder %s8741_s21, 3 }
   0x4   : > { %p247_p2 = pnand %p6480_p0, %p246_p1 }
   0x6   : > { %250 = sbr.rel (%p247_p2) target bundleno = 745 (0x2e9), region = 44 }
   0xb   : > { %v8474_v0 = vld [vmem:[%s10704_s4 + $0x18] ss:$0 sps:$4 sm:$0x11]   ;;  %vm991_vm0 = vcmask 1040384   ;;  %v8743_v1 = vmov 0   ;;  %v8475_v4 = vld [vmem:[%s10704_s4 + $0x10] sm:$0xff]  }
   0xc   : > { %v993_v2 = vsel %vm991_vm0, 65535, %v8743_v1  ;;  %s6481_s27 = sshll.u32 %s6476_s22, 7  ;;  %v8476_v5 = vld [vmem:[%s10704_s4 + $0x8] sm:$0xff]   ;;  %v8477_v6 = vld [vmem:[%s10704_s4] sm:$0xff]   ;;  %vm798_vm1 = vcmask 400384  }
   0xd   : > { %v995_v3 = vand.u32 %v8474_v0, %v993_v2  ;;  %p292_p3 = scmp.lt.s32.totalorder %s6481_s27, 255 }
   0xf   : > { %7921 = vmatprep.subr.bf16.mxu0 %v995_v3  ;;  %8057 = vmatprep.subr.bf16.mxu1 %v995_v3  ;;  %s11463_s27 = smov (!%p292_p3, %s6481_s27), 255 }
  0x10   : > { %7922 = vmatpush3.bf16.msra.mxu0 %v995_v3  ;;  %8058 = vmatpush3.bf16.msra.mxu1 %v995_v3  ;;  %s8796_s30 = sshll.u32 %s11463_s27, 2 }
  0x11   : > { %7923 = vmatprep.subr.bf16.mxu0 %v8475_v4  ;;  %8059 = vmatprep.subr.bf16.mxu1 %v8475_v4  ;;  %s8805_s11 = scalar_lea.vmem %s10700_s0, %s8796_s30  ;;  %s8811_s14 = scalar_lea.vmem %s10701_s1, %s8796_s30 }
  0x12   : > { %v8478_v7 = vld [vmem:[%s8805_s11] sm:$0xff]   ;;  %v8480_v9 = vld [vmem:[%s8805_s11 + $0x8] sm:$0xff]   ;;  %v8482_v11 = vld [vmem:[%s8805_s11 + $0x10] sm:$0xff]   ;;  %s8952_s17 = scalar_lea.vmem %s10702_s2, %s8796_s30  ;;  %s8959_s20 = scalar_lea.vmem %s10703_s3, %s8796_s30 }
  0x13   : > { %v8479_v8 = vld [vmem:[%s8811_s14] sm:$0xff]   ;;  %7929 = vmatprep.mubr.msk.bf16.mxu0 %vm798_vm1, %v8478_v7  ;;  %v8481_v10 = vld [vmem:[%s8811_s14 + $0x8] sm:$0xff]   ;;  %v8483_v12 = vld [vmem:[%s8811_s14 + $0x10] sm:$0xff]   ;;  %s10092_s26 = scalar_lea.vmem %s10706_s6, %s8796_s30 }
  0x14   : > { %7924 = vmatpush3.bf16.msra.mxu0 %v8475_v4  ;;  %8060 = vmatpush3.bf16.msra.mxu1 %v8475_v4  ;;  %v8484_v13 = vld [vmem:[%s8805_s11 + $0x18] sm:$0xff]   ;;  %v8486_v15 = vld [vmem:[%s8805_s11 + $0x20] sm:$0xff]   ;;  %v8488_v17 = vld [vmem:[%s8805_s11 + $0x28] sm:$0xff]  }
  0x15   : > { %7925 = vmatprep.subr.bf16.mxu0 %v8476_v5  ;;  %8061 = vmatprep.subr.bf16.mxu1 %v8476_v5  ;;  %v8485_v14 = vld [vmem:[%s8811_s14 + $0x18] sm:$0xff]   ;;  %v8487_v16 = vld [vmem:[%s8811_s14 + $0x20] sm:$0xff]   ;;  %v8489_v18 = vld [vmem:[%s8811_s14 + $0x28] sm:$0xff]  }
  0x16   : > { %8065 = vmatprep.mubr.msk.bf16.mxu1 %vm798_vm1, %v8479_v8  ;;  %v8490_v19 = vld [vmem:[%s8805_s11 + $0x30] sm:$0xff]   ;;  %v8492_v21 = vld [vmem:[%s8805_s11 + $0x38] sm:$0xff]   ;;  %v8494_v23 = vld [vmem:[%s8805_s11 + $0x40] sm:$0xff]  }
  0x17   : > { %v8491_v20 = vld [vmem:[%s8811_s14 + $0x30] sm:$0xff]   ;;  %v8493_v22 = vld [vmem:[%s8811_s14 + $0x38] sm:$0xff]   ;;  %v8495_v24 = vld [vmem:[%s8811_s14 + $0x40] sm:$0xff]  }
  0x18   : > { %7926 = vmatpush3.bf16.msra.mxu0 %v8476_v5  ;;  %8062 = vmatpush3.bf16.msra.mxu1 %v8476_v5  ;;  %v8496_v25 = vld [vmem:[%s8805_s11 + $0x48] sm:$0xff]   ;;  %v8498_v27 = vld [vmem:[%s8805_s11 + $0x50] sm:$0xff]   ;;  %v8500_v29 = vld [vmem:[%s8805_s11 + $0x58] sm:$0xff]  }
  0x19   : > { %7927 = vmatprep.subr.bf16.mxu0 %v8477_v6  ;;  %8063 = vmatprep.subr.bf16.mxu1 %v8477_v6  ;;  %v8497_v26 = vld [vmem:[%s8811_s14 + $0x48] sm:$0xff]   ;;  %v8499_v28 = vld [vmem:[%s8811_s14 + $0x50] sm:$0xff]   ;;  %v8501_v30 = vld [vmem:[%s8811_s14 + $0x58] sm:$0xff]  }
  0x1a   : > { %v8502_v31 = vld [vmem:[%s8805_s11 + $0x60] sm:$0xff]   ;;  %v8504_v33 = vld [vmem:[%s8805_s11 + $0x68] sm:$0xff]   ;;  %v8506_v35 = vld [vmem:[%s8805_s11 + $0x70] sm:$0xff]  }
  0x1b   : > { %v8503_v32 = vld [vmem:[%s8811_s14 + $0x60] sm:$0xff]   ;;  %v8505_v34 = vld [vmem:[%s8811_s14 + $0x68] sm:$0xff]   ;;  %v8507_v36 = vld [vmem:[%s8811_s14 + $0x70] sm:$0xff]  }
  0x1c   : > { %7928 = vmatpush3.bf16.msra.mxu0 %v8477_v6  ;;  %8064 = vmatpush3.bf16.msra.mxu1 %v8477_v6  ;;  %v8508_v37 = vld [vmem:[%s8805_s11 + $0x78] sm:$0xff]   ;;  %v8510_v39 = vld [vmem:[%s8805_s11 + $0x80] sm:$0xff]   ;;  %v8512_v41 = vld [vmem:[%s8805_s11 + $0x88] sm:$0xff]  }
  0x1d   : > { %8193 = vmatprep.subr.bf16.mxu0 %v995_v3  ;;  %8329 = vmatprep.subr.bf16.mxu1 %v995_v3  ;;  %v8509_v38 = vld [vmem:[%s8811_s14 + $0x78] sm:$0xff]   ;;  %v8511_v40 = vld [vmem:[%s8811_s14 + $0x80] sm:$0xff]   ;;  %v8513_v42 = vld [vmem:[%s8811_s14 + $0x88] sm:$0xff]  }
  0x1e   : > { %v8514_v43 = vld [vmem:[%s8805_s11 + $0x90] sm:$0xff]   ;;  %v8516_v45 = vld [vmem:[%s8805_s11 + $0x98] sm:$0xff]   ;;  %v8518_v47 = vld [vmem:[%s8805_s11 + $0xa0] sm:$0xff]  }
  0x1f   : > { %7930 = vmatmul.mubr.msk.bf16.vlgmr.msra.gmra.mxu0 %vm798_vm1, %v8480_v9  ;;  %8066 = vmatmul.mubr.msk.bf16.vlgmr.msra.gmra.mxu1 %vm798_vm1, %v8481_v10  ;;  %v8515_v44 = vld [vmem:[%s8811_s14 + $0x90] sm:$0xff]   ;;  %v8517_v46 = vld [vmem:[%s8811_s14 + $0x98] sm:$0xff]   ;;  %v8519_v48 = vld [vmem:[%s8811_s14 + $0xa0] sm:$0xff]  }
  0x20   : > { %8194 = vmatpush3.bf16.msra.mxu0 %v995_v3  ;;  %8330 = vmatpush3.bf16.msra.mxu1 %v995_v3  ;;  %v8520_v49 = vld [vmem:[%s8805_s11 + $0xa8] sm:$0xff]   ;;  %v8522_v51 = vld [vmem:[%s8805_s11 + $0xb0] sm:$0xff]   ;;  %v8524_v53 = vld [vmem:[%s8805_s11 + $0xb8] sm:$0xff]  }
  0x21   : > { %7933 = vmatprep.mubr.msk.bf16.mxu0 %vm798_vm1, %v8482_v11  ;;  %8069 = vmatprep.mubr.msk.bf16.mxu1 %vm798_vm1, %v8483_v12  ;;  %v8521_v50 = vld [vmem:[%s8811_s14 + $0xa8] sm:$0xff]   ;;  %v8523_v52 = vld [vmem:[%s8811_s14 + $0xb0] sm:$0xff]   ;;  %v8525_v54 = vld [vmem:[%s8811_s14 + $0xb8] sm:$0xff]  }
  0x22   : > { %8195 = vmatprep.subr.bf16.mxu0 %v8475_v4  ;;  %8331 = vmatprep.subr.bf16.mxu1 %v8475_v4  ;;  %v8526_v55 = vld [vmem:[%s8805_s11 + $0xc0] sm:$0xff]   ;;  %v8528_v57 = vld [vmem:[%s8805_s11 + $0xc8] sm:$0xff]   ;;  %v8530_v59 = vld [vmem:[%s8805_s11 + $0xd0] sm:$0xff]  }
  0x23   : > { %v8527_v56 = vld [vmem:[%s8811_s14 + $0xc0] sm:$0xff]   ;;  %v8529_v58 = vld [vmem:[%s8811_s14 + $0xc8] sm:$0xff]   ;;  %v8531_v60 = vld [vmem:[%s8811_s14 + $0xd0] sm:$0xff]  }
  0x24   : > { %8196 = vmatpush3.bf16.msra.mxu0 %v8475_v4  ;;  %8332 = vmatpush3.bf16.msra.mxu1 %v8475_v4  ;;  %v8532_v61 = vld [vmem:[%s8805_s11 + $0xd8] sm:$0xff]   ;;  %v8534_v63 = vld [vmem:[%s8805_s11 + $0xe0] sm:$0xff]   ;;  %v8536_v1 = vld [vmem:[%s8805_s11 + $0xe8] sm:$0xff]  }
  0x25   : > { %8197 = vmatprep.subr.bf16.mxu0 %v8476_v5  ;;  %8333 = vmatprep.subr.bf16.mxu1 %v8476_v5  ;;  %v8533_v62 = vld [vmem:[%s8811_s14 + $0xd8] sm:$0xff]   ;;  %v8535_v0 = vld [vmem:[%s8811_s14 + $0xe0] sm:$0xff]   ;;  %v8537_v2 = vld [vmem:[%s8811_s14 + $0xe8] sm:$0xff]  }
  0x26   : > { %v8538_v3 = vld [vmem:[%s8805_s11 + $0xf0] sm:$0xff]   ;;  %v8542_v7 = vld [vmem:[%s8805_s11 + $0x100] sm:$0xff]   ;;  %v8544_v9 = vld [vmem:[%s8805_s11 + $0x108] sm:$0xff]  }
  0x27   : > { %7934 = vmatmul.mubr.msk.bf16.gmra.mxu0 %vm798_vm1, %v8484_v13  ;;  %8070 = vmatmul.mubr.msk.bf16.gmra.mxu1 %vm798_vm1, %v8485_v14  ;;  %v8539_v4 = vld [vmem:[%s8811_s14 + $0xf0] sm:$0xff]   ;;  %v8543_v8 = vld [vmem:[%s8811_s14 + $0x100] sm:$0xff]   ;;  %v8545_v10 = vld [vmem:[%s8811_s14 + $0x108] sm:$0xff]  }
  0x28   : > { %7937 = vmatprep.mubr.msk.bf16.mxu0 %vm798_vm1, %v8486_v15  ;;  %8073 = vmatprep.mubr.msk.bf16.mxu1 %vm798_vm1, %v8487_v16  ;;  %v8546_v11 = vld [vmem:[%s8805_s11 + $0x110] sm:$0xff]   ;;  %v8548_v13 = vld [vmem:[%s8805_s11 + $0x118] sm:$0xff]   ;;  %v8550_v15 = vld [vmem:[%s8805_s11 + $0x120] sm:$0xff]  }
  0x29   : > { %8198 = vmatpush3.bf16.msra.mxu0 %v8476_v5  ;;  %8334 = vmatpush3.bf16.msra.mxu1 %v8476_v5  ;;  %v8540_v5 = vld [vmem:[%s8805_s11 + $0xf8] sm:$0xff]   ;;  %v8547_v12 = vld [vmem:[%s8811_s14 + $0x110] sm:$0xff]   ;;  %v8551_v16 = vld [vmem:[%s8811_s14 + $0x120] sm:$0xff]  }
  0x2a   : > { %8199 = vmatprep.subr.bf16.mxu0 %v8477_v6  ;;  %8335 = vmatprep.subr.bf16.mxu1 %v8477_v6  ;;  %v8549_v14 = vld [vmem:[%s8811_s14 + $0x118] sm:$0xff]  }
  0x2d   : > { %8200 = vmatpush3.bf16.msra.mxu0 %v8477_v6  ;;  %8336 = vmatpush3.bf16.msra.mxu1 %v8477_v6  ;;  %v8541_v6 = vld [vmem:[%s8811_s14 + $0xf8] sm:$0xff]  }
  0x2f   : > { %7938 = vmatmul.mubr.msk.bf16.gmra.mxu0 %vm798_vm1, %v8488_v17  ;;  %8074 = vmatmul.mubr.msk.bf16.gmra.mxu1 %vm798_vm1, %v8489_v18  ;;  %v8552_v17 = vld [vmem:[%s8805_s11 + $0x128] sm:$0xff]  }
  0x30   : > { %7941 = vmatprep.mubr.msk.bf16.mxu0 %vm798_vm1, %v8490_v19  ;;  %8077 = vmatprep.mubr.msk.bf16.mxu1 %vm798_vm1, %v8491_v20  ;;  %v8553_v18 = vld [vmem:[%s8811_s14 + $0x128] sm:$0xff]   ;;  %v8554_v19 = vld [vmem:[%s8805_s11 + $0x130] sm:$0xff]  }
  0x31   : > { %v8555_v20 = vld [vmem:[%s8811_s14 + $0x130] sm:$0xff]  }
  0x37   : > { %7942 = vmatmul.mubr.msk.bf16.gmra.mxu0 %vm798_vm1, %v8492_v21  ;;  %8078 = vmatmul.mubr.msk.bf16.gmra.mxu1 %vm798_vm1, %v8493_v22  ;;  %v8556_v21 = vld [vmem:[%s8805_s11 + $0x138] sm:$0xff]  }
  0x38   : > { %7945 = vmatprep.mubr.msk.bf16.mxu0 %vm798_vm1, %v8494_v23  ;;  %8081 = vmatprep.mubr.msk.bf16.mxu1 %vm798_vm1, %v8495_v24  ;;  %v8557_v22 = vld [vmem:[%s8811_s14 + $0x138] sm:$0xff]   ;;  %v8558_v23 = vld [vmem:[%s8805_s11 + $0x140] sm:$0xff]  }
  0x39   : > { %v8559_v24 = vld [vmem:[%s8811_s14 + $0x140] sm:$0xff]  }
  0x3f   : > { %7946 = vmatmul.mubr.msk.bf16.gmra.mxu0 %vm798_vm1, %v8496_v25  ;;  %8082 = vmatmul.mubr.msk.bf16.gmra.mxu1 %vm798_vm1, %v8497_v26  ;;  %v8560_v25 = vld [vmem:[%s8805_s11 + $0x148] sm:$0xff]  }
  0x40   : > { %7949 = vmatprep.mubr.msk.bf16.mxu0 %vm798_vm1, %v8498_v27  ;;  %8085 = vmatprep.mubr.msk.bf16.mxu1 %vm798_vm1, %v8499_v28  ;;  %v8561_v26 = vld [vmem:[%s8811_s14 + $0x148] sm:$0xff]   ;;  %v8562_v27 = vld [vmem:[%s8805_s11 + $0x150] sm:$0xff]  }
  0x41   : > { %v8563_v28 = vld [vmem:[%s8811_s14 + $0x150] sm:$0xff]  }
  0x47   : > { %7950 = vmatmul.mubr.msk.bf16.gmra.mxu0 %vm798_vm1, %v8500_v29  ;;  %8086 = vmatmul.mubr.msk.bf16.gmra.mxu1 %vm798_vm1, %v8501_v30  ;;  %v8564_v29 = vld [vmem:[%s8805_s11 + $0x158] sm:$0xff]  }
  0x48   : > { %7953 = vmatprep.mubr.msk.bf16.mxu0 %vm798_vm1, %v8502_v31  ;;  %8089 = vmatprep.mubr.msk.bf16.mxu1 %vm798_vm1, %v8503_v32  ;;  %v8565_v30 = vld [vmem:[%s8811_s14 + $0x158] sm:$0xff]   ;;  %v8566_v31 = vld [vmem:[%s8805_s11 + $0x160] sm:$0xff]  }
  0x49   : > { %v8567_v32 = vld [vmem:[%s8811_s14 + $0x160] sm:$0xff]  }
  0x4f   : > { %7954 = vmatmul.mubr.msk.bf16.gmra.mxu0 %vm798_vm1, %v8504_v33  ;;  %8090 = vmatmul.mubr.msk.bf16.gmra.mxu1 %vm798_vm1, %v8505_v34  ;;  %v8568_v33 = vld [vmem:[%s8805_s11 + $0x168] sm:$0xff]  }
  0x50   : > { %7957 = vmatprep.mubr.msk.bf16.mxu0 %vm798_vm1, %v8506_v35  ;;  %8093 = vmatprep.mubr.msk.bf16.mxu1 %vm798_vm1, %v8507_v36  ;;  %v8569_v34 = vld [vmem:[%s8811_s14 + $0x168] sm:$0xff]   ;;  %v8570_v35 = vld [vmem:[%s8805_s11 + $0x170] sm:$0xff]  }
  0x51   : > { %v8571_v36 = vld [vmem:[%s8811_s14 + $0x170] sm:$0xff]  }
  0x57   : > { %7958 = vmatmul.mubr.msk.bf16.gmra.mxu0 %vm798_vm1, %v8508_v37  ;;  %8094 = vmatmul.mubr.msk.bf16.gmra.mxu1 %vm798_vm1, %v8509_v38  ;;  %v8572_v37 = vld [vmem:[%s8805_s11 + $0x178] sm:$0xff]  }
  0x58   : > { %7961 = vmatprep.mubr.msk.bf16.mxu0 %vm798_vm1, %v8510_v39  ;;  %8097 = vmatprep.mubr.msk.bf16.mxu1 %vm798_vm1, %v8511_v40  ;;  %v8573_v38 = vld [vmem:[%s8811_s14 + $0x178] sm:$0xff]   ;;  %v8574_v39 = vld [vmem:[%s8805_s11 + $0x180] sm:$0xff]  }
  0x59   : > { %v8575_v40 = vld [vmem:[%s8811_s14 + $0x180] sm:$0xff]  }
  0x5f   : > { %7962 = vmatmul.mubr.msk.bf16.gmra.mxu0 %vm798_vm1, %v8512_v41  ;;  %8098 = vmatmul.mubr.msk.bf16.gmra.mxu1 %vm798_vm1, %v8513_v42  ;;  %v8576_v41 = vld [vmem:[%s8805_s11 + $0x188] sm:$0xff]  }
  0x60   : > { %7965 = vmatprep.mubr.msk.bf16.mxu0 %vm798_vm1, %v8514_v43  ;;  %8101 = vmatprep.mubr.msk.bf16.mxu1 %vm798_vm1, %v8515_v44  ;;  %v8577_v42 = vld [vmem:[%s8811_s14 + $0x188] sm:$0xff]   ;;  %v8578_v43 = vld [vmem:[%s8805_s11 + $0x190] sm:$0xff]  }
  0x61   : > { %v8579_v44 = vld [vmem:[%s8811_s14 + $0x190] sm:$0xff]  }
  0x67   : > { %7966 = vmatmul.mubr.msk.bf16.gmra.mxu0 %vm798_vm1, %v8516_v45  ;;  %8102 = vmatmul.mubr.msk.bf16.gmra.mxu1 %vm798_vm1, %v8517_v46 }
  0x68   : > { %7969 = vmatprep.mubr.msk.bf16.mxu0 %vm798_vm1, %v8518_v47  ;;  %8105 = vmatprep.mubr.msk.bf16.mxu1 %vm798_vm1, %v8519_v48 }
  0x6f   : > { %7970 = vmatmul.mubr.msk.bf16.gmra.mxu0 %vm798_vm1, %v8520_v49  ;;  %8106 = vmatmul.mubr.msk.bf16.gmra.mxu1 %vm798_vm1, %v8521_v50  ;;  %v8580_v50 = vld [vmem:[%s8805_s11 + $0x198] sm:$0xff]  }
  0x70   : > { %7973 = vmatprep.mubr.msk.bf16.mxu0 %vm798_vm1, %v8522_v51  ;;  %8109 = vmatprep.mubr.msk.bf16.mxu1 %vm798_vm1, %v8523_v52  ;;  %v8581_v51 = vld [vmem:[%s8811_s14 + $0x198] sm:$0xff]  }
  0x77   : > { %7974 = vmatmul.mubr.msk.bf16.gmra.mxu0 %vm798_vm1, %v8524_v53  ;;  %8110 = vmatmul.mubr.msk.bf16.gmra.mxu1 %vm798_vm1, %v8525_v54 }
  0x78   : > { %7977 = vmatprep.mubr.msk.bf16.mxu0 %vm798_vm1, %v8526_v55  ;;  %8113 = vmatprep.mubr.msk.bf16.mxu1 %vm798_vm1, %v8527_v56  ;;  %v8582_v56 = vld [vmem:[%s8805_s11 + $0x1a0] sm:$0xff]  }
  0x7f   : > { %7978 = vmatmul.mubr.msk.bf16.gmra.mxu0 %vm798_vm1, %v8528_v57  ;;  %8114 = vmatmul.mubr.msk.bf16.gmra.mxu1 %vm798_vm1, %v8529_v58  ;;  %v8583_v57 = vld [vmem:[%s8811_s14 + $0x1a0] sm:$0xff]  }
  0x80   : > { %7981 = vmatprep.mubr.msk.bf16.mxu0 %vm798_vm1, %v8530_v59  ;;  %8117 = vmatprep.mubr.msk.bf16.mxu1 %vm798_vm1, %v8531_v60  ;;  %v8606_v60 = vld [vmem:[%s8952_s17] sm:$0xff]  }
  0x87   : > { %7982 = vmatmul.mubr.msk.bf16.gmra.mxu0 %vm798_vm1, %v8532_v61  ;;  %8118 = vmatmul.mubr.msk.bf16.gmra.mxu1 %vm798_vm1, %v8533_v62 }
  0x88   : > { %7985 = vmatprep.mubr.msk.bf16.mxu0 %vm798_vm1, %v8534_v63  ;;  %8121 = vmatprep.mubr.msk.bf16.mxu1 %vm798_vm1, %v8535_v0  ;;  %v8604_v63 = vld [vmem:[%s8805_s11 + $0x1f8] sm:$0xff]  }
  0x8f   : > { %7986 = vmatmul.mubr.msk.bf16.gmra.mxu0 %vm798_vm1, %v8536_v1  ;;  %8122 = vmatmul.mubr.msk.bf16.gmra.mxu1 %vm798_vm1, %v8537_v2  ;;  %v8584_v2 = vld [vmem:[%s8805_s11 + $0x1a8] sm:$0xff]  }
  0x90   : > { %7989 = vmatprep.mubr.msk.bf16.mxu0 %vm798_vm1, %v8538_v3  ;;  %8125 = vmatprep.mubr.msk.bf16.mxu1 %vm798_vm1, %v8539_v4  ;;  %v8585_v3 = vld [vmem:[%s8811_s14 + $0x1a8] sm:$0xff]  }
  0x97   : > { %7990 = vmatmul.mubr.msk.bf16.gmra.mxu0 %vm798_vm1, %v8540_v5  ;;  %8126 = vmatmul.mubr.msk.bf16.gmra.mxu1 %vm798_vm1, %v8541_v6 }
  0x98   : > { %7993 = vmatprep.mubr.msk.bf16.mxu0 %vm798_vm1, %v8542_v7  ;;  %8129 = vmatprep.mubr.msk.bf16.mxu1 %vm798_vm1, %v8543_v8  ;;  %v8586_v8 = vld [vmem:[%s8805_s11 + $0x1b0] sm:$0xff]  }
  0x9f   : > { %7994 = vmatmul.mubr.msk.bf16.gmra.mxu0 %vm798_vm1, %v8544_v9  ;;  %8130 = vmatmul.mubr.msk.bf16.gmra.mxu1 %vm798_vm1, %v8545_v10  ;;  %v8587_v9 = vld [vmem:[%s8811_s14 + $0x1b0] sm:$0xff]  }
  0xa0   : > { %7997 = vmatprep.mubr.msk.bf16.mxu0 %vm798_vm1, %v8546_v11  ;;  %8133 = vmatprep.mubr.msk.bf16.mxu1 %vm798_vm1, %v8547_v12 }
  0xa7   : > { %7998 = vmatmul.mubr.msk.bf16.gmra.mxu0 %vm798_vm1, %v8548_v13  ;;  %8134 = vmatmul.mubr.msk.bf16.gmra.mxu1 %vm798_vm1, %v8549_v14 }
  0xa8   : > { %8001 = vmatprep.mubr.msk.bf16.mxu0 %vm798_vm1, %v8550_v15  ;;  %8137 = vmatprep.mubr.msk.bf16.mxu1 %vm798_vm1, %v8551_v16 }
  0xaf   : > { %8002 = vmatmul.mubr.msk.bf16.gmra.mxu0 %vm798_vm1, %v8552_v17  ;;  %8138 = vmatmul.mubr.msk.bf16.gmra.mxu1 %vm798_vm1, %v8553_v18  ;;  %v8588_v18 = vld [vmem:[%s8805_s11 + $0x1b8] sm:$0xff]  }
  0xb0   : > { %8005 = vmatprep.mubr.msk.bf16.mxu0 %vm798_vm1, %v8554_v19  ;;  %8141 = vmatprep.mubr.msk.bf16.mxu1 %vm798_vm1, %v8555_v20  ;;  %v8589_v19 = vld [vmem:[%s8811_s14 + $0x1b8] sm:$0xff]  }
  0xb7   : > { %8006 = vmatmul.mubr.msk.bf16.gmra.mxu0 %vm798_vm1, %v8556_v21  ;;  %8142 = vmatmul.mubr.msk.bf16.gmra.mxu1 %vm798_vm1, %v8557_v22 }
  0xb8   : > { %8009 = vmatprep.mubr.msk.bf16.mxu0 %vm798_vm1, %v8558_v23  ;;  %8145 = vmatprep.mubr.msk.bf16.mxu1 %vm798_vm1, %v8559_v24  ;;  %v8590_v24 = vld [vmem:[%s8805_s11 + $0x1c0] sm:$0xff]  }
  0xbf   : > { %8010 = vmatmul.mubr.msk.bf16.gmra.mxu0 %vm798_vm1, %v8560_v25  ;;  %8146 = vmatmul.mubr.msk.bf16.gmra.mxu1 %vm798_vm1, %v8561_v26  ;;  %v8591_v25 = vld [vmem:[%s8811_s14 + $0x1c0] sm:$0xff]  }
  0xc0   : > { %8013 = vmatprep.mubr.msk.bf16.mxu0 %vm798_vm1, %v8562_v27  ;;  %8149 = vmatprep.mubr.msk.bf16.mxu1 %vm798_vm1, %v8563_v28  ;;  %v8602_v28 = vld [vmem:[%s8805_s11 + $0x1f0] sm:$0xff]  }
  0xc7   : > { %8014 = vmatmul.mubr.msk.bf16.gmra.mxu0 %vm798_vm1, %v8564_v29  ;;  %8150 = vmatmul.mubr.msk.bf16.gmra.mxu1 %vm798_vm1, %v8565_v30 }
  0xc8   : > { %8017 = vmatprep.mubr.msk.bf16.mxu0 %vm798_vm1, %v8566_v31  ;;  %8153 = vmatprep.mubr.msk.bf16.mxu1 %vm798_vm1, %v8567_v32  ;;  %v8600_v31 = vld [vmem:[%s8805_s11 + $0x1e8] sm:$0xff]  }
  0xcf   : > { %8018 = vmatmul.mubr.msk.bf16.gmra.mxu0 %vm798_vm1, %v8568_v33  ;;  %8154 = vmatmul.mubr.msk.bf16.gmra.mxu1 %vm798_vm1, %v8569_v34  ;;  %v8592_v34 = vld [vmem:[%s8805_s11 + $0x1c8] sm:$0xff]  }
  0xd0   : > { %8021 = vmatprep.mubr.msk.bf16.mxu0 %vm798_vm1, %v8570_v35  ;;  %8157 = vmatprep.mubr.msk.bf16.mxu1 %vm798_vm1, %v8571_v36  ;;  %v8593_v35 = vld [vmem:[%s8811_s14 + $0x1c8] sm:$0xff]  }
  0xd7   : > { %8022 = vmatmul.mubr.msk.bf16.gmra.mxu0 %vm798_vm1, %v8572_v37  ;;  %8158 = vmatmul.mubr.msk.bf16.gmra.mxu1 %vm798_vm1, %v8573_v38 }
  0xd8   : > { %8025 = vmatprep.mubr.msk.bf16.mxu0 %vm798_vm1, %v8574_v39  ;;  %8161 = vmatprep.mubr.msk.bf16.mxu1 %vm798_vm1, %v8575_v40  ;;  %v8594_v40 = vld [vmem:[%s8805_s11 + $0x1d0] sm:$0xff]  }
  0xdf   : > { %v9025_v45 = vpop.f32.mrf.mxu0  ;;  %8026 = vmatmul.mubr.msk.bf16.gmra.mxu0 %vm798_vm1, %v8576_v41  ;;  %v9028_v46 = vpop.f32.mrf.mxu1  ;;  %8162 = vmatmul.mubr.msk.bf16.gmra.mxu1 %vm798_vm1, %v8577_v42  ;;  %v8595_v41 = vld [vmem:[%s8811_s14 + $0x1d0] sm:$0xff]  }
  0xe0   : > { %8029 = vmatprep.mubr.msk.bf16.mxu0 %vm798_vm1, %v8578_v43  ;;  %8165 = vmatprep.mubr.msk.bf16.mxu1 %vm798_vm1, %v8579_v44 }
  0xe1   : > { %v9035_v48 = vpop.f32.mrf.mxu0  ;;  %v9037_v49 = vpop.f32.mrf.mxu1 }
  0xe3   : > { %v9043_v53 = vpop.f32.mrf.mxu0  ;;  %v9045_v54 = vpop.f32.mrf.mxu1 }
  0xe5   : > { %v9051_v58 = vpop.f32.mrf.mxu0  ;;  %v9053_v59 = vpop.f32.mrf.mxu1 }
  0xe7   : > { %v9057_v61 = vpop.f32.mrf.mxu0  ;;  %8030 = vmatmul.mubr.msk.bf16.gmra.mxu0 %vm798_vm1, %v8580_v50  ;;  %v9060_v62 = vpop.f32.mrf.mxu1  ;;  %8166 = vmatmul.mubr.msk.bf16.gmra.mxu1 %vm798_vm1, %v8581_v51 }
  0xe8   : > { %8033 = vmatprep.mubr.msk.bf16.mxu0 %vm798_vm1, %v8582_v56  ;;  %8169 = vmatprep.mubr.msk.bf16.mxu1 %vm798_vm1, %v8583_v57 }
  0xe9   : > { %v9067_v0 = vpop.f32.mrf.mxu0  ;;  %v9069_v1 = vpop.f32.mrf.mxu1 }
  0xeb   : > { %v9075_v5 = vpop.f32.mrf.mxu0  ;;  %v9077_v6 = vpop.f32.mrf.mxu1 }
  0xed   : > { %v9083_v10 = vpop.f32.mrf.mxu0  ;;  %v9085_v11 = vpop.f32.mrf.mxu1 }
  0xef   : > { %v9089_v13 = vpop.f32.mrf.mxu0  ;;  %8034 = vmatmul.mubr.msk.bf16.gmra.mxu0 %vm798_vm1, %v8584_v2  ;;  %v9092_v14 = vpop.f32.mrf.mxu1  ;;  %8170 = vmatmul.mubr.msk.bf16.gmra.mxu1 %vm798_vm1, %v8585_v3 }
  0xf0   : > { %8037 = vmatprep.mubr.msk.bf16.mxu0 %vm798_vm1, %v8586_v8  ;;  %8173 = vmatprep.mubr.msk.bf16.mxu1 %vm798_vm1, %v8587_v9 }
  0xf1   : > { %v9099_v16 = vpop.f32.mrf.mxu0  ;;  %v9101_v17 = vpop.f32.mrf.mxu1 }
  0xf3   : > { %v9107_v21 = vpop.f32.mrf.mxu0  ;;  %v9109_v22 = vpop.f32.mrf.mxu1 }
  0xf5   : > { %v9115_v26 = vpop.f32.mrf.mxu0  ;;  %v9117_v27 = vpop.f32.mrf.mxu1 }
  0xf7   : > { %v9121_v29 = vpop.f32.mrf.mxu0  ;;  %8038 = vmatmul.mubr.msk.bf16.gmra.mxu0 %vm798_vm1, %v8588_v18  ;;  %v9124_v30 = vpop.f32.mrf.mxu1  ;;  %8174 = vmatmul.mubr.msk.bf16.gmra.mxu1 %vm798_vm1, %v8589_v19  ;;  %v8596_v18 = vld [vmem:[%s8805_s11 + $0x1d8] sm:$0xff]  }
  0xf8   : > { %8041 = vmatprep.mubr.msk.bf16.mxu0 %vm798_vm1, %v8590_v24  ;;  %8177 = vmatprep.mubr.msk.bf16.mxu1 %vm798_vm1, %v8591_v25  ;;  %v8597_v19 = vld [vmem:[%s8811_s14 + $0x1d8] sm:$0xff]   ;;  %v8598_v25 = vld [vmem:[%s8805_s11 + $0x1e0] sm:$0xff]   ;;  %v11125_v24 = vmax.f32 %v9025_v45, %v9028_v46 }
  0xf9   : > { %v9131_v32 = vpop.f32.mrf.mxu0  ;;  %v9133_v33 = vpop.f32.mrf.mxu1  ;;  %v8708_v46 = vld [vmem:[%s8952_s17 + $0x198] sm:$0xff]  }
  0xfb   : > { %v9139_v37 = vpop.f32.mrf.mxu0  ;;  %v9141_v38 = vpop.f32.mrf.mxu1 }
  0xfd   : > { %v9147_v42 = vpop.f32.mrf.mxu0  ;;  %v9149_v43 = vpop.f32.mrf.mxu1 }
  0xff   : > { %v9153_v50 = vpop.f32.mrf.mxu0  ;;  %8042 = vmatmul.mubr.msk.bf16.gmra.mxu0 %vm798_vm1, %v8592_v34  ;;  %v9156_v51 = vpop.f32.mrf.mxu1  ;;  %8178 = vmatmul.mubr.msk.bf16.gmra.mxu1 %vm798_vm1, %v8593_v35  ;;  %v8599_v34 = vld [vmem:[%s8811_s14 + $0x1e0] sm:$0xff]  }
 0x100   : > { %8045 = vmatprep.mubr.msk.bf16.mxu0 %vm798_vm1, %v8594_v40  ;;  %8181 = vmatprep.mubr.msk.bf16.mxu1 %vm798_vm1, %v8595_v41 }
 0x101   : > { %v9163_v57 = vpop.f32.mrf.mxu0  ;;  %v9165_v2 = vpop.f32.mrf.mxu1 }
 0x103   : > { %v9169_v8 = vpop.f32.mrf.mxu0  ;;  %v9171_v9 = vpop.f32.mrf.mxu1 }
 0x105   : > { %v9179_v35 = vpop.f32.mrf.mxu0  ;;  %v9181_v40 = vpop.f32.mrf.mxu1 }
 0x107   : > { %v9185_v3 = vpop.f32.mrf.mxu0  ;;  %8046 = vmatmul.mubr.msk.bf16.gmra.mxu0 %vm798_vm1, %v8596_v18  ;;  %v9188_v56 = vpop.f32.mrf.mxu1  ;;  %8182 = vmatmul.mubr.msk.bf16.gmra.mxu1 %vm798_vm1, %v8597_v19  ;;  %v8601_v19 = vld [vmem:[%s8811_s14 + $0x1e8] sm:$0xff]  }
 0x108   : > { %8049 = vmatprep.mubr.msk.bf16.mxu0 %vm798_vm1, %v8598_v25  ;;  %8185 = vmatprep.mubr.msk.bf16.mxu1 %vm798_vm1, %v8599_v34  ;;  %v8603_v25 = vld [vmem:[%s8811_s14 + $0x1f0] sm:$0xff]  }
 0x109   : > { %v9195_v44 = vpop.f32.mrf.mxu0  ;;  %v9197_v41 = vpop.f32.mrf.mxu1 }
 0x10b   : > { %v9201_v36 = vpop.f32.mrf.mxu0  ;;  %v9203_v18 = vpop.f32.mrf.mxu1 }
 0x10d   : > { %v9211_v34 = vpop.f32.mrf.mxu0  ;;  %v9213_v23 = vpop.f32.mrf.mxu1 }
 0x10e   : > { %10916 = vst [vmem:[#allocation2_spill] sm:$0xff] %v9213_v23 }
 0x10f   : > { %v9217_v20 = vpop.f32.mrf.mxu0  ;;  %8050 = vmatmul.mubr.msk.bf16.gmra.mxu0 %vm798_vm1, %v8600_v31  ;;  %v9220_v15 = vpop.f32.mrf.mxu1  ;;  %8186 = vmatmul.mubr.msk.bf16.gmra.mxu1 %vm798_vm1, %v8601_v19  ;;  %v8605_v19 = vld [vmem:[%s8811_s14 + $0x1f8] sm:$0xff]  }
 0x110   : > { %10917 = vst [vmem:[#allocation3_spill] sm:$0xff] %v9217_v20  ;;  %10918 = vst [vmem:[#allocation4_spill] sm:$0xff] %v9220_v15  ;;  %8053 = vmatprep.mubr.msk.bf16.mxu0 %vm798_vm1, %v8602_v28  ;;  %8189 = vmatprep.mubr.msk.bf16.mxu1 %vm798_vm1, %v8603_v25  ;;  %v8607_v28 = vld [vmem:[%s8959_s20] sm:$0xff]  }
 0x111   : > { %v9227_v12 = vpop.f32.mrf.mxu0  ;;  %v9229_v39 = vpop.f32.mrf.mxu1 }
 0x112   : > { %10919 = vst [vmem:[#allocation5_spill] sm:$0xff] %v9227_v12  ;;  %10920 = vst [vmem:[#allocation6_spill] sm:$0xff] %v9229_v39  ;;  %v8710_v12 = vld [vmem:[%s8952_s17 + $0x1a0] sm:$0xff]  }
 0x113   : > { %v9233_v4 = vpop.f32.mrf.mxu0  ;;  %v9235_v31 = vpop.f32.mrf.mxu1 }
 0x114   : > { %10921 = vst [vmem:[#allocation7_spill] sm:$0xff] %v9233_v4  ;;  %10922 = vst [vmem:[#allocation8_spill] sm:$0xff] %v9235_v31  ;;  %v8608_v4 = vld [vmem:[%s8952_s17 + $0x8] sm:$0xff]  }
 0x115   : > { %v9243_v25 = vpop.f32.mrf.mxu0  ;;  %v9245_v55 = vpop.f32.mrf.mxu1 }
 0x116   : > { %10923 = vst [vmem:[#allocation9_spill] sm:$0xff] %v9243_v25  ;;  %10924 = vst [vmem:[#allocation10_spill] sm:$0xff] %v9245_v55 }
 0x117   : > { %v9249_v52 = vpop.f32.mrf.mxu0  ;;  %8054 = vmatmul.mubr.msk.bf16.gmra.mxu0 %vm798_vm1, %v8604_v63  ;;  %v9252_v47 = vpop.f32.mrf.mxu1  ;;  %8190 = vmatmul.mubr.msk.bf16.gmra.mxu1 %vm798_vm1, %v8605_v19  ;;  %v8609_v19 = vld [vmem:[%s8959_s20 + $0x8] sm:$0xff]  }
 0x118   : > { %10925 = vst [vmem:[#allocation11_spill] sm:$0xff] %v9249_v52  ;;  %10926 = vst [vmem:[#allocation12_spill] sm:$0xff] %v9252_v47  ;;  %8201 = vmatprep.mubr.msk.bf16.mxu0 %vm798_vm1, %v8606_v60  ;;  %8337 = vmatprep.mubr.msk.bf16.mxu1 %vm798_vm1, %v8607_v28  ;;  %v8610_v47 = vld [vmem:[%s8952_s17 + $0x10] sm:$0xff]  }
 0x119   : > { %v9259_v31 = vpop.f32.mrf.mxu0  ;;  %v9261_v7 = vpop.f32.mrf.mxu1  ;;  %v8611_v60 = vld [vmem:[%s8959_s20 + $0x10] sm:$0xff]  }
 0x11a   : > { %10927 = vst [vmem:[#allocation13_spill] sm:$0xff] %v9259_v31  ;;  %10928 = vst [vmem:[#allocation14_spill] sm:$0xff] %v9261_v7 }
 0x11b   : > { %v9265_v25 = vpop.f32.mrf.mxu0  ;;  %v9267_v63 = vpop.f32.mrf.mxu1 }
 0x11c   : > { %10929 = vst [vmem:[#allocation15_spill] sm:$0xff] %v9265_v25  ;;  %10930 = vst [vmem:[#allocation16_spill] sm:$0xff] %v9267_v63 }
 0x11d   : > { %v9275_v28 = vpop.f32.mrf.mxu0  ;;  %v9277_v52 = vpop.f32.mrf.mxu1 }
 0x11e   : > { %10931 = vst [vmem:[#allocation17_spill] sm:$0xff] %v9275_v28  ;;  %10932 = vst [vmem:[#allocation18_spill] sm:$0xff] %v9277_v52 }
 0x11f   : > { %v9281_v7 = vpop.f32.mrf.mxu0  ;;  %v9283_v31 = vpop.f32.mrf.mxu1  ;;  %8202 = vmatmul.mubr.msk.bf16.vlgmr.msra.gmra.mxu0 %vm798_vm1, %v8608_v4  ;;  %8338 = vmatmul.mubr.msk.bf16.vlgmr.msra.gmra.mxu1 %vm798_vm1, %v8609_v19  ;;  %v8612_v4 = vld [vmem:[%s8952_s17 + $0x18] sm:$0xff]  }
 0x120   : > { %10933 = vst [vmem:[#allocation19_spill] sm:$0xff] %v9281_v7  ;;  %10934 = vst [vmem:[#allocation20_spill] sm:$0xff] %v9283_v31  ;;  %8205 = vmatprep.mubr.msk.bf16.mxu0 %vm798_vm1, %v8610_v47  ;;  %8341 = vmatprep.mubr.msk.bf16.mxu1 %vm798_vm1, %v8611_v60  ;;  %v8613_v19 = vld [vmem:[%s8959_s20 + $0x18] sm:$0xff]   ;;  %v8614_v31 = vld [vmem:[%s8952_s17 + $0x20] sm:$0xff]  }
 0x121   : > { %v9291_v63 = vpop.f32.mrf.mxu0  ;;  %v9293_v55 = vpop.f32.mrf.mxu1  ;;  %v8615_v47 = vld [vmem:[%s8959_s20 + $0x20] sm:$0xff]  }
 0x122   : > { %10935 = vst [vmem:[#allocation21_spill] sm:$0xff] %v9291_v63  ;;  %10936 = vst [vmem:[#allocation22_spill] sm:$0xff] %v9293_v55 }
 0x123   : > { %v9297_v28 = vpop.f32.mrf.mxu0  ;;  %v9299_v25 = vpop.f32.mrf.mxu1 }
 0x124   : > { %10937 = vst [vmem:[#allocation23_spill] sm:$0xff] %v9297_v28  ;;  %10938 = vst [vmem:[#allocation24_spill] sm:$0xff] %v9299_v25 }
 0x125   : > { %v9307_v60 = vpop.f32.mrf.mxu0  ;;  %v9309_v7 = vpop.f32.mrf.mxu1 }
 0x126   : > { %10939 = vst [vmem:[#allocation25_spill] sm:$0xff] %v9307_v60  ;;  %10940 = vst [vmem:[#allocation26_spill] sm:$0xff] %v9309_v7 }
 0x127   : > { %v9313_v55 = vpop.f32.mrf.mxu0  ;;  %v9315_v63 = vpop.f32.mrf.mxu1  ;;  %8206 = vmatmul.mubr.msk.bf16.gmra.mxu0 %vm798_vm1, %v8612_v4  ;;  %8342 = vmatmul.mubr.msk.bf16.gmra.mxu1 %vm798_vm1, %v8613_v19  ;;  %v8616_v4 = vld [vmem:[%s8952_s17 + $0x28] sm:$0xff]  }
 0x128   : > { %10941 = vst [vmem:[#allocation27_spill] sm:$0xff] %v9313_v55  ;;  %10942 = vst [vmem:[#allocation28_spill] sm:$0xff] %v9315_v63  ;;  %8209 = vmatprep.mubr.msk.bf16.mxu0 %vm798_vm1, %v8614_v31  ;;  %8345 = vmatprep.mubr.msk.bf16.mxu1 %vm798_vm1, %v8615_v47  ;;  %v8617_v19 = vld [vmem:[%s8959_s20 + $0x28] sm:$0xff]   ;;  %v8618_v63 = vld [vmem:[%s8952_s17 + $0x30] sm:$0xff]  }
 0x129   : > { %v9323_v25 = vpop.f32.mrf.mxu0  ;;  %v9325_v52 = vpop.f32.mrf.mxu1  ;;  %v8619_v31 = vld [vmem:[%s8959_s20 + $0x30] sm:$0xff]  }
 0x12a   : > { %10943 = vst [vmem:[#allocation29_spill] sm:$0xff] %v9323_v25  ;;  %10944 = vst [vmem:[#allocation30_spill] sm:$0xff] %v9325_v52 }
 0x12b   : > { %v9329_v60 = vpop.f32.mrf.mxu0  ;;  %v9331_v28 = vpop.f32.mrf.mxu1 }
 0x12c   : > { %10945 = vst [vmem:[#allocation31_spill] sm:$0xff] %v9329_v60  ;;  %10946 = vst [vmem:[#allocation32_spill] sm:$0xff] %v9331_v28 }
 0x12d   : > { %v9339_v47 = vpop.f32.mrf.mxu0  ;;  %v9341_v55 = vpop.f32.mrf.mxu1 }
 0x12e   : > { %10947 = vst [vmem:[#allocation33_spill] sm:$0xff] %v9339_v47  ;;  %10948 = vst [vmem:[#allocation34_spill] sm:$0xff] %v9341_v55 }
 0x12f   : > { %v9345_v52 = vpop.f32.mrf.mxu0  ;;  %v9347_v25 = vpop.f32.mrf.mxu1  ;;  %8210 = vmatmul.mubr.msk.bf16.gmra.mxu0 %vm798_vm1, %v8616_v4  ;;  %8346 = vmatmul.mubr.msk.bf16.gmra.mxu1 %vm798_vm1, %v8617_v19  ;;  %v8620_v4 = vld [vmem:[%s8952_s17 + $0x38] sm:$0xff]  }
 0x130   : > { %10949 = vst [vmem:[#allocation35_spill] sm:$0xff] %v9345_v52  ;;  %10950 = vst [vmem:[#allocation36_spill] sm:$0xff] %v9347_v25  ;;  %8213 = vmatprep.mubr.msk.bf16.mxu0 %vm798_vm1, %v8618_v63  ;;  %8349 = vmatprep.mubr.msk.bf16.mxu1 %vm798_vm1, %v8619_v31  ;;  %v8621_v19 = vld [vmem:[%s8959_s20 + $0x38] sm:$0xff]   ;;  %v8622_v25 = vld [vmem:[%s8952_s17 + $0x40] sm:$0xff]  }
 0x131   : > { %v9355_v28 = vpop.f32.mrf.mxu0  ;;  %v9357_v7 = vpop.f32.mrf.mxu1  ;;  %v8623_v63 = vld [vmem:[%s8959_s20 + $0x40] sm:$0xff]  }
 0x132   : > { %10951 = vst [vmem:[#allocation37_spill] sm:$0xff] %v9355_v28  ;;  %10952 = vst [vmem:[#allocation38_spill] sm:$0xff] %v9357_v7 }
 0x133   : > { %v9361_v47 = vpop.f32.mrf.mxu0  ;;  %v9363_v60 = vpop.f32.mrf.mxu1 }
 0x134   : > { %10953 = vst [vmem:[#allocation39_spill] sm:$0xff] %v9361_v47  ;;  %10954 = vst [vmem:[#allocation40_spill] sm:$0xff] %v9363_v60 }
 0x135   : > { %v9371_v31 = vpop.f32.mrf.mxu0  ;;  %v9373_v52 = vpop.f32.mrf.mxu1 }
 0x136   : > { %10955 = vst [vmem:[#allocation41_spill] sm:$0xff] %v9371_v31  ;;  %10956 = vst [vmem:[#allocation42_spill] sm:$0xff] %v9373_v52 }
 0x137   : > { %v9377_v7 = vpop.f32.mrf.mxu0  ;;  %v9379_v28 = vpop.f32.mrf.mxu1  ;;  %8214 = vmatmul.mubr.msk.bf16.gmra.mxu0 %vm798_vm1, %v8620_v4  ;;  %8350 = vmatmul.mubr.msk.bf16.gmra.mxu1 %vm798_vm1, %v8621_v19  ;;  %v8624_v4 = vld [vmem:[%s8952_s17 + $0x48] sm:$0xff]  }
 0x138   : > { %10957 = vst [vmem:[#allocation43_spill] sm:$0xff] %v9377_v7  ;;  %10958 = vst [vmem:[#allocation44_spill] sm:$0xff] %v9379_v28  ;;  %8217 = vmatprep.mubr.msk.bf16.mxu0 %vm798_vm1, %v8622_v25  ;;  %8353 = vmatprep.mubr.msk.bf16.mxu1 %vm798_vm1, %v8623_v63  ;;  %v8625_v19 = vld [vmem:[%s8959_s20 + $0x48] sm:$0xff]   ;;  %v8626_v28 = vld [vmem:[%s8952_s17 + $0x50] sm:$0xff]  }
 0x139   : > { %v9387_v60 = vpop.f32.mrf.mxu0  ;;  %v9389_v55 = vpop.f32.mrf.mxu1  ;;  %v8627_v25 = vld [vmem:[%s8959_s20 + $0x50] sm:$0xff]  }
 0x13a   : > { %10959 = vst [vmem:[#allocation45_spill] sm:$0xff] %v9387_v60  ;;  %10960 = vst [vmem:[#allocation46_spill] sm:$0xff] %v9389_v55 }
 0x13b   : > { %v9393_v31 = vpop.f32.mrf.mxu0  ;;  %v9395_v47 = vpop.f32.mrf.mxu1 }
 0x13c   : > { %10961 = vst [vmem:[#allocation47_spill] sm:$0xff] %v9393_v31  ;;  %10962 = vst [vmem:[#allocation48_spill] sm:$0xff] %v9395_v47 }
 0x13d   : > { %v9403_v63 = vpop.f32.mrf.mxu0  ;;  %v9405_v7 = vpop.f32.mrf.mxu1 }
 0x13e   : > { %10963 = vst [vmem:[#allocation49_spill] sm:$0xff] %v9403_v63  ;;  %10964 = vst [vmem:[#allocation50_spill] sm:$0xff] %v9405_v7 }
 0x13f   : > { %v9409_v55 = vpop.f32.mrf.mxu0  ;;  %v9411_v60 = vpop.f32.mrf.mxu1  ;;  %8218 = vmatmul.mubr.msk.bf16.gmra.mxu0 %vm798_vm1, %v8624_v4  ;;  %8354 = vmatmul.mubr.msk.bf16.gmra.mxu1 %vm798_vm1, %v8625_v19  ;;  %v8628_v4 = vld [vmem:[%s8952_s17 + $0x58] sm:$0xff]  }
 0x140   : > { %10965 = vst [vmem:[#allocation51_spill] sm:$0xff] %v9409_v55  ;;  %10966 = vst [vmem:[#allocation52_spill] sm:$0xff] %v9411_v60  ;;  %8221 = vmatprep.mubr.msk.bf16.mxu0 %vm798_vm1, %v8626_v28  ;;  %8357 = vmatprep.mubr.msk.bf16.mxu1 %vm798_vm1, %v8627_v25  ;;  %v8629_v19 = vld [vmem:[%s8959_s20 + $0x58] sm:$0xff]   ;;  %v8630_v60 = vld [vmem:[%s8952_s17 + $0x60] sm:$0xff]  }
 0x141   : > { %v9419_v47 = vpop.f32.mrf.mxu0  ;;  %v9421_v52 = vpop.f32.mrf.mxu1  ;;  %v8631_v28 = vld [vmem:[%s8959_s20 + $0x60] sm:$0xff]  }
 0x142   : > { %10967 = vst [vmem:[#allocation53_spill] sm:$0xff] %v9419_v47  ;;  %10968 = vst [vmem:[#allocation54_spill] sm:$0xff] %v9421_v52 }
 0x143   : > { %v9425_v63 = vpop.f32.mrf.mxu0  ;;  %v9427_v31 = vpop.f32.mrf.mxu1 }
 0x144   : > { %10969 = vst [vmem:[#allocation55_spill] sm:$0xff] %v9425_v63  ;;  %10970 = vst [vmem:[#allocation56_spill] sm:$0xff] %v9427_v31 }
 0x145   : > { %v9435_v25 = vpop.f32.mrf.mxu0  ;;  %v9437_v55 = vpop.f32.mrf.mxu1 }
 0x146   : > { %10971 = vst [vmem:[#allocation57_spill] sm:$0xff] %v9435_v25  ;;  %10972 = vst [vmem:[#allocation58_spill] sm:$0xff] %v9437_v55 }
 0x147   : > { %v9441_v52 = vpop.f32.mrf.mxu0  ;;  %v9443_v47 = vpop.f32.mrf.mxu1  ;;  %8222 = vmatmul.mubr.msk.bf16.gmra.mxu0 %vm798_vm1, %v8628_v4  ;;  %8358 = vmatmul.mubr.msk.bf16.gmra.mxu1 %vm798_vm1, %v8629_v19  ;;  %v8632_v4 = vld [vmem:[%s8952_s17 + $0x68] sm:$0xff]  }
 0x148   : > { %10973 = vst [vmem:[#allocation59_spill] sm:$0xff] %v9441_v52  ;;  %10974 = vst [vmem:[#allocation60_spill] sm:$0xff] %v9443_v47  ;;  %8225 = vmatprep.mubr.msk.bf16.mxu0 %vm798_vm1, %v8630_v60  ;;  %8361 = vmatprep.mubr.msk.bf16.mxu1 %vm798_vm1, %v8631_v28  ;;  %v8633_v19 = vld [vmem:[%s8959_s20 + $0x68] sm:$0xff]   ;;  %v8634_v47 = vld [vmem:[%s8952_s17 + $0x70] sm:$0xff]  }
 0x149   : > { %v9451_v31 = vpop.f32.mrf.mxu0  ;;  %v9453_v7 = vpop.f32.mrf.mxu1  ;;  %v8635_v60 = vld [vmem:[%s8959_s20 + $0x70] sm:$0xff]  }
 0x14a   : > { %10975 = vst [vmem:[#allocation61_spill] sm:$0xff] %v9451_v31  ;;  %10976 = vst [vmem:[#allocation62_spill] sm:$0xff] %v9453_v7 }
 0x14b   : > { %v9457_v25 = vpop.f32.mrf.mxu0  ;;  %v9459_v63 = vpop.f32.mrf.mxu1 }
 0x14c   : > { %10977 = vst [vmem:[#allocation63_spill] sm:$0xff] %v9457_v25  ;;  %10978 = vst [vmem:[#allocation64_spill] sm:$0xff] %v9459_v63 }
 0x14d   : > { %v9467_v28 = vpop.f32.mrf.mxu0  ;;  %v9469_v52 = vpop.f32.mrf.mxu1 }
 0x14e   : > { %10979 = vst [vmem:[#allocation65_spill] sm:$0xff] %v9467_v28  ;;  %10980 = vst [vmem:[#allocation66_spill] sm:$0xff] %v9469_v52 }
 0x14f   : > { %v9473_v7 = vpop.f32.mrf.mxu0  ;;  %v9475_v31 = vpop.f32.mrf.mxu1  ;;  %8226 = vmatmul.mubr.msk.bf16.gmra.mxu0 %vm798_vm1, %v8632_v4  ;;  %8362 = vmatmul.mubr.msk.bf16.gmra.mxu1 %vm798_vm1, %v8633_v19  ;;  %v8636_v4 = vld [vmem:[%s8952_s17 + $0x78] sm:$0xff]  }
 0x150   : > { %10981 = vst [vmem:[#allocation67_spill] sm:$0xff] %v9473_v7  ;;  %10982 = vst [vmem:[#allocation68_spill] sm:$0xff] %v9475_v31  ;;  %8229 = vmatprep.mubr.msk.bf16.mxu0 %vm798_vm1, %v8634_v47  ;;  %8365 = vmatprep.mubr.msk.bf16.mxu1 %vm798_vm1, %v8635_v60  ;;  %v8637_v19 = vld [vmem:[%s8959_s20 + $0x78] sm:$0xff]   ;;  %v8638_v31 = vld [vmem:[%s8952_s17 + $0x80] sm:$0xff]  }
 0x151   : > { %v9483_v63 = vpop.f32.mrf.mxu0  ;;  %v9485_v55 = vpop.f32.mrf.mxu1  ;;  %v8639_v47 = vld [vmem:[%s8959_s20 + $0x80] sm:$0xff]  }
 0x152   : > { %10983 = vst [vmem:[#allocation69_spill] sm:$0xff] %v9483_v63  ;;  %10984 = vst [vmem:[#allocation70_spill] sm:$0xff] %v9485_v55 }
 0x153   : > { %v9489_v28 = vpop.f32.mrf.mxu0  ;;  %v9491_v25 = vpop.f32.mrf.mxu1 }
 0x154   : > { %10985 = vst [vmem:[#allocation71_spill] sm:$0xff] %v9489_v28  ;;  %10986 = vst [vmem:[#allocation72_spill] sm:$0xff] %v9491_v25 }
 0x155   : > { %v9499_v60 = vpop.f32.mrf.mxu0  ;;  %v9501_v7 = vpop.f32.mrf.mxu1 }
 0x156   : > { %10987 = vst [vmem:[#allocation73_spill] sm:$0xff] %v9499_v60  ;;  %10988 = vst [vmem:[#allocation74_spill] sm:$0xff] %v9501_v7 }
 0x157   : > { %v9505_v55 = vpop.f32.mrf.mxu0  ;;  %v9507_v63 = vpop.f32.mrf.mxu1  ;;  %8230 = vmatmul.mubr.msk.bf16.gmra.mxu0 %vm798_vm1, %v8636_v4  ;;  %8366 = vmatmul.mubr.msk.bf16.gmra.mxu1 %vm798_vm1, %v8637_v19  ;;  %v8640_v4 = vld [vmem:[%s8952_s17 + $0x88] sm:$0xff]  }
 0x158   : > { %10989 = vst [vmem:[#allocation75_spill] sm:$0xff] %v9505_v55  ;;  %10990 = vst [vmem:[#allocation76_spill] sm:$0xff] %v9507_v63  ;;  %8233 = vmatprep.mubr.msk.bf16.mxu0 %vm798_vm1, %v8638_v31  ;;  %8369 = vmatprep.mubr.msk.bf16.mxu1 %vm798_vm1, %v8639_v47  ;;  %v8641_v19 = vld [vmem:[%s8959_s20 + $0x88] sm:$0xff]   ;;  %v8642_v63 = vld [vmem:[%s8952_s17 + $0x90] sm:$0xff]  }
 0x159   : > { %v9515_v25 = vpop.f32.mrf.mxu0  ;;  %v9517_v52 = vpop.f32.mrf.mxu1  ;;  %v8643_v31 = vld [vmem:[%s8959_s20 + $0x90] sm:$0xff]  }
 0x15a   : > { %10991 = vst [vmem:[#allocation77_spill] sm:$0xff] %v9515_v25  ;;  %10992 = vst [vmem:[#allocation78_spill] sm:$0xff] %v9517_v52 }
 0x15b   : > { %v9521_v60 = vpop.f32.mrf.mxu0  ;;  %v9523_v28 = vpop.f32.mrf.mxu1 }
 0x15c   : > { %10993 = vst [vmem:[#allocation79_spill] sm:$0xff] %v9521_v60  ;;  %10994 = vst [vmem:[#allocation80_spill] sm:$0xff] %v9523_v28 }
 0x15d   : > { %v9531_v47 = vpop.f32.mrf.mxu0  ;;  %v9533_v55 = vpop.f32.mrf.mxu1 }
 0x15e   : > { %10995 = vst [vmem:[#allocation81_spill] sm:$0xff] %v9531_v47  ;;  %10996 = vst [vmem:[#allocation82_spill] sm:$0xff] %v9533_v55 }
 0x15f   : > { %v9537_v52 = vpop.f32.mrf.mxu0  ;;  %v9539_v25 = vpop.f32.mrf.mxu1  ;;  %8234 = vmatmul.mubr.msk.bf16.gmra.mxu0 %vm798_vm1, %v8640_v4  ;;  %8370 = vmatmul.mubr.msk.bf16.gmra.mxu1 %vm798_vm1, %v8641_v19  ;;  %v8644_v4 = vld [vmem:[%s8952_s17 + $0x98] sm:$0xff]  }
 0x160   : > { %10997 = vst [vmem:[#allocation83_spill] sm:$0xff] %v9537_v52  ;;  %10998 = vst [vmem:[#allocation84_spill] sm:$0xff] %v9539_v25  ;;  %8237 = vmatprep.mubr.msk.bf16.mxu0 %vm798_vm1, %v8642_v63  ;;  %8373 = vmatprep.mubr.msk.bf16.mxu1 %vm798_vm1, %v8643_v31  ;;  %v8645_v19 = vld [vmem:[%s8959_s20 + $0x98] sm:$0xff]   ;;  %v8646_v25 = vld [vmem:[%s8952_s17 + $0xa0] sm:$0xff]  }
 0x161   : > { %v9547_v28 = vpop.f32.mrf.mxu0  ;;  %v9549_v7 = vpop.f32.mrf.mxu1  ;;  %v8647_v63 = vld [vmem:[%s8959_s20 + $0xa0] sm:$0xff]  }
 0x162   : > { %10999 = vst [vmem:[#allocation85_spill] sm:$0xff] %v9547_v28  ;;  %11000 = vst [vmem:[#allocation86_spill] sm:$0xff] %v9549_v7 }
 0x163   : > { %v9553_v47 = vpop.f32.mrf.mxu0  ;;  %v9555_v60 = vpop.f32.mrf.mxu1 }
 0x164   : > { %11001 = vst [vmem:[#allocation87_spill] sm:$0xff] %v9553_v47  ;;  %11002 = vst [vmem:[#allocation88_spill] sm:$0xff] %v9555_v60 }
 0x165   : > { %v9563_v31 = vpop.f32.mrf.mxu0  ;;  %v9565_v52 = vpop.f32.mrf.mxu1 }
 0x166   : > { %11003 = vst [vmem:[#allocation89_spill] sm:$0xff] %v9563_v31  ;;  %11004 = vst [vmem:[#allocation90_spill] sm:$0xff] %v9565_v52 }
 0x167   : > { %v9569_v7 = vpop.f32.mrf.mxu0  ;;  %v9571_v28 = vpop.f32.mrf.mxu1  ;;  %8238 = vmatmul.mubr.msk.bf16.gmra.mxu0 %vm798_vm1, %v8644_v4  ;;  %8374 = vmatmul.mubr.msk.bf16.gmra.mxu1 %vm798_vm1, %v8645_v19  ;;  %v8648_v4 = vld [vmem:[%s8952_s17 + $0xa8] sm:$0xff]  }
 0x168   : > { %11005 = vst [vmem:[#allocation91_spill] sm:$0xff] %v9569_v7  ;;  %11006 = vst [vmem:[#allocation92_spill] sm:$0xff] %v9571_v28  ;;  %8241 = vmatprep.mubr.msk.bf16.mxu0 %vm798_vm1, %v8646_v25  ;;  %8377 = vmatprep.mubr.msk.bf16.mxu1 %vm798_vm1, %v8647_v63  ;;  %v8649_v19 = vld [vmem:[%s8959_s20 + $0xa8] sm:$0xff]   ;;  %v8650_v28 = vld [vmem:[%s8952_s17 + $0xb0] sm:$0xff]  }
 0x169   : > { %v9579_v60 = vpop.f32.mrf.mxu0  ;;  %v9581_v55 = vpop.f32.mrf.mxu1  ;;  %v8651_v25 = vld [vmem:[%s8959_s20 + $0xb0] sm:$0xff]  }
 0x16a   : > { %11007 = vst [vmem:[#allocation93_spill] sm:$0xff] %v9579_v60  ;;  %11008 = vst [vmem:[#allocation94_spill] sm:$0xff] %v9581_v55 }
 0x16b   : > { %v9585_v31 = vpop.f32.mrf.mxu0  ;;  %v9587_v47 = vpop.f32.mrf.mxu1 }
 0x16c   : > { %11009 = vst [vmem:[#allocation95_spill] sm:$0xff] %v9585_v31  ;;  %11010 = vst [vmem:[#allocation96_spill] sm:$0xff] %v9587_v47 }
 0x16d   : > { %v9595_v63 = vpop.f32.mrf.mxu0  ;;  %v9597_v7 = vpop.f32.mrf.mxu1 }
 0x16e   : > { %11011 = vst [vmem:[#allocation97_spill] sm:$0xff] %v9595_v63  ;;  %11012 = vst [vmem:[#allocation98_spill] sm:$0xff] %v9597_v7 }
 0x16f   : > { %v9601_v55 = vpop.f32.mrf.mxu0  ;;  %v9603_v60 = vpop.f32.mrf.mxu1  ;;  %8242 = vmatmul.mubr.msk.bf16.gmra.mxu0 %vm798_vm1, %v8648_v4  ;;  %8378 = vmatmul.mubr.msk.bf16.gmra.mxu1 %vm798_vm1, %v8649_v19  ;;  %v8652_v4 = vld [vmem:[%s8952_s17 + $0xb8] sm:$0xff]  }
 0x170   : > { %11013 = vst [vmem:[#allocation99_spill] sm:$0xff] %v9601_v55  ;;  %11014 = vst [vmem:[#allocation100_spill] sm:$0xff] %v9603_v60  ;;  %8245 = vmatprep.mubr.msk.bf16.mxu0 %vm798_vm1, %v8650_v28  ;;  %8381 = vmatprep.mubr.msk.bf16.mxu1 %vm798_vm1, %v8651_v25  ;;  %v8653_v19 = vld [vmem:[%s8959_s20 + $0xb8] sm:$0xff]   ;;  %v8654_v60 = vld [vmem:[%s8952_s17 + $0xc0] sm:$0xff]  }
 0x171   : > { %v9611_v47 = vpop.f32.mrf.mxu0  ;;  %v9613_v52 = vpop.f32.mrf.mxu1  ;;  %v8655_v28 = vld [vmem:[%s8959_s20 + $0xc0] sm:$0xff]  }
 0x172   : > { %11015 = vst [vmem:[#allocation101_spill] sm:$0xff] %v9611_v47  ;;  %11016 = vst [vmem:[#allocation102_spill] sm:$0xff] %v9613_v52 }
 0x173   : > { %v9617_v63 = vpop.f32.mrf.mxu0  ;;  %v9619_v31 = vpop.f32.mrf.mxu1 }
 0x174   : > { %11017 = vst [vmem:[#allocation103_spill] sm:$0xff] %v9617_v63  ;;  %11018 = vst [vmem:[#allocation104_spill] sm:$0xff] %v9619_v31 }
 0x175   : > { %v9627_v25 = vpop.f32.mrf.mxu0  ;;  %v9629_v55 = vpop.f32.mrf.mxu1 }
 0x176   : > { %11019 = vst [vmem:[#allocation105_spill] sm:$0xff] %v9627_v25  ;;  %11020 = vst [vmem:[#allocation106_spill] sm:$0xff] %v9629_v55 }
 0x177   : > { %v9633_v52 = vpop.f32.mrf.mxu0  ;;  %v9635_v47 = vpop.f32.mrf.mxu1  ;;  %8246 = vmatmul.mubr.msk.bf16.gmra.mxu0 %vm798_vm1, %v8652_v4  ;;  %8382 = vmatmul.mubr.msk.bf16.gmra.mxu1 %vm798_vm1, %v8653_v19  ;;  %v8656_v4 = vld [vmem:[%s8952_s17 + $0xc8] sm:$0xff]  }
 0x178   : > { %11021 = vst [vmem:[#allocation107_spill] sm:$0xff] %v9633_v52  ;;  %11022 = vst [vmem:[#allocation108_spill] sm:$0xff] %v9635_v47  ;;  %8249 = vmatprep.mubr.msk.bf16.mxu0 %vm798_vm1, %v8654_v60  ;;  %8385 = vmatprep.mubr.msk.bf16.mxu1 %vm798_vm1, %v8655_v28  ;;  %v8657_v19 = vld [vmem:[%s8959_s20 + $0xc8] sm:$0xff]   ;;  %v8658_v47 = vld [vmem:[%s8952_s17 + $0xd0] sm:$0xff]  }
 0x179   : > { %v9643_v31 = vpop.f32.mrf.mxu0  ;;  %v9645_v7 = vpop.f32.mrf.mxu1  ;;  %v8659_v60 = vld [vmem:[%s8959_s20 + $0xd0] sm:$0xff]  }
 0x17a   : > { %11023 = vst [vmem:[#allocation109_spill] sm:$0xff] %v9643_v31  ;;  %11024 = vst [vmem:[#allocation110_spill] sm:$0xff] %v9645_v7 }
 0x17b   : > { %v9649_v25 = vpop.f32.mrf.mxu0  ;;  %v9651_v63 = vpop.f32.mrf.mxu1 }
 0x17c   : > { %11025 = vst [vmem:[#allocation111_spill] sm:$0xff] %v9649_v25  ;;  %11026 = vst [vmem:[#allocation112_spill] sm:$0xff] %v9651_v63 }
 0x17d   : > { %v9659_v28 = vpop.f32.mrf.mxu0  ;;  %v9661_v52 = vpop.f32.mrf.mxu1 }
 0x17e   : > { %11027 = vst [vmem:[#allocation113_spill] sm:$0xff] %v9659_v28  ;;  %11028 = vst [vmem:[#allocation114_spill] sm:$0xff] %v9661_v52 }
 0x17f   : > { %v9665_v7 = vpop.f32.mrf.mxu0  ;;  %v9667_v31 = vpop.f32.mrf.mxu1  ;;  %8250 = vmatmul.mubr.msk.bf16.gmra.mxu0 %vm798_vm1, %v8656_v4  ;;  %8386 = vmatmul.mubr.msk.bf16.gmra.mxu1 %vm798_vm1, %v8657_v19  ;;  %v8660_v4 = vld [vmem:[%s8952_s17 + $0xd8] sm:$0xff]  }
 0x180   : > { %11029 = vst [vmem:[#allocation115_spill] sm:$0xff] %v9665_v7  ;;  %11030 = vst [vmem:[#allocation116_spill] sm:$0xff] %v9667_v31  ;;  %8253 = vmatprep.mubr.msk.bf16.mxu0 %vm798_vm1, %v8658_v47  ;;  %8389 = vmatprep.mubr.msk.bf16.mxu1 %vm798_vm1, %v8659_v60  ;;  %v8661_v19 = vld [vmem:[%s8959_s20 + $0xd8] sm:$0xff]   ;;  %v8662_v31 = vld [vmem:[%s8952_s17 + $0xe0] sm:$0xff]  }
 0x181   : > { %v9675_v63 = vpop.f32.mrf.mxu0  ;;  %v9677_v55 = vpop.f32.mrf.mxu1  ;;  %v8663_v47 = vld [vmem:[%s8959_s20 + $0xe0] sm:$0xff]  }
 0x182   : > { %11031 = vst [vmem:[#allocation117_spill] sm:$0xff] %v9675_v63  ;;  %11032 = vst [vmem:[#allocation118_spill] sm:$0xff] %v9677_v55 }
 0x183   : > { %v9681_v28 = vpop.f32.mrf.mxu0  ;;  %v9683_v25 = vpop.f32.mrf.mxu1 }
 0x184   : > { %11033 = vst [vmem:[#allocation119_spill] sm:$0xff] %v9681_v28  ;;  %11034 = vst [vmem:[#allocation120_spill] sm:$0xff] %v9683_v25 }
 0x185   : > { %v9691_v60 = vpop.f32.mrf.mxu0  ;;  %v9693_v7 = vpop.f32.mrf.mxu1 }
 0x186   : > { %11035 = vst [vmem:[#allocation121_spill] sm:$0xff] %v9691_v60  ;;  %11036 = vst [vmem:[#allocation122_spill] sm:$0xff] %v9693_v7 }
 0x187   : > { %v9697_v55 = vpop.f32.mrf.mxu0  ;;  %v9699_v63 = vpop.f32.mrf.mxu1  ;;  %8254 = vmatmul.mubr.msk.bf16.gmra.mxu0 %vm798_vm1, %v8660_v4  ;;  %8390 = vmatmul.mubr.msk.bf16.gmra.mxu1 %vm798_vm1, %v8661_v19  ;;  %v8664_v4 = vld [vmem:[%s8952_s17 + $0xe8] sm:$0xff]  }
 0x188   : > { %11037 = vst [vmem:[#allocation123_spill] sm:$0xff] %v9697_v55  ;;  %11038 = vst [vmem:[#allocation124_spill] sm:$0xff] %v9699_v63  ;;  %8257 = vmatprep.mubr.msk.bf16.mxu0 %vm798_vm1, %v8662_v31  ;;  %8393 = vmatprep.mubr.msk.bf16.mxu1 %vm798_vm1, %v8663_v47  ;;  %v8665_v19 = vld [vmem:[%s8959_s20 + $0xe8] sm:$0xff]   ;;  %v8666_v63 = vld [vmem:[%s8952_s17 + $0xf0] sm:$0xff]  }
 0x189   : > { %v9707_v25 = vpop.f32.mrf.mxu0  ;;  %v9709_v52 = vpop.f32.mrf.mxu1  ;;  %v8667_v31 = vld [vmem:[%s8959_s20 + $0xf0] sm:$0xff]  }
 0x18a   : > { %11039 = vst [vmem:[#allocation125_spill] sm:$0xff] %v9707_v25  ;;  %11040 = vst [vmem:[#allocation126_spill] sm:$0xff] %v9709_v52 }
 0x18b   : > { %v9713_v60 = vpop.f32.mrf.mxu0  ;;  %v9715_v28 = vpop.f32.mrf.mxu1 }
 0x18c   : > { %11041 = vst [vmem:[#allocation127_spill] sm:$0xff] %v9713_v60  ;;  %11042 = vst [vmem:[#allocation128_spill] sm:$0xff] %v9715_v28 }
 0x18d   : > { %v9723_v47 = vpop.f32.mrf.mxu0  ;;  %v9725_v55 = vpop.f32.mrf.mxu1 }
 0x18e   : > { %11043 = vst [vmem:[#allocation129_spill] sm:$0xff] %v9723_v47  ;;  %11044 = vst [vmem:[#allocation130_spill] sm:$0xff] %v9725_v55 }
 0x18f   : > { %v9729_v52 = vpop.f32.mrf.mxu0  ;;  %v9731_v25 = vpop.f32.mrf.mxu1  ;;  %8258 = vmatmul.mubr.msk.bf16.gmra.mxu0 %vm798_vm1, %v8664_v4  ;;  %8394 = vmatmul.mubr.msk.bf16.gmra.mxu1 %vm798_vm1, %v8665_v19  ;;  %v8668_v4 = vld [vmem:[%s8952_s17 + $0xf8] sm:$0xff]  }
 0x190   : > { %11045 = vst [vmem:[#allocation131_spill] sm:$0xff] %v9729_v52  ;;  %11046 = vst [vmem:[#allocation132_spill] sm:$0xff] %v9731_v25  ;;  %8261 = vmatprep.mubr.msk.bf16.mxu0 %vm798_vm1, %v8666_v63  ;;  %8397 = vmatprep.mubr.msk.bf16.mxu1 %vm798_vm1, %v8667_v31  ;;  %v8669_v19 = vld [vmem:[%s8959_s20 + $0xf8] sm:$0xff]   ;;  %v8670_v25 = vld [vmem:[%s8952_s17 + $0x100] sm:$0xff]  }
 0x191   : > { %v9739_v28 = vpop.f32.mrf.mxu0  ;;  %v9741_v7 = vpop.f32.mrf.mxu1  ;;  %v8671_v63 = vld [vmem:[%s8959_s20 + $0x100] sm:$0xff]  }
 0x192   : > { %11047 = vst [vmem:[#allocation133_spill] sm:$0xff] %v9739_v28  ;;  %11048 = vst [vmem:[#allocation134_spill] sm:$0xff] %v9741_v7 }
 0x193   : > { %v9745_v47 = vpop.f32.mrf.mxu0  ;;  %v9747_v60 = vpop.f32.mrf.mxu1 }
 0x194   : > { %11049 = vst [vmem:[#allocation135_spill] sm:$0xff] %v9745_v47  ;;  %11050 = vst [vmem:[#allocation136_spill] sm:$0xff] %v9747_v60 }
 0x195   : > { %v9755_v31 = vpop.f32.mrf.mxu0  ;;  %v9757_v52 = vpop.f32.mrf.mxu1 }
 0x196   : > { %11051 = vst [vmem:[#allocation137_spill] sm:$0xff] %v9755_v31  ;;  %11052 = vst [vmem:[#allocation138_spill] sm:$0xff] %v9757_v52 }
 0x197   : > { %v9761_v7 = vpop.f32.mrf.mxu0  ;;  %v9763_v28 = vpop.f32.mrf.mxu1  ;;  %8262 = vmatmul.mubr.msk.bf16.gmra.mxu0 %vm798_vm1, %v8668_v4  ;;  %8398 = vmatmul.mubr.msk.bf16.gmra.mxu1 %vm798_vm1, %v8669_v19  ;;  %v8672_v4 = vld [vmem:[%s8952_s17 + $0x108] sm:$0xff]  }
 0x198   : > { %11053 = vst [vmem:[#allocation139_spill] sm:$0xff] %v9761_v7  ;;  %11054 = vst [vmem:[#allocation140_spill] sm:$0xff] %v9763_v28  ;;  %8265 = vmatprep.mubr.msk.bf16.mxu0 %vm798_vm1, %v8670_v25  ;;  %8401 = vmatprep.mubr.msk.bf16.mxu1 %vm798_vm1, %v8671_v63  ;;  %v8673_v19 = vld [vmem:[%s8959_s20 + $0x108] sm:$0xff]   ;;  %v8674_v28 = vld [vmem:[%s8952_s17 + $0x110] sm:$0xff]  }
 0x199   : > { %v9771_v60 = vpop.f32.mrf.mxu0  ;;  %v9773_v55 = vpop.f32.mrf.mxu1  ;;  %v8675_v25 = vld [vmem:[%s8959_s20 + $0x110] sm:$0xff]  }
 0x19a   : > { %11055 = vst [vmem:[#allocation141_spill] sm:$0xff] %v9771_v60  ;;  %11056 = vst [vmem:[#allocation142_spill] sm:$0xff] %v9773_v55 }
 0x19b   : > { %v9777_v31 = vpop.f32.mrf.mxu0  ;;  %v9779_v47 = vpop.f32.mrf.mxu1 }
 0x19c   : > { %11057 = vst [vmem:[#allocation143_spill] sm:$0xff] %v9777_v31  ;;  %11058 = vst [vmem:[#allocation144_spill] sm:$0xff] %v9779_v47 }
 0x19d   : > { %v9787_v63 = vpop.f32.mrf.mxu0  ;;  %v9789_v7 = vpop.f32.mrf.mxu1 }
 0x19e   : > { %11059 = vst [vmem:[#allocation145_spill] sm:$0xff] %v9787_v63  ;;  %11060 = vst [vmem:[#allocation146_spill] sm:$0xff] %v9789_v7 }
 0x19f   : > { %v9793_v55 = vpop.f32.mrf.mxu0  ;;  %v9795_v60 = vpop.f32.mrf.mxu1  ;;  %8266 = vmatmul.mubr.msk.bf16.gmra.mxu0 %vm798_vm1, %v8672_v4  ;;  %8402 = vmatmul.mubr.msk.bf16.gmra.mxu1 %vm798_vm1, %v8673_v19  ;;  %v8676_v4 = vld [vmem:[%s8952_s17 + $0x118] sm:$0xff]  }
 0x1a0   : > { %11061 = vst [vmem:[#allocation147_spill] sm:$0xff] %v9793_v55  ;;  %11062 = vst [vmem:[#allocation148_spill] sm:$0xff] %v9795_v60  ;;  %8269 = vmatprep.mubr.msk.bf16.mxu0 %vm798_vm1, %v8674_v28  ;;  %8405 = vmatprep.mubr.msk.bf16.mxu1 %vm798_vm1, %v8675_v25  ;;  %v8677_v19 = vld [vmem:[%s8959_s20 + $0x118] sm:$0xff]   ;;  %v8678_v60 = vld [vmem:[%s8952_s17 + $0x120] sm:$0xff]  }
 0x1a1   : > { %v9803_v47 = vpop.f32.mrf.mxu0  ;;  %v9805_v52 = vpop.f32.mrf.mxu1  ;;  %v8679_v28 = vld [vmem:[%s8959_s20 + $0x120] sm:$0xff]  }
 0x1a2   : > { %11063 = vst [vmem:[#allocation149_spill] sm:$0xff] %v9803_v47  ;;  %11064 = vst [vmem:[#allocation150_spill] sm:$0xff] %v9805_v52 }
 0x1a3   : > { %v9809_v63 = vpop.f32.mrf.mxu0  ;;  %v9811_v31 = vpop.f32.mrf.mxu1 }
 0x1a4   : > { %11065 = vst [vmem:[#allocation151_spill] sm:$0xff] %v9809_v63  ;;  %11066 = vst [vmem:[#allocation152_spill] sm:$0xff] %v9811_v31 }
 0x1a5   : > { %v9819_v25 = vpop.f32.mrf.mxu0  ;;  %v9821_v55 = vpop.f32.mrf.mxu1 }
 0x1a6   : > { %11067 = vst [vmem:[#allocation153_spill] sm:$0xff] %v9819_v25  ;;  %11068 = vst [vmem:[#allocation154_spill] sm:$0xff] %v9821_v55 }
 0x1a7   : > { %v9825_v52 = vpop.f32.mrf.mxu0  ;;  %v9827_v47 = vpop.f32.mrf.mxu1  ;;  %8270 = vmatmul.mubr.msk.bf16.gmra.mxu0 %vm798_vm1, %v8676_v4  ;;  %8406 = vmatmul.mubr.msk.bf16.gmra.mxu1 %vm798_vm1, %v8677_v19  ;;  %v8680_v4 = vld [vmem:[%s8952_s17 + $0x128] sm:$0xff]  }
 0x1a8   : > { %11069 = vst [vmem:[#allocation155_spill] sm:$0xff] %v9825_v52  ;;  %11070 = vst [vmem:[#allocation156_spill] sm:$0xff] %v9827_v47  ;;  %8273 = vmatprep.mubr.msk.bf16.mxu0 %vm798_vm1, %v8678_v60  ;;  %8409 = vmatprep.mubr.msk.bf16.mxu1 %vm798_vm1, %v8679_v28  ;;  %v8681_v19 = vld [vmem:[%s8959_s20 + $0x128] sm:$0xff]   ;;  %v8682_v47 = vld [vmem:[%s8952_s17 + $0x130] sm:$0xff]  }
 0x1a9   : > { %v9835_v31 = vpop.f32.mrf.mxu0  ;;  %v9837_v7 = vpop.f32.mrf.mxu1  ;;  %v8683_v60 = vld [vmem:[%s8959_s20 + $0x130] sm:$0xff]  }
 0x1aa   : > { %11071 = vst [vmem:[#allocation157_spill] sm:$0xff] %v9835_v31  ;;  %11072 = vst [vmem:[#allocation158_spill] sm:$0xff] %v9837_v7 }
 0x1ab   : > { %v9841_v25 = vpop.f32.mrf.mxu0  ;;  %v9843_v63 = vpop.f32.mrf.mxu1 }
 0x1ac   : > { %11073 = vst [vmem:[#allocation159_spill] sm:$0xff] %v9841_v25  ;;  %11074 = vst [vmem:[#allocation160_spill] sm:$0xff] %v9843_v63 }
 0x1ad   : > { %v9851_v28 = vpop.f32.mrf.mxu0  ;;  %v9853_v52 = vpop.f32.mrf.mxu1 }
 0x1ae   : > { %11075 = vst [vmem:[#allocation161_spill] sm:$0xff] %v9851_v28  ;;  %11076 = vst [vmem:[#allocation162_spill] sm:$0xff] %v9853_v52 }
 0x1af   : > { %v9857_v7 = vpop.f32.mrf.mxu0  ;;  %v9859_v31 = vpop.f32.mrf.mxu1  ;;  %8274 = vmatmul.mubr.msk.bf16.gmra.mxu0 %vm798_vm1, %v8680_v4  ;;  %8410 = vmatmul.mubr.msk.bf16.gmra.mxu1 %vm798_vm1, %v8681_v19  ;;  %v8684_v4 = vld [vmem:[%s8952_s17 + $0x138] sm:$0xff]  }
 0x1b0   : > { %11077 = vst [vmem:[#allocation163_spill] sm:$0xff] %v9857_v7  ;;  %11078 = vst [vmem:[#allocation164_spill] sm:$0xff] %v9859_v31  ;;  %8277 = vmatprep.mubr.msk.bf16.mxu0 %vm798_vm1, %v8682_v47  ;;  %8413 = vmatprep.mubr.msk.bf16.mxu1 %vm798_vm1, %v8683_v60  ;;  %v8685_v19 = vld [vmem:[%s8959_s20 + $0x138] sm:$0xff]   ;;  %v8686_v31 = vld [vmem:[%s8952_s17 + $0x140] sm:$0xff]  }
 0x1b1   : > { %v9867_v63 = vpop.f32.mrf.mxu0  ;;  %v9869_v55 = vpop.f32.mrf.mxu1  ;;  %v8687_v47 = vld [vmem:[%s8959_s20 + $0x140] sm:$0xff]  }
 0x1b2   : > { %11079 = vst [vmem:[#allocation165_spill] sm:$0xff] %v9867_v63  ;;  %11080 = vst [vmem:[#allocation166_spill] sm:$0xff] %v9869_v55 }
 0x1b3   : > { %v9873_v28 = vpop.f32.mrf.mxu0  ;;  %v9875_v25 = vpop.f32.mrf.mxu1 }
 0x1b4   : > { %11081 = vst [vmem:[#allocation167_spill] sm:$0xff] %v9873_v28  ;;  %11082 = vst [vmem:[#allocation168_spill] sm:$0xff] %v9875_v25 }
 0x1b5   : > { %v9883_v60 = vpop.f32.mrf.mxu0  ;;  %v9885_v7 = vpop.f32.mrf.mxu1 }
 0x1b6   : > { %11083 = vst [vmem:[#allocation169_spill] sm:$0xff] %v9883_v60  ;;  %11084 = vst [vmem:[#allocation170_spill] sm:$0xff] %v9885_v7 }
 0x1b7   : > { %v9889_v55 = vpop.f32.mrf.mxu0  ;;  %v9891_v63 = vpop.f32.mrf.mxu1  ;;  %8278 = vmatmul.mubr.msk.bf16.gmra.mxu0 %vm798_vm1, %v8684_v4  ;;  %8414 = vmatmul.mubr.msk.bf16.gmra.mxu1 %vm798_vm1, %v8685_v19  ;;  %v8688_v4 = vld [vmem:[%s8952_s17 + $0x148] sm:$0xff]  }
 0x1b8   : > { %11085 = vst [vmem:[#allocation171_spill] sm:$0xff] %v9889_v55  ;;  %11086 = vst [vmem:[#allocation172_spill] sm:$0xff] %v9891_v63  ;;  %8281 = vmatprep.mubr.msk.bf16.mxu0 %vm798_vm1, %v8686_v31  ;;  %8417 = vmatprep.mubr.msk.bf16.mxu1 %vm798_vm1, %v8687_v47  ;;  %v8689_v19 = vld [vmem:[%s8959_s20 + $0x148] sm:$0xff]   ;;  %v8690_v63 = vld [vmem:[%s8952_s17 + $0x150] sm:$0xff]  }
 0x1b9   : > { %v9899_v25 = vpop.f32.mrf.mxu0  ;;  %v9901_v52 = vpop.f32.mrf.mxu1  ;;  %v8691_v31 = vld [vmem:[%s8959_s20 + $0x150] sm:$0xff]  }
 0x1ba   : > { %11087 = vst [vmem:[#allocation173_spill] sm:$0xff] %v9899_v25  ;;  %11088 = vst [vmem:[#allocation174_spill] sm:$0xff] %v9901_v52 }
 0x1bb   : > { %v9905_v60 = vpop.f32.mrf.mxu0  ;;  %v9907_v28 = vpop.f32.mrf.mxu1 }
 0x1bc   : > { %11089 = vst [vmem:[#allocation175_spill] sm:$0xff] %v9905_v60  ;;  %11090 = vst [vmem:[#allocation176_spill] sm:$0xff] %v9907_v28 }
 0x1bd   : > { %v9915_v47 = vpop.f32.mrf.mxu0  ;;  %v9917_v55 = vpop.f32.mrf.mxu1 }
 0x1be   : > { %11091 = vst [vmem:[#allocation177_spill] sm:$0xff] %v9915_v47  ;;  %11092 = vst [vmem:[#allocation178_spill] sm:$0xff] %v9917_v55 }
 0x1bf   : > { %v9921_v52 = vpop.f32.mrf.mxu0  ;;  %v9923_v25 = vpop.f32.mrf.mxu1  ;;  %8282 = vmatmul.mubr.msk.bf16.gmra.mxu0 %vm798_vm1, %v8688_v4  ;;  %8418 = vmatmul.mubr.msk.bf16.gmra.mxu1 %vm798_vm1, %v8689_v19  ;;  %v8692_v4 = vld [vmem:[%s8952_s17 + $0x158] sm:$0xff]  }
 0x1c0   : > { %11093 = vst [vmem:[#allocation179_spill] sm:$0xff] %v9921_v52  ;;  %11094 = vst [vmem:[#allocation180_spill] sm:$0xff] %v9923_v25  ;;  %8285 = vmatprep.mubr.msk.bf16.mxu0 %vm798_vm1, %v8690_v63  ;;  %8421 = vmatprep.mubr.msk.bf16.mxu1 %vm798_vm1, %v8691_v31  ;;  %v8693_v19 = vld [vmem:[%s8959_s20 + $0x158] sm:$0xff]   ;;  %v8694_v25 = vld [vmem:[%s8952_s17 + $0x160] sm:$0xff]  }
 0x1c1   : > { %v9931_v28 = vpop.f32.mrf.mxu0  ;;  %v9933_v7 = vpop.f32.mrf.mxu1  ;;  %v8695_v63 = vld [vmem:[%s8959_s20 + $0x160] sm:$0xff]  }
 0x1c2   : > { %11095 = vst [vmem:[#allocation181_spill] sm:$0xff] %v9931_v28  ;;  %11096 = vst [vmem:[#allocation182_spill] sm:$0xff] %v9933_v7 }
 0x1c3   : > { %v9937_v47 = vpop.f32.mrf.mxu0  ;;  %v9939_v60 = vpop.f32.mrf.mxu1 }
 0x1c4   : > { %11097 = vst [vmem:[#allocation183_spill] sm:$0xff] %v9937_v47  ;;  %11098 = vst [vmem:[#allocation184_spill] sm:$0xff] %v9939_v60 }
 0x1c5   : > { %v9947_v31 = vpop.f32.mrf.mxu0  ;;  %v9949_v52 = vpop.f32.mrf.mxu1 }
 0x1c6   : > { %11099 = vst [vmem:[#allocation185_spill] sm:$0xff] %v9947_v31  ;;  %11100 = vst [vmem:[#allocation186_spill] sm:$0xff] %v9949_v52 }
 0x1c7   : > { %v9953_v7 = vpop.f32.mrf.mxu0  ;;  %v9955_v28 = vpop.f32.mrf.mxu1  ;;  %8286 = vmatmul.mubr.msk.bf16.gmra.mxu0 %vm798_vm1, %v8692_v4  ;;  %8422 = vmatmul.mubr.msk.bf16.gmra.mxu1 %vm798_vm1, %v8693_v19  ;;  %v8696_v4 = vld [vmem:[%s8952_s17 + $0x168] sm:$0xff]  }
 0x1c8   : > { %11101 = vst [vmem:[#allocation187_spill] sm:$0xff] %v9953_v7  ;;  %11102 = vst [vmem:[#allocation188_spill] sm:$0xff] %v9955_v28  ;;  %8289 = vmatprep.mubr.msk.bf16.mxu0 %vm798_vm1, %v8694_v25  ;;  %8425 = vmatprep.mubr.msk.bf16.mxu1 %vm798_vm1, %v8695_v63  ;;  %v8697_v19 = vld [vmem:[%s8959_s20 + $0x168] sm:$0xff]   ;;  %v8698_v28 = vld [vmem:[%s8952_s17 + $0x170] sm:$0xff]  }
 0x1c9   : > { %v9963_v60 = vpop.f32.mrf.mxu0  ;;  %v9965_v55 = vpop.f32.mrf.mxu1  ;;  %v8699_v25 = vld [vmem:[%s8959_s20 + $0x170] sm:$0xff]  }
 0x1ca   : > { %11103 = vst [vmem:[#allocation189_spill] sm:$0xff] %v9963_v60  ;;  %11104 = vst [vmem:[#allocation190_spill] sm:$0xff] %v9965_v55 }
 0x1cb   : > { %v9969_v31 = vpop.f32.mrf.mxu0  ;;  %v9971_v47 = vpop.f32.mrf.mxu1 }
 0x1cc   : > { %11105 = vst [vmem:[#allocation191_spill] sm:$0xff] %v9969_v31  ;;  %11106 = vst [vmem:[#allocation192_spill] sm:$0xff] %v9971_v47 }
 0x1cd   : > { %v9979_v63 = vpop.f32.mrf.mxu0  ;;  %v9981_v7 = vpop.f32.mrf.mxu1 }
 0x1ce   : > { %11107 = vst [vmem:[#allocation193_spill] sm:$0xff] %v9979_v63  ;;  %11108 = vst [vmem:[#allocation194_spill] sm:$0xff] %v9981_v7 }
 0x1cf   : > { %v9985_v55 = vpop.f32.mrf.mxu0  ;;  %v9987_v60 = vpop.f32.mrf.mxu1  ;;  %8290 = vmatmul.mubr.msk.bf16.gmra.mxu0 %vm798_vm1, %v8696_v4  ;;  %8426 = vmatmul.mubr.msk.bf16.gmra.mxu1 %vm798_vm1, %v8697_v19  ;;  %v8700_v4 = vld [vmem:[%s8952_s17 + $0x178] sm:$0xff]  }
 0x1d0   : > { %11109 = vst [vmem:[#allocation195_spill] sm:$0xff] %v9985_v55  ;;  %11110 = vst [vmem:[#allocation196_spill] sm:$0xff] %v9987_v60  ;;  %8293 = vmatprep.mubr.msk.bf16.mxu0 %vm798_vm1, %v8698_v28  ;;  %8429 = vmatprep.mubr.msk.bf16.mxu1 %vm798_vm1, %v8699_v25  ;;  %v8701_v19 = vld [vmem:[%s8959_s20 + $0x178] sm:$0xff]   ;;  %v8702_v60 = vld [vmem:[%s8952_s17 + $0x180] sm:$0xff]  }
 0x1d1   : > { %v9995_v47 = vpop.f32.mrf.mxu0  ;;  %v9997_v52 = vpop.f32.mrf.mxu1  ;;  %v8703_v28 = vld [vmem:[%s8959_s20 + $0x180] sm:$0xff]  }
 0x1d2   : > { %11111 = vst [vmem:[#allocation197_spill] sm:$0xff] %v9995_v47  ;;  %11112 = vst [vmem:[#allocation198_spill] sm:$0xff] %v9997_v52 }
 0x1d3   : > { %v10001_v63 = vpop.f32.mrf.mxu0  ;;  %v10003_v31 = vpop.f32.mrf.mxu1 }
 0x1d4   : > { %11113 = vst [vmem:[#allocation199_spill] sm:$0xff] %v10001_v63  ;;  %11114 = vst [vmem:[#allocation200_spill] sm:$0xff] %v10003_v31 }
 0x1d5   : > { %v10011_v25 = vpop.f32.mrf.mxu0  ;;  %v10013_v55 = vpop.f32.mrf.mxu1 }
 0x1d6   : > { %11115 = vst [vmem:[#allocation201_spill] sm:$0xff] %v10011_v25  ;;  %11116 = vst [vmem:[#allocation202_spill] sm:$0xff] %v10013_v55 }
 0x1d7   : > { %v10017_v52 = vpop.f32.mrf.mxu0  ;;  %v10019_v47 = vpop.f32.mrf.mxu1  ;;  %8294 = vmatmul.mubr.msk.bf16.gmra.mxu0 %vm798_vm1, %v8700_v4  ;;  %8430 = vmatmul.mubr.msk.bf16.gmra.mxu1 %vm798_vm1, %v8701_v19  ;;  %v8704_v4 = vld [vmem:[%s8952_s17 + $0x188] sm:$0xff]  }
 0x1d8   : > { %11117 = vst [vmem:[#allocation203_spill] sm:$0xff] %v10017_v52  ;;  %11118 = vst [vmem:[#allocation204_spill] sm:$0xff] %v10019_v47  ;;  %8297 = vmatprep.mubr.msk.bf16.mxu0 %vm798_vm1, %v8702_v60  ;;  %8433 = vmatprep.mubr.msk.bf16.mxu1 %vm798_vm1, %v8703_v28  ;;  %v8705_v19 = vld [vmem:[%s8959_s20 + $0x188] sm:$0xff]   ;;  %v8706_v47 = vld [vmem:[%s8952_s17 + $0x190] sm:$0xff]  }
 0x1d9   : > { %v10027_v31 = vpop.f32.mrf.mxu0  ;;  %v10029_v7 = vpop.f32.mrf.mxu1  ;;  %v8707_v60 = vld [vmem:[%s8959_s20 + $0x190] sm:$0xff]  }
 0x1da   : > { %11119 = vst [vmem:[#allocation205_spill] sm:$0xff] %v10027_v31  ;;  %11120 = vst [vmem:[#allocation206_spill] sm:$0xff] %v10029_v7 }
 0x1db   : > { %v10033_v25 = vpop.f32.mrf.mxu0  ;;  %v10035_v63 = vpop.f32.mrf.mxu1 }
 0x1dc   : > { %11121 = vst [vmem:[#allocation207_spill] sm:$0xff] %v10033_v25  ;;  %11122 = vst [vmem:[#allocation208_spill] sm:$0xff] %v10035_v63 }
 0x1dd   : > { %v10043_v52 = vpop.f32.mrf.mxu0  ;;  %v10045_v28 = vpop.f32.mrf.mxu1 }
 0x1de   : > { %11123 = vst [vmem:[#allocation209_spill] sm:$0xff] %v10043_v52  ;;  %11124 = vst [vmem:[#allocation210_spill] sm:$0xff] %v10045_v28  ;;  %v11126_v28 = vmax.f32 %v9035_v48, %v9037_v49 }
 0x1df   : > { %v8203_v55 = vpop.f32.mrf.mxu0  ;;  %8298 = vmatmul.mubr.msk.bf16.gmra.mxu0 %vm798_vm1, %v8704_v4  ;;  %v8339_v7 = vpop.f32.mrf.mxu1  ;;  %8434 = vmatmul.mubr.msk.bf16.gmra.mxu1 %vm798_vm1, %v8705_v19  ;;  %v10062_v19 = vld [vmem:[%s10705_s5] ss:$0 sm:$0xff] }
 0x1e0   : > { %v4042_v63 = vmax.f32 %v11125_v24, %v8203_v55  ;;  %8301 = vmatprep.mubr.msk.bf16.mxu0 %vm798_vm1, %v8706_v47  ;;  %8437 = vmatprep.mubr.msk.bf16.mxu1 %vm798_vm1, %v8707_v60  ;;  %v8709_v55 = vld [vmem:[%s8959_s20 + $0x198] sm:$0xff]   ;;  %v11127_v47 = vmax.f32 %v9043_v53, %v9045_v54  ;;  %v11129_v54 = vmax.f32 %v9057_v61, %v9060_v62 }
 0x1e1   : > { %v3529_v25 = vpop.f32.mrf.mxu0  ;;  %v4842_v31 = vpop.f32.mrf.mxu1 }
 0x1e2   : > { %v5355_v39 = vmax.f32 %v4042_v63, %v8339_v7  ;;  %v4040_v4 = vmax.f32 %v11126_v28, %v3529_v25  ;;  %v8711_v7 = vld [vmem:[%s8959_s20 + $0x1a0] sm:$0xff]   ;;  %v11128_v25 = vmax.f32 %v9051_v58, %v9053_v59 }
 0x1e3   : > { %v8204_v52 = vpop.f32.mrf.mxu0  ;;  %v8340_v45 = vpop.f32.mrf.mxu1 }
 0x1e4   : > { %v5353_v24 = vmax.f32 %v4040_v4, %v4842_v31  ;;  %v4043_v60 = vmax.f32 %v11127_v47, %v8204_v52  ;;  %v5490_v48 = vadd.f32 %v10062_v19, %v5355_v39 }
 0x1e5   : > { %v3532_v63 = vpop.f32.mrf.mxu0  ;;  %v4845_v15 = vpop.f32.mrf.mxu1 }
 0x1e6   : > { %v5356_v49 = vmax.f32 %v4043_v60, %v8340_v45  ;;  %v4041_v28 = vmax.f32 %v11128_v25, %v3532_v63  ;;  %v5488_v20 = vadd.f32 %v10062_v19, %v5353_v24  ;;  %v5618_v4 = vmax.f32 %v5490_v48, 0.0  ;;  %v8713_v24 = vld [vmem:[%s8959_s20 + $0x1a8] sm:$0xff]   ;;  %v8714_v48 = vld [vmem:[%s8952_s17 + $0x1b0] sm:$0xff]  }
 0x1e7   : > { %v8207_v23 = vpop.f32.mrf.mxu0  ;;  %8302 = vmatmul.mubr.msk.bf16.gmra.mxu0 %vm798_vm1, %v8708_v46  ;;  %v8343_v31 = vpop.f32.mrf.mxu1  ;;  %8438 = vmatmul.mubr.msk.bf16.gmra.mxu1 %vm798_vm1, %v8709_v55  ;;  %v11130_v55 = vmax.f32 %v9067_v0, %v9069_v1  ;;  %v11131_v0 = vmax.f32 %v9075_v5, %v9077_v6 }
 0x1e8   : > { %v5491_v52 = vadd.f32 %v10062_v19, %v5356_v49  ;;  %v5354_v53 = vmax.f32 %v4041_v28, %v4845_v15  ;;  %v4046_v39 = vmax.f32 %v11129_v54, %v8207_v23  ;;  %8305 = vmatprep.mubr.msk.bf16.mxu0 %vm798_vm1, %v8710_v12  ;;  %8441 = vmatprep.mubr.msk.bf16.mxu1 %vm798_vm1, %v8711_v7  ;;  %v8712_v23 = vld [vmem:[%s8952_s17 + $0x1a8] sm:$0xff]   ;;  %v5616_v47 = vmax.f32 %v5488_v20, 0.0  ;;  %v8715_v49 = vld [vmem:[%s8959_s20 + $0x1b0] sm:$0xff]  }
 0x1e9   : > { %v3545_v58 = vpop.f32.mrf.mxu0  ;;  %v4858_v59 = vpop.f32.mrf.mxu1 }
 0x1ea   : > { %v5619_v45 = vmax.f32 %v5491_v52, 0.0  ;;  %v5489_v46 = vadd.f32 %v10062_v19, %v5354_v53  ;;  %v4044_v15 = vmax.f32 %v11130_v55, %v3545_v58  ;;  %v5359_v61 = vmax.f32 %v4046_v39, %v8343_v31 }
 0x1eb   : > { %v8208_v62 = vpop.f32.mrf.mxu0  ;;  %v8344_v12 = vpop.f32.mrf.mxu1  ;;  %v11132_v31 = vmax.f32 %v9083_v10, %v9085_v11 }
 0x1ec   : > { %v7274_v60 = vpack.c.bf16 %v5619_v45, %v5618_v4  ;;  %v5617_v7 = vmax.f32 %v5489_v46, 0.0  ;;  %v5357_v63 = vmax.f32 %v4044_v15, %v4858_v59  ;;  %v4047_v1 = vmax.f32 %v11131_v0, %v8208_v62 }
 0x1ed   : > { %v3548_v25 = vpop.f32.mrf.mxu0  ;;  %v4861_v28 = vpop.f32.mrf.mxu1  ;;  %v5494_v20 = vadd.f32 %v10062_v19, %v5359_v61  ;;  %v11133_v59 = vmax.f32 %v9089_v13, %v9092_v14  ;;  %v11134_v15 = vmax.f32 %v9099_v16, %v9101_v17 }
 0x1ee   : > { %7586 = vst [vmem:[%s10092_s26 + $0x8] sm:$0xff] %v7274_v60   ;;  %v7269_v52 = vpack.c.bf16 %v5617_v7, %v5616_v47  ;;  %v4045_v53 = vmax.f32 %v11132_v31, %v3548_v25  ;;  %v5360_v54 = vmax.f32 %v4047_v1, %v8344_v12  ;;  %v5492_v5 = vadd.f32 %v10062_v19, %v5357_v63 }
 0x1ef   : > { %v8211_v39 = vpop.f32.mrf.mxu0  ;;  %8306 = vmatmul.mubr.msk.bf16.gmra.mxu0 %vm798_vm1, %v8712_v23  ;;  %v8347_v58 = vpop.f32.mrf.mxu1  ;;  %8442 = vmatmul.mubr.msk.bf16.gmra.mxu1 %vm798_vm1, %v8713_v24  ;;  %v5622_v62 = vmax.f32 %v5494_v20, 0.0  ;;  %v8716_v23 = vld [vmem:[%s8952_s17 + $0x1b8] sm:$0xff]   ;;  %v11135_v7 = vmax.f32 %v9107_v21, %v9109_v22  ;;  %v11136_v31 = vmax.f32 %v9115_v26, %v9117_v27 }
 0x1f0   : > { %7270 = vst [vmem:[%s10092_s26] sm:$0xff] %v7269_v52   ;;  %v5358_v6 = vmax.f32 %v4045_v53, %v4861_v28  ;;  %v4050_v10 = vmax.f32 %v11133_v59, %v8211_v39  ;;  %8309 = vmatprep.mubr.msk.bf16.mxu0 %vm798_vm1, %v8714_v48  ;;  %8445 = vmatprep.mubr.msk.bf16.mxu1 %vm798_vm1, %v8715_v49  ;;  %v8717_v24 = vld [vmem:[%s8959_s20 + $0x1b8] sm:$0xff]   ;;  %v5620_v47 = vmax.f32 %v5492_v5, 0.0  ;;  %v8718_v48 = vld [vmem:[%s8952_s17 + $0x1c0] sm:$0xff]  }
 0x1f1   : > { %v5495_v11 = vadd.f32 %v10062_v19, %v5360_v54  ;;  %v3561_v4 = vpop.f32.mrf.mxu0  ;;  %v4874_v45 = vpop.f32.mrf.mxu1  ;;  %v8719_v49 = vld [vmem:[%s8959_s20 + $0x1c0] sm:$0xff]   ;;  %v11137_v54 = vmax.f32 %v9121_v29, %v9124_v30 }
 0x1f2   : > { %v5493_v46 = vadd.f32 %v10062_v19, %v5358_v6  ;;  %v5363_v55 = vmax.f32 %v4050_v10, %v8347_v58  ;;  %v4048_v61 = vmax.f32 %v11134_v15, %v3561_v4 }
 0x1f3   : > { %v5623_v13 = vmax.f32 %v5495_v11, 0.0  ;;  %v8212_v14 = vpop.f32.mrf.mxu0  ;;  %v8348_v12 = vpop.f32.mrf.mxu1  ;;  %v11138_v11 = vmax.f32 %v9131_v32, %v9133_v33 }
 0x1f4   : > { %v5621_v60 = vmax.f32 %v5493_v46, 0.0  ;;  %v4051_v63 = vmax.f32 %v11135_v7, %v8212_v14  ;;  %v5361_v1 = vmax.f32 %v4048_v61, %v4874_v45  ;;  %v5498_v28 = vadd.f32 %v10062_v19, %v5363_v55  ;;  %v8720_v46 = vld [vmem:[%s8952_s17 + $0x1c8] sm:$0xff]   ;;  %v8722_v14 = vld [vmem:[%s8952_s17 + $0x1d0] sm:$0xff]  }
 0x1f5   : > { %v7284_v0 = vpack.c.bf16 %v5623_v13, %v5622_v62  ;;  %v3564_v16 = vpop.f32.mrf.mxu0  ;;  %v4877_v17 = vpop.f32.mrf.mxu1  ;;  %v8721_v55 = vld [vmem:[%s8959_s20 + $0x1c8] sm:$0xff]   ;;  %v11139_v62 = vmax.f32 %v9139_v37, %v9141_v38  ;;  %v11140_v7 = vmax.f32 %v9147_v42, %v9149_v43 }
 0x1f6   : > { %v7279_v25 = vpack.c.bf16 %v5621_v60, %v5620_v47  ;;  %v5364_v52 = vmax.f32 %v4051_v63, %v8348_v12  ;;  %v4049_v53 = vmax.f32 %v11136_v31, %v3564_v16  ;;  %v5496_v26 = vadd.f32 %v10062_v19, %v5361_v1  ;;  %v8723_v12 = vld [vmem:[%s8959_s20 + $0x1d0] sm:$0xff]  }
 0x1f7   : > { %7588 = vst [vmem:[%s10092_s26 + $0x18] sm:$0xff] %v7284_v0   ;;  %v8215_v20 = vpop.f32.mrf.mxu0  ;;  %8310 = vmatmul.mubr.msk.bf16.gmra.mxu0 %vm798_vm1, %v8716_v23  ;;  %v8351_v21 = vpop.f32.mrf.mxu1  ;;  %8446 = vmatmul.mubr.msk.bf16.gmra.mxu1 %vm798_vm1, %v8717_v24  ;;  %v5626_v6 = vmax.f32 %v5498_v28, 0.0  ;;  %v11141_v16 = vmax.f32 %v9153_v50, %v9156_v51  ;;  %v11142_v31 = vmax.f32 %v9163_v57, %v9165_v2 }
 0x1f8   : > { %7587 = vst [vmem:[%s10092_s26 + $0x10] sm:$0xff] %v7279_v25   ;;  %v5499_v22 = vadd.f32 %v10062_v19, %v5364_v52  ;;  %v4054_v39 = vmax.f32 %v11137_v54, %v8215_v20  ;;  %8313 = vmatprep.mubr.msk.bf16.mxu0 %vm798_vm1, %v8718_v48  ;;  %8449 = vmatprep.mubr.msk.bf16.mxu1 %vm798_vm1, %v8719_v49  ;;  %v5624_v23 = vmax.f32 %v5496_v26, 0.0 }
 0x1f9   : > { %v5362_v27 = vmax.f32 %v4049_v53, %v4877_v17  ;;  %v3577_v58 = vpop.f32.mrf.mxu0  ;;  %v4890_v5 = vpop.f32.mrf.mxu1 }
 0x1fa   : > { %v5627_v59 = vmax.f32 %v5499_v22, 0.0  ;;  %v5367_v10 = vmax.f32 %v4054_v39, %v8351_v21  ;;  %v4052_v29 = vmax.f32 %v11138_v11, %v3577_v58  ;;  %v8724_v21 = vld [vmem:[%s8952_s17 + $0x1d8] sm:$0xff]   ;;  %v8726_v58 = vld [vmem:[%s8952_s17 + $0x1e0] sm:$0xff]   ;;  %v11144_v11 = vmax.f32 %v9179_v35, %v9181_v40 }
 0x1fb   : > { %v5497_v30 = vadd.f32 %v10062_v19, %v5362_v27  ;;  %v8216_v4 = vpop.f32.mrf.mxu0  ;;  %v8352_v45 = vpop.f32.mrf.mxu1  ;;  %v8725_v22 = vld [vmem:[%s8959_s20 + $0x1d8] sm:$0xff]  }
 0x1fc   : > { %v7294_v15 = vpack.c.bf16 %v5627_v59, %v5626_v6  ;;  %v5365_v61 = vmax.f32 %v4052_v29, %v4890_v5  ;;  %v4055_v13 = vmax.f32 %v11139_v62, %v8216_v4  ;;  %v5502_v33 = vadd.f32 %v10062_v19, %v5367_v10  ;;  %v8727_v5 = vld [vmem:[%s8959_s20 + $0x1e0] sm:$0xff]  }
 0x1fd   : > { %v5625_v24 = vmax.f32 %v5497_v30, 0.0  ;;  %v3580_v47 = vpop.f32.mrf.mxu0  ;;  %v4893_v32 = vpop.f32.mrf.mxu1  ;;  %v11143_v6 = vmax.f32 %v9169_v8, %v9171_v9 }
 0x1fe   : > { %7590 = vst [vmem:[%s10092_s26 + $0x28] sm:$0xff] %v7294_v15   ;;  %v5368_v60 = vmax.f32 %v4055_v13, %v8352_v45  ;;  %v4053_v63 = vmax.f32 %v11140_v7, %v3580_v47  ;;  %v5500_v49 = vadd.f32 %v10062_v19, %v5365_v61  ;;  %v5630_v25 = vmax.f32 %v5502_v33, 0.0  ;;  %v8728_v47 = vld [vmem:[%s8952_s17 + $0x1e8] sm:$0xff]  }
 0x1ff   : > { %v7289_v48 = vpack.c.bf16 %v5625_v24, %v5624_v23  ;;  %v8219_v37 = vpop.f32.mrf.mxu0  ;;  %8314 = vmatmul.mubr.msk.bf16.gmra.mxu0 %vm798_vm1, %v8720_v46  ;;  %v8355_v38 = vpop.f32.mrf.mxu1  ;;  %8450 = vmatmul.mubr.msk.bf16.gmra.mxu1 %vm798_vm1, %v8721_v55  ;;  %v11145_v55 = vmax.f32 %v9185_v3, %v9188_v56  ;;  %v11147_v7 = vmax.f32 %v9201_v36, %v9203_v18 }
 0x200   : > { %v5503_v0 = vadd.f32 %v10062_v19, %v5368_v60  ;;  %v5366_v1 = vmax.f32 %v4053_v63, %v4893_v32  ;;  %v4058_v17 = vmax.f32 %v11141_v16, %v8219_v37  ;;  %8317 = vmatprep.mubr.msk.bf16.mxu0 %vm798_vm1, %v8722_v14  ;;  %8453 = vmatprep.mubr.msk.bf16.mxu1 %vm798_vm1, %v8723_v12  ;;  %v5628_v54 = vmax.f32 %v5500_v49, 0.0  ;;  %v8729_v32 = vld [vmem:[%s8959_s20 + $0x1e8] sm:$0xff]   ;;  %v8731_v49 = vld [vmem:[%s8959_s20 + $0x1f0] sm:$0xff]  }
 0x201   : > { %7589 = vst [vmem:[%s10092_s26 + $0x20] sm:$0xff] %v7289_v48   ;;  %v3593_v42 = vpop.f32.mrf.mxu0  ;;  %v4906_v43 = vpop.f32.mrf.mxu1  ;;  %v11146_v14 = vmax.f32 %v9195_v44, %v9197_v41  ;;  %v8730_v48 = vld [vmem:[%s8952_s17 + $0x1f0] sm:$0xff]  }
 0x202   : > { %v5631_v28 = vmax.f32 %v5503_v0, 0.0  ;;  %v5501_v52 = vadd.f32 %v10062_v19, %v5366_v1  ;;  %v4056_v53 = vmax.f32 %v11142_v31, %v3593_v42  ;;  %v5371_v50 = vmax.f32 %v4058_v17, %v8355_v38  ;;  %v11148_v17 = vld [vmem:[#allocation2_spill] sm:$0xff] }
 0x203   : > { %v8220_v51 = vpop.f32.mrf.mxu0  ;;  %v8356_v20 = vpop.f32.mrf.mxu1  ;;  %v11149_v42 = vmax.f32 %v9211_v34, %v11148_v17 }
 0x204   : > { %v7304_v39 = vpack.c.bf16 %v5631_v28, %v5630_v25  ;;  %v5629_v26 = vmax.f32 %v5501_v52, 0.0  ;;  %v5369_v27 = vmax.f32 %v4056_v53, %v4906_v43  ;;  %v4059_v59 = vmax.f32 %v11143_v6, %v8220_v51  ;;  %v11150_v28 = vld [vmem:[#allocation3_spill] sm:$0xff]  ;;  %v11151_v52 = vld [vmem:[#allocation4_spill] sm:$0xff] }
 0x205   : > { %v3596_v10 = vpop.f32.mrf.mxu0  ;;  %v4909_v57 = vpop.f32.mrf.mxu1  ;;  %v5506_v30 = vadd.f32 %v10062_v19, %v5371_v50  ;;  %v11152_v31 = vmax.f32 %v11150_v28, %v11151_v52  ;;  %v11169_v28 = vld [vmem:[#allocation16_spill] sm:$0xff] }
 0x206   : > { %7592 = vst [vmem:[%s10092_s26 + $0x38] sm:$0xff] %v7304_v39   ;;  %v7299_v2 = vpack.c.bf16 %v5629_v26, %v5628_v54  ;;  %v4057_v29 = vmax.f32 %v11144_v11, %v3596_v10  ;;  %v5372_v4 = vmax.f32 %v4059_v59, %v8356_v20  ;;  %v5504_v8 = vadd.f32 %v10062_v19, %v5369_v27  ;;  %v11153_v39 = vld [vmem:[#allocation5_spill] sm:$0xff]  ;;  %v11154_v26 = vld [vmem:[#allocation6_spill] sm:$0xff] }
 0x207   : > { %v8223_v45 = vpop.f32.mrf.mxu0  ;;  %8318 = vmatmul.mubr.msk.bf16.gmra.mxu0 %vm798_vm1, %v8724_v21  ;;  %v8359_v46 = vpop.f32.mrf.mxu1  ;;  %8454 = vmatmul.mubr.msk.bf16.gmra.mxu1 %vm798_vm1, %v8725_v22  ;;  %v5634_v23 = vmax.f32 %v5506_v30, 0.0  ;;  %v11155_v27 = vmax.f32 %v11153_v39, %v11154_v26  ;;  %v8732_v10 = vld [vmem:[%s8952_s17 + $0x1f8] sm:$0xff]   ;;  %v11157_v30 = vld [vmem:[#allocation8_spill] sm:$0xff] }
 0x208   : > { %7591 = vst [vmem:[%s10092_s26 + $0x30] sm:$0xff] %v7299_v2   ;;  %v5370_v9 = vmax.f32 %v4057_v29, %v4909_v57  ;;  %v4062_v35 = vmax.f32 %v11145_v55, %v8223_v45  ;;  %8321 = vmatprep.mubr.msk.bf16.mxu0 %vm798_vm1, %v8726_v58  ;;  %8457 = vmatprep.mubr.msk.bf16.mxu1 %vm798_vm1, %v8727_v5  ;;  %v5632_v33 = vmax.f32 %v5504_v8, 0.0  ;;  %v8733_v57 = vld [vmem:[%s8959_s20 + $0x1f8] sm:$0xff]   ;;  %v11156_v29 = vld [vmem:[#allocation7_spill] sm:$0xff] }
 0x209   : > { %v5507_v40 = vadd.f32 %v10062_v19, %v5372_v4  ;;  %v3609_v15 = vpop.f32.mrf.mxu0  ;;  %v4922_v61 = vpop.f32.mrf.mxu1  ;;  %v11158_v4 = vmax.f32 %v11156_v29, %v11157_v30 }
 0x20a   : > { %v5505_v62 = vadd.f32 %v10062_v19, %v5370_v9  ;;  %v5375_v13 = vmax.f32 %v4062_v35, %v8359_v46  ;;  %v4060_v12 = vmax.f32 %v11146_v14, %v3609_v15  ;;  %v11159_v15 = vld [vmem:[#allocation9_spill] sm:$0xff] }
 0x20b   : > { %v5635_v56 = vmax.f32 %v5507_v40, 0.0  ;;  %v8224_v3 = vpop.f32.mrf.mxu0  ;;  %v8360_v24 = vpop.f32.mrf.mxu1 }
 0x20c   : > { %v5633_v60 = vmax.f32 %v5505_v62, 0.0  ;;  %v4063_v63 = vmax.f32 %v11147_v7, %v8224_v3  ;;  %v5373_v38 = vmax.f32 %v4060_v12, %v4922_v61  ;;  %v5510_v1 = vadd.f32 %v10062_v19, %v5375_v13  ;;  %v11160_v61 = vld [vmem:[#allocation10_spill] sm:$0xff] }
 0x20d   : > { %v7314_v37 = vpack.c.bf16 %v5635_v56, %v5634_v23  ;;  %v3612_v44 = vpop.f32.mrf.mxu0  ;;  %v4925_v41 = vpop.f32.mrf.mxu1  ;;  %v11161_v62 = vmax.f32 %v11159_v15, %v11160_v61 }
 0x20e   : > { %v7309_v0 = vpack.c.bf16 %v5633_v60, %v5632_v33  ;;  %v5376_v16 = vmax.f32 %v4063_v63, %v8360_v24  ;;  %v4061_v43 = vmax.f32 %v11149_v42, %v3612_v44  ;;  %v5508_v34 = vadd.f32 %v10062_v19, %v5373_v38  ;;  %v11165_v38 = vld [vmem:[#allocation13_spill] sm:$0xff]  ;;  %v11166_v44 = vld [vmem:[#allocation14_spill] sm:$0xff] }
 0x20f   : > { %7594 = vst [vmem:[%s10092_s26 + $0x48] sm:$0xff] %v7314_v37   ;;  %v8227_v25 = vpop.f32.mrf.mxu0  ;;  %8322 = vmatmul.mubr.msk.bf16.gmra.mxu0 %vm798_vm1, %v8728_v47  ;;  %v8363_v36 = vpop.f32.mrf.mxu1  ;;  %8458 = vmatmul.mubr.msk.bf16.gmra.mxu1 %vm798_vm1, %v8729_v32  ;;  %v5638_v21 = vmax.f32 %v5510_v1, 0.0  ;;  %v11162_v47 = vld [vmem:[#allocation11_spill] sm:$0xff]  ;;  %v11163_v32 = vld [vmem:[#allocation12_spill] sm:$0xff] }
 0x210   : > { %7593 = vst [vmem:[%s10092_s26 + $0x40] sm:$0xff] %v7309_v0   ;;  %v5511_v18 = vadd.f32 %v10062_v19, %v5376_v16  ;;  %v4066_v53 = vmax.f32 %v11152_v31, %v8227_v25  ;;  %8325 = vmatprep.mubr.msk.bf16.mxu0 %vm798_vm1, %v8730_v48  ;;  %8461 = vmatprep.mubr.msk.bf16.mxu1 %vm798_vm1, %v8731_v49  ;;  %v5636_v46 = vmax.f32 %v5508_v34, 0.0 }
 0x211   : > { %v5374_v50 = vmax.f32 %v4061_v43, %v4925_v41  ;;  %v3625_v51 = vpop.f32.mrf.mxu0  ;;  %v4938_v20 = vpop.f32.mrf.mxu1  ;;  %v11164_v33 = vmax.f32 %v11162_v47, %v11163_v32  ;;  %v11167_v41 = vmax.f32 %v11165_v38, %v11166_v44 }
 0x212   : > { %v5639_v22 = vmax.f32 %v5511_v18, 0.0  ;;  %v5379_v54 = vmax.f32 %v4066_v53, %v8363_v36  ;;  %v4064_v58 = vmax.f32 %v11155_v27, %v3625_v51  ;;  %v11168_v18 = vld [vmem:[#allocation15_spill] sm:$0xff]  ;;  %v11171_v51 = vld [vmem:[#allocation17_spill] sm:$0xff] }
 0x213   : > { %v5509_v5 = vadd.f32 %v10062_v19, %v5374_v50  ;;  %v8228_v6 = vpop.f32.mrf.mxu0  ;;  %v8364_v59 = vpop.f32.mrf.mxu1  ;;  %v11170_v52 = vmax.f32 %v11168_v18, %v11169_v28 }
 0x214   : > { %v7324_v2 = vpack.c.bf16 %v5639_v22, %v5638_v21  ;;  %v5377_v11 = vmax.f32 %v4064_v58, %v4938_v20  ;;  %v4067_v45 = vmax.f32 %v11158_v4, %v8228_v6  ;;  %v5514_v35 = vadd.f32 %v10062_v19, %v5379_v54  ;;  %v11172_v20 = vld [vmem:[#allocation18_spill] sm:$0xff]  ;;  %v11174_v6 = vld [vmem:[#allocation19_spill] sm:$0xff] }
 0x215   : > { %v5637_v8 = vmax.f32 %v5509_v5, 0.0  ;;  %v3628_v9 = vpop.f32.mrf.mxu0  ;;  %v4941_v55 = vpop.f32.mrf.mxu1  ;;  %v11173_v21 = vmax.f32 %v11171_v51, %v11172_v20 }
 0x216   : > { %7596 = vst [vmem:[%s10092_s26 + $0x58] sm:$0xff] %v7324_v2   ;;  %v5380_v40 = vmax.f32 %v4067_v45, %v8364_v59  ;;  %v4065_v13 = vmax.f32 %v11161_v62, %v3628_v9  ;;  %v5512_v56 = vadd.f32 %v10062_v19, %v5377_v11  ;;  %v5642_v48 = vmax.f32 %v5514_v35, 0.0  ;;  %v11175_v59 = vld [vmem:[#allocation20_spill] sm:$0xff]  ;;  %v11177_v45 = vld [vmem:[#allocation21_spill] sm:$0xff] }
 0x217   : > { %v7319_v14 = vpack.c.bf16 %v5637_v8, %v5636_v46  ;;  %v8231_v12 = vpop.f32.mrf.mxu0  ;;  %8326 = vmatmul.mubr.msk.bf16.gmra.mxu0 %vm798_vm1, %v8732_v10  ;;  %v8367_v23 = vpop.f32.mrf.mxu1  ;;  %8462 = vmatmul.mubr.msk.bf16.gmra.mxu1 %vm798_vm1, %v8733_v57  ;;  %v11176_v10 = vmax.f32 %v11174_v6, %v11175_v59  ;;  %v11178_v46 = vld [vmem:[#allocation22_spill] sm:$0xff] }
 0x218   : > { %v5515_v3 = vadd.f32 %v10062_v19, %v5380_v40  ;;  %v5378_v24 = vmax.f32 %v4065_v13, %v4941_v55  ;;  %v4070_v60 = vmax.f32 %v11164_v33, %v8231_v12  ;;  %v5640_v42 = vmax.f32 %v5512_v56, 0.0  ;;  %v11180_v13 = vld [vmem:[#allocation23_spill] sm:$0xff] }
 0x219   : > { %7595 = vst [vmem:[%s10092_s26 + $0x50] sm:$0xff] %v7319_v14   ;;  %v3641_v7 = vpop.f32.mrf.mxu0  ;;  %v4954_v63 = vpop.f32.mrf.mxu1  ;;  %v11179_v8 = vmax.f32 %v11177_v45, %v11178_v46  ;;  %v11181_v14 = vld [vmem:[#allocation24_spill] sm:$0xff] }
 0x21a   : > { %v5643_v49 = vmax.f32 %v5515_v3, 0.0  ;;  %v5513_v37 = vadd.f32 %v10062_v19, %v5378_v24  ;;  %v4068_v0 = vmax.f32 %v11167_v41, %v3641_v7  ;;  %v5383_v1 = vmax.f32 %v4070_v60, %v8367_v23  ;;  %v11183_v7 = vld [vmem:[#allocation25_spill] sm:$0xff]  ;;  %v11186_v41 = vld [vmem:[#allocation27_spill] sm:$0xff] }
 0x21b   : > { %v8232_v16 = vpop.f32.mrf.mxu0  ;;  %v8368_v17 = vpop.f32.mrf.mxu1  ;;  %v11182_v12 = vmax.f32 %v11180_v13, %v11181_v14 }
 0x21c   : > { %v7334_v43 = vpack.c.bf16 %v5643_v49, %v5642_v48  ;;  %v5641_v25 = vmax.f32 %v5513_v37, 0.0  ;;  %v5381_v36 = vmax.f32 %v4068_v0, %v4954_v63  ;;  %v4071_v31 = vmax.f32 %v11170_v52, %v8232_v16  ;;  %v11184_v63 = vld [vmem:[#allocation26_spill] sm:$0xff]  ;;  %v11187_v0 = vld [vmem:[#allocation28_spill] sm:$0xff]  ;;  %v11189_v52 = vld [vmem:[#allocation29_spill] sm:$0xff] }
 0x21d   : > { %v3644_v53 = vpop.f32.mrf.mxu0  ;;  %v4957_v34 = vpop.f32.mrf.mxu1  ;;  %v5518_v54 = vadd.f32 %v10062_v19, %v5383_v1  ;;  %v11185_v48 = vmax.f32 %v11183_v7, %v11184_v63  ;;  %v11188_v1 = vmax.f32 %v11186_v41, %v11187_v0 }
 0x21e   : > { %7598 = vst [vmem:[%s10092_s26 + $0x68] sm:$0xff] %v7334_v43   ;;  %v7329_v50 = vpack.c.bf16 %v5641_v25, %v5640_v42  ;;  %v4069_v22 = vmax.f32 %v11173_v21, %v3644_v53  ;;  %v5384_v39 = vmax.f32 %v4071_v31, %v8368_v17  ;;  %v5516_v58 = vadd.f32 %v10062_v19, %v5381_v36  ;;  %v11190_v31 = vld [vmem:[#allocation30_spill] sm:$0xff] }
 0x21f   : > { %v8235_v26 = vpop.f32.mrf.mxu0  ;;  %v8371_v27 = vpop.f32.mrf.mxu1  ;;  %v5646_v55 = vmax.f32 %v5518_v54, 0.0  ;;  %v11191_v53 = vmax.f32 %v11189_v52, %v11190_v31  ;;  %v11192_v54 = vld [vmem:[#allocation31_spill] sm:$0xff] }
 0x220   : > { %7597 = vst [vmem:[%s10092_s26 + $0x60] sm:$0xff] %v7329_v50   ;;  %v5382_v5 = vmax.f32 %v4069_v22, %v4957_v34  ;;  %v4074_v57 = vmax.f32 %v11176_v10, %v8235_v26  ;;  %v5519_v2 = vadd.f32 %v10062_v19, %v5384_v39  ;;  %v5644_v61 = vmax.f32 %v5516_v58, 0.0  ;;  %v11193_v39 = vld [vmem:[#allocation32_spill] sm:$0xff] }
 0x221   : > { %v3657_v11 = vpop.f32.mrf.mxu0  ;;  %v4970_v29 = vpop.f32.mrf.mxu1  ;;  %v11194_v26 = vmax.f32 %v11192_v54, %v11193_v39 }
 0x222   : > { %v5517_v30 = vadd.f32 %v10062_v19, %v5382_v5  ;;  %v5387_v4 = vmax.f32 %v4074_v57, %v8371_v27  ;;  %v4072_v9 = vmax.f32 %v11179_v8, %v3657_v11  ;;  %v5647_v35 = vmax.f32 %v5519_v2, 0.0  ;;  %v11195_v2 = vld [vmem:[#allocation33_spill] sm:$0xff]  ;;  %v11196_v11 = vld [vmem:[#allocation34_spill] sm:$0xff] }
 0x223   : > { %v8236_v40 = vpop.f32.mrf.mxu0  ;;  %v8372_v15 = vpop.f32.mrf.mxu1 }
 0x224   : > { %v5645_v62 = vmax.f32 %v5517_v30, 0.0  ;;  %v4075_v23 = vmax.f32 %v11182_v12, %v8236_v40  ;;  %v7344_v56 = vpack.c.bf16 %v5647_v35, %v5646_v55  ;;  %v5385_v3 = vmax.f32 %v4072_v9, %v4970_v29  ;;  %v11198_v35 = vld [vmem:[#allocation35_spill] sm:$0xff]  ;;  %v11199_v40 = vld [vmem:[#allocation36_spill] sm:$0xff] }
 0x225   : > { %v3660_v24 = vpop.f32.mrf.mxu0  ;;  %v4973_v47 = vpop.f32.mrf.mxu1  ;;  %v5522_v33 = vadd.f32 %v10062_v19, %v5387_v4  ;;  %v11197_v29 = vmax.f32 %v11195_v2, %v11196_v11 }
 0x226   : > { %v7339_v32 = vpack.c.bf16 %v5645_v62, %v5644_v61  ;;  %v5388_v60 = vmax.f32 %v4075_v23, %v8372_v15  ;;  %7600 = vst [vmem:[%s10092_s26 + $0x78] sm:$0xff] %v7344_v56   ;;  %v4073_v49 = vmax.f32 %v11185_v48, %v3660_v24  ;;  %v5520_v17 = vadd.f32 %v10062_v19, %v5385_v3  ;;  %v11201_v56 = vld [vmem:[#allocation37_spill] sm:$0xff]  ;;  %v11202_v3 = vld [vmem:[#allocation38_spill] sm:$0xff] }
 0x227   : > { %v8239_v37 = vpop.f32.mrf.mxu0  ;;  %v8375_v38 = vpop.f32.mrf.mxu1  ;;  %v5650_v36 = vmax.f32 %v5522_v33, 0.0  ;;  %v11200_v15 = vmax.f32 %v11198_v35, %v11199_v40  ;;  %v11203_v24 = vmax.f32 %v11201_v56, %v11202_v3 }
 0x228   : > { %7599 = vst [vmem:[%s10092_s26 + $0x70] sm:$0xff] %v7339_v32   ;;  %v5523_v44 = vadd.f32 %v10062_v19, %v5388_v60  ;;  %v4078_v16 = vmax.f32 %v11188_v1, %v8239_v37  ;;  %v5386_v42 = vmax.f32 %v4073_v49, %v4973_v47  ;;  %v5648_v58 = vmax.f32 %v5520_v17, 0.0  ;;  %v11204_v37 = vld [vmem:[#allocation39_spill] sm:$0xff]  ;;  %v11207_v17 = vld [vmem:[#allocation41_spill] sm:$0xff] }
 0x229   : > { %v3673_v43 = vpop.f32.mrf.mxu0  ;;  %v4986_v25 = vpop.f32.mrf.mxu1 }
 0x22a   : > { %v5651_v18 = vmax.f32 %v5523_v44, 0.0  ;;  %v5391_v28 = vmax.f32 %v4078_v16, %v8375_v38  ;;  %v4076_v34 = vmax.f32 %v11191_v53, %v3673_v43  ;;  %v5521_v50 = vadd.f32 %v10062_v19, %v5386_v42  ;;  %v11205_v38 = vld [vmem:[#allocation40_spill] sm:$0xff]  ;;  %v11208_v42 = vld [vmem:[#allocation42_spill] sm:$0xff] }
 0x22b   : > { %v8240_v51 = vpop.f32.mrf.mxu0  ;;  %v8376_v20 = vpop.f32.mrf.mxu1  ;;  %v11206_v44 = vmax.f32 %v11204_v37, %v11205_v38  ;;  %v11209_v43 = vmax.f32 %v11207_v17, %v11208_v42 }
 0x22c   : > { %v7354_v21 = vpack.c.bf16 %v5651_v18, %v5650_v36  ;;  %v5389_v22 = vmax.f32 %v4076_v34, %v4986_v25  ;;  %v4079_v27 = vmax.f32 %v11194_v26, %v8240_v51  ;;  %v5649_v5 = vmax.f32 %v5521_v50, 0.0  ;;  %v11210_v34 = vld [vmem:[#allocation43_spill] sm:$0xff]  ;;  %v11211_v50 = vld [vmem:[#allocation44_spill] sm:$0xff] }
 0x22d   : > { %v3676_v6 = vpop.f32.mrf.mxu0  ;;  %v4989_v59 = vpop.f32.mrf.mxu1  ;;  %v5526_v10 = vadd.f32 %v10062_v19, %v5391_v28  ;;  %v11212_v51 = vmax.f32 %v11210_v34, %v11211_v50 }
 0x22e   : > { %7602 = vst [vmem:[%s10092_s26 + $0x88] sm:$0xff] %v7354_v21   ;;  %v5392_v57 = vmax.f32 %v4079_v27, %v8376_v20  ;;  %v4077_v30 = vmax.f32 %v11197_v29, %v3676_v6  ;;  %v7349_v4 = vpack.c.bf16 %v5649_v5, %v5648_v58  ;;  %v5524_v8 = vadd.f32 %v10062_v19, %v5389_v22  ;;  %v11213_v27 = vld [vmem:[#allocation45_spill] sm:$0xff]  ;;  %v11214_v58 = vld [vmem:[#allocation46_spill] sm:$0xff] }
 0x22f   : > { %v8243_v45 = vpop.f32.mrf.mxu0  ;;  %v8379_v46 = vpop.f32.mrf.mxu1  ;;  %v5654_v14 = vmax.f32 %v5526_v10, 0.0  ;;  %v11215_v5 = vmax.f32 %v11213_v27, %v11214_v58 }
 0x230   : > { %v5527_v9 = vadd.f32 %v10062_v19, %v5392_v57  ;;  %v5390_v55 = vmax.f32 %v4077_v30, %v4989_v59  ;;  %v4082_v61 = vmax.f32 %v11200_v15, %v8243_v45  ;;  %7601 = vst [vmem:[%s10092_s26 + $0x80] sm:$0xff] %v7349_v4   ;;  %v5652_v7 = vmax.f32 %v5524_v8, 0.0  ;;  %v11216_v30 = vld [vmem:[#allocation47_spill] sm:$0xff]  ;;  %v11217_v4 = vld [vmem:[#allocation48_spill] sm:$0xff] }
 0x231   : > { %v3689_v62 = vpop.f32.mrf.mxu0  ;;  %v5002_v13 = vpop.f32.mrf.mxu1  ;;  %v11218_v45 = vmax.f32 %v11216_v30, %v11217_v4 }
 0x232   : > { %v5655_v12 = vmax.f32 %v5527_v9, 0.0  ;;  %v5525_v23 = vadd.f32 %v10062_v19, %v5390_v55  ;;  %v4080_v47 = vmax.f32 %v11203_v24, %v3689_v62  ;;  %v5395_v32 = vmax.f32 %v4082_v61, %v8379_v46  ;;  %v11219_v62 = vld [vmem:[#allocation49_spill] sm:$0xff]  ;;  %v11222_v24 = vld [vmem:[#allocation51_spill] sm:$0xff] }
 0x233   : > { %v8244_v33 = vpop.f32.mrf.mxu0  ;;  %v8380_v60 = vpop.f32.mrf.mxu1 }
 0x234   : > { %v7364_v63 = vpack.c.bf16 %v5655_v12, %v5654_v14  ;;  %v5653_v48 = vmax.f32 %v5525_v23, 0.0  ;;  %v5393_v49 = vmax.f32 %v4080_v47, %v5002_v13  ;;  %v4083_v41 = vmax.f32 %v11206_v44, %v8244_v33  ;;  %v11220_v13 = vld [vmem:[#allocation50_spill] sm:$0xff]  ;;  %v11223_v47 = vld [vmem:[#allocation52_spill] sm:$0xff]  ;;  %v11225_v44 = vld [vmem:[#allocation53_spill] sm:$0xff] }
 0x235   : > { %v3692_v0 = vpop.f32.mrf.mxu0  ;;  %v5005_v1 = vpop.f32.mrf.mxu1  ;;  %v5530_v36 = vadd.f32 %v10062_v19, %v5395_v32  ;;  %v11221_v14 = vmax.f32 %v11219_v62, %v11220_v13  ;;  %v11224_v32 = vmax.f32 %v11222_v24, %v11223_v47 }
 0x236   : > { %7604 = vst [vmem:[%s10092_s26 + $0x98] sm:$0xff] %v7364_v63   ;;  %v7359_v16 = vpack.c.bf16 %v5653_v48, %v5652_v7  ;;  %v4081_v25 = vmax.f32 %v11209_v43, %v3692_v0  ;;  %v5396_v18 = vmax.f32 %v4083_v41, %v8380_v60  ;;  %v5528_v31 = vadd.f32 %v10062_v19, %v5393_v49  ;;  %v11226_v41 = vld [vmem:[#allocation54_spill] sm:$0xff] }
 0x237   : > { %v8247_v28 = vpop.f32.mrf.mxu0  ;;  %v8383_v52 = vpop.f32.mrf.mxu1  ;;  %v5658_v59 = vmax.f32 %v5530_v36, 0.0  ;;  %v11227_v0 = vmax.f32 %v11225_v44, %v11226_v41  ;;  %v11228_v36 = vld [vmem:[#allocation55_spill] sm:$0xff] }
 0x238   : > { %7603 = vst [vmem:[%s10092_s26 + $0x90] sm:$0xff] %v7359_v16   ;;  %v5394_v53 = vmax.f32 %v4081_v25, %v5005_v1  ;;  %v4086_v20 = vmax.f32 %v11212_v51, %v8247_v28  ;;  %v5531_v21 = vadd.f32 %v10062_v19, %v5396_v18  ;;  %v5656_v11 = vmax.f32 %v5528_v31, 0.0  ;;  %v11229_v18 = vld [vmem:[#allocation56_spill] sm:$0xff] }
 0x239   : > { %v3705_v22 = vpop.f32.mrf.mxu0  ;;  %v5018_v54 = vpop.f32.mrf.mxu1  ;;  %v11230_v28 = vmax.f32 %v11228_v36, %v11229_v18 }
 0x23a   : > { %v5529_v39 = vadd.f32 %v10062_v19, %v5394_v53  ;;  %v5399_v26 = vmax.f32 %v4086_v20, %v8383_v52  ;;  %v4084_v6 = vmax.f32 %v11215_v5, %v3705_v22  ;;  %v5659_v10 = vmax.f32 %v5531_v21, 0.0  ;;  %v11231_v21 = vld [vmem:[#allocation57_spill] sm:$0xff]  ;;  %v11232_v22 = vld [vmem:[#allocation58_spill] sm:$0xff] }
 0x23b   : > { %v8248_v57 = vpop.f32.mrf.mxu0  ;;  %v8384_v2 = vpop.f32.mrf.mxu1 }
 0x23c   : > { %v5657_v29 = vmax.f32 %v5529_v39, 0.0  ;;  %v4087_v46 = vmax.f32 %v11218_v45, %v8248_v57  ;;  %v7374_v8 = vpack.c.bf16 %v5659_v10, %v5658_v59  ;;  %v5397_v9 = vmax.f32 %v4084_v6, %v5018_v54  ;;  %v11234_v10 = vld [vmem:[#allocation59_spill] sm:$0xff]  ;;  %v11235_v57 = vld [vmem:[#allocation60_spill] sm:$0xff] }
 0x23d   : > { %v3708_v55 = vpop.f32.mrf.mxu0  ;;  %v5021_v35 = vpop.f32.mrf.mxu1  ;;  %v5534_v15 = vadd.f32 %v10062_v19, %v5399_v26  ;;  %v11233_v54 = vmax.f32 %v11231_v21, %v11232_v22 }
 0x23e   : > { %v7369_v40 = vpack.c.bf16 %v5657_v29, %v5656_v11  ;;  %v5400_v61 = vmax.f32 %v4087_v46, %v8384_v2  ;;  %7606 = vst [vmem:[%s10092_s26 + $0xa8] sm:$0xff] %v7374_v8   ;;  %v4085_v12 = vmax.f32 %v11221_v14, %v3708_v55  ;;  %v5532_v60 = vadd.f32 %v10062_v19, %v5397_v9  ;;  %v11237_v8 = vld [vmem:[#allocation61_spill] sm:$0xff]  ;;  %v11238_v9 = vld [vmem:[#allocation62_spill] sm:$0xff] }
 0x23f   : > { %v8251_v23 = vpop.f32.mrf.mxu0  ;;  %v8387_v56 = vpop.f32.mrf.mxu1  ;;  %v5662_v49 = vmax.f32 %v5534_v15, 0.0  ;;  %v11236_v2 = vmax.f32 %v11234_v10, %v11235_v57  ;;  %v11239_v55 = vmax.f32 %v11237_v8, %v11238_v9 }
 0x240   : > { %7605 = vst [vmem:[%s10092_s26 + $0xa0] sm:$0xff] %v7369_v40   ;;  %v5535_v3 = vadd.f32 %v10062_v19, %v5400_v61  ;;  %v4090_v33 = vmax.f32 %v11224_v32, %v8251_v23  ;;  %v5398_v7 = vmax.f32 %v4085_v12, %v5021_v35  ;;  %v5660_v31 = vmax.f32 %v5532_v60, 0.0  ;;  %v11240_v23 = vld [vmem:[#allocation63_spill] sm:$0xff]  ;;  %v11243_v60 = vld [vmem:[#allocation65_spill] sm:$0xff] }
 0x241   : > { %v3721_v63 = vpop.f32.mrf.mxu0  ;;  %v5034_v48 = vpop.f32.mrf.mxu1 }
 0x242   : > { %v5663_v37 = vmax.f32 %v5535_v3, 0.0  ;;  %v5403_v38 = vmax.f32 %v4090_v33, %v8387_v56  ;;  %v4088_v1 = vmax.f32 %v11227_v0, %v3721_v63  ;;  %v5533_v16 = vadd.f32 %v10062_v19, %v5398_v7  ;;  %v11241_v56 = vld [vmem:[#allocation64_spill] sm:$0xff]  ;;  %v11244_v7 = vld [vmem:[#allocation66_spill] sm:$0xff] }
 0x243   : > { %v8252_v17 = vpop.f32.mrf.mxu0  ;;  %v8388_v42 = vpop.f32.mrf.mxu1  ;;  %v11242_v3 = vmax.f32 %v11240_v23, %v11241_v56  ;;  %v11245_v63 = vmax.f32 %v11243_v60, %v11244_v7 }
 0x244   : > { %v7384_v43 = vpack.c.bf16 %v5663_v37, %v5662_v49  ;;  %v5401_v25 = vmax.f32 %v4088_v1, %v5034_v48  ;;  %v4091_v52 = vmax.f32 %v11230_v28, %v8252_v17  ;;  %v5661_v53 = vmax.f32 %v5533_v16, 0.0  ;;  %v11246_v1 = vld [vmem:[#allocation67_spill] sm:$0xff]  ;;  %v11247_v16 = vld [vmem:[#allocation68_spill] sm:$0xff] }
 0x245   : > { %v3724_v34 = vpop.f32.mrf.mxu0  ;;  %v5037_v50 = vpop.f32.mrf.mxu1  ;;  %v5538_v51 = vadd.f32 %v10062_v19, %v5403_v38  ;;  %v11248_v17 = vmax.f32 %v11246_v1, %v11247_v16 }
 0x246   : > { %7608 = vst [vmem:[%s10092_s26 + $0xb8] sm:$0xff] %v7384_v43   ;;  %v5404_v20 = vmax.f32 %v4091_v52, %v8388_v42  ;;  %v4089_v39 = vmax.f32 %v11233_v54, %v3724_v34  ;;  %v7379_v26 = vpack.c.bf16 %v5661_v53, %v5660_v31  ;;  %v5536_v5 = vadd.f32 %v10062_v19, %v5401_v25  ;;  %v11249_v52 = vld [vmem:[#allocation69_spill] sm:$0xff]  ;;  %v11250_v31 = vld [vmem:[#allocation70_spill] sm:$0xff] }
 0x247   : > { %v8255_v27 = vpop.f32.mrf.mxu0  ;;  %v8391_v58 = vpop.f32.mrf.mxu1  ;;  %v5666_v4 = vmax.f32 %v5538_v51, 0.0  ;;  %v11251_v53 = vmax.f32 %v11249_v52, %v11250_v31 }
 0x248   : > { %v5539_v6 = vadd.f32 %v10062_v19, %v5404_v20  ;;  %v5402_v59 = vmax.f32 %v4089_v39, %v5037_v50  ;;  %v4094_v11 = vmax.f32 %v11236_v2, %v8255_v27  ;;  %7607 = vst [vmem:[%s10092_s26 + $0xb0] sm:$0xff] %v7379_v26   ;;  %v5664_v62 = vmax.f32 %v5536_v5, 0.0  ;;  %v11252_v39 = vld [vmem:[#allocation71_spill] sm:$0xff]  ;;  %v11253_v26 = vld [vmem:[#allocation72_spill] sm:$0xff] }
 0x249   : > { %v3737_v29 = vpop.f32.mrf.mxu0  ;;  %v5050_v30 = vpop.f32.mrf.mxu1  ;;  %v11254_v27 = vmax.f32 %v11252_v39, %v11253_v26 }
 0x24a   : > { %v5667_v45 = vmax.f32 %v5539_v6, 0.0  ;;  %v5537_v46 = vadd.f32 %v10062_v19, %v5402_v59  ;;  %v4092_v35 = vmax.f32 %v11239_v55, %v3737_v29  ;;  %v5407_v40 = vmax.f32 %v4094_v11, %v8391_v58  ;;  %v11255_v29 = vld [vmem:[#allocation73_spill] sm:$0xff]  ;;  %v11258_v55 = vld [vmem:[#allocation75_spill] sm:$0xff] }
 0x24b   : > { %v8256_v15 = vpop.f32.mrf.mxu0  ;;  %v8392_v61 = vpop.f32.mrf.mxu1 }
 0x24c   : > { %v7394_v13 = vpack.c.bf16 %v5667_v45, %v5666_v4  ;;  %v5665_v14 = vmax.f32 %v5537_v46, 0.0  ;;  %v5405_v12 = vmax.f32 %v4092_v35, %v5050_v30  ;;  %v4095_v24 = vmax.f32 %v11242_v3, %v8256_v15  ;;  %v11256_v30 = vld [vmem:[#allocation74_spill] sm:$0xff]  ;;  %v11259_v35 = vld [vmem:[#allocation76_spill] sm:$0xff]  ;;  %v11261_v3 = vld [vmem:[#allocation77_spill] sm:$0xff] }
 0x24d   : > { %v3740_v47 = vpop.f32.mrf.mxu0  ;;  %v5053_v32 = vpop.f32.mrf.mxu1  ;;  %v5542_v49 = vadd.f32 %v10062_v19, %v5407_v40  ;;  %v11257_v4 = vmax.f32 %v11255_v29, %v11256_v30  ;;  %v11260_v40 = vmax.f32 %v11258_v55, %v11259_v35 }
 0x24e   : > { %7610 = vst [vmem:[%s10092_s26 + $0xc8] sm:$0xff] %v7394_v13   ;;  %v7389_v33 = vpack.c.bf16 %v5665_v14, %v5664_v62  ;;  %v4093_v48 = vmax.f32 %v11245_v63, %v3740_v47  ;;  %v5408_v37 = vmax.f32 %v4095_v24, %v8392_v61  ;;  %v5540_v41 = vadd.f32 %v10062_v19, %v5405_v12  ;;  %v11262_v24 = vld [vmem:[#allocation78_spill] sm:$0xff] }
 0x24f   : > { %v8259_v38 = vpop.f32.mrf.mxu0  ;;  %v8395_v44 = vpop.f32.mrf.mxu1  ;;  %v5670_v50 = vmax.f32 %v5542_v49, 0.0  ;;  %v11263_v47 = vmax.f32 %v11261_v3, %v11262_v24  ;;  %v11264_v49 = vld [vmem:[#allocation79_spill] sm:$0xff]  ;;  %v10420_v24 = vld [vmem:[%s10705_s5] ss:$0 sm:$0xff] }
 0x250   : > { %7609 = vst [vmem:[%s10092_s26 + $0xc0] sm:$0xff] %v7389_v33   ;;  %v5406_v0 = vmax.f32 %v4093_v48, %v5053_v32  ;;  %v4098_v42 = vmax.f32 %v11248_v17, %v8259_v38  ;;  %v5543_v43 = vadd.f32 %v10062_v19, %v5408_v37  ;;  %v5668_v22 = vmax.f32 %v5540_v41, 0.0  ;;  %v11265_v37 = vld [vmem:[#allocation80_spill] sm:$0xff] }
 0x251   : > { %v3753_v25 = vpop.f32.mrf.mxu0  ;;  %v5066_v36 = vpop.f32.mrf.mxu1  ;;  %v11266_v38 = vmax.f32 %v11264_v49, %v11265_v37 }
 0x252   : > { %v5541_v18 = vadd.f32 %v10062_v19, %v5406_v0  ;;  %v5411_v28 = vmax.f32 %v4098_v42, %v8395_v44  ;;  %v4096_v34 = vmax.f32 %v11251_v53, %v3753_v25  ;;  %v5671_v51 = vmax.f32 %v5543_v43, 0.0  ;;  %v11267_v43 = vld [vmem:[#allocation81_spill] sm:$0xff]  ;;  %v11268_v25 = vld [vmem:[#allocation82_spill] sm:$0xff] }
 0x253   : > { %v8260_v20 = vpop.f32.mrf.mxu0  ;;  %v8396_v21 = vpop.f32.mrf.mxu1 }
 0x254   : > { %v5669_v54 = vmax.f32 %v5541_v18, 0.0  ;;  %v4099_v58 = vmax.f32 %v11254_v27, %v8260_v20  ;;  %v7404_v5 = vpack.c.bf16 %v5671_v51, %v5670_v50  ;;  %v5409_v6 = vmax.f32 %v4096_v34, %v5066_v36  ;;  %v11270_v51 = vld [vmem:[#allocation83_spill] sm:$0xff]  ;;  %v11271_v20 = vld [vmem:[#allocation84_spill] sm:$0xff] }
 0x255   : > { %v3756_v59 = vpop.f32.mrf.mxu0  ;;  %v5069_v10 = vpop.f32.mrf.mxu1  ;;  %v5546_v2 = vadd.f32 %v10062_v19, %v5411_v28  ;;  %v11269_v36 = vmax.f32 %v11267_v43, %v11268_v25 }
 0x256   : > { %v7399_v57 = vpack.c.bf16 %v5669_v54, %v5668_v22  ;;  %v5412_v11 = vmax.f32 %v4099_v58, %v8396_v21  ;;  %7612 = vst [vmem:[%s10092_s26 + $0xd8] sm:$0xff] %v7404_v5   ;;  %v4097_v45 = vmax.f32 %v11257_v4, %v3756_v59  ;;  %v5544_v61 = vadd.f32 %v10062_v19, %v5409_v6  ;;  %v11273_v5 = vld [vmem:[#allocation85_spill] sm:$0xff]  ;;  %v11274_v6 = vld [vmem:[#allocation86_spill] sm:$0xff] }
 0x257   : > { %v8263_v46 = vpop.f32.mrf.mxu0  ;;  %v8399_v8 = vpop.f32.mrf.mxu1  ;;  %v5674_v12 = vmax.f32 %v5546_v2, 0.0  ;;  %v11272_v21 = vmax.f32 %v11270_v51, %v11271_v20  ;;  %v11275_v59 = vmax.f32 %v11273_v5, %v11274_v6 }
 0x258   : > { %7611 = vst [vmem:[%s10092_s26 + $0xd0] sm:$0xff] %v7399_v57   ;;  %v5547_v9 = vadd.f32 %v10062_v19, %v5412_v11  ;;  %v4102_v15 = vmax.f32 %v11260_v40, %v8263_v46  ;;  %v5410_v62 = vmax.f32 %v4097_v45, %v5069_v10  ;;  %v5672_v41 = vmax.f32 %v5544_v61, 0.0  ;;  %v11276_v46 = vld [vmem:[#allocation87_spill] sm:$0xff]  ;;  %v11279_v61 = vld [vmem:[#allocation89_spill] sm:$0xff] }
 0x259   : > { %v3769_v13 = vpop.f32.mrf.mxu0  ;;  %v5082_v14 = vpop.f32.mrf.mxu1 }
 0x25a   : > { %v5675_v23 = vmax.f32 %v5547_v9, 0.0  ;;  %v5415_v56 = vmax.f32 %v4102_v15, %v8399_v8  ;;  %v4100_v32 = vmax.f32 %v11263_v47, %v3769_v13  ;;  %v5545_v33 = vadd.f32 %v10062_v19, %v5410_v62  ;;  %v11277_v8 = vld [vmem:[#allocation88_spill] sm:$0xff]  ;;  %v11280_v62 = vld [vmem:[#allocation90_spill] sm:$0xff] }
 0x25b   : > { %v8264_v60 = vpop.f32.mrf.mxu0  ;;  %v8400_v7 = vpop.f32.mrf.mxu1  ;;  %v11278_v9 = vmax.f32 %v11276_v46, %v11277_v8  ;;  %v11281_v13 = vmax.f32 %v11279_v61, %v11280_v62 }
 0x25c   : > { %v7414_v63 = vpack.c.bf16 %v5675_v23, %v5674_v12  ;;  %v5413_v48 = vmax.f32 %v4100_v32, %v5082_v14  ;;  %v4103_v44 = vmax.f32 %v11266_v38, %v8264_v60  ;;  %v5673_v0 = vmax.f32 %v5545_v33, 0.0  ;;  %v11282_v33 = vld [vmem:[#allocation91_spill] sm:$0xff]  ;;  %v11283_v60 = vld [vmem:[#allocation92_spill] sm:$0xff] }
 0x25d   : > { %v3772_v1 = vpop.f32.mrf.mxu0  ;;  %v5085_v16 = vpop.f32.mrf.mxu1  ;;  %v5550_v17 = vadd.f32 %v10062_v19, %v5415_v56 }
 0x25e   : > { %7614 = vst [vmem:[%s10092_s26 + $0xe8] sm:$0xff] %v7414_v63   ;;  %v5416_v42 = vmax.f32 %v4103_v44, %v8400_v7  ;;  %v4101_v18 = vmax.f32 %v11269_v36, %v3772_v1  ;;  %v7409_v28 = vpack.c.bf16 %v5673_v0, %v5672_v41  ;;  %v5548_v53 = vadd.f32 %v10062_v19, %v5413_v48  ;;  %v11285_v44 = vld [vmem:[#allocation93_spill] sm:$0xff]  ;;  %v11286_v41 = vld [vmem:[#allocation94_spill] sm:$0xff] }
 0x25f   : > { %v8267_v52 = vpop.f32.mrf.mxu0  ;;  %v8403_v31 = vpop.f32.mrf.mxu1  ;;  %v5678_v26 = vmax.f32 %v5550_v17, 0.0  ;;  %v11284_v7 = vmax.f32 %v11282_v33, %v11283_v60  ;;  %v11287_v0 = vmax.f32 %v11285_v44, %v11286_v41 }
 0x260   : > { %v5551_v34 = vadd.f32 %v10062_v19, %v5416_v42  ;;  %v5414_v50 = vmax.f32 %v4101_v18, %v5085_v16  ;;  %v4106_v22 = vmax.f32 %v11272_v21, %v8267_v52  ;;  %7613 = vst [vmem:[%s10092_s26 + $0xe0] sm:$0xff] %v7409_v28   ;;  %v5676_v29 = vmax.f32 %v5548_v53, 0.0  ;;  %v11288_v18 = vld [vmem:[#allocation95_spill] sm:$0xff]  ;;  %v11289_v28 = vld [vmem:[#allocation96_spill] sm:$0xff] }
 0x261   : > { %v3785_v54 = vpop.f32.mrf.mxu0  ;;  %v5098_v39 = vpop.f32.mrf.mxu1  ;;  %v11290_v52 = vmax.f32 %v11288_v18, %v11289_v28 }
 0x262   : > { %v5679_v27 = vmax.f32 %v5551_v34, 0.0  ;;  %v5549_v58 = vadd.f32 %v10062_v19, %v5414_v50  ;;  %v4104_v10 = vmax.f32 %v11275_v59, %v3785_v54  ;;  %v5419_v57 = vmax.f32 %v4106_v22, %v8403_v31  ;;  %v11291_v54 = vld [vmem:[#allocation97_spill] sm:$0xff]  ;;  %v11294_v59 = vld [vmem:[#allocation99_spill] sm:$0xff] }
 0x263   : > { %v8268_v2 = vpop.f32.mrf.mxu0  ;;  %v8404_v11 = vpop.f32.mrf.mxu1 }
 0x264   : > { %v7424_v30 = vpack.c.bf16 %v5679_v27, %v5678_v26  ;;  %v5677_v4 = vmax.f32 %v5549_v58, 0.0  ;;  %v5417_v45 = vmax.f32 %v4104_v10, %v5098_v39  ;;  %v4107_v55 = vmax.f32 %v11278_v9, %v8268_v2  ;;  %v11292_v39 = vld [vmem:[#allocation98_spill] sm:$0xff]  ;;  %v11295_v10 = vld [vmem:[#allocation100_spill] sm:$0xff]  ;;  %v11297_v9 = vld [vmem:[#allocation101_spill] sm:$0xff] }
 0x265   : > { %v3788_v35 = vpop.f32.mrf.mxu0  ;;  %v5101_v40 = vpop.f32.mrf.mxu1  ;;  %v5554_v12 = vadd.f32 %v10062_v19, %v5419_v57  ;;  %v11293_v26 = vmax.f32 %v11291_v54, %v11292_v39  ;;  %v11296_v57 = vmax.f32 %v11294_v59, %v11295_v10 }
 0x266   : > { %7616 = vst [vmem:[%s10092_s26 + $0xf8] sm:$0xff] %v7424_v30   ;;  %v7419_v15 = vpack.c.bf16 %v5677_v4, %v5676_v29  ;;  %v4105_v14 = vmax.f32 %v11281_v13, %v3788_v35  ;;  %v5420_v23 = vmax.f32 %v4107_v55, %v8404_v11  ;;  %v5552_v47 = vadd.f32 %v10420_v24, %v5417_v45  ;;  %v11298_v55 = vld [vmem:[#allocation102_spill] sm:$0xff] }
 0x267   : > { %v8271_v56 = vpop.f32.mrf.mxu0  ;;  %v8407_v3 = vpop.f32.mrf.mxu1  ;;  %v5682_v16 = vmax.f32 %v5554_v12, 0.0  ;;  %v11299_v35 = vmax.f32 %v11297_v9, %v11298_v55  ;;  %v11300_v12 = vld [vmem:[#allocation103_spill] sm:$0xff] }
 0x268   : > { %7615 = vst [vmem:[%s10092_s26 + $0xf0] sm:$0xff] %v7419_v15   ;;  %v5418_v32 = vmax.f32 %v4105_v14, %v5101_v40  ;;  %v4110_v63 = vmax.f32 %v11284_v7, %v8271_v56  ;;  %v5555_v48 = vadd.f32 %v10420_v24, %v5420_v23  ;;  %v5680_v25 = vmax.f32 %v5552_v47, 0.0  ;;  %v11301_v23 = vld [vmem:[#allocation104_spill] sm:$0xff] }
 0x269   : > { %v3801_v49 = vpop.f32.mrf.mxu0  ;;  %v5114_v19 = vpop.f32.mrf.mxu1  ;;  %v11302_v56 = vmax.f32 %v11300_v12, %v11301_v23 }
 0x26a   : > { %v5553_v37 = vadd.f32 %v10420_v24, %v5418_v32  ;;  %v5423_v38 = vmax.f32 %v4110_v63, %v8407_v3  ;;  %v4108_v1 = vmax.f32 %v11287_v0, %v3801_v49  ;;  %v5683_v17 = vmax.f32 %v5555_v48, 0.0  ;;  %v11303_v48 = vld [vmem:[#allocation105_spill] sm:$0xff]  ;;  %v11304_v49 = vld [vmem:[#allocation106_spill] sm:$0xff] }
 0x26b   : > { %v8272_v42 = vpop.f32.mrf.mxu0  ;;  %v8408_v43 = vpop.f32.mrf.mxu1 }
 0x26c   : > { %v5681_v36 = vmax.f32 %v5553_v37, 0.0  ;;  %v4111_v31 = vmax.f32 %v11290_v52, %v8272_v42  ;;  %v7434_v53 = vpack.c.bf16 %v5683_v17, %v5682_v16  ;;  %v5421_v34 = vmax.f32 %v4108_v1, %v5114_v19  ;;  %v11306_v17 = vld [vmem:[#allocation107_spill] sm:$0xff]  ;;  %v11307_v42 = vld [vmem:[#allocation108_spill] sm:$0xff] }
 0x26d   : > { %v3804_v50 = vpop.f32.mrf.mxu0  ;;  %v5117_v51 = vpop.f32.mrf.mxu1  ;;  %v5558_v21 = vadd.f32 %v10420_v24, %v5423_v38  ;;  %v11305_v19 = vmax.f32 %v11303_v48, %v11304_v49 }
 0x26e   : > { %v7429_v20 = vpack.c.bf16 %v5681_v36, %v5680_v25  ;;  %v5424_v22 = vmax.f32 %v4111_v31, %v8408_v43  ;;  %7618 = vst [vmem:[%s10092_s26 + $0x108] sm:$0xff] %v7434_v53   ;;  %v4109_v27 = vmax.f32 %v11293_v26, %v3804_v50  ;;  %v5556_v11 = vadd.f32 %v10420_v24, %v5421_v34  ;;  %v11309_v53 = vld [vmem:[#allocation109_spill] sm:$0xff]  ;;  %v11310_v34 = vld [vmem:[#allocation110_spill] sm:$0xff] }
 0x26f   : > { %v8275_v58 = vpop.f32.mrf.mxu0  ;;  %v8411_v5 = vpop.f32.mrf.mxu1  ;;  %v5686_v45 = vmax.f32 %v5558_v21, 0.0  ;;  %v11308_v43 = vmax.f32 %v11306_v17, %v11307_v42  ;;  %v11311_v50 = vmax.f32 %v11309_v53, %v11310_v34 }
 0x270   : > { %7617 = vst [vmem:[%s10092_s26 + $0x100] sm:$0xff] %v7429_v20   ;;  %v5559_v6 = vadd.f32 %v10420_v24, %v5424_v22  ;;  %v4114_v2 = vmax.f32 %v11296_v57, %v8275_v58  ;;  %v5422_v29 = vmax.f32 %v4109_v27, %v5117_v51  ;;  %v5684_v47 = vmax.f32 %v5556_v11, 0.0  ;;  %v11312_v58 = vld [vmem:[#allocation111_spill] sm:$0xff]  ;;  %v11315_v11 = vld [vmem:[#allocation113_spill] sm:$0xff] }
 0x271   : > { %v3817_v30 = vpop.f32.mrf.mxu0  ;;  %v5130_v4 = vpop.f32.mrf.mxu1 }
 0x272   : > { %v5687_v46 = vmax.f32 %v5559_v6, 0.0  ;;  %v5427_v8 = vmax.f32 %v4114_v2, %v8411_v5  ;;  %v4112_v40 = vmax.f32 %v11299_v35, %v3817_v30  ;;  %v5557_v15 = vadd.f32 %v10420_v24, %v5422_v29  ;;  %v11313_v5 = vld [vmem:[#allocation112_spill] sm:$0xff]  ;;  %v11316_v29 = vld [vmem:[#allocation114_spill] sm:$0xff] }
 0x273   : > { %v8276_v61 = vpop.f32.mrf.mxu0  ;;  %v8412_v62 = vpop.f32.mrf.mxu1  ;;  %v11314_v6 = vmax.f32 %v11312_v58, %v11313_v5  ;;  %v11317_v30 = vmax.f32 %v11315_v11, %v11316_v29 }
 0x274   : > { %v7444_v13 = vpack.c.bf16 %v5687_v46, %v5686_v45  ;;  %v5425_v14 = vmax.f32 %v4112_v40, %v5130_v4  ;;  %v4115_v3 = vmax.f32 %v11302_v56, %v8276_v61  ;;  %v5685_v32 = vmax.f32 %v5557_v15, 0.0  ;;  %v11318_v40 = vld [vmem:[#allocation115_spill] sm:$0xff]  ;;  %v11319_v15 = vld [vmem:[#allocation116_spill] sm:$0xff] }
 0x275   : > { %v3820_v33 = vpop.f32.mrf.mxu0  ;;  %v5133_v60 = vpop.f32.mrf.mxu1  ;;  %v5562_v7 = vadd.f32 %v10420_v24, %v5427_v8  ;;  %v11320_v61 = vmax.f32 %v11318_v40, %v11319_v15 }
 0x276   : > { %7620 = vst [vmem:[%s10092_s26 + $0x118] sm:$0xff] %v7444_v13   ;;  %v5428_v63 = vmax.f32 %v4115_v3, %v8412_v62  ;;  %v4113_v37 = vmax.f32 %v11305_v19, %v3820_v33  ;;  %v7439_v38 = vpack.c.bf16 %v5685_v32, %v5684_v47  ;;  %v5560_v0 = vadd.f32 %v10420_v24, %v5425_v14  ;;  %v11321_v3 = vld [vmem:[#allocation117_spill] sm:$0xff]  ;;  %v11322_v47 = vld [vmem:[#allocation118_spill] sm:$0xff] }
 0x277   : > { %v8279_v44 = vpop.f32.mrf.mxu0  ;;  %v8415_v41 = vpop.f32.mrf.mxu1  ;;  %v5690_v28 = vmax.f32 %v5562_v7, 0.0  ;;  %v11323_v32 = vmax.f32 %v11321_v3, %v11322_v47 }
 0x278   : > { %v5563_v1 = vadd.f32 %v10420_v24, %v5428_v63  ;;  %v5426_v16 = vmax.f32 %v4113_v37, %v5133_v60  ;;  %v4118_v25 = vmax.f32 %v11308_v43, %v8279_v44  ;;  %7619 = vst [vmem:[%s10092_s26 + $0x110] sm:$0xff] %v7439_v38   ;;  %v5688_v54 = vmax.f32 %v5560_v0, 0.0  ;;  %v11324_v37 = vld [vmem:[#allocation119_spill] sm:$0xff]  ;;  %v11325_v38 = vld [vmem:[#allocation120_spill] sm:$0xff] }
 0x279   : > { %v3833_v36 = vpop.f32.mrf.mxu0  ;;  %v5146_v18 = vpop.f32.mrf.mxu1  ;;  %v11326_v44 = vmax.f32 %v11324_v37, %v11325_v38 }
 0x27a   : > { %v5691_v52 = vmax.f32 %v5563_v1, 0.0  ;;  %v5561_v31 = vadd.f32 %v10420_v24, %v5426_v16  ;;  %v4116_v51 = vmax.f32 %v11311_v50, %v3833_v36  ;;  %v5431_v20 = vmax.f32 %v4118_v25, %v8415_v41  ;;  %v11327_v36 = vld [vmem:[#allocation121_spill] sm:$0xff]  ;;  %v11330_v50 = vld [vmem:[#allocation123_spill] sm:$0xff] }
 0x27b   : > { %v8280_v21 = vpop.f32.mrf.mxu0  ;;  %v8416_v22 = vpop.f32.mrf.mxu1 }
 0x27c   : > { %v7454_v39 = vpack.c.bf16 %v5691_v52, %v5690_v28  ;;  %v5689_v26 = vmax.f32 %v5561_v31, 0.0  ;;  %v5429_v27 = vmax.f32 %v4116_v51, %v5146_v18  ;;  %v4119_v59 = vmax.f32 %v11314_v6, %v8280_v21  ;;  %v11328_v18 = vld [vmem:[#allocation122_spill] sm:$0xff]  ;;  %v11331_v51 = vld [vmem:[#allocation124_spill] sm:$0xff]  ;;  %v11333_v6 = vld [vmem:[#allocation125_spill] sm:$0xff] }
 0x27d   : > { %v3836_v10 = vpop.f32.mrf.mxu0  ;;  %v5149_v57 = vpop.f32.mrf.mxu1  ;;  %v5566_v45 = vadd.f32 %v10420_v24, %v5431_v20  ;;  %v11329_v28 = vmax.f32 %v11327_v36, %v11328_v18  ;;  %v11332_v20 = vmax.f32 %v11330_v50, %v11331_v51 }
 0x27e   : > { %7622 = vst [vmem:[%s10092_s26 + $0x128] sm:$0xff] %v7454_v39   ;;  %v7449_v2 = vpack.c.bf16 %v5689_v26, %v5688_v54  ;;  %v4117_v4 = vmax.f32 %v11317_v30, %v3836_v10  ;;  %v5432_v46 = vmax.f32 %v4119_v59, %v8416_v22  ;;  %v5564_v55 = vadd.f32 %v10420_v24, %v5429_v27  ;;  %v11334_v59 = vld [vmem:[#allocation126_spill] sm:$0xff] }
 0x27f   : > { %v8283_v8 = vpop.f32.mrf.mxu0  ;;  %v8419_v9 = vpop.f32.mrf.mxu1  ;;  %v5694_v60 = vmax.f32 %v5566_v45, 0.0  ;;  %v11335_v10 = vmax.f32 %v11333_v6, %v11334_v59  ;;  %v11336_v45 = vld [vmem:[#allocation127_spill] sm:$0xff] }
 0x280   : > { %7621 = vst [vmem:[%s10092_s26 + $0x120] sm:$0xff] %v7449_v2   ;;  %v5430_v35 = vmax.f32 %v4117_v4, %v5149_v57  ;;  %v4122_v62 = vmax.f32 %v11320_v61, %v8283_v8  ;;  %v5567_v13 = vadd.f32 %v10420_v24, %v5432_v46  ;;  %v5692_v49 = vmax.f32 %v5564_v55, 0.0  ;;  %v11337_v46 = vld [vmem:[#allocation128_spill] sm:$0xff] }
 0x281   : > { %v3849_v14 = vpop.f32.mrf.mxu0  ;;  %v5162_v12 = vpop.f32.mrf.mxu1  ;;  %v11338_v8 = vmax.f32 %v11336_v45, %v11337_v46 }
 0x282   : > { %v5565_v23 = vadd.f32 %v10420_v24, %v5430_v35  ;;  %v5435_v56 = vmax.f32 %v4122_v62, %v8419_v9  ;;  %v4120_v33 = vmax.f32 %v11323_v32, %v3849_v14  ;;  %v5695_v7 = vmax.f32 %v5567_v13, 0.0  ;;  %v11339_v13 = vld [vmem:[#allocation129_spill] sm:$0xff]  ;;  %v11340_v14 = vld [vmem:[#allocation130_spill] sm:$0xff] }
 0x283   : > { %v8284_v63 = vpop.f32.mrf.mxu0  ;;  %v8420_v48 = vpop.f32.mrf.mxu1 }
 0x284   : > { %v5693_v19 = vmax.f32 %v5565_v23, 0.0  ;;  %v4123_v41 = vmax.f32 %v11326_v44, %v8284_v63  ;;  %v7464_v0 = vpack.c.bf16 %v5695_v7, %v5694_v60  ;;  %v5433_v1 = vmax.f32 %v4120_v33, %v5162_v12  ;;  %v11342_v7 = vld [vmem:[#allocation131_spill] sm:$0xff]  ;;  %v11343_v63 = vld [vmem:[#allocation132_spill] sm:$0xff] }
 0x285   : > { %v3852_v16 = vpop.f32.mrf.mxu0  ;;  %v5165_v17 = vpop.f32.mrf.mxu1  ;;  %v5570_v43 = vadd.f32 %v10420_v24, %v5435_v56  ;;  %v11341_v12 = vmax.f32 %v11339_v13, %v11340_v14 }
 0x286   : > { %v7459_v42 = vpack.c.bf16 %v5693_v19, %v5692_v49  ;;  %v5436_v25 = vmax.f32 %v4123_v41, %v8420_v48  ;;  %7624 = vst [vmem:[%s10092_s26 + $0x138] sm:$0xff] %v7464_v0   ;;  %v4121_v52 = vmax.f32 %v11329_v28, %v3852_v16  ;;  %v5568_v22 = vadd.f32 %v10420_v24, %v5433_v1  ;;  %v11345_v0 = vld [vmem:[#allocation133_spill] sm:$0xff]  ;;  %v11346_v1 = vld [vmem:[#allocation134_spill] sm:$0xff] }
 0x287   : > { %v8287_v31 = vpop.f32.mrf.mxu0  ;;  %v8423_v53 = vpop.f32.mrf.mxu1  ;;  %v5698_v27 = vmax.f32 %v5570_v43, 0.0  ;;  %v11344_v48 = vmax.f32 %v11342_v7, %v11343_v63  ;;  %v11347_v16 = vmax.f32 %v11345_v0, %v11346_v1 }
 0x288   : > { %7623 = vst [vmem:[%s10092_s26 + $0x130] sm:$0xff] %v7459_v42   ;;  %v5571_v34 = vadd.f32 %v10420_v24, %v5436_v25  ;;  %v4126_v21 = vmax.f32 %v11332_v20, %v8287_v31  ;;  %v5434_v54 = vmax.f32 %v4121_v52, %v5165_v17  ;;  %v5696_v55 = vmax.f32 %v5568_v22, 0.0  ;;  %v11348_v31 = vld [vmem:[#allocation135_spill] sm:$0xff]  ;;  %v11351_v22 = vld [vmem:[#allocation137_spill] sm:$0xff] }
 0x289   : > { %v3865_v39 = vpop.f32.mrf.mxu0  ;;  %v5178_v26 = vpop.f32.mrf.mxu1 }
 0x28a   : > { %v5699_v58 = vmax.f32 %v5571_v34, 0.0  ;;  %v5439_v5 = vmax.f32 %v4126_v21, %v8423_v53  ;;  %v4124_v57 = vmax.f32 %v11335_v10, %v3865_v39  ;;  %v5569_v2 = vadd.f32 %v10420_v24, %v5434_v54  ;;  %v11349_v53 = vld [vmem:[#allocation136_spill] sm:$0xff]  ;;  %v11352_v54 = vld [vmem:[#allocation138_spill] sm:$0xff] }
 0x28b   : > { %v8288_v11 = vpop.f32.mrf.mxu0  ;;  %v8424_v29 = vpop.f32.mrf.mxu1  ;;  %v11350_v34 = vmax.f32 %v11348_v31, %v11349_v53  ;;  %v11353_v39 = vmax.f32 %v11351_v22, %v11352_v54 }
 0x28c   : > { %v7474_v30 = vpack.c.bf16 %v5699_v58, %v5698_v27  ;;  %v5437_v4 = vmax.f32 %v4124_v57, %v5178_v26  ;;  %v4127_v9 = vmax.f32 %v11338_v8, %v8288_v11  ;;  %v5697_v35 = vmax.f32 %v5569_v2, 0.0  ;;  %v11354_v57 = vld [vmem:[#allocation139_spill] sm:$0xff]  ;;  %v11355_v2 = vld [vmem:[#allocation140_spill] sm:$0xff] }
 0x28d   : > { %v3868_v40 = vpop.f32.mrf.mxu0  ;;  %v5181_v15 = vpop.f32.mrf.mxu1  ;;  %v5574_v61 = vadd.f32 %v10420_v24, %v5439_v5  ;;  %v11356_v11 = vmax.f32 %v11354_v57, %v11355_v2 }
 0x28e   : > { %7626 = vst [vmem:[%s10092_s26 + $0x148] sm:$0xff] %v7474_v30   ;;  %v5440_v62 = vmax.f32 %v4127_v9, %v8424_v29  ;;  %v4125_v23 = vmax.f32 %v11341_v12, %v3868_v40  ;;  %v7469_v56 = vpack.c.bf16 %v5697_v35, %v5696_v55  ;;  %v5572_v32 = vadd.f32 %v10420_v24, %v5437_v4  ;;  %v11357_v9 = vld [vmem:[#allocation141_spill] sm:$0xff]  ;;  %v11358_v55 = vld [vmem:[#allocation142_spill] sm:$0xff] }
 0x28f   : > { %v8291_v3 = vpop.f32.mrf.mxu0  ;;  %v8427_v47 = vpop.f32.mrf.mxu1  ;;  %v5702_v38 = vmax.f32 %v5574_v61, 0.0  ;;  %v11359_v35 = vmax.f32 %v11357_v9, %v11358_v55 }
 0x290   : > { %v5575_v33 = vadd.f32 %v10420_v24, %v5440_v62  ;;  %v5438_v60 = vmax.f32 %v4125_v23, %v5181_v15  ;;  %v4130_v49 = vmax.f32 %v11344_v48, %v8291_v3  ;;  %7625 = vst [vmem:[%s10092_s26 + $0x140] sm:$0xff] %v7469_v56   ;;  %v5700_v36 = vmax.f32 %v5572_v32, 0.0  ;;  %v11360_v23 = vld [vmem:[#allocation143_spill] sm:$0xff]  ;;  %v11361_v56 = vld [vmem:[#allocation144_spill] sm:$0xff] }
 0x291   : > { %v3881_v19 = vpop.f32.mrf.mxu0  ;;  %v5194_v37 = vpop.f32.mrf.mxu1  ;;  %v11362_v3 = vmax.f32 %v11360_v23, %v11361_v56 }
 0x292   : > { %v5703_v44 = vmax.f32 %v5575_v33, 0.0  ;;  %v5573_v41 = vadd.f32 %v10420_v24, %v5438_v60  ;;  %v4128_v17 = vmax.f32 %v11347_v16, %v3881_v19  ;;  %v5443_v42 = vmax.f32 %v4130_v49, %v8427_v47  ;;  %v11363_v19 = vld [vmem:[#allocation145_spill] sm:$0xff]  ;;  %v11366_v16 = vld [vmem:[#allocation147_spill] sm:$0xff] }
 0x293   : > { %v8292_v43 = vpop.f32.mrf.mxu0  ;;  %v8428_v25 = vpop.f32.mrf.mxu1 }
 0x294   : > { %v7484_v18 = vpack.c.bf16 %v5703_v44, %v5702_v38  ;;  %v5701_v28 = vmax.f32 %v5573_v41, 0.0  ;;  %v5441_v52 = vmax.f32 %v4128_v17, %v5194_v37  ;;  %v4131_v50 = vmax.f32 %v11350_v34, %v8292_v43  ;;  %v11364_v37 = vld [vmem:[#allocation146_spill] sm:$0xff]  ;;  %v11367_v17 = vld [vmem:[#allocation148_spill] sm:$0xff]  ;;  %v11369_v34 = vld [vmem:[#allocation149_spill] sm:$0xff] }
 0x295   : > { %v3884_v51 = vpop.f32.mrf.mxu0  ;;  %v5197_v20 = vpop.f32.mrf.mxu1  ;;  %v5578_v27 = vadd.f32 %v10420_v24, %v5443_v42  ;;  %v11365_v38 = vmax.f32 %v11363_v19, %v11364_v37  ;;  %v11368_v42 = vmax.f32 %v11366_v16, %v11367_v17 }
 0x296   : > { %7628 = vst [vmem:[%s10092_s26 + $0x158] sm:$0xff] %v7484_v18   ;;  %v7479_v21 = vpack.c.bf16 %v5701_v28, %v5700_v36  ;;  %v4129_v26 = vmax.f32 %v11353_v39, %v3884_v51  ;;  %v5444_v58 = vmax.f32 %v4131_v50, %v8428_v25  ;;  %v5576_v59 = vadd.f32 %v10420_v24, %v5441_v52  ;;  %v11370_v50 = vld [vmem:[#allocation150_spill] sm:$0xff] }
 0x297   : > { %v8295_v5 = vpop.f32.mrf.mxu0  ;;  %v8431_v6 = vpop.f32.mrf.mxu1  ;;  %v5706_v15 = vmax.f32 %v5578_v27, 0.0  ;;  %v11371_v51 = vmax.f32 %v11369_v34, %v11370_v50  ;;  %v11372_v27 = vld [vmem:[#allocation151_spill] sm:$0xff] }
 0x298   : > { %7627 = vst [vmem:[%s10092_s26 + $0x150] sm:$0xff] %v7479_v21   ;;  %v5442_v10 = vmax.f32 %v4129_v26, %v5197_v20  ;;  %v4134_v29 = vmax.f32 %v11356_v11, %v8295_v5  ;;  %v5579_v30 = vadd.f32 %v10420_v24, %v5444_v58  ;;  %v5704_v14 = vmax.f32 %v5576_v59, 0.0  ;;  %v11373_v58 = vld [vmem:[#allocation152_spill] sm:$0xff] }
 0x299   : > { %v3897_v4 = vpop.f32.mrf.mxu0  ;;  %v5210_v45 = vpop.f32.mrf.mxu1  ;;  %v11374_v5 = vmax.f32 %v11372_v27, %v11373_v58 }
 0x29a   : > { %v5577_v46 = vadd.f32 %v10420_v24, %v5442_v10  ;;  %v5447_v8 = vmax.f32 %v4134_v29, %v8431_v6  ;;  %v4132_v40 = vmax.f32 %v11359_v35, %v3897_v4  ;;  %v5707_v61 = vmax.f32 %v5579_v30, 0.0  ;;  %v11375_v30 = vld [vmem:[#allocation153_spill] sm:$0xff]  ;;  %v11376_v4 = vld [vmem:[#allocation154_spill] sm:$0xff] }
 0x29b   : > { %v8296_v62 = vpop.f32.mrf.mxu0  ;;  %v8432_v13 = vpop.f32.mrf.mxu1 }
 0x29c   : > { %v5705_v12 = vmax.f32 %v5577_v46, 0.0  ;;  %v4135_v47 = vmax.f32 %v11362_v3, %v8296_v62  ;;  %v7494_v32 = vpack.c.bf16 %v5707_v61, %v5706_v15  ;;  %v5445_v33 = vmax.f32 %v4132_v40, %v5210_v45  ;;  %v11378_v61 = vld [vmem:[#allocation155_spill] sm:$0xff]  ;;  %v11379_v62 = vld [vmem:[#allocation156_spill] sm:$0xff] }
 0x29d   : > { %v3900_v60 = vpop.f32.mrf.mxu0  ;;  %v5213_v7 = vpop.f32.mrf.mxu1  ;;  %v5582_v48 = vadd.f32 %v10420_v24, %v5447_v8  ;;  %v11377_v45 = vmax.f32 %v11375_v30, %v11376_v4 }
 0x29e   : > { %v7489_v63 = vpack.c.bf16 %v5705_v12, %v5704_v14  ;;  %v5448_v49 = vmax.f32 %v4135_v47, %v8432_v13  ;;  %7630 = vst [vmem:[%s10092_s26 + $0x168] sm:$0xff] %v7494_v32   ;;  %v4133_v44 = vmax.f32 %v11365_v38, %v3900_v60  ;;  %v5580_v25 = vadd.f32 %v10420_v24, %v5445_v33  ;;  %v11381_v32 = vld [vmem:[#allocation157_spill] sm:$0xff]  ;;  %v11382_v33 = vld [vmem:[#allocation158_spill] sm:$0xff] }
 0x29f   : > { %v8299_v41 = vpop.f32.mrf.mxu0  ;;  %v8435_v0 = vpop.f32.mrf.mxu1  ;;  %v5710_v52 = vmax.f32 %v5582_v48, 0.0  ;;  %v11380_v13 = vmax.f32 %v11378_v61, %v11379_v62  ;;  %v11383_v60 = vmax.f32 %v11381_v32, %v11382_v33 }
 0x2a0   : > { %7629 = vst [vmem:[%s10092_s26 + $0x160] sm:$0xff] %v7489_v63   ;;  %v5583_v1 = vadd.f32 %v10420_v24, %v5448_v49  ;;  %v4138_v43 = vmax.f32 %v11368_v42, %v8299_v41  ;;  %v5446_v36 = vmax.f32 %v4133_v44, %v5213_v7  ;;  %v5708_v59 = vmax.f32 %v5580_v25, 0.0  ;;  %v11384_v41 = vld [vmem:[#allocation159_spill] sm:$0xff]  ;;  %v11387_v25 = vld [vmem:[#allocation161_spill] sm:$0xff] }
 0x2a1   : > { %v3913_v18 = vpop.f32.mrf.mxu0  ;;  %v5226_v28 = vpop.f32.mrf.mxu1 }
 0x2a2   : > { %v5711_v31 = vmax.f32 %v5583_v1, 0.0  ;;  %v5451_v53 = vmax.f32 %v4138_v43, %v8435_v0  ;;  %v4136_v20 = vmax.f32 %v11371_v51, %v3913_v18  ;;  %v5581_v21 = vadd.f32 %v10420_v24, %v5446_v36  ;;  %v11385_v0 = vld [vmem:[#allocation160_spill] sm:$0xff]  ;;  %v11388_v36 = vld [vmem:[#allocation162_spill] sm:$0xff] }
 0x2a3   : > { %v8300_v22 = vpop.f32.mrf.mxu0  ;;  %v8436_v54 = vpop.f32.mrf.mxu1  ;;  %v11386_v1 = vmax.f32 %v11384_v41, %v11385_v0  ;;  %v11389_v18 = vmax.f32 %v11387_v25, %v11388_v36 }
 0x2a4   : > { %v7504_v39 = vpack.c.bf16 %v5711_v31, %v5710_v52  ;;  %v5449_v26 = vmax.f32 %v4136_v20, %v5226_v28  ;;  %v4139_v6 = vmax.f32 %v11374_v5, %v8300_v22  ;;  %v5709_v10 = vmax.f32 %v5581_v21, 0.0  ;;  %v11390_v20 = vld [vmem:[#allocation163_spill] sm:$0xff]  ;;  %v11391_v21 = vld [vmem:[#allocation164_spill] sm:$0xff] }
 0x2a5   : > { %v3916_v57 = vpop.f32.mrf.mxu0  ;;  %v5229_v2 = vpop.f32.mrf.mxu1  ;;  %v5586_v11 = vadd.f32 %v10420_v24, %v5451_v53  ;;  %v11392_v22 = vmax.f32 %v11390_v20, %v11391_v21 }
 0x2a6   : > { %7632 = vst [vmem:[%s10092_s26 + $0x178] sm:$0xff] %v7504_v39   ;;  %v5452_v29 = vmax.f32 %v4139_v6, %v8436_v54  ;;  %v4137_v46 = vmax.f32 %v11377_v45, %v3916_v57  ;;  %v7499_v8 = vpack.c.bf16 %v5709_v10, %v5708_v59  ;;  %v5584_v35 = vadd.f32 %v10420_v24, %v5449_v26  ;;  %v11393_v6 = vld [vmem:[#allocation165_spill] sm:$0xff]  ;;  %v11394_v59 = vld [vmem:[#allocation166_spill] sm:$0xff] }
 0x2a7   : > { %v8303_v9 = vpop.f32.mrf.mxu0  ;;  %v8439_v55 = vpop.f32.mrf.mxu1  ;;  %v5714_v56 = vmax.f32 %v5586_v11, 0.0  ;;  %v11395_v10 = vmax.f32 %v11393_v6, %v11394_v59 }
 0x2a8   : > { %v5587_v40 = vadd.f32 %v10420_v24, %v5452_v29  ;;  %v5450_v15 = vmax.f32 %v4137_v46, %v5229_v2  ;;  %v4142_v14 = vmax.f32 %v11380_v13, %v8303_v9  ;;  %7631 = vst [vmem:[%s10092_s26 + $0x170] sm:$0xff] %v7499_v8   ;;  %v5712_v19 = vmax.f32 %v5584_v35, 0.0  ;;  %v11396_v46 = vld [vmem:[#allocation167_spill] sm:$0xff]  ;;  %v11397_v8 = vld [vmem:[#allocation168_spill] sm:$0xff] }
 0x2a9   : > { %v3929_v12 = vpop.f32.mrf.mxu0  ;;  %v5242_v23 = vpop.f32.mrf.mxu1  ;;  %v11398_v9 = vmax.f32 %v11396_v46, %v11397_v8 }
 0x2aa   : > { %v5715_v3 = vmax.f32 %v5587_v40, 0.0  ;;  %v5585_v47 = vadd.f32 %v10420_v24, %v5450_v15  ;;  %v4140_v7 = vmax.f32 %v11383_v60, %v3929_v12  ;;  %v5455_v63 = vmax.f32 %v4142_v14, %v8439_v55  ;;  %v11399_v12 = vld [vmem:[#allocation169_spill] sm:$0xff]  ;;  %v11402_v60 = vld [vmem:[#allocation171_spill] sm:$0xff] }
 0x2ab   : > { %v8304_v48 = vpop.f32.mrf.mxu0  ;;  %v8440_v49 = vpop.f32.mrf.mxu1 }
 0x2ac   : > { %v7514_v37 = vpack.c.bf16 %v5715_v3, %v5714_v56  ;;  %v5713_v38 = vmax.f32 %v5585_v47, 0.0  ;;  %v5453_v44 = vmax.f32 %v4140_v7, %v5242_v23  ;;  %v4143_v16 = vmax.f32 %v11386_v1, %v8304_v48  ;;  %v11400_v23 = vld [vmem:[#allocation170_spill] sm:$0xff]  ;;  %v11403_v7 = vld [vmem:[#allocation172_spill] sm:$0xff]  ;;  %v11405_v1 = vld [vmem:[#allocation173_spill] sm:$0xff] }
 0x2ad   : > { %v3932_v17 = vpop.f32.mrf.mxu0  ;;  %v5245_v42 = vpop.f32.mrf.mxu1  ;;  %v5590_v52 = vadd.f32 %v10420_v24, %v5455_v63  ;;  %v11401_v56 = vmax.f32 %v11399_v12, %v11400_v23  ;;  %v11404_v63 = vmax.f32 %v11402_v60, %v11403_v7 }
 0x2ae   : > { %7634 = vst [vmem:[%s10092_s26 + $0x188] sm:$0xff] %v7514_v37   ;;  %v7509_v43 = vpack.c.bf16 %v5713_v38, %v5712_v19  ;;  %v4141_v28 = vmax.f32 %v11389_v18, %v3932_v17  ;;  %v5456_v31 = vmax.f32 %v4143_v16, %v8440_v49  ;;  %v5588_v50 = vadd.f32 %v10420_v24, %v5453_v44  ;;  %v11406_v16 = vld [vmem:[#allocation174_spill] sm:$0xff] }
 0x2af   : > { %v8307_v53 = vpop.f32.mrf.mxu0  ;;  %v8443_v34 = vpop.f32.mrf.mxu1  ;;  %v5718_v2 = vmax.f32 %v5590_v52, 0.0  ;;  %v11407_v17 = vmax.f32 %v11405_v1, %v11406_v16  ;;  %v11408_v52 = vld [vmem:[#allocation175_spill] sm:$0xff] }
 0x2b0   : > { %7633 = vst [vmem:[%s10092_s26 + $0x180] sm:$0xff] %v7509_v43   ;;  %v5454_v51 = vmax.f32 %v4141_v28, %v5245_v42  ;;  %v4146_v54 = vmax.f32 %v11392_v22, %v8307_v53  ;;  %v5591_v39 = vadd.f32 %v10420_v24, %v5456_v31  ;;  %v5716_v4 = vmax.f32 %v5588_v50, 0.0  ;;  %v11409_v31 = vld [vmem:[#allocation176_spill] sm:$0xff] }
 0x2b1   : > { %v3945_v26 = vpop.f32.mrf.mxu0  ;;  %v5258_v27 = vpop.f32.mrf.mxu1  ;;  %v11410_v53 = vmax.f32 %v11408_v52, %v11409_v31 }
 0x2b2   : > { %v5589_v58 = vadd.f32 %v10420_v24, %v5454_v51  ;;  %v5459_v5 = vmax.f32 %v4146_v54, %v8443_v34  ;;  %v4144_v57 = vmax.f32 %v11395_v10, %v3945_v26  ;;  %v5719_v11 = vmax.f32 %v5591_v39, 0.0  ;;  %v11411_v39 = vld [vmem:[#allocation177_spill] sm:$0xff]  ;;  %v11412_v26 = vld [vmem:[#allocation178_spill] sm:$0xff] }
 0x2b3   : > { %v8308_v29 = vpop.f32.mrf.mxu0  ;;  %v8444_v30 = vpop.f32.mrf.mxu1 }
 0x2b4   : > { %v5717_v45 = vmax.f32 %v5589_v58, 0.0  ;;  %v4147_v55 = vmax.f32 %v11398_v9, %v8308_v29  ;;  %v7524_v35 = vpack.c.bf16 %v5719_v11, %v5718_v2  ;;  %v5457_v40 = vmax.f32 %v4144_v57, %v5258_v27  ;;  %v11414_v11 = vld [vmem:[#allocation179_spill] sm:$0xff]  ;;  %v11415_v29 = vld [vmem:[#allocation180_spill] sm:$0xff] }
 0x2b5   : > { %v3948_v15 = vpop.f32.mrf.mxu0  ;;  %v5261_v61 = vpop.f32.mrf.mxu1  ;;  %v5594_v13 = vadd.f32 %v10420_v24, %v5459_v5  ;;  %v11413_v27 = vmax.f32 %v11411_v39, %v11412_v26 }
 0x2b6   : > { %v7519_v62 = vpack.c.bf16 %v5717_v45, %v5716_v4  ;;  %v5460_v14 = vmax.f32 %v4147_v55, %v8444_v30  ;;  %7636 = vst [vmem:[%s10092_s26 + $0x198] sm:$0xff] %v7524_v35   ;;  %v4145_v3 = vmax.f32 %v11401_v56, %v3948_v15  ;;  %v5592_v49 = vadd.f32 %v10420_v24, %v5457_v40  ;;  %v11417_v35 = vld [vmem:[#allocation181_spill] sm:$0xff]  ;;  %v11418_v40 = vld [vmem:[#allocation182_spill] sm:$0xff] }
 0x2b7   : > { %v8311_v47 = vpop.f32.mrf.mxu0  ;;  %v8447_v32 = vpop.f32.mrf.mxu1  ;;  %v5722_v44 = vmax.f32 %v5594_v13, 0.0  ;;  %v11416_v30 = vmax.f32 %v11414_v11, %v11415_v29  ;;  %v11419_v15 = vmax.f32 %v11417_v35, %v11418_v40 }
 0x2b8   : > { %7635 = vst [vmem:[%s10092_s26 + $0x190] sm:$0xff] %v7519_v62   ;;  %v5595_v33 = vadd.f32 %v10420_v24, %v5460_v14  ;;  %v4150_v48 = vmax.f32 %v11404_v63, %v8311_v47  ;;  %v5458_v19 = vmax.f32 %v4145_v3, %v5261_v61  ;;  %v5720_v50 = vmax.f32 %v5592_v49, 0.0  ;;  %v11420_v47 = vld [vmem:[#allocation183_spill] sm:$0xff]  ;;  %v11423_v49 = vld [vmem:[#allocation185_spill] sm:$0xff] }
 0x2b9   : > { %v3961_v37 = vpop.f32.mrf.mxu0  ;;  %v5274_v38 = vpop.f32.mrf.mxu1 }
 0x2ba   : > { %v5723_v41 = vmax.f32 %v5595_v33, 0.0  ;;  %v5463_v0 = vmax.f32 %v4150_v48, %v8447_v32  ;;  %v4148_v42 = vmax.f32 %v11407_v17, %v3961_v37  ;;  %v5593_v43 = vadd.f32 %v10420_v24, %v5458_v19  ;;  %v11421_v32 = vld [vmem:[#allocation184_spill] sm:$0xff]  ;;  %v11424_v19 = vld [vmem:[#allocation186_spill] sm:$0xff] }
 0x2bb   : > { %v8312_v25 = vpop.f32.mrf.mxu0  ;;  %v8448_v36 = vpop.f32.mrf.mxu1  ;;  %v11422_v33 = vmax.f32 %v11420_v47, %v11421_v32  ;;  %v11425_v37 = vmax.f32 %v11423_v49, %v11424_v19 }
 0x2bc   : > { %v7534_v18 = vpack.c.bf16 %v5723_v41, %v5722_v44  ;;  %v5461_v28 = vmax.f32 %v4148_v42, %v5274_v38  ;;  %v4151_v34 = vmax.f32 %v11410_v53, %v8312_v25  ;;  %v5721_v51 = vmax.f32 %v5593_v43, 0.0  ;;  %v11426_v42 = vld [vmem:[#allocation187_spill] sm:$0xff]  ;;  %v11427_v43 = vld [vmem:[#allocation188_spill] sm:$0xff] }
 0x2bd   : > { %v3964_v20 = vpop.f32.mrf.mxu0  ;;  %v5277_v21 = vpop.f32.mrf.mxu1  ;;  %v5598_v22 = vadd.f32 %v10420_v24, %v5463_v0  ;;  %v11428_v25 = vmax.f32 %v11426_v42, %v11427_v43 }
 0x2be   : > { %7638 = vst [vmem:[%s10092_s26 + $0x1a8] sm:$0xff] %v7534_v18   ;;  %v5464_v54 = vmax.f32 %v4151_v34, %v8448_v36  ;;  %v4149_v58 = vmax.f32 %v11413_v27, %v3964_v20  ;;  %v7529_v5 = vpack.c.bf16 %v5721_v51, %v5720_v50  ;;  %v5596_v10 = vadd.f32 %v10420_v24, %v5461_v28  ;;  %v11429_v34 = vld [vmem:[#allocation189_spill] sm:$0xff]  ;;  %v11430_v50 = vld [vmem:[#allocation190_spill] sm:$0xff] }
 0x2bf   : > { %v8315_v6 = vpop.f32.mrf.mxu0  ;;  %v8451_v59 = vpop.f32.mrf.mxu1  ;;  %v5726_v8 = vmax.f32 %v5598_v22, 0.0  ;;  %v11431_v51 = vmax.f32 %v11429_v34, %v11430_v50 }
 0x2c0   : > { %v5599_v57 = vadd.f32 %v10420_v24, %v5464_v54  ;;  %v5462_v2 = vmax.f32 %v4149_v58, %v5277_v21  ;;  %v4154_v4 = vmax.f32 %v11416_v30, %v8315_v6  ;;  %7637 = vst [vmem:[%s10092_s26 + $0x1a0] sm:$0xff] %v7529_v5   ;;  %v5724_v12 = vmax.f32 %v5596_v10, 0.0  ;;  %v11432_v58 = vld [vmem:[#allocation191_spill] sm:$0xff]  ;;  %v11433_v5 = vld [vmem:[#allocation192_spill] sm:$0xff] }
 0x2c1   : > { %v3977_v45 = vpop.f32.mrf.mxu0  ;;  %v5290_v46 = vpop.f32.mrf.mxu1  ;;  %v11434_v6 = vmax.f32 %v11432_v58, %v11433_v5 }
 0x2c2   : > { %v5727_v9 = vmax.f32 %v5599_v57, 0.0  ;;  %v5597_v55 = vadd.f32 %v10420_v24, %v5462_v2  ;;  %v4152_v61 = vmax.f32 %v11419_v15, %v3977_v45  ;;  %v5467_v62 = vmax.f32 %v4154_v4, %v8451_v59  ;;  %v11435_v45 = vld [vmem:[#allocation193_spill] sm:$0xff]  ;;  %v11438_v15 = vld [vmem:[#allocation195_spill] sm:$0xff] }
 0x2c3   : > { %v8316_v13 = vpop.f32.mrf.mxu0  ;;  %v8452_v14 = vpop.f32.mrf.mxu1 }
 0x2c4   : > { %v7544_v23 = vpack.c.bf16 %v5727_v9, %v5726_v8  ;;  %v5725_v56 = vmax.f32 %v5597_v55, 0.0  ;;  %v5465_v3 = vmax.f32 %v4152_v61, %v5290_v46  ;;  %v4155_v60 = vmax.f32 %v11422_v33, %v8316_v13  ;;  %v11436_v46 = vld [vmem:[#allocation194_spill] sm:$0xff]  ;;  %v11439_v61 = vld [vmem:[#allocation196_spill] sm:$0xff]  ;;  %v11441_v33 = vld [vmem:[#allocation197_spill] sm:$0xff] }
 0x2c5   : > { %v3980_v7 = vpop.f32.mrf.mxu0  ;;  %v5293_v63 = vpop.f32.mrf.mxu1  ;;  %v5602_v44 = vadd.f32 %v10420_v24, %v5467_v62  ;;  %v11437_v8 = vmax.f32 %v11435_v45, %v11436_v46  ;;  %v11440_v62 = vmax.f32 %v11438_v15, %v11439_v61 }
 0x2c6   : > { %7640 = vst [vmem:[%s10092_s26 + $0x1b8] sm:$0xff] %v7544_v23   ;;  %v7539_v48 = vpack.c.bf16 %v5725_v56, %v5724_v12  ;;  %v4153_v38 = vmax.f32 %v11425_v37, %v3980_v7  ;;  %v5468_v41 = vmax.f32 %v4155_v60, %v8452_v14  ;;  %v5600_v16 = vadd.f32 %v10420_v24, %v5465_v3  ;;  %v11442_v60 = vld [vmem:[#allocation198_spill] sm:$0xff] }
 0x2c7   : > { %v8319_v0 = vpop.f32.mrf.mxu0  ;;  %v8455_v1 = vpop.f32.mrf.mxu1  ;;  %v5730_v21 = vmax.f32 %v5602_v44, 0.0  ;;  %v11443_v7 = vmax.f32 %v11441_v33, %v11442_v60  ;;  %v11444_v44 = vld [vmem:[#allocation199_spill] sm:$0xff] }
 0x2c8   : > { %7639 = vst [vmem:[%s10092_s26 + $0x1b0] sm:$0xff] %v7539_v48   ;;  %v5466_v17 = vmax.f32 %v4153_v38, %v5293_v63  ;;  %v4158_v36 = vmax.f32 %v11428_v25, %v8319_v0  ;;  %v5603_v18 = vadd.f32 %v10420_v24, %v5468_v41  ;;  %v5728_v26 = vmax.f32 %v5600_v16, 0.0  ;;  %v11445_v41 = vld [vmem:[#allocation200_spill] sm:$0xff] }
 0x2c9   : > { %v3993_v28 = vpop.f32.mrf.mxu0  ;;  %v5306_v52 = vpop.f32.mrf.mxu1  ;;  %v11446_v0 = vmax.f32 %v11444_v44, %v11445_v41 }
 0x2ca   : > { %v5601_v31 = vadd.f32 %v10420_v24, %v5466_v17  ;;  %v5471_v53 = vmax.f32 %v4158_v36, %v8455_v1  ;;  %v4156_v20 = vmax.f32 %v11431_v51, %v3993_v28  ;;  %v5731_v22 = vmax.f32 %v5603_v18, 0.0  ;;  %v11447_v18 = vld [vmem:[#allocation201_spill] sm:$0xff]  ;;  %v11448_v28 = vld [vmem:[#allocation202_spill] sm:$0xff] }
 0x2cb   : > { %v8320_v54 = vpop.f32.mrf.mxu0  ;;  %v8456_v39 = vpop.f32.mrf.mxu1 }
 0x2cc   : > { %v5729_v27 = vmax.f32 %v5601_v31, 0.0  ;;  %v4159_v59 = vmax.f32 %v11434_v6, %v8320_v54  ;;  %v7554_v10 = vpack.c.bf16 %v5731_v22, %v5730_v21  ;;  %v5469_v57 = vmax.f32 %v4156_v20, %v5306_v52  ;;  %v11450_v22 = vld [vmem:[#allocation203_spill] sm:$0xff]  ;;  %v11451_v54 = vld [vmem:[#allocation204_spill] sm:$0xff] }
 0x2cd   : > { %v3996_v2 = vpop.f32.mrf.mxu0  ;;  %v5309_v11 = vpop.f32.mrf.mxu1  ;;  %v5606_v30 = vadd.f32 %v10420_v24, %v5471_v53  ;;  %v11449_v52 = vmax.f32 %v11447_v18, %v11448_v28 }
 0x2ce   : > { %v7549_v29 = vpack.c.bf16 %v5729_v27, %v5728_v26  ;;  %v5472_v4 = vmax.f32 %v4159_v59, %v8456_v39  ;;  %7642 = vst [vmem:[%s10092_s26 + $0x1c8] sm:$0xff] %v7554_v10   ;;  %v4157_v9 = vmax.f32 %v11437_v8, %v3996_v2  ;;  %v5604_v14 = vadd.f32 %v10420_v24, %v5469_v57  ;;  %v11453_v10 = vld [vmem:[#allocation205_spill] sm:$0xff]  ;;  %v11454_v57 = vld [vmem:[#allocation206_spill] sm:$0xff] }
 0x2cf   : > { %v8323_v55 = vpop.f32.mrf.mxu0  ;;  %v8459_v35 = vpop.f32.mrf.mxu1  ;;  %v5734_v3 = vmax.f32 %v5606_v30, 0.0  ;;  %v11452_v39 = vmax.f32 %v11450_v22, %v11451_v54  ;;  %v11455_v2 = vmax.f32 %v11453_v10, %v11454_v57 }
 0x2d0   : > { %7641 = vst [vmem:[%s10092_s26 + $0x1c0] sm:$0xff] %v7549_v29   ;;  %v5607_v40 = vadd.f32 %v10420_v24, %v5472_v4  ;;  %v4162_v13 = vmax.f32 %v11440_v62, %v8323_v55  ;;  %v5470_v12 = vmax.f32 %v4157_v9, %v5309_v11  ;;  %v5732_v16 = vmax.f32 %v5604_v14, 0.0  ;;  %v11456_v55 = vld [vmem:[#allocation207_spill] sm:$0xff]  ;;  %v11460_v14 = vld [vmem:[#allocation210_spill] sm:$0xff] }
 0x2d1   : > { %v4009_v23 = vpop.f32.mrf.mxu0  ;;  %v5322_v56 = vpop.f32.mrf.mxu1 }
 0x2d2   : > { %v5735_v47 = vmax.f32 %v5607_v40, 0.0  ;;  %v5475_v32 = vmax.f32 %v4162_v13, %v8459_v35  ;;  %v4160_v63 = vmax.f32 %v11443_v7, %v4009_v23  ;;  %v5605_v48 = vadd.f32 %v10420_v24, %v5470_v12  ;;  %v11457_v35 = vld [vmem:[#allocation208_spill] sm:$0xff]  ;;  %v11459_v13 = vld [vmem:[#allocation209_spill] sm:$0xff] }
 0x2d3   : > { %v8324_v49 = vpop.f32.mrf.mxu0  ;;  %v8460_v19 = vpop.f32.mrf.mxu1  ;;  %v11458_v40 = vmax.f32 %v11456_v55, %v11457_v35  ;;  %v11461_v12 = vmax.f32 %v11459_v13, %v11460_v14 }
 0x2d4   : > { %v7564_v37 = vpack.c.bf16 %v5735_v47, %v5734_v3  ;;  %v5473_v38 = vmax.f32 %v4160_v63, %v5322_v56  ;;  %v4163_v1 = vmax.f32 %v11446_v0, %v8324_v49  ;;  %v5733_v17 = vmax.f32 %v5605_v48, 0.0 }
 0x2d5   : > { %v4012_v42 = vpop.f32.mrf.mxu0  ;;  %v5325_v43 = vpop.f32.mrf.mxu1  ;;  %v5610_v25 = vadd.f32 %v10420_v24, %v5475_v32 }
 0x2d6   : > { %7644 = vst [vmem:[%s10092_s26 + $0x1d8] sm:$0xff] %v7564_v37   ;;  %v5476_v36 = vmax.f32 %v4163_v1, %v8460_v19  ;;  %v4161_v31 = vmax.f32 %v11449_v52, %v4012_v42  ;;  %v7559_v53 = vpack.c.bf16 %v5733_v17, %v5732_v16  ;;  %v5608_v51 = vadd.f32 %v10420_v24, %v5473_v38 }
 0x2d7   : > { %v8327_v34 = vpop.f32.mrf.mxu0  ;;  %v8463_v50 = vpop.f32.mrf.mxu1  ;;  %v5738_v5 = vmax.f32 %v5610_v25, 0.0 }
 0x2d8   : > { %v5611_v20 = vadd.f32 %v10420_v24, %v5476_v36  ;;  %v5474_v21 = vmax.f32 %v4161_v31, %v5325_v43  ;;  %v4166_v26 = vmax.f32 %v11452_v39, %v8327_v34  ;;  %7643 = vst [vmem:[%s10092_s26 + $0x1d0] sm:$0xff] %v7559_v53   ;;  %v5736_v45 = vmax.f32 %v5608_v51, 0.0 }
 0x2d9   : > { %v4025_v27 = vpop.f32.mrf.mxu0  ;;  %v5338_v58 = vpop.f32.mrf.mxu1 }
 0x2da   : > { %v5739_v6 = vmax.f32 %v5611_v20, 0.0  ;;  %v5609_v59 = vadd.f32 %v10420_v24, %v5474_v21  ;;  %v4164_v11 = vmax.f32 %v11455_v2, %v4025_v27  ;;  %v5479_v29 = vmax.f32 %v4166_v26, %v8463_v50 }
 0x2db   : > { %v8328_v30 = vpop.f32.mrf.mxu0  ;;  %v8464_v4 = vpop.f32.mrf.mxu1 }
 0x2dc   : > { %v7574_v46 = vpack.c.bf16 %v5739_v6, %v5738_v5  ;;  %v5737_v8 = vmax.f32 %v5609_v59, 0.0  ;;  %v5477_v9 = vmax.f32 %v4164_v11, %v5338_v58  ;;  %v4167_v15 = vmax.f32 %v11458_v40, %v8328_v30 }
 0x2dd   : > { %v4028_v61 = vpop.f32.mrf.mxu0  ;;  %v5614_v56 = vadd.f32 %v10420_v24, %v5479_v29  ;;  %v5341_v47 = vpop.f32.mrf.mxu1 }
 0x2de   : > { %7646 = vst [vmem:[%s10092_s26 + $0x1e8] sm:$0xff] %v7574_v46   ;;  %v7569_v62 = vpack.c.bf16 %v5737_v8, %v5736_v45  ;;  %v4165_v23 = vmax.f32 %v11461_v12, %v4028_v61  ;;  %v5480_v3 = vmax.f32 %v4167_v15, %v8464_v4  ;;  %v5612_v32 = vadd.f32 %v10420_v24, %v5477_v9 }
 0x2df   : > { %v5742_v63 = vmax.f32 %v5614_v56, 0.0 }
 0x2e0   : > { %7645 = vst [vmem:[%s10092_s26 + $0x1e0] sm:$0xff] %v7569_v62   ;;  %v5478_v33 = vmax.f32 %v4165_v23, %v5341_v47  ;;  %v5615_v60 = vadd.f32 %v10420_v24, %v5480_v3  ;;  %v5740_v49 = vmax.f32 %v5612_v32, 0.0 }
 0x2e2   : > { %v5613_v7 = vadd.f32 %v10420_v24, %v5478_v33  ;;  %v5743_v48 = vmax.f32 %v5615_v60, 0.0 }
 0x2e4   : > { %v5741_v19 = vmax.f32 %v5613_v7, 0.0  ;;  %v7584_v37 = vpack.c.bf16 %v5743_v48, %v5742_v63 }
 0x2e6   : > { %v7579_v38 = vpack.c.bf16 %v5741_v19, %v5740_v49  ;;  %7648 = vst [vmem:[%s10092_s26 + $0x1f8] sm:$0xff] %v7584_v37  }
 0x2e8   : > { %7647 = vst [vmem:[%s10092_s26 + $0x1f0] sm:$0xff] %v7579_v38  }
 0x2e9 PF: > { %s16_s21 = sadd.s32 1, %s8741_s21  }
 0x2ea   : > { %p13_p4 = scmp.ge.s32.totalorder %s16_s21, 4  }
 0x2ec   :  { %15 = sbr.rel (!%p13_p4) target bundleno = 1 (0x1), region = 83 }

// kernel: christoph_cnn_with_pcen_forward.6
= control target key start
LH: loop header
LB: loop body
LE: loop exit
PB: predicated region body
PF: predicated region fallthrough
CT: control target
= control target key end

     0   :  { %s4662_s21 = smov 0   ;;  %s6063_s0 = inlined_call_operand.vmem [shape: bf16[256,735], index: 0, kind: input, shape index: {}]   ;;  %s6064_s1 = inlined_call_operand.vmem [shape: bf16[256,735], index: 1, kind: input, shape index: {}]   ;;  %s6065_s2 = inlined_call_operand.vmem [shape: bf16[256,735], index: 2, kind: input, shape index: {}]   ;;  %s6066_s3 = inlined_call_operand.vmem [shape: bf16[256,735], index: 3, kind: input, shape index: {}]   ;;  %s6067_s4 = inlined_call_operand.vmem [shape: bf16[735,128], index: 4, kind: input, shape index: {}]   ;;  %s6068_s5 = inlined_call_operand.vmem [shape: f32[1,128], index: 5, kind: input, shape index: {}]   ;;  %s6069_s6 = inlined_call_operand.vmem [shape: bf16[256,128], index: 6, kind: output, shape index: {}]  }
   0x1 LB: > { %s3348_s22 = sadd.s32 4294967295, %s4623_s21   ;;  %p3352_p0 = scmp.ge.s32.totalorder %s4623_s21, 1  ;;  %s4623_s21 = sphi %s4662_s21, %s16_s21  }
   0x2   : > { %p250_p1 = scmp.lt.s32.totalorder %s4623_s21, 3 }
   0x4   : > { %p251_p2 = pnand %p3352_p0, %p250_p1 }
   0x6   : > { %254 = sbr.rel (%p251_p2) target bundleno = 635 (0x27b), region = 44 }
   0xb   : > { %v4673_v0 = vld [vmem:[%s6067_s4 + $0x78] sm:$0xff]   ;;  %v4696_v4 = vld [vmem:[%s6067_s4 + $0x70] sm:$0xff]   ;;  %v4720_v8 = vld [vmem:[%s6067_s4 + $0x68] sm:$0xff]   ;;  %s3353_s7 = sshll.u32 %s3348_s22, 4  ;;  %v6070_v34 = vmov 0   ;;  %vm1006_vm0 = vcmask 1046528  }
   0xc   : > { %v4678_v1 = vld [vmem:[%s6067_s4 + $0xf8] sm:$0xff]   ;;  %3715 = vmatprep.subr.bf16.mxu0 %v4673_v0  ;;  %v4702_v5 = vld [vmem:[%s6067_s4 + $0xf0] sm:$0xff]   ;;  %v4726_v9 = vld [vmem:[%s6067_s4 + $0xe8] sm:$0xff]   ;;  %p300_p3 = scmp.lt.s32.totalorder %s3353_s7, 31  ;;  %vm1007_vm1 = vcmask 1047552   ;;  %v4626_v58 = vmov 65535  }
   0xd   : > { %v4684_v2 = vld [vmem:[%s6067_s4 + $0x38] sm:$0xff]   ;;  %3779 = vmatprep.subr.bf16.mxu1 %v4678_v1  ;;  %v4708_v6 = vld [vmem:[%s6067_s4 + $0x30] sm:$0xff]   ;;  %v4732_v10 = vld [vmem:[%s6067_s4 + $0x28] sm:$0xff]   ;;  %v1008_v59 = vsel %vm1006_vm0, 4294967295, %v4626_v58  ;;  %vm981_vm2 = vcmask 777216  }
   0xe   : > { %v4690_v3 = vld [vmem:[%s6067_s4 + $0xb8] sm:$0xff]   ;;  %3716 = vmatpush3.bf16.msra.mxu0 %v4684_v2  ;;  %v4714_v7 = vld [vmem:[%s6067_s4 + $0xb0] sm:$0xff]   ;;  %v4738_v11 = vld [vmem:[%s6067_s4 + $0xa8] sm:$0xff]   ;;  %s6096_s7 = smov (!%p300_p3, %s3353_s7), 31  ;;  %v1009_v62 = vsel %vm1007_vm1, %v1008_v59, 0 }
   0xf   : > { %3780 = vmatpush3.bf16.msra.mxu1 %v4690_v3  ;;  %3717 = vmatprep.subr.bf16.mxu0 %v4696_v4  ;;  %v4744_v12 = vld [vmem:[%s6067_s4 + $0x60] sm:$0xff]   ;;  %v4770_v16 = vld [vmem:[%s6067_s4 + $0x58] sm:$0xff]   ;;  %v4794_v20 = vld [vmem:[%s6067_s4 + $0x50] sm:$0xff]   ;;  %s4829_s8 = smul.u32 24, %s6096_s7  ;;  %s3362_s11 = sshll.u32 %s6096_s7, 2 }
  0x10   : > { %3781 = vmatprep.subr.bf16.mxu1 %v4702_v5  ;;  %v4750_v13 = vld [vmem:[%s6067_s4 + $0xe0] sm:$0xff]   ;;  %v4776_v17 = vld [vmem:[%s6067_s4 + $0xd8] sm:$0xff]   ;;  %v4800_v21 = vld [vmem:[%s6067_s4 + $0xd0] sm:$0xff]   ;;  %s6005_s22 = scalar_lea.vmem %s6069_s6, %s3362_s11 }
  0x11   : > { %v4756_v14 = vld [vmem:[%s6067_s4 + $0x20] sm:$0xff]   ;;  %v4782_v18 = vld [vmem:[%s6067_s4 + $0x18] sm:$0xff]   ;;  %v4808_v22 = vld [vmem:[%s6067_s4 + $0x10] sm:$0xff]   ;;  %s4859_s18 = scalar_lea.vmem %s6063_s0, %s4829_s8  ;;  %s4979_s25 = scalar_lea.vmem %s6064_s1, %s4829_s8 }
  0x12   : > { %3718 = vmatpush3.bf16.msra.mxu0 %v4708_v6  ;;  %v4764_v15 = vld [vmem:[%s6067_s4 + $0xa0] sm:$0xff]   ;;  %v4788_v19 = vld [vmem:[%s6067_s4 + $0x98] sm:$0xff]   ;;  %v4814_v23 = vld [vmem:[%s6067_s4 + $0x90] sm:$0xff]   ;;  %s5054_s15 = scalar_lea.vmem %s6065_s2, %s4829_s8  ;;  %s5134_s20 = scalar_lea.vmem %s6066_s3, %s4829_s8 }
  0x13   : > { %3782 = vmatpush3.bf16.msra.mxu1 %v4714_v7  ;;  %3719 = vmatprep.subr.bf16.mxu0 %v4720_v8  ;;  %v4820_v24 = vld [vmem:[%s6067_s4 + $0x48] sm:$0xff]   ;;  %v4847_v28 = vld [vmem:[%s6067_s4 + $0x40] sm:$0xff]   ;;  %v4884_v37 = vld [vmem:[%s6067_s4 + $0x138] sm:$0xff]  }
  0x14   : > { %3783 = vmatprep.subr.bf16.mxu1 %v4726_v9  ;;  %v4826_v25 = vld [vmem:[%s6067_s4 + $0xc8] sm:$0xff]   ;;  %v4853_v29 = vld [vmem:[%s6067_s4 + $0xc0] sm:$0xff]   ;;  %v4889_v38 = vld [vmem:[%s6067_s4 + $0x130] sm:$0xff]  }
  0x15   : > { %v4835_v26 = vld [vmem:[%s6067_s4 + $0x8] sm:$0xff]   ;;  %v4865_v30 = vld [vmem:[%s6067_s4] sm:$0xff]   ;;  %v4280_v40 = vld [vmem:[%s4859_s18 + $0x3c] ss:$24 sps:$4 sm:$0xff]  }
  0x16   : > { %3720 = vmatpush3.bf16.msra.mxu0 %v4732_v10  ;;  %v4841_v27 = vld [vmem:[%s6067_s4 + $0x88] sm:$0xff]   ;;  %v4871_v31 = vld [vmem:[%s6067_s4 + $0x80] sm:$0xff]   ;;  %v4283_v42 = vld [vmem:[%s4859_s18 + $0x38] ss:$24 sps:$4 sm:$0xff]  }
  0x17   : > { %3784 = vmatpush3.bf16.msra.mxu1 %v4738_v11  ;;  %3721 = vmatprep.subr.bf16.mxu0 %v4744_v12  ;;  %v4270_v32 = vld [vmem:[%s4859_s18] ss:$24 sps:$4 sm:$0xff]   ;;  %v4272_v33 = vld [vmem:[%s4859_s18 + $0x4] ss:$24 sps:$4 sm:$0xff]   ;;  %v4278_v39 = vld [vmem:[%s4859_s18 + $0x34] ss:$24 sps:$4 sm:$0xff]  }
  0x18   : > { %3785 = vmatprep.subr.bf16.mxu1 %v4750_v13  ;;  %v4273_v35 = vld [vmem:[%s4859_s18 + $0x8] ss:$24 sps:$4 sm:$0xff]   ;;  %v4275_v36 = vld [vmem:[%s4859_s18 + $0xc] ss:$24 sps:$4 sm:$0xff]   ;;  %1045 = vmatprep.mubr.bf16.mxu0 %v4272_v33  ;;  %v4923_v49 = vld [vmem:[%s6067_s4 + $0x118] sm:$0xff]  }
  0x19   : > { %1142 = vmatprep.mubr.bf16.mxu1 %v4275_v36  ;;  %v4282_v41 = vld [vmem:[%s4859_s18 + $0x30] ss:$24 sps:$4 sm:$0xff]   ;;  %v4285_v44 = vld [vmem:[%s4859_s18 + $0x64] ss:$24 sps:$4 sm:$0xff]   ;;  %v4290_v47 = vld [vmem:[%s4859_s18 + $0x60] ss:$24 sps:$4 sm:$0xff]  }
  0x1a   : > { %3722 = vmatpush3.bf16.msra.mxu0 %v4756_v14  ;;  %v4903_v43 = vld [vmem:[%s6067_s4 + $0x128] sm:$0xff]   ;;  %v4914_v46 = vld [vmem:[%s6067_s4 + $0x120] sm:$0xff]   ;;  %v4295_v51 = vld [vmem:[%s4859_s18 + $0x9c] ss:$24 sps:$4 sm:$0xff]  }
  0x1b   : > { %3786 = vmatpush3.bf16.msra.mxu1 %v4764_v15  ;;  %3723 = vmatprep.subr.bf16.mxu0 %v4770_v16  ;;  %v4287_v45 = vld [vmem:[%s4859_s18 + $0x6c] ss:$24 sps:$4 sm:$0xff]   ;;  %v4291_v48 = vld [vmem:[%s4859_s18 + $0x68] ss:$24 sps:$4 sm:$0xff]   ;;  %v4936_v52 = vld [vmem:[%s6067_s4 + $0x110] sm:$0xff]  }
  0x1c   : > { %3787 = vmatprep.subr.bf16.mxu1 %v4776_v17  ;;  %v4293_v50 = vld [vmem:[%s4859_s18 + $0x94] ss:$24 sps:$4 sm:$0xff]   ;;  %v4297_v53 = vld [vmem:[%s4859_s18 + $0x90] ss:$24 sps:$4 sm:$0xff]   ;;  %v4301_v56 = vld [vmem:[%s4859_s18 + $0xc4] ss:$24 sps:$4 sm:$0xff]  }
  0x1d   : > { %v4298_v54 = vld [vmem:[%s4859_s18 + $0x98] ss:$24 sps:$4 sm:$0xff]   ;;  %v4945_v55 = vld [vmem:[%s6067_s4 + $0x108] sm:$0xff]   ;;  %v4958_v60 = vld [vmem:[%s6067_s4 + $0x100] sm:$0xff]  }
  0x1e   : > { %3724 = vmatpush3.bf16.msra.mxu0 %v4782_v18  ;;  %v4303_v57 = vld [vmem:[%s4859_s18 + $0xcc] ss:$24 sps:$4 sm:$0xff]   ;;  %v4305_v63 = vld [vmem:[%s4859_s18 + $0xc0] ss:$24 sps:$4 sm:$0xff]  }
  0x1f   : > { %3788 = vmatpush3.bf16.msra.mxu1 %v4788_v19  ;;  %3725 = vmatprep.subr.bf16.mxu0 %v4794_v20  ;;  %v4308_v61 = vld [vmem:[%s6067_s4 + $0x168] sm:$0xff]   ;;  %v5022_v33 = vld [vmem:[%s6067_s4 + $0x140] sm:$0xff]   ;;  %v4329_v36 = vld [vmem:[%s4859_s18 + $0x158] ss:$24 sps:$4 sm:$0xff]  }
  0x20   : > { %3789 = vmatprep.subr.bf16.mxu1 %v4800_v21  ;;  %v4388_v58 = vld [vmem:[%s4979_s25 + $0x44] ss:$24 sps:$4 sm:$0xff]  }
  0x21   : > { %v5140_v59 = vld [vmem:[%s6067_s4 + $0x38] sm:$0xff]  }
  0x22   : > { %3726 = vmatpush3.bf16.msra.mxu0 %v4808_v22 }
  0x23   : > { %3790 = vmatpush3.bf16.msra.mxu1 %v4814_v23  ;;  %3727 = vmatprep.subr.bf16.mxu0 %v4820_v24 }
  0x24   : > { %3791 = vmatprep.subr.bf16.mxu1 %v4826_v25 }
  0x26   : > { %3728 = vmatpush3.bf16.msra.mxu0 %v4835_v26 }
  0x27   : > { %3792 = vmatpush3.bf16.msra.mxu1 %v4841_v27  ;;  %3729 = vmatprep.subr.bf16.mxu0 %v4847_v28 }
  0x28   : > { %3793 = vmatprep.subr.bf16.mxu1 %v4853_v29 }
  0x2a   : > { %3730 = vmatpush3.bf16.msra.mxu0 %v4865_v30 }
  0x2b   : > { %3794 = vmatpush3.bf16.msra.mxu1 %v4871_v31  ;;  %1207 = vmatprep.subr.bf16.mxu0 %v6070_v34 }
  0x2c   : > { %3843 = vmatprep.subr.bf16.mxu1 %v4673_v0 }
  0x2d   : > { %1046 = vmatmul.mubr.bf16.vlgmr.msra.gmra.mxu0 %v4270_v32  ;;  %v5015_v32 = vld [vmem:[%s6067_s4 + $0x148] sm:$0xff]  }
  0x2e   : > { %1143 = vmatmul.mubr.bf16.vlgmr.msra.gmra.mxu1 %v4273_v35  ;;  %1208 = vmatpush1.bf16.msra.mxu0 %v4884_v37  ;;  %v4328_v35 = vld [vmem:[%s4859_s18 + $0x150] ss:$24 sps:$4 sm:$0xff]  }
  0x2f   : > { %1209 = vmatprep.subr.bf16.mxu0 %v6070_v34  ;;  %3844 = vmatpush3.bf16.msra.mxu1 %v4684_v2  ;;  %v4306_v2 = vld [vmem:[%s4859_s18 + $0xc8] ss:$24 sps:$4 sm:$0xff]  }
  0x30   : > { %1053 = vmatprep.mubr.bf16.mxu0 %v4278_v39  ;;  %3845 = vmatprep.subr.bf16.mxu1 %v4696_v4  ;;  %v4969_v4 = vand.u32 %v4308_v61, %v1009_v62  ;;  %v4334_v39 = vld [vmem:[%s4859_s18 + $0x14] ss:$24 sps:$4 sm:$0xff]   ;;  %v5148_v61 = vld [vmem:[%s6067_s4 + $0xb8] sm:$0xff]  }
  0x31   : > { %1150 = vmatprep.mubr.bf16.mxu1 %v4280_v40  ;;  %v4337_v40 = vld [vmem:[%s4979_s25 + $0x4] ss:$24 sps:$4 sm:$0xff]   ;;  %v4391_v62 = vld [vmem:[%s4979_s25 + $0x40] ss:$24 sps:$4 sm:$0xff]  }
  0x32   : > { %1210 = vmatpush1.bf16.msra.mxu0 %v4889_v38 }
  0x33   : > { %1211 = vmatprep.subr.bf16.mxu0 %v6070_v34  ;;  %3846 = vmatpush3.bf16.msra.mxu1 %v4708_v6  ;;  %v4309_v6 = vld [vmem:[%s4859_s18 + $0xf4] ss:$24 sps:$4 sm:$0xff]  }
  0x34   : > { %3847 = vmatprep.subr.bf16.mxu1 %v4720_v8  ;;  %v4311_v8 = vld [vmem:[%s4859_s18 + $0xfc] ss:$24 sps:$4 sm:$0xff]  }
  0x35   : > { %1054 = vmatmul.mubr.bf16.gmra.mxu0 %v4282_v41  ;;  %v4332_v41 = vld [vmem:[%s4859_s18 + $0x10] ss:$24 sps:$4 sm:$0xff]  }
  0x36   : > { %1151 = vmatmul.mubr.bf16.gmra.mxu1 %v4283_v42  ;;  %1212 = vmatpush1.bf16.msra.mxu0 %v4903_v43  ;;  %v4335_v42 = vld [vmem:[%s4979_s25] ss:$24 sps:$4 sm:$0xff]  }
  0x37   : > { %1213 = vmatprep.subr.bf16.mxu0 %v6070_v34  ;;  %1061 = vmatprep.mubr.bf16.mxu0 %v4285_v44  ;;  %v4338_v44 = vld [vmem:[%s4859_s18 + $0x44] ss:$24 sps:$4 sm:$0xff]  }
  0x38   : > { %1158 = vmatprep.mubr.bf16.mxu1 %v4287_v45  ;;  %3848 = vmatpush3.bf16.msra.mxu1 %v4732_v10  ;;  %v4986_v10 = vld [vmem:[%s6067_s4 + $0x160] sm:$0xff]   ;;  %v4340_v45 = vld [vmem:[%s4979_s25 + $0x34] ss:$24 sps:$4 sm:$0xff]  }
  0x39   : > { %3849 = vmatprep.subr.bf16.mxu1 %v4744_v12  ;;  %v4313_v12 = vld [vmem:[%s4859_s18 + $0xf0] ss:$24 sps:$4 sm:$0xff]  }
  0x3a   : > { %1214 = vmatpush1.bf16.msra.mxu0 %v4914_v46 }
  0x3b   : > { %1215 = vmatprep.subr.bf16.mxu0 %v6070_v34 }
  0x3c   : > { %3850 = vmatpush3.bf16.msra.mxu1 %v4756_v14  ;;  %v4314_v14 = vld [vmem:[%s4859_s18 + $0xf8] ss:$24 sps:$4 sm:$0xff]  }
  0x3d   : > { %1062 = vmatmul.mubr.bf16.gmra.mxu0 %v4290_v47  ;;  %3851 = vmatprep.subr.bf16.mxu1 %v4770_v16  ;;  %v4316_v16 = vld [vmem:[%s4859_s18 + $0x124] ss:$24 sps:$4 sm:$0xff]   ;;  %v4343_v47 = vld [vmem:[%s4979_s25 + $0x30] ss:$24 sps:$4 sm:$0xff]  }
  0x3e   : > { %1159 = vmatmul.mubr.bf16.gmra.mxu1 %v4291_v48  ;;  %1216 = vmatpush1.bf16.msra.mxu0 %v4923_v49  ;;  %v4344_v48 = vld [vmem:[%s4859_s18 + $0x74] ss:$24 sps:$4 sm:$0xff]  }
  0x3f   : > { %1069 = vmatprep.mubr.bf16.mxu0 %v4293_v50  ;;  %1166 = vmatprep.mubr.bf16.mxu1 %v4295_v51  ;;  %v4346_v50 = vld [vmem:[%s4979_s25 + $0x64] ss:$24 sps:$4 sm:$0xff]   ;;  %v4379_v51 = vld [vmem:[%s4979_s25 + $0x150] ss:$24 sps:$4 sm:$0xff]  }
  0x40   : > { %1217 = vmatprep.subr.bf16.mxu0 %v6070_v34  ;;  %3852 = vmatpush3.bf16.msra.mxu1 %v4782_v18  ;;  %v4318_v18 = vld [vmem:[%s4859_s18 + $0x12c] ss:$24 sps:$4 sm:$0xff]  }
  0x41   : > { %3853 = vmatprep.subr.bf16.mxu1 %v4794_v20  ;;  %v4998_v20 = vld [vmem:[%s6067_s4 + $0x158] sm:$0xff]  }
  0x42   : > { %1218 = vmatpush1.bf16.msra.mxu0 %v4936_v52 }
  0x43   : > { %1219 = vmatprep.subr.bf16.mxu0 %v6070_v34 }
  0x44   : > { %3854 = vmatpush3.bf16.msra.mxu1 %v4808_v22  ;;  %v5004_v22 = vld [vmem:[%s6067_s4 + $0x150] sm:$0xff]  }
  0x45   : > { %1070 = vmatmul.mubr.bf16.gmra.mxu0 %v4297_v53  ;;  %3855 = vmatprep.subr.bf16.mxu1 %v4820_v24  ;;  %v4321_v24 = vld [vmem:[%s4859_s18 + $0x120] ss:$24 sps:$4 sm:$0xff]   ;;  %v4385_v53 = vld [vmem:[%s4979_s25 + $0x14] ss:$24 sps:$4 sm:$0xff]  }
  0x46   : > { %1167 = vmatmul.mubr.bf16.gmra.mxu1 %v4298_v54  ;;  %1220 = vmatpush1.bf16.msra.mxu0 %v4945_v55  ;;  %v5123_v54 = vld [vmem:[%s6067_s4 + $0xf8] sm:$0xff]  }
  0x47   : > { %1077 = vmatprep.mubr.bf16.mxu0 %v4301_v56  ;;  %1174 = vmatprep.mubr.bf16.mxu1 %v4303_v57  ;;  %v4383_v56 = vld [vmem:[%s4979_s25 + $0x10] ss:$24 sps:$4 sm:$0xff]   ;;  %v4386_v57 = vld [vmem:[%s4979_s25 + $0x3c] ss:$24 sps:$4 sm:$0xff]  }
  0x48   : > { %1221 = vmatprep.subr.bf16.mxu0 %v6070_v34  ;;  %3856 = vmatpush3.bf16.msra.mxu1 %v4835_v26  ;;  %v4322_v26 = vld [vmem:[%s4859_s18 + $0x128] ss:$24 sps:$4 sm:$0xff]  }
  0x49   : > { %3857 = vmatprep.subr.bf16.mxu1 %v4847_v28  ;;  %v4324_v28 = vld [vmem:[%s4859_s18 + $0x154] ss:$24 sps:$4 sm:$0xff]  }
  0x4a   : > { %1222 = vmatpush1.bf16.msra.mxu0 %v4958_v60 }
  0x4b   : > { %1227 = vmatprep.subr.bf16.mxu0 %v6070_v34 }
  0x4c   : > { %3858 = vmatpush3.bf16.msra.mxu1 %v4865_v30  ;;  %v4326_v30 = vld [vmem:[%s4859_s18 + $0x15c] ss:$24 sps:$4 sm:$0xff]  }
  0x4d   : > { %1078 = vmatmul.mubr.bf16.gmra.mxu0 %v4305_v63  ;;  %1802 = vmatprep.subr.bf16.mxu1 %v6070_v34  ;;  %v5155_v63 = vld [vmem:[%s6067_s4 + $0x70] sm:$0xff]  }
  0x4e   : > { %1175 = vmatmul.mubr.bf16.gmra.mxu1 %v4306_v2  ;;  %1228 = vmatpush2.bf16.msra.mxu0 %v4969_v4  ;;  %v4392_v2 = vld [vmem:[%s4979_s25 + $0x6c] ss:$24 sps:$4 sm:$0xff]  }
  0x4f   : > { %1085 = vmatprep.mubr.bf16.mxu0 %v4309_v6  ;;  %1182 = vmatprep.mubr.bf16.mxu1 %v4311_v8  ;;  %v5162_v6 = vld [vmem:[%s6067_s4 + $0xf0] sm:$0xff]  }
  0x50   : > { %1229 = vmatprep.subr.bf16.mxu0 %v6070_v34  ;;  %v5168_v8 = vld [vmem:[%s6067_s4 + $0x30] sm:$0xff]  }
  0x52   : > { %1230 = vmatpush2.bf16.msra.mxu0 %v4986_v10 }
  0x53   : > { %1231 = vmatprep.subr.bf16.mxu0 %v6070_v34 }
  0x55   : > { %1086 = vmatmul.mubr.bf16.gmra.mxu0 %v4313_v12  ;;  %v5175_v12 = vld [vmem:[%s6067_s4 + $0x68] sm:$0xff]  }
  0x56   : > { %1183 = vmatmul.mubr.bf16.gmra.mxu1 %v4314_v14  ;;  %1093 = vmatprep.mubr.bf16.mxu0 %v4316_v16  ;;  %v5181_v14 = vld [vmem:[%s6067_s4 + $0xb0] sm:$0xff]   ;;  %v5187_v16 = vld [vmem:[%s6067_s4 + $0xe8] sm:$0xff]  }
  0x57   : > { %1190 = vmatprep.mubr.bf16.mxu1 %v4318_v18  ;;  %1232 = vmatpush2.bf16.msra.mxu0 %v4998_v20  ;;  %v4396_v18 = vld [vmem:[%s4979_s25 + $0x68] ss:$24 sps:$4 sm:$0xff]  }
  0x58   : > { %1233 = vmatprep.subr.bf16.mxu0 %v6070_v34 }
  0x5b   : > { %1234 = vmatpush2.bf16.msra.mxu0 %v5004_v22 }
  0x5c   : > { %1235 = vmatprep.subr.bf16.mxu0 %v6070_v34 }
  0x5d   : > { %1094 = vmatmul.mubr.bf16.gmra.mxu0 %v4321_v24  ;;  %v4398_v24 = vld [vmem:[%s4979_s25 + $0x9c] ss:$24 sps:$4 sm:$0xff]  }
  0x5e   : > { %1191 = vmatmul.mubr.bf16.gmra.mxu1 %v4322_v26  ;;  %1101 = vmatprep.mubr.bf16.mxu0 %v4324_v28  ;;  %v5203_v26 = vld [vmem:[%s6067_s4 + $0xa8] sm:$0xff]   ;;  %v5209_v28 = vld [vmem:[%s6067_s4 + $0x60] sm:$0xff]  }
  0x5f   : > { %1198 = vmatprep.mubr.bf16.mxu1 %v4326_v30  ;;  %1236 = vmatpush2.bf16.msra.mxu0 %v5015_v32  ;;  %v5215_v30 = vld [vmem:[%s6067_s4 + $0xe0] sm:$0xff]  }
  0x60   : > { %1237 = vmatprep.subr.bf16.mxu0 %v6070_v34 }
  0x63   : > { %1238 = vmatpush2.bf16.msra.mxu0 %v5022_v33 }
  0x64   : > { %3907 = vmatprep.subr.bf16.mxu0 %v4678_v1  ;;  %v4342_v1 = vld [vmem:[%s4859_s18 + $0x40] ss:$24 sps:$4 sm:$0xff]  }
  0x65   : > { %1102 = vmatmul.mubr.bf16.gmra.mxu0 %v4328_v35  ;;  %v5228_v35 = vld [vmem:[%s6067_s4 + $0xa0] sm:$0xff]  }
  0x66   : > { %1199 = vmatmul.mubr.bf16.gmra.mxu1 %v4329_v36  ;;  %3457 = vmatprep.mubr.msk.bf16.mxu0 %vm981_vm2, %v4334_v39  ;;  %v5234_v36 = vld [vmem:[%s6067_s4 + $0x58] sm:$0xff]  }
  0x67   : > { %1640 = vmatprep.mubr.bf16.mxu1 %v4337_v40  ;;  %v5240_v39 = vld [vmem:[%s6067_s4 + $0xd8] sm:$0xff]  }
  0x68   : > { %v5247_v40 = vld [vmem:[%s6067_s4 + $0x18] sm:$0xff]  }
  0x6d   : > { %1240 = vmatmul.mubr.bf16.vlgmr.msra.gmra.mxu0 %v4332_v41  ;;  %v5253_v41 = vld [vmem:[%s6067_s4 + $0x98] sm:$0xff]  }
  0x6e   : > { %1641 = vmatmul.mubr.bf16.vlgmr.msra.gmra.mxu1 %v4335_v42  ;;  %3908 = vmatpush3.bf16.msra.mxu0 %v4690_v3  ;;  %v4348_v3 = vld [vmem:[%s4859_s18 + $0x70] ss:$24 sps:$4 sm:$0xff]  }
  0x6f   : > { %3458 = vmatprep.mubr.msk.bf16.mxu0 %vm981_vm2, %v4338_v44  ;;  %1648 = vmatprep.mubr.bf16.mxu1 %v4340_v45  ;;  %v5259_v42 = vld [vmem:[%s6067_s4 + $0x50] sm:$0xff]  }
  0x70   : > { %1803 = vmatpush1.bf16.msra.mxu1 %v4884_v37  ;;  %3909 = vmatprep.subr.bf16.mxu0 %v4702_v5  ;;  %v4349_v5 = vld [vmem:[%s4979_s25 + $0x60] ss:$24 sps:$4 sm:$0xff]   ;;  %v4370_v37 = vld [vmem:[%s4979_s25 + $0x124] ss:$24 sps:$4 sm:$0xff]   ;;  %v5266_v45 = vld [vmem:[%s6067_s4 + $0xd0] sm:$0xff]  }
  0x71   : > { %1804 = vmatprep.subr.bf16.mxu1 %v6070_v34  ;;  %v4402_v44 = vld [vmem:[%s4979_s25 + $0x98] ss:$24 sps:$4 sm:$0xff]  }
  0x72   : > { %3910 = vmatpush3.bf16.msra.mxu0 %v4714_v7  ;;  %v4350_v7 = vld [vmem:[%s4859_s18 + $0xa4] ss:$24 sps:$4 sm:$0xff]  }
  0x73   : > { %3911 = vmatprep.subr.bf16.mxu0 %v4726_v9  ;;  %v4352_v9 = vld [vmem:[%s4979_s25 + $0x94] ss:$24 sps:$4 sm:$0xff]  }
  0x74   : > { %1805 = vmatpush1.bf16.msra.mxu1 %v4889_v38  ;;  %v4373_v38 = vld [vmem:[%s4979_s25 + $0x120] ss:$24 sps:$4 sm:$0xff]  }
  0x75   : > { %1248 = vmatmul.mubr.bf16.gmra.mxu0 %v4342_v1  ;;  %1806 = vmatprep.subr.bf16.mxu1 %v6070_v34  ;;  %v4403_v1 = vld [vmem:[%s4979_s25 + $0xa0] ss:$24 sps:$4 sm:$0xff]  }
  0x76   : > { %1649 = vmatmul.mubr.bf16.gmra.mxu1 %v4343_v47  ;;  %3459 = vmatprep.mubr.msk.bf16.mxu0 %vm981_vm2, %v4344_v48  ;;  %v4404_v47 = vld [vmem:[%s4979_s25 + $0xcc] ss:$24 sps:$4 sm:$0xff]  }
  0x77   : > { %1656 = vmatprep.mubr.bf16.mxu1 %v4346_v50  ;;  %3912 = vmatpush3.bf16.msra.mxu0 %v4738_v11  ;;  %v4354_v11 = vld [vmem:[%s4859_s18 + $0xa0] ss:$24 sps:$4 sm:$0xff]   ;;  %v4406_v48 = vld [vmem:[%s4979_s25 + $0xd4] ss:$24 sps:$4 sm:$0xff]  }
  0x78   : > { %1807 = vmatpush1.bf16.msra.mxu1 %v4903_v43  ;;  %3913 = vmatprep.subr.bf16.mxu0 %v4750_v13  ;;  %v4355_v13 = vld [vmem:[%s4979_s25 + $0x90] ss:$24 sps:$4 sm:$0xff]   ;;  %v4374_v43 = vld [vmem:[%s4859_s18 + $0x164] ss:$24 sps:$4 sm:$0xff]  }
  0x79   : > { %1808 = vmatprep.subr.bf16.mxu1 %v6070_v34  ;;  %v5275_v50 = vld [vmem:[%s6067_s4 + $0x10] sm:$0xff]  }
  0x7b   : > { %3914 = vmatpush3.bf16.msra.mxu0 %v4764_v15  ;;  %v4356_v15 = vld [vmem:[%s4859_s18 + $0xd4] ss:$24 sps:$4 sm:$0xff]  }
  0x7c   : > { %1809 = vmatpush1.bf16.msra.mxu1 %v4914_v46  ;;  %3915 = vmatprep.subr.bf16.mxu0 %v4776_v17  ;;  %v4358_v17 = vld [vmem:[%s4979_s25 + $0xc4] ss:$24 sps:$4 sm:$0xff]   ;;  %v4376_v46 = vld [vmem:[%s4979_s25 + $0x154] ss:$24 sps:$4 sm:$0xff]  }
  0x7d   : > { %1256 = vmatmul.mubr.bf16.gmra.mxu0 %v4348_v3  ;;  %1810 = vmatprep.subr.bf16.mxu1 %v6070_v34  ;;  %v5281_v3 = vld [vmem:[%s6067_s4 + $0x90] sm:$0xff]  }
  0x7e   : > { %1657 = vmatmul.mubr.bf16.gmra.mxu1 %v4349_v5  ;;  %3460 = vmatprep.mubr.msk.bf16.mxu0 %vm981_vm2, %v4350_v7  ;;  %v5287_v5 = vld [vmem:[%s6067_s4 + $0x48] sm:$0xff]  }
  0x7f   : > { %1664 = vmatprep.mubr.bf16.mxu1 %v4352_v9  ;;  %3916 = vmatpush3.bf16.msra.mxu0 %v4788_v19  ;;  %v4360_v19 = vld [vmem:[%s4859_s18 + $0xd0] ss:$24 sps:$4 sm:$0xff]  }
  0x80   : > { %1811 = vmatpush1.bf16.msra.mxu1 %v4923_v49  ;;  %3917 = vmatprep.subr.bf16.mxu0 %v4800_v21  ;;  %v4361_v21 = vld [vmem:[%s4979_s25 + $0xc0] ss:$24 sps:$4 sm:$0xff]   ;;  %v5293_v7 = vld [vmem:[%s6067_s4 + $0xc8] sm:$0xff]  }
  0x81   : > { %1812 = vmatprep.subr.bf16.mxu1 %v6070_v34  ;;  %v4378_v49 = vld [vmem:[%s4859_s18 + $0x160] ss:$24 sps:$4 sm:$0xff]   ;;  %v5300_v9 = vld [vmem:[%s6067_s4 + $0x8] sm:$0xff]  }
  0x83   : > { %3918 = vmatpush3.bf16.msra.mxu0 %v4814_v23  ;;  %v4362_v23 = vld [vmem:[%s4859_s18 + $0x104] ss:$24 sps:$4 sm:$0xff]  }
  0x84   : > { %1813 = vmatpush1.bf16.msra.mxu1 %v4936_v52  ;;  %3919 = vmatprep.subr.bf16.mxu0 %v4826_v25  ;;  %v4364_v25 = vld [vmem:[%s4979_s25 + $0xf4] ss:$24 sps:$4 sm:$0xff]  }
  0x85   : > { %1264 = vmatmul.mubr.bf16.gmra.mxu0 %v4354_v11  ;;  %1814 = vmatprep.subr.bf16.mxu1 %v6070_v34  ;;  %v4382_v52 = vld [vmem:[%s4979_s25 + $0xc] ss:$24 sps:$4 sm:$0xff]  }
  0x86   : > { %1665 = vmatmul.mubr.bf16.gmra.mxu1 %v4355_v13  ;;  %3461 = vmatprep.mubr.msk.bf16.mxu0 %vm981_vm2, %v4356_v15  ;;  %v5306_v11 = vld [vmem:[%s6067_s4 + $0x88] sm:$0xff]   ;;  %v5312_v13 = vld [vmem:[%s6067_s4 + $0x40] sm:$0xff]  }
  0x87   : > { %1672 = vmatprep.mubr.bf16.mxu1 %v4358_v17  ;;  %3920 = vmatpush3.bf16.msra.mxu0 %v4841_v27  ;;  %v4366_v27 = vld [vmem:[%s4859_s18 + $0x100] ss:$24 sps:$4 sm:$0xff]  }
  0x88   : > { %1815 = vmatpush1.bf16.msra.mxu1 %v4945_v55  ;;  %3921 = vmatprep.subr.bf16.mxu0 %v4853_v29  ;;  %v4367_v29 = vld [vmem:[%s4979_s25 + $0xf0] ss:$24 sps:$4 sm:$0xff]   ;;  %v5319_v17 = vld [vmem:[%s6067_s4 + $0xc0] sm:$0xff]  }
  0x89   : > { %1816 = vmatprep.subr.bf16.mxu1 %v6070_v34  ;;  %v4380_v55 = vld [vmem:[%s4979_s25 + $0x8] ss:$24 sps:$4 sm:$0xff]  }
  0x8a   : > { %v4408_v15 = vld [vmem:[%s4979_s25 + $0xc8] ss:$24 sps:$4 sm:$0xff]  }
  0x8b   : > { %3922 = vmatpush3.bf16.msra.mxu0 %v4871_v31  ;;  %v4368_v31 = vld [vmem:[%s4859_s18 + $0x134] ss:$24 sps:$4 sm:$0xff]  }
  0x8c   : > { %1817 = vmatpush1.bf16.msra.mxu1 %v4958_v60  ;;  %3971 = vmatprep.subr.bf16.mxu0 %v4673_v0  ;;  %v4372_v0 = vld [vmem:[%s4859_s18 + $0x130] ss:$24 sps:$4 sm:$0xff]  }
  0x8d   : > { %1272 = vmatmul.mubr.bf16.gmra.mxu0 %v4360_v19  ;;  %1822 = vmatprep.subr.bf16.mxu1 %v6070_v34  ;;  %v4390_v60 = vld [vmem:[%s4979_s25 + $0x38] ss:$24 sps:$4 sm:$0xff]  }
  0x8e   : > { %1673 = vmatmul.mubr.bf16.gmra.mxu1 %v4361_v21  ;;  %3462 = vmatprep.mubr.msk.bf16.mxu0 %vm981_vm2, %v4362_v23  ;;  %v4409_v19 = vld [vmem:[%s4979_s25 + $0xd0] ss:$24 sps:$4 sm:$0xff]   ;;  %v4410_v21 = vld [vmem:[%s4979_s25 + $0xfc] ss:$24 sps:$4 sm:$0xff]  }
  0x8f   : > { %1680 = vmatprep.mubr.bf16.mxu1 %v4364_v25  ;;  %v4412_v23 = vld [vmem:[%s4979_s25 + $0x104] ss:$24 sps:$4 sm:$0xff]  }
  0x90   : > { %1823 = vmatpush2.bf16.msra.mxu1 %v4969_v4  ;;  %v5328_v25 = vld [vmem:[%s6067_s4] sm:$0xff]  }
  0x91   : > { %1824 = vmatprep.subr.bf16.mxu1 %v6070_v34 }
  0x94   : > { %1825 = vmatpush2.bf16.msra.mxu1 %v4986_v10  ;;  %v4394_v10 = vld [vmem:[%s4979_s25 + $0x74] ss:$24 sps:$4 sm:$0xff]  }
  0x95   : > { %1280 = vmatmul.mubr.bf16.gmra.mxu0 %v4366_v27  ;;  %1826 = vmatprep.subr.bf16.mxu1 %v6070_v34  ;;  %v5334_v27 = vld [vmem:[%s6067_s4 + $0x80] sm:$0xff]  }
  0x96   : > { %1681 = vmatmul.mubr.bf16.gmra.mxu1 %v4367_v29  ;;  %3463 = vmatprep.mubr.msk.bf16.mxu0 %vm981_vm2, %v4368_v31  ;;  %v4603_v29 = vld [vmem:[%s6067_s4 + $0x78] sm:$0xff]  }
  0x97   : > { %1688 = vmatprep.mubr.bf16.mxu1 %v4370_v37  ;;  %v4414_v31 = vld [vmem:[%s4979_s25 + $0xf8] ss:$24 sps:$4 sm:$0xff]  }
  0x98   : > { %1827 = vmatpush2.bf16.msra.mxu1 %v4998_v20  ;;  %v5195_v20 = vld [vmem:[%s6067_s4 + $0x28] sm:$0xff]   ;;  %v4415_v37 = vld [vmem:[%s4979_s25 + $0x100] ss:$24 sps:$4 sm:$0xff]  }
  0x99   : > { %1828 = vmatprep.subr.bf16.mxu1 %v6070_v34 }
  0x9c   : > { %1829 = vmatpush2.bf16.msra.mxu1 %v5004_v22  ;;  %v4397_v22 = vld [vmem:[%s4979_s25 + $0x70] ss:$24 sps:$4 sm:$0xff]  }
  0x9d   : > { %1288 = vmatmul.mubr.bf16.gmra.mxu0 %v4372_v0  ;;  %1830 = vmatprep.subr.bf16.mxu1 %v6070_v34  ;;  %v4416_v0 = vld [vmem:[%s4979_s25 + $0x12c] ss:$24 sps:$4 sm:$0xff]  }
  0x9e   : > { %1689 = vmatmul.mubr.bf16.gmra.mxu1 %v4373_v38  ;;  %3464 = vmatprep.mubr.msk.bf16.mxu0 %vm981_vm2, %v4374_v43  ;;  %v4418_v38 = vld [vmem:[%s4979_s25 + $0x134] ss:$24 sps:$4 sm:$0xff]   ;;  %v4420_v43 = vld [vmem:[%s4979_s25 + $0x128] ss:$24 sps:$4 sm:$0xff]  }
  0x9f   : > { %1696 = vmatprep.mubr.bf16.mxu1 %v4376_v46  ;;  %v4421_v46 = vld [vmem:[%s4979_s25 + $0x130] ss:$24 sps:$4 sm:$0xff]  }
  0xa0   : > { %1831 = vmatpush2.bf16.msra.mxu1 %v5015_v32  ;;  %v4400_v32 = vld [vmem:[%s4979_s25 + $0xa4] ss:$24 sps:$4 sm:$0xff]  }
  0xa1   : > { %1832 = vmatprep.subr.bf16.mxu1 %v6070_v34 }
  0xa4   : > { %1833 = vmatpush2.bf16.msra.mxu1 %v5022_v33  ;;  %v5222_v33 = vld [vmem:[%s6067_s4 + $0x20] sm:$0xff]  }
  0xa5   : > { %1296 = vmatmul.mubr.bf16.gmra.mxu0 %v4378_v49  ;;  %4035 = vmatprep.subr.bf16.mxu1 %v5123_v54  ;;  %v4422_v49 = vld [vmem:[%s4979_s25 + $0x15c] ss:$24 sps:$4 sm:$0xff]  }
  0xa6   : > { %1697 = vmatmul.mubr.bf16.gmra.mxu1 %v4379_v51  ;;  %1737 = vmatprep.mubr.bf16.mxu0 %v4382_v52  ;;  %v4424_v51 = vld [vmem:[%s4979_s25 + $0x164] ss:$24 sps:$4 sm:$0xff]   ;;  %v4426_v52 = vld [vmem:[%s4979_s25 + $0x158] ss:$24 sps:$4 sm:$0xff]  }
  0xa7   : > { %3513 = vmatprep.mubr.msk.bf16.mxu1 %vm981_vm2, %v4385_v53  ;;  %v4427_v53 = vld [vmem:[%s4979_s25 + $0x160] ss:$24 sps:$4 sm:$0xff]  }
  0xad   : > { %1738 = vmatmul.mubr.bf16.vlgmr.msra.gmra.mxu0 %v4380_v55  ;;  %v4430_v55 = vld [vmem:[%s5054_s15 + $0x4] ss:$24 sps:$4 sm:$0xff]  }
  0xae   : > { %1835 = vmatmul.mubr.bf16.vlgmr.msra.gmra.mxu1 %v4383_v56  ;;  %3972 = vmatpush3.bf16.msra.mxu0 %v5140_v59  ;;  %v4433_v56 = vld [vmem:[%s5054_s15 + $0xc] ss:$24 sps:$4 sm:$0xff]  }
  0xaf   : > { %1745 = vmatprep.mubr.bf16.mxu0 %v4386_v57  ;;  %3514 = vmatprep.mubr.msk.bf16.mxu1 %vm981_vm2, %v4388_v58  ;;  %v4428_v57 = vld [vmem:[%s5054_s15] ss:$24 sps:$4 sm:$0xff]  }
  0xb0   : > { %4036 = vmatpush3.bf16.msra.mxu1 %v5148_v61  ;;  %3973 = vmatprep.subr.bf16.mxu0 %v5155_v63  ;;  %v4431_v58 = vld [vmem:[%s5054_s15 + $0x8] ss:$24 sps:$4 sm:$0xff]  }
  0xb1   : > { %4037 = vmatprep.subr.bf16.mxu1 %v5162_v6 }
  0xb2   : > { %3974 = vmatpush3.bf16.msra.mxu0 %v5168_v8 }
  0xb3   : > { %3975 = vmatprep.subr.bf16.mxu0 %v5175_v12 }
  0xb4   : > { %4038 = vmatpush3.bf16.msra.mxu1 %v5181_v14 }
  0xb5   : > { %1746 = vmatmul.mubr.bf16.gmra.mxu0 %v4390_v60  ;;  %4039 = vmatprep.subr.bf16.mxu1 %v5187_v16  ;;  %v4434_v60 = vld [vmem:[%s5054_s15 + $0x34] ss:$24 sps:$4 sm:$0xff]  }
  0xb6   : > { %1843 = vmatmul.mubr.bf16.gmra.mxu1 %v4391_v62  ;;  %1753 = vmatprep.mubr.bf16.mxu0 %v4392_v2  ;;  %v4436_v62 = vld [vmem:[%s5054_s15 + $0x3c] ss:$24 sps:$4 sm:$0xff]  }
  0xb7   : > { %3515 = vmatprep.mubr.msk.bf16.mxu1 %vm981_vm2, %v4394_v10  ;;  %3976 = vmatpush3.bf16.msra.mxu0 %v5195_v20 }
  0xb8   : > { %4040 = vmatpush3.bf16.msra.mxu1 %v5203_v26  ;;  %3977 = vmatprep.subr.bf16.mxu0 %v5209_v28 }
  0xb9   : > { %4041 = vmatprep.subr.bf16.mxu1 %v5215_v30 }
  0xbb   : > { %3978 = vmatpush3.bf16.msra.mxu0 %v5222_v33 }
  0xbc   : > { %4042 = vmatpush3.bf16.msra.mxu1 %v5228_v35  ;;  %3979 = vmatprep.subr.bf16.mxu0 %v5234_v36 }
  0xbd   : > { %1754 = vmatmul.mubr.bf16.gmra.mxu0 %v4396_v18  ;;  %4043 = vmatprep.subr.bf16.mxu1 %v5240_v39  ;;  %v5363_v18 = vld [vmem:[%s6067_s4 + $0x138] sm:$0xff]  }
  0xbe   : > { %1851 = vmatmul.mubr.bf16.gmra.mxu1 %v4397_v22  ;;  %1761 = vmatprep.mubr.bf16.mxu0 %v4398_v24 }
  0xbf   : > { %3516 = vmatprep.mubr.msk.bf16.mxu1 %vm981_vm2, %v4400_v32  ;;  %3980 = vmatpush3.bf16.msra.mxu0 %v5247_v40 }
  0xc0   : > { %4044 = vmatpush3.bf16.msra.mxu1 %v5253_v41  ;;  %3981 = vmatprep.subr.bf16.mxu0 %v5259_v42 }
  0xc1   : > { %4045 = vmatprep.subr.bf16.mxu1 %v5266_v45 }
  0xc3   : > { %3982 = vmatpush3.bf16.msra.mxu0 %v5275_v50 }
  0xc4   : > { %4046 = vmatpush3.bf16.msra.mxu1 %v5281_v3  ;;  %3983 = vmatprep.subr.bf16.mxu0 %v5287_v5 }
  0xc5   : > { %1762 = vmatmul.mubr.bf16.gmra.mxu0 %v4402_v44  ;;  %4047 = vmatprep.subr.bf16.mxu1 %v5293_v7 }
  0xc6   : > { %1859 = vmatmul.mubr.bf16.gmra.mxu1 %v4403_v1  ;;  %1769 = vmatprep.mubr.bf16.mxu0 %v4404_v47  ;;  %v4438_v47 = vld [vmem:[%s5054_s15 + $0x30] ss:$24 sps:$4 sm:$0xff]  }
  0xc7   : > { %3517 = vmatprep.mubr.msk.bf16.mxu1 %vm981_vm2, %v4406_v48  ;;  %3984 = vmatpush3.bf16.msra.mxu0 %v5300_v9 }
  0xc8   : > { %4048 = vmatpush3.bf16.msra.mxu1 %v5306_v11  ;;  %3985 = vmatprep.subr.bf16.mxu0 %v5312_v13 }
  0xc9   : > { %4049 = vmatprep.subr.bf16.mxu1 %v5319_v17 }
  0xcb   : > { %3986 = vmatpush3.bf16.msra.mxu0 %v5328_v25 }
  0xcc   : > { %4050 = vmatpush3.bf16.msra.mxu1 %v5334_v27  ;;  %2413 = vmatprep.subr.bf16.mxu0 %v6070_v34 }
  0xcd   : > { %1770 = vmatmul.mubr.bf16.gmra.mxu0 %v4408_v15  ;;  %4099 = vmatprep.subr.bf16.mxu1 %v4603_v29  ;;  %v5373_v15 = vld [vmem:[%s6067_s4 + $0x130] sm:$0xff]  }
  0xce   : > { %1867 = vmatmul.mubr.bf16.gmra.mxu1 %v4409_v19  ;;  %1777 = vmatprep.mubr.bf16.mxu0 %v4410_v21  ;;  %v4439_v19 = vld [vmem:[%s5054_s15 + $0x38] ss:$24 sps:$4 sm:$0xff]  }
  0xcf   : > { %3518 = vmatprep.mubr.msk.bf16.mxu1 %vm981_vm2, %v4412_v23  ;;  %v4440_v23 = vld [vmem:[%s5054_s15 + $0x64] ss:$24 sps:$4 sm:$0xff]  }
  0xd5   : > { %1778 = vmatmul.mubr.bf16.gmra.mxu0 %v4414_v31 }
  0xd6   : > { %1875 = vmatmul.mubr.bf16.gmra.mxu1 %v4415_v37  ;;  %1785 = vmatprep.mubr.bf16.mxu0 %v4416_v0  ;;  %v4442_v37 = vld [vmem:[%s5054_s15 + $0x6c] ss:$24 sps:$4 sm:$0xff]  }
  0xd7   : > { %3519 = vmatprep.mubr.msk.bf16.mxu1 %vm981_vm2, %v4418_v38 }
  0xdd   : > { %1786 = vmatmul.mubr.bf16.gmra.mxu0 %v4420_v43  ;;  %v5387_v43 = vld [vmem:[%s6067_s4 + $0x128] sm:$0xff]  }
  0xde   : > { %1883 = vmatmul.mubr.bf16.gmra.mxu1 %v4421_v46  ;;  %1793 = vmatprep.mubr.bf16.mxu0 %v4422_v49 }
  0xdf   : > { %3520 = vmatprep.mubr.msk.bf16.mxu1 %vm981_vm2, %v4424_v51 }
  0xe5   : > { %1794 = vmatmul.mubr.bf16.gmra.mxu0 %v4426_v52 }
  0xe6   : > { %1891 = vmatmul.mubr.bf16.gmra.mxu1 %v4427_v53  ;;  %2251 = vmatprep.mubr.bf16.mxu0 %v4430_v55  ;;  %v4444_v53 = vld [vmem:[%s5054_s15 + $0x60] ss:$24 sps:$4 sm:$0xff]  }
  0xe7   : > { %2348 = vmatprep.mubr.bf16.mxu1 %v4433_v56  ;;  %v5399_v56 = vld [vmem:[%s6067_s4 + $0x120] sm:$0xff]  }
  0xed   : > { %v3731_v2 = vpop.f32.mrf.mxu0  ;;  %2252 = vmatmul.mubr.bf16.vlgmr.msra.gmra.mxu0 %v4428_v57  ;;  %v4445_v57 = vld [vmem:[%s5054_s15 + $0x68] ss:$24 sps:$4 sm:$0xff]  }
  0xee   : > { %v3795_v10 = vpop.f32.mrf.mxu1  ;;  %2349 = vmatmul.mubr.bf16.vlgmr.msra.gmra.mxu1 %v4431_v58  ;;  %2414 = vmatpush1.bf16.msra.mxu0 %v5363_v18 }
  0xef   : > { %v3732_v22 = vpop.f32.mrf.mxu0  ;;  %2415 = vmatprep.subr.bf16.mxu0 %v6070_v34  ;;  %2259 = vmatprep.mubr.bf16.mxu0 %v4434_v60  ;;  %v4446_v60 = vld [vmem:[%s5054_s15 + $0x94] ss:$24 sps:$4 sm:$0xff]  }
  0xf0   : > { %v3733_v24 = vadd.f32 %v3732_v22, %v3731_v2  ;;  %v3796_v32 = vpop.f32.mrf.mxu1  ;;  %2356 = vmatprep.mubr.bf16.mxu1 %v4436_v62  ;;  %4100 = vmatpush3.bf16.msra.mxu1 %v5140_v59  ;;  %v4448_v62 = vld [vmem:[%s5054_s15 + $0x9c] ss:$24 sps:$4 sm:$0xff]  }
  0xf1   : > { %v3797_v44 = vadd.f32 %v3796_v32, %v3795_v10  ;;  %v3734_v1 = vpop.f32.mrf.mxu0  ;;  %4101 = vmatprep.subr.bf16.mxu1 %v5155_v63  ;;  %v5413_v32 = vld [vmem:[%s6067_s4 + $0x118] sm:$0xff]  }
  0xf2   : > { %v3798_v48 = vpop.f32.mrf.mxu1  ;;  %2416 = vmatpush1.bf16.msra.mxu0 %v5373_v15 }
  0xf3   : > { %v3735_v21 = vpop.f32.mrf.mxu0  ;;  %2417 = vmatprep.subr.bf16.mxu0 %v6070_v34  ;;  %v5379_v29 = vadd.f32 %v3797_v44, %v3733_v24 }
  0xf4   : > { %v3736_v59 = vadd.f32 %v3735_v21, %v3734_v1  ;;  %v3799_v31 = vpop.f32.mrf.mxu1  ;;  %4102 = vmatpush3.bf16.msra.mxu1 %v5168_v8 }
  0xf5   : > { %v3800_v63 = vadd.f32 %v3799_v31, %v3798_v48  ;;  %v3737_v0 = vpop.f32.mrf.mxu0  ;;  %2260 = vmatmul.mubr.bf16.gmra.mxu0 %v4438_v47  ;;  %4103 = vmatprep.subr.bf16.mxu1 %v5175_v12 }
  0xf6   : > { %v3801_v38 = vpop.f32.mrf.mxu1  ;;  %2357 = vmatmul.mubr.bf16.gmra.mxu1 %v4439_v19  ;;  %2418 = vmatpush1.bf16.msra.mxu0 %v5387_v43  ;;  %v4450_v19 = vld [vmem:[%s5054_s15 + $0x90] ss:$24 sps:$4 sm:$0xff]  }
  0xf7   : > { %v3738_v46 = vpop.f32.mrf.mxu0  ;;  %2419 = vmatprep.subr.bf16.mxu0 %v6070_v34  ;;  %2267 = vmatprep.mubr.bf16.mxu0 %v4440_v23  ;;  %v5391_v8 = vadd.f32 %v3800_v63, %v3736_v59  ;;  %v4451_v23 = vld [vmem:[%s5054_s15 + $0x98] ss:$24 sps:$4 sm:$0xff]   ;;  %v4457_v63 = vld [vmem:[%s5054_s15 + $0xcc] ss:$24 sps:$4 sm:$0xff]  }
  0xf8   : > { %v3739_v49 = vadd.f32 %v3738_v46, %v3737_v0  ;;  %v3802_v12 = vpop.f32.mrf.mxu1  ;;  %2364 = vmatprep.mubr.bf16.mxu1 %v4442_v37  ;;  %4104 = vmatpush3.bf16.msra.mxu1 %v5195_v20  ;;  %v5426_v59 = vld [vmem:[%s6067_s4 + $0x110] sm:$0xff]   ;;  %v4454_v37 = vld [vmem:[%s5054_s15 + $0xc4] ss:$24 sps:$4 sm:$0xff]  }
  0xf9   : > { %v3803_v51 = vadd.f32 %v3802_v12, %v3801_v38  ;;  %v3740_v52 = vpop.f32.mrf.mxu0  ;;  %4105 = vmatprep.subr.bf16.mxu1 %v5209_v28  ;;  %v5439_v12 = vld [vmem:[%s6067_s4 + $0x108] sm:$0xff]  }
  0xfa   : > { %v3804_v55 = vpop.f32.mrf.mxu1  ;;  %2420 = vmatpush1.bf16.msra.mxu0 %v5399_v56 }
  0xfb   : > { %v3741_v58 = vpop.f32.mrf.mxu0  ;;  %2421 = vmatprep.subr.bf16.mxu0 %v6070_v34  ;;  %v5406_v20 = vadd.f32 %v3803_v51, %v3739_v49 }
  0xfc   : > { %v3742_v2 = vadd.f32 %v3741_v58, %v3740_v52  ;;  %v3805_v10 = vpop.f32.mrf.mxu1  ;;  %4106 = vmatpush3.bf16.msra.mxu1 %v5222_v33 }
  0xfd   : > { %v3806_v28 = vadd.f32 %v3805_v10, %v3804_v55  ;;  %v3743_v22 = vpop.f32.mrf.mxu0  ;;  %2268 = vmatmul.mubr.bf16.gmra.mxu0 %v4444_v53  ;;  %4107 = vmatprep.subr.bf16.mxu1 %v5234_v36  ;;  %v4460_v10 = vld [vmem:[%s5054_s15 + $0xf4] ss:$24 sps:$4 sm:$0xff]  }
  0xfe   : > { %v3807_v24 = vpop.f32.mrf.mxu1  ;;  %2365 = vmatmul.mubr.bf16.gmra.mxu1 %v4445_v57  ;;  %2422 = vmatpush1.bf16.msra.mxu0 %v5413_v32  ;;  %v4452_v57 = vld [vmem:[%s5054_s15 + $0xc0] ss:$24 sps:$4 sm:$0xff]  }
  0xff   : > { %v3744_v44 = vpop.f32.mrf.mxu0  ;;  %2275 = vmatprep.mubr.bf16.mxu0 %v4446_v60  ;;  %2372 = vmatprep.mubr.bf16.mxu1 %v4448_v62  ;;  %v5416_v33 = vadd.f32 %v3806_v28, %v3742_v2  ;;  %v4455_v60 = vld [vmem:[%s5054_s15 + $0xc8] ss:$24 sps:$4 sm:$0xff]   ;;  %v4463_v28 = vld [vmem:[%s5054_s15 + $0xfc] ss:$24 sps:$4 sm:$0xff]  }
 0x100   : > { %v3745_v1 = vadd.f32 %v3744_v44, %v3743_v22  ;;  %v3808_v47 = vpop.f32.mrf.mxu1  ;;  %2423 = vmatprep.subr.bf16.mxu0 %v6070_v34  ;;  %4108 = vmatpush3.bf16.msra.mxu1 %v5247_v40  ;;  %v5452_v62 = vld [vmem:[%s6067_s4 + $0x100] sm:$0xff]  }
 0x101   : > { %v3809_v36 = vadd.f32 %v3808_v47, %v3807_v24  ;;  %v3746_v48 = vpop.f32.mrf.mxu0  ;;  %4109 = vmatprep.subr.bf16.mxu1 %v5259_v42 }
 0x102   : > { %v3810_v21 = vpop.f32.mrf.mxu1  ;;  %2424 = vmatpush1.bf16.msra.mxu0 %v5426_v59 }
 0x103   : > { %v3747_v31 = vpop.f32.mrf.mxu0  ;;  %2425 = vmatprep.subr.bf16.mxu0 %v6070_v34  ;;  %v5432_v40 = vadd.f32 %v3809_v36, %v3745_v1 }
 0x104   : > { %v3748_v0 = vadd.f32 %v3747_v31, %v3746_v48  ;;  %v3811_v38 = vpop.f32.mrf.mxu1  ;;  %4110 = vmatpush3.bf16.msra.mxu1 %v5275_v50 }
 0x105   : > { %v3812_v42 = vadd.f32 %v3811_v38, %v3810_v21  ;;  %v3749_v46 = vpop.f32.mrf.mxu0  ;;  %2276 = vmatmul.mubr.bf16.gmra.mxu0 %v4450_v19  ;;  %4111 = vmatprep.subr.bf16.mxu1 %v5287_v5 }
 0x106   : > { %v3813_v49 = vpop.f32.mrf.mxu1  ;;  %2373 = vmatmul.mubr.bf16.gmra.mxu1 %v4451_v23  ;;  %2426 = vmatpush1.bf16.msra.mxu0 %v5439_v12  ;;  %v4458_v23 = vld [vmem:[%s5054_s15 + $0xf0] ss:$24 sps:$4 sm:$0xff]  }
 0x107   : > { %v3750_v51 = vpop.f32.mrf.mxu0  ;;  %2283 = vmatprep.mubr.bf16.mxu0 %v4454_v37  ;;  %2380 = vmatprep.mubr.bf16.mxu1 %v4457_v63  ;;  %v5442_v50 = vadd.f32 %v3812_v42, %v3748_v0  ;;  %v4461_v37 = vld [vmem:[%s5054_s15 + $0xf8] ss:$24 sps:$4 sm:$0xff]   ;;  %v5471_v63 = vld [vmem:[%s6067_s4 + $0x160] sm:$0xff]  }
 0x108   : > { %v3751_v52 = vadd.f32 %v3750_v51, %v3749_v46  ;;  %v3814_v53 = vpop.f32.mrf.mxu1  ;;  %2427 = vmatprep.subr.bf16.mxu0 %v6070_v34  ;;  %4112 = vmatpush3.bf16.msra.mxu1 %v5300_v9  ;;  %v4466_v0 = vld [vmem:[%s5054_s15 + $0x124] ss:$24 sps:$4 sm:$0xff]  }
 0x109   : > { %v3815_v5 = vadd.f32 %v3814_v53, %v3813_v49  ;;  %v3752_v55 = vpop.f32.mrf.mxu0  ;;  %4113 = vmatprep.subr.bf16.mxu1 %v5312_v13  ;;  %v4469_v42 = vld [vmem:[%s5054_s15 + $0x12c] ss:$24 sps:$4 sm:$0xff]  }
 0x10a   : > { %v3816_v58 = vpop.f32.mrf.mxu1  ;;  %2428 = vmatpush1.bf16.msra.mxu0 %v5452_v62 }
 0x10b   : > { %v3753_v2 = vpop.f32.mrf.mxu0  ;;  %2433 = vmatprep.subr.bf16.mxu0 %v6070_v34  ;;  %v5458_v9 = vadd.f32 %v3815_v5, %v3751_v52 }
 0x10c   : > { %v3754_v22 = vadd.f32 %v3753_v2, %v3752_v55  ;;  %v3817_v24 = vpop.f32.mrf.mxu1  ;;  %4114 = vmatpush3.bf16.msra.mxu1 %v5328_v25 }
 0x10d   : > { %v3818_v13 = vadd.f32 %v3817_v24, %v3816_v58  ;;  %v3755_v44 = vpop.f32.mrf.mxu0  ;;  %2284 = vmatmul.mubr.bf16.gmra.mxu0 %v4452_v57  ;;  %3024 = vmatprep.subr.bf16.mxu1 %v6070_v34  ;;  %v5482_v57 = vld [vmem:[%s6067_s4 + $0x158] sm:$0xff]  }
 0x10e   : > { %v3819_v1 = vpop.f32.mrf.mxu1  ;;  %2381 = vmatmul.mubr.bf16.gmra.mxu1 %v4455_v60  ;;  %2434 = vmatpush2.bf16.msra.mxu0 %v4969_v4 }
 0x10f   : > { %v3756_v47 = vpop.f32.mrf.mxu0  ;;  %2291 = vmatprep.mubr.bf16.mxu0 %v4460_v10  ;;  %2388 = vmatprep.mubr.bf16.mxu1 %v4463_v28  ;;  %v5463_v36 = vadd.f32 %v3818_v13, %v3754_v22  ;;  %v4464_v22 = vld [vmem:[%s5054_s15 + $0x120] ss:$24 sps:$4 sm:$0xff]  }
 0x110   : > { %v3757_v48 = vadd.f32 %v3756_v47, %v3755_v44  ;;  %v3820_v25 = vpop.f32.mrf.mxu1  ;;  %2435 = vmatprep.subr.bf16.mxu0 %v6070_v34  ;;  %v4467_v13 = vld [vmem:[%s5054_s15 + $0x128] ss:$24 sps:$4 sm:$0xff]   ;;  %v4472_v44 = vld [vmem:[%s5054_s15 + $0x154] ss:$24 sps:$4 sm:$0xff]  }
 0x111   : > { %v3821_v19 = vadd.f32 %v3820_v25, %v3819_v1  ;;  %v3758_v21 = vpop.f32.mrf.mxu0  ;;  %v5494_v47 = vld [vmem:[%s6067_s4 + $0x150] sm:$0xff]  }
 0x112   : > { %v3822_v31 = vpop.f32.mrf.mxu1  ;;  %2436 = vmatpush2.bf16.msra.mxu0 %v5471_v63 }
 0x113   : > { %v3759_v38 = vpop.f32.mrf.mxu0  ;;  %2437 = vmatprep.subr.bf16.mxu0 %v6070_v34  ;;  %v5477_v46 = vadd.f32 %v3821_v19, %v3757_v48  ;;  %v4475_v48 = vld [vmem:[%s5054_s15 + $0x15c] ss:$24 sps:$4 sm:$0xff]  }
 0x114   : > { %v3760_v49 = vadd.f32 %v3759_v38, %v3758_v21  ;;  %v3823_v51 = vpop.f32.mrf.mxu1  ;;  %v5504_v38 = vld [vmem:[%s6067_s4 + $0x148] sm:$0xff]  }
 0x115   : > { %v3824_v52 = vadd.f32 %v3823_v51, %v3822_v31  ;;  %v3761_v53 = vpop.f32.mrf.mxu0  ;;  %2292 = vmatmul.mubr.bf16.gmra.mxu0 %v4458_v23 }
 0x116   : > { %v3825_v5 = vpop.f32.mrf.mxu1  ;;  %2389 = vmatmul.mubr.bf16.gmra.mxu1 %v4461_v37  ;;  %2299 = vmatprep.mubr.bf16.mxu0 %v4466_v0 }
 0x117   : > { %v3762_v55 = vpop.f32.mrf.mxu0  ;;  %2396 = vmatprep.mubr.bf16.mxu1 %v4469_v42  ;;  %2438 = vmatpush2.bf16.msra.mxu0 %v5482_v57  ;;  %v5485_v58 = vadd.f32 %v3824_v52, %v3760_v49 }
 0x118   : > { %v3763_v60 = vadd.f32 %v3762_v55, %v3761_v53  ;;  %v3826_v2 = vpop.f32.mrf.mxu1  ;;  %2439 = vmatprep.subr.bf16.mxu0 %v6070_v34 }
 0x119   : > { %v3827_v10 = vadd.f32 %v3826_v2, %v3825_v5  ;;  %v3764_v28 = vpop.f32.mrf.mxu0  ;;  %v4470_v5 = vld [vmem:[%s5054_s15 + $0x150] ss:$24 sps:$4 sm:$0xff]   ;;  %v4478_v2 = vld [vmem:[%s5054_s15 + $0x14] ss:$24 sps:$4 sm:$0xff]  }
 0x11a   : > { %v3828_v24 = vpop.f32.mrf.mxu1 }
 0x11b   : > { %v3765_v1 = vpop.f32.mrf.mxu0  ;;  %2440 = vmatpush2.bf16.msra.mxu0 %v5494_v47  ;;  %v5498_v25 = vadd.f32 %v3827_v10, %v3763_v60  ;;  %v4473_v60 = vld [vmem:[%s5054_s15 + $0x158] ss:$24 sps:$4 sm:$0xff]  }
 0x11c   : > { %v3766_v19 = vadd.f32 %v3765_v1, %v3764_v28  ;;  %v3829_v21 = vpop.f32.mrf.mxu1  ;;  %2441 = vmatprep.subr.bf16.mxu0 %v6070_v34  ;;  %v5516_v28 = vld [vmem:[%s6067_s4 + $0x140] sm:$0xff]  }
 0x11d   : > { %v3830_v23 = vadd.f32 %v3829_v21, %v3828_v24  ;;  %v3767_v31 = vpop.f32.mrf.mxu0  ;;  %2300 = vmatmul.mubr.bf16.gmra.mxu0 %v4464_v22  ;;  %v4481_v22 = vld [vmem:[%s5134_s20 + $0x4] ss:$24 sps:$4 sm:$0xff]  }
 0x11e   : > { %v3831_v37 = vpop.f32.mrf.mxu1  ;;  %2397 = vmatmul.mubr.bf16.gmra.mxu1 %v4467_v13  ;;  %2307 = vmatprep.mubr.bf16.mxu0 %v4472_v44 }
 0x11f   : > { %v3768_v0 = vpop.f32.mrf.mxu0  ;;  %2404 = vmatprep.mubr.bf16.mxu1 %v4475_v48  ;;  %2442 = vmatpush2.bf16.msra.mxu0 %v5504_v38  ;;  %v5507_v42 = vadd.f32 %v3830_v23, %v3766_v19 }
 0x120   : > { %v3769_v49 = vadd.f32 %v3768_v0, %v3767_v31  ;;  %v3832_v51 = vpop.f32.mrf.mxu1  ;;  %2443 = vmatprep.subr.bf16.mxu0 %v6070_v34 }
 0x121   : > { %v3833_v52 = vadd.f32 %v3832_v51, %v3831_v37  ;;  %v3770_v53 = vpop.f32.mrf.mxu0  ;;  %v4476_v51 = vld [vmem:[%s5054_s15 + $0x10] ss:$24 sps:$4 sm:$0xff]  }
 0x122   : > { %v3834_v55 = vpop.f32.mrf.mxu1 }
 0x123   : > { %v3771_v10 = vpop.f32.mrf.mxu0  ;;  %2444 = vmatpush2.bf16.msra.mxu0 %v5516_v28  ;;  %v5520_v24 = vadd.f32 %v3833_v52, %v3769_v49  ;;  %v4479_v52 = vld [vmem:[%s5134_s20] ss:$24 sps:$4 sm:$0xff]  }
 0x124   : > { %v3772_v13 = vadd.f32 %v3771_v10, %v3770_v53  ;;  %v3835_v44 = vpop.f32.mrf.mxu1  ;;  %4163 = vmatprep.subr.bf16.mxu0 %v5123_v54 }
 0x125   : > { %v3836_v1 = vadd.f32 %v3835_v44, %v3834_v55  ;;  %v3773_v48 = vpop.f32.mrf.mxu0  ;;  %2308 = vmatmul.mubr.bf16.gmra.mxu0 %v4470_v5  ;;  %v4482_v55 = vld [vmem:[%s5054_s15 + $0x44] ss:$24 sps:$4 sm:$0xff]   ;;  %v4487_v44 = vld [vmem:[%s5134_s20 + $0x34] ss:$24 sps:$4 sm:$0xff]  }
 0x126   : > { %v3837_v19 = vpop.f32.mrf.mxu1  ;;  %2405 = vmatmul.mubr.bf16.gmra.mxu1 %v4473_v60  ;;  %3569 = vmatprep.mubr.msk.bf16.mxu0 %vm981_vm2, %v4478_v2 }
 0x127   : > { %v3774_v21 = vpop.f32.mrf.mxu0  ;;  %2862 = vmatprep.mubr.bf16.mxu1 %v4481_v22  ;;  %v5524_v23 = vadd.f32 %v3836_v1, %v3772_v13 }
 0x128   : > { %v3775_v31 = vadd.f32 %v3774_v21, %v3773_v48  ;;  %v3838_v37 = vpop.f32.mrf.mxu1  ;;  %v4484_v21 = vld [vmem:[%s5054_s15 + $0x40] ss:$24 sps:$4 sm:$0xff]  }
 0x129   : > { %v3839_v0 = vadd.f32 %v3838_v37, %v3837_v19  ;;  %v3776_v49 = vpop.f32.mrf.mxu0 }
 0x12a   : > { %v3840_v54 = vpop.f32.mrf.mxu1 }
 0x12b   : > { %v3777_v53 = vpop.f32.mrf.mxu0  ;;  %v5529_v10 = vadd.f32 %v3839_v0, %v3775_v31  ;;  %v6074_v31 = vmov 0   ;;  %v4485_v0 = vld [vmem:[%s5134_s20 + $0x30] ss:$24 sps:$4 sm:$0xff]  }
 0x12c   : > { %v3778_v5 = vadd.f32 %v3777_v53, %v3776_v49  ;;  %v3841_v60 = vpop.f32.mrf.mxu1 }
 0x12d   : > { %v3842_v2 = vadd.f32 %v3841_v60, %v3840_v54  ;;  %v1241_v34 = vpop.f32.mrf.mxu0  ;;  %2446 = vmatmul.mubr.bf16.vlgmr.msra.gmra.mxu0 %v4476_v51  ;;  %v4493_v51 = vld [vmem:[%s5134_s20 + $0x64] ss:$24 sps:$4 sm:$0xff]  }
 0x12e   : > { %v5533_v22 = vadd.f32 %v1241_v34, %v5379_v29  ;;  %v3859_v13 = vpop.f32.mrf.mxu1  ;;  %2863 = vmatmul.mubr.bf16.vlgmr.msra.gmra.mxu1 %v4479_v52  ;;  %4164 = vmatpush3.bf16.msra.mxu0 %v5148_v61 }
 0x12f   : > { %v1243_v1 = vpop.f32.mrf.mxu0  ;;  %3570 = vmatprep.mubr.msk.bf16.mxu0 %vm981_vm2, %v4482_v55  ;;  %3025 = vmatpush1.bf16.msra.mxu1 %v5363_v18  ;;  %v5538_v48 = vadd.f32 %v3842_v2, %v3778_v5  ;;  %v4488_v18 = vld [vmem:[%s5054_s15 + $0x74] ss:$24 sps:$4 sm:$0xff]   ;;  %v4490_v55 = vld [vmem:[%s5054_s15 + $0x70] ss:$24 sps:$4 sm:$0xff]   ;;  %v4494_v2 = vld [vmem:[%s5054_s15 + $0xa4] ss:$24 sps:$4 sm:$0xff]  }
 0x130   : > { %v3860_v19 = vpop.f32.mrf.mxu1  ;;  %2870 = vmatprep.mubr.bf16.mxu1 %v4487_v44  ;;  %4165 = vmatprep.subr.bf16.mxu0 %v5162_v6  ;;  %v4491_v44 = vld [vmem:[%s5134_s20 + $0x60] ss:$24 sps:$4 sm:$0xff]   ;;  %v4499_v1 = vld [vmem:[%s5134_s20 + $0x94] ss:$24 sps:$4 sm:$0xff]  }
 0x131   : > { %v5541_v34 = vadd.f32 %v3860_v19, %v3859_v13  ;;  %v1244_v29 = vpop.f32.mrf.mxu0  ;;  %3026 = vmatprep.subr.bf16.mxu1 %v6074_v31 }
 0x132   : > { %v5546_v61 = vadd.f32 %v1244_v29, %v5391_v8  ;;  %v3862_v37 = vpop.f32.mrf.mxu1  ;;  %4166 = vmatpush3.bf16.msra.mxu0 %v5181_v14  ;;  %v4496_v29 = vld [vmem:[%s5054_s15 + $0xa0] ss:$24 sps:$4 sm:$0xff]  }
 0x133   : > { %v1246_v49 = vpop.f32.mrf.mxu0  ;;  %3027 = vmatpush1.bf16.msra.mxu1 %v5373_v15  ;;  %4167 = vmatprep.subr.bf16.mxu0 %v5187_v16 }
 0x134   : > { %v3863_v6 = vpop.f32.mrf.mxu1  ;;  %3028 = vmatprep.subr.bf16.mxu1 %v6074_v31 }
 0x135   : > { %v5555_v54 = vadd.f32 %v3863_v6, %v3862_v37  ;;  %v1249_v52 = vpop.f32.mrf.mxu0  ;;  %2454 = vmatmul.mubr.bf16.gmra.mxu0 %v4484_v21 }
 0x136   : > { %v5558_v8 = vadd.f32 %v1249_v52, %v5406_v20  ;;  %v3865_v14 = vpop.f32.mrf.mxu1  ;;  %2871 = vmatmul.mubr.bf16.gmra.mxu1 %v4485_v0  ;;  %3571 = vmatprep.mubr.msk.bf16.mxu0 %vm981_vm2, %v4488_v18  ;;  %v4497_v0 = vld [vmem:[%s5134_s20 + $0x90] ss:$24 sps:$4 sm:$0xff]   ;;  %v4500_v18 = vld [vmem:[%s5054_s15 + $0xd4] ss:$24 sps:$4 sm:$0xff]  }
 0x137   : > { %v1251_v15 = vpop.f32.mrf.mxu0  ;;  %2878 = vmatprep.mubr.bf16.mxu1 %v4493_v51  ;;  %4168 = vmatpush3.bf16.msra.mxu0 %v5203_v26  ;;  %v4505_v51 = vld [vmem:[%s5134_s20 + $0xc4] ss:$24 sps:$4 sm:$0xff]   ;;  %v4502_v52 = vld [vmem:[%s5054_s15 + $0xd0] ss:$24 sps:$4 sm:$0xff]  }
 0x138   : > { %v3866_v16 = vpop.f32.mrf.mxu1  ;;  %3029 = vmatpush1.bf16.msra.mxu1 %v5387_v43  ;;  %4169 = vmatprep.subr.bf16.mxu0 %v5215_v30 }
 0x139   : > { %v5564_v53 = vadd.f32 %v3866_v16, %v3865_v14  ;;  %v1252_v20 = vpop.f32.mrf.mxu0  ;;  %3030 = vmatprep.subr.bf16.mxu1 %v6074_v31  ;;  %v4503_v16 = vld [vmem:[%s5134_s20 + $0xc0] ss:$24 sps:$4 sm:$0xff]  }
 0x13a   : > { %v5569_v5 = vadd.f32 %v1252_v20, %v5416_v33  ;;  %v3868_v60 = vpop.f32.mrf.mxu1  ;;  %v4506_v20 = vld [vmem:[%s5054_s15 + $0x104] ss:$24 sps:$4 sm:$0xff]  }
 0x13b   : > { %v1254_v13 = vpop.f32.mrf.mxu0  ;;  %4170 = vmatpush3.bf16.msra.mxu0 %v5228_v35 }
 0x13c   : > { %v3869_v26 = vpop.f32.mrf.mxu1  ;;  %3031 = vmatpush1.bf16.msra.mxu1 %v5399_v56  ;;  %4171 = vmatprep.subr.bf16.mxu0 %v5240_v39 }
 0x13d   : > { %v5577_v30 = vadd.f32 %v3869_v26, %v3868_v60  ;;  %v1257_v43 = vpop.f32.mrf.mxu0  ;;  %2462 = vmatmul.mubr.bf16.gmra.mxu0 %v4490_v55  ;;  %3032 = vmatprep.subr.bf16.mxu1 %v6074_v31  ;;  %v4511_v60 = vld [vmem:[%s5134_s20 + $0xf4] ss:$24 sps:$4 sm:$0xff]  }
 0x13e   : > { %v5581_v33 = vadd.f32 %v1257_v43, %v5432_v40  ;;  %v3871_v19 = vpop.f32.mrf.mxu1  ;;  %2879 = vmatmul.mubr.bf16.gmra.mxu1 %v4491_v44  ;;  %3572 = vmatprep.mubr.msk.bf16.mxu0 %vm981_vm2, %v4494_v2  ;;  %v4509_v43 = vld [vmem:[%s5134_s20 + $0xf0] ss:$24 sps:$4 sm:$0xff]  }
 0x13f   : > { %v1259_v35 = vpop.f32.mrf.mxu0  ;;  %2886 = vmatprep.mubr.bf16.mxu1 %v4499_v1  ;;  %4172 = vmatpush3.bf16.msra.mxu0 %v5253_v41  ;;  %v4508_v1 = vld [vmem:[%s5054_s15 + $0x100] ss:$24 sps:$4 sm:$0xff]  }
 0x140   : > { %v3872_v39 = vpop.f32.mrf.mxu1  ;;  %3033 = vmatpush1.bf16.msra.mxu1 %v5413_v32  ;;  %4173 = vmatprep.subr.bf16.mxu0 %v5266_v45 }
 0x141   : > { %v5587_v56 = vadd.f32 %v3872_v39, %v3871_v19  ;;  %v1260_v40 = vpop.f32.mrf.mxu0  ;;  %3034 = vmatprep.subr.bf16.mxu1 %v6074_v31  ;;  %v4512_v19 = vld [vmem:[%s5054_s15 + $0x134] ss:$24 sps:$4 sm:$0xff]   ;;  %v4517_v39 = vld [vmem:[%s5134_s20 + $0x124] ss:$24 sps:$4 sm:$0xff]  }
 0x142   : > { %v5592_v21 = vadd.f32 %v1260_v40, %v5442_v50  ;;  %v3874_v37 = vpop.f32.mrf.mxu1 }
 0x143   : > { %v1262_v49 = vpop.f32.mrf.mxu0  ;;  %4174 = vmatpush3.bf16.msra.mxu0 %v5281_v3 }
 0x144   : > { %v3875_v41 = vpop.f32.mrf.mxu1  ;;  %3035 = vmatpush1.bf16.msra.mxu1 %v5426_v59  ;;  %4175 = vmatprep.subr.bf16.mxu0 %v5293_v7 }
 0x145   : > { %v5600_v45 = vadd.f32 %v3875_v41, %v3874_v37  ;;  %v1265_v32 = vpop.f32.mrf.mxu0  ;;  %2470 = vmatmul.mubr.bf16.gmra.mxu0 %v4496_v29  ;;  %3036 = vmatprep.subr.bf16.mxu1 %v6074_v31 }
 0x146   : > { %v5604_v50 = vadd.f32 %v1265_v32, %v5458_v9  ;;  %v3877_v6 = vpop.f32.mrf.mxu1  ;;  %2887 = vmatmul.mubr.bf16.gmra.mxu1 %v4497_v0  ;;  %3573 = vmatprep.mubr.msk.bf16.mxu0 %vm981_vm2, %v4500_v18  ;;  %v4515_v32 = vld [vmem:[%s5134_s20 + $0x120] ss:$24 sps:$4 sm:$0xff]  }
 0x147   : > { %v1267_v3 = vpop.f32.mrf.mxu0  ;;  %2894 = vmatprep.mubr.bf16.mxu1 %v4505_v51  ;;  %4176 = vmatpush3.bf16.msra.mxu0 %v5306_v11  ;;  %v4514_v51 = vld [vmem:[%s5054_s15 + $0x130] ss:$24 sps:$4 sm:$0xff]  }
 0x148   : > { %v3878_v7 = vpop.f32.mrf.mxu1  ;;  %3037 = vmatpush1.bf16.msra.mxu1 %v5439_v12  ;;  %4177 = vmatprep.subr.bf16.mxu0 %v5319_v17 }
 0x149   : > { %v5610_v59 = vadd.f32 %v3878_v7, %v3877_v6  ;;  %v1268_v9 = vpop.f32.mrf.mxu0  ;;  %3038 = vmatprep.subr.bf16.mxu1 %v6074_v31  ;;  %v4518_v6 = vld [vmem:[%s5054_s15 + $0x164] ss:$24 sps:$4 sm:$0xff]   ;;  %v4523_v7 = vld [vmem:[%s5134_s20 + $0x154] ss:$24 sps:$4 sm:$0xff]  }
 0x14a   : > { %v5615_v14 = vadd.f32 %v1268_v9, %v5463_v36  ;;  %v3880_v15 = vpop.f32.mrf.mxu1 }
 0x14b   : > { %v1270_v55 = vpop.f32.mrf.mxu0  ;;  %4178 = vmatpush3.bf16.msra.mxu0 %v5334_v27 }
 0x14c   : > { %v3881_v11 = vpop.f32.mrf.mxu1  ;;  %3039 = vmatpush1.bf16.msra.mxu1 %v5452_v62 }
 0x14d   : > { %v5622_v17 = vadd.f32 %v3881_v11, %v3880_v15  ;;  %v1273_v12 = vpop.f32.mrf.mxu0  ;;  %2478 = vmatmul.mubr.bf16.gmra.mxu0 %v4502_v52  ;;  %3044 = vmatprep.subr.bf16.mxu1 %v6074_v31 }
 0x14e   : > { %v5626_v36 = vadd.f32 %v1273_v12, %v5477_v46  ;;  %v3883_v44 = vpop.f32.mrf.mxu1  ;;  %2895 = vmatmul.mubr.bf16.gmra.mxu1 %v4503_v16  ;;  %3574 = vmatprep.mubr.msk.bf16.mxu0 %vm981_vm2, %v4506_v20  ;;  %v4521_v12 = vld [vmem:[%s5134_s20 + $0x150] ss:$24 sps:$4 sm:$0xff]  }
 0x14f   : > { %v1275_v27 = vpop.f32.mrf.mxu0  ;;  %2902 = vmatprep.mubr.bf16.mxu1 %v4511_v60  ;;  %v4520_v60 = vld [vmem:[%s5054_s15 + $0x160] ss:$24 sps:$4 sm:$0xff]  }
 0x150   : > { %v3884_v2 = vpop.f32.mrf.mxu1  ;;  %3045 = vmatpush2.bf16.msra.mxu1 %v4969_v4 }
 0x151   : > { %v5630_v62 = vadd.f32 %v3884_v2, %v3883_v44  ;;  %v1276_v13 = vpop.f32.mrf.mxu0  ;;  %3046 = vmatprep.subr.bf16.mxu1 %v6074_v31  ;;  %v4526_v44 = vld [vmem:[%s5134_s20 + $0xc] ss:$24 sps:$4 sm:$0xff]  }
 0x152   : > { %v5635_v26 = vadd.f32 %v1276_v13, %v5485_v58  ;;  %v3886_v46 = vpop.f32.mrf.mxu1  ;;  %v4529_v2 = vld [vmem:[%s5134_s20 + $0x14] ss:$24 sps:$4 sm:$0xff]  }
 0x153   : > { %v1278_v35 = vpop.f32.mrf.mxu0 }
 0x154   : > { %v3887_v40 = vpop.f32.mrf.mxu1  ;;  %3047 = vmatpush2.bf16.msra.mxu1 %v5471_v63  ;;  %v4524_v35 = vld [vmem:[%s5134_s20 + $0x8] ss:$24 sps:$4 sm:$0xff]  }
 0x155   : > { %v5641_v29 = vadd.f32 %v3887_v40, %v3886_v46  ;;  %v1281_v4 = vpop.f32.mrf.mxu0  ;;  %2486 = vmatmul.mubr.bf16.gmra.mxu0 %v4508_v1  ;;  %3048 = vmatprep.subr.bf16.mxu1 %v6074_v31 }
 0x156   : > { %v5645_v58 = vadd.f32 %v1281_v4, %v5498_v25  ;;  %v3889_v37 = vpop.f32.mrf.mxu1  ;;  %2903 = vmatmul.mubr.bf16.gmra.mxu1 %v4509_v43  ;;  %3575 = vmatprep.mubr.msk.bf16.mxu0 %vm981_vm2, %v4512_v19  ;;  %v4527_v4 = vld [vmem:[%s5134_s20 + $0x10] ss:$24 sps:$4 sm:$0xff]  }
 0x157   : > { %v1283_v0 = vpop.f32.mrf.mxu0  ;;  %2910 = vmatprep.mubr.bf16.mxu1 %v4517_v39 }
 0x158   : > { %v3890_v18 = vpop.f32.mrf.mxu1  ;;  %3049 = vmatpush2.bf16.msra.mxu1 %v5482_v57  ;;  %v4533_v0 = vld [vmem:[%s5134_s20 + $0x44] ss:$24 sps:$4 sm:$0xff]  }
 0x159   : > { %v5649_v63 = vadd.f32 %v3890_v18, %v3889_v37  ;;  %v1284_v49 = vpop.f32.mrf.mxu0  ;;  %3050 = vmatprep.subr.bf16.mxu1 %v6074_v31  ;;  %v4532_v37 = vld [vmem:[%s5134_s20 + $0x3c] ss:$24 sps:$4 sm:$0xff]  }
 0x15a   : > { %v5654_v41 = vadd.f32 %v1284_v49, %v5507_v42  ;;  %v3892_v25 = vpop.f32.mrf.mxu1 }
 0x15b   : > { %v1286_v3 = vpop.f32.mrf.mxu0 }
 0x15c   : > { %v3893_v9 = vpop.f32.mrf.mxu1  ;;  %3051 = vmatpush2.bf16.msra.mxu1 %v5494_v47 }
 0x15d   : > { %v5660_v52 = vadd.f32 %v3893_v9, %v3892_v25  ;;  %v1289_v57 = vpop.f32.mrf.mxu0  ;;  %2494 = vmatmul.mubr.bf16.gmra.mxu0 %v4514_v51  ;;  %3052 = vmatprep.subr.bf16.mxu1 %v6074_v31 }
 0x15e   : > { %v5664_v42 = vadd.f32 %v1289_v57, %v5520_v24  ;;  %v3895_v15 = vpop.f32.mrf.mxu1  ;;  %2911 = vmatmul.mubr.bf16.gmra.mxu1 %v4515_v32  ;;  %3576 = vmatprep.mubr.msk.bf16.mxu0 %vm981_vm2, %v4518_v6 }
 0x15f   : > { %v1291_v16 = vpop.f32.mrf.mxu0  ;;  %2918 = vmatprep.mubr.bf16.mxu1 %v4523_v7  ;;  %v4530_v7 = vld [vmem:[%s5134_s20 + $0x38] ss:$24 sps:$4 sm:$0xff]  }
 0x160   : > { %v3896_v20 = vpop.f32.mrf.mxu1  ;;  %3053 = vmatpush2.bf16.msra.mxu1 %v5504_v38  ;;  %v4538_v16 = vld [vmem:[%s5134_s20 + $0x6c] ss:$24 sps:$4 sm:$0xff]  }
 0x161   : > { %v5668_v47 = vadd.f32 %v3896_v20, %v3895_v15  ;;  %v1292_v55 = vpop.f32.mrf.mxu0  ;;  %3054 = vmatprep.subr.bf16.mxu1 %v6074_v31  ;;  %v4535_v15 = vld [vmem:[%s5134_s20 + $0x40] ss:$24 sps:$4 sm:$0xff]  }
 0x162   : > { %v5673_v11 = vadd.f32 %v1292_v55, %v5524_v23  ;;  %v3898_v24 = vpop.f32.mrf.mxu1  ;;  %v4539_v55 = vld [vmem:[%s5134_s20 + $0x74] ss:$24 sps:$4 sm:$0xff]  }
 0x163   : > { %v1294_v27 = vpop.f32.mrf.mxu0 }
 0x164   : > { %v3899_v13 = vpop.f32.mrf.mxu1  ;;  %3055 = vmatpush2.bf16.msra.mxu1 %v5516_v28 }
 0x165   : > { %v5679_v38 = vadd.f32 %v3899_v13, %v3898_v24  ;;  %v1297_v1 = vpop.f32.mrf.mxu0  ;;  %2502 = vmatmul.mubr.bf16.gmra.mxu0 %v4520_v60 }
 0x166   : > { %v5682_v31 = vadd.f32 %v1297_v1, %v5529_v10  ;;  %v3901_v23 = vpop.f32.mrf.mxu1  ;;  %2919 = vmatmul.mubr.bf16.gmra.mxu1 %v4521_v12  ;;  %2959 = vmatprep.mubr.bf16.mxu0 %v4526_v44 }
 0x167   : > { %v1299_v46 = vpop.f32.mrf.mxu0  ;;  %3625 = vmatprep.mubr.msk.bf16.mxu1 %vm981_vm2, %v4529_v2 }
 0x168   : > { %v3902_v43 = vpop.f32.mrf.mxu1 }
 0x169   : > { %v5685_v19 = vadd.f32 %v3902_v43, %v3901_v23  ;;  %v1300_v28 = vpop.f32.mrf.mxu0 }
 0x16a   : > { %v5689_v39 = vadd.f32 %v1300_v28, %v5538_v48  ;;  %v3904_v40 = vpop.f32.mrf.mxu1  ;;  %v4536_v28 = vld [vmem:[%s5134_s20 + $0x68] ss:$24 sps:$4 sm:$0xff]  }
 0x16b   : > { %v1302_v10 = vpop.f32.mrf.mxu0 }
 0x16c   : > { %6075 = vst [vmem:[#allocation2_spill] sm:$0xff] %v5689_v39  ;;  %v3905_v18 = vpop.f32.mrf.mxu1 }
 0x16d   : > { %v5694_v49 = vadd.f32 %v3905_v18, %v3904_v40  ;;  %v3923_v51 = vpop.f32.mrf.mxu0  ;;  %2960 = vmatmul.mubr.bf16.vlgmr.msra.gmra.mxu0 %v4524_v35 }
 0x16e   : > { %v1836_v25 = vpop.f32.mrf.mxu1  ;;  %3057 = vmatmul.mubr.bf16.vlgmr.msra.gmra.mxu1 %v4527_v4  ;;  %2967 = vmatprep.mubr.bf16.mxu0 %v4532_v37  ;;  %v4544_v4 = vld [vmem:[%s5134_s20 + $0x9c] ss:$24 sps:$4 sm:$0xff]  }
 0x16f   : > { %v3924_v32 = vpop.f32.mrf.mxu0  ;;  %3626 = vmatprep.mubr.msk.bf16.mxu1 %vm981_vm2, %v4533_v0  ;;  %v4545_v0 = vld [vmem:[%s5134_s20 + $0xa4] ss:$24 sps:$4 sm:$0xff]  }
 0x170   : > { %v3925_v48 = vadd.f32 %v3924_v32, %v3923_v51  ;;  %v1838_v6 = vpop.f32.mrf.mxu1 }
 0x171   : > { %v3926_v3 = vpop.f32.mrf.mxu0 }
 0x172   : > { %v1740_v9 = vadd.f32 %v3925_v48, %v5541_v34  ;;  %v1839_v57 = vpop.f32.mrf.mxu1 }
 0x173   : > { %v3927_v20 = vpop.f32.mrf.mxu0 }
 0x174   : > { %v5702_v60 = vadd.f32 %v1836_v25, %v1740_v9  ;;  %v3928_v24 = vadd.f32 %v3927_v20, %v3926_v3  ;;  %v1841_v12 = vpop.f32.mrf.mxu1 }
 0x175   : > { %v3929_v44 = vpop.f32.mrf.mxu0  ;;  %2968 = vmatmul.mubr.bf16.gmra.mxu0 %v4530_v7 }
 0x176   : > { %v1743_v27 = vadd.f32 %v3928_v24, %v5555_v54  ;;  %v1844_v2 = vpop.f32.mrf.mxu1  ;;  %3065 = vmatmul.mubr.bf16.gmra.mxu1 %v4535_v15  ;;  %2975 = vmatprep.mubr.bf16.mxu0 %v4538_v16  ;;  %v4541_v54 = vld [vmem:[%s5134_s20 + $0x70] ss:$24 sps:$4 sm:$0xff]   ;;  %v4550_v24 = vld [vmem:[%s5134_s20 + $0xcc] ss:$24 sps:$4 sm:$0xff]  }
 0x177   : > { %v3930_v13 = vpop.f32.mrf.mxu0  ;;  %3627 = vmatprep.mubr.msk.bf16.mxu1 %vm981_vm2, %v4539_v55  ;;  %v4542_v16 = vld [vmem:[%s5134_s20 + $0x98] ss:$24 sps:$4 sm:$0xff]  }
 0x178   : > { %v5708_v1 = vadd.f32 %v1839_v57, %v1743_v27  ;;  %v3931_v23 = vadd.f32 %v3930_v13, %v3929_v44  ;;  %v1846_v46 = vpop.f32.mrf.mxu1  ;;  %v4551_v27 = vld [vmem:[%s5134_s20 + $0xd4] ss:$24 sps:$4 sm:$0xff]  }
 0x179   : > { %v3932_v43 = vpop.f32.mrf.mxu0 }
 0x17a   : > { %v1748_v35 = vadd.f32 %v3931_v23, %v5564_v53  ;;  %v1847_v40 = vpop.f32.mrf.mxu1 }
 0x17b   : > { %v3933_v10 = vpop.f32.mrf.mxu0 }
 0x17c   : > { %v5717_v18 = vadd.f32 %v1844_v2, %v1748_v35  ;;  %v3934_v51 = vadd.f32 %v3933_v10, %v3932_v43  ;;  %v1849_v25 = vpop.f32.mrf.mxu1 }
 0x17d   : > { %v3935_v32 = vpop.f32.mrf.mxu0  ;;  %2976 = vmatmul.mubr.bf16.gmra.mxu0 %v4536_v28 }
 0x17e   : > { %v1751_v48 = vadd.f32 %v3934_v51, %v5577_v30  ;;  %v1852_v53 = vpop.f32.mrf.mxu1  ;;  %3073 = vmatmul.mubr.bf16.gmra.mxu1 %v4541_v54  ;;  %2983 = vmatprep.mubr.bf16.mxu0 %v4544_v4  ;;  %v4547_v30 = vld [vmem:[%s5134_s20 + $0xa0] ss:$24 sps:$4 sm:$0xff]  }
 0x17f   : > { %v3936_v3 = vpop.f32.mrf.mxu0  ;;  %3628 = vmatprep.mubr.msk.bf16.mxu1 %vm981_vm2, %v4545_v0  ;;  %v4548_v0 = vld [vmem:[%s5134_s20 + $0xc8] ss:$24 sps:$4 sm:$0xff]  }
 0x180   : > { %v5723_v7 = vadd.f32 %v1847_v40, %v1751_v48  ;;  %v3937_v9 = vadd.f32 %v3936_v3, %v3935_v32  ;;  %v1854_v57 = vpop.f32.mrf.mxu1  ;;  %v4556_v32 = vld [vmem:[%s5134_s20 + $0xfc] ss:$24 sps:$4 sm:$0xff]  }
 0x181   : > { %v3938_v15 = vpop.f32.mrf.mxu0  ;;  %v4557_v3 = vld [vmem:[%s5134_s20 + $0x104] ss:$24 sps:$4 sm:$0xff]  }
 0x182   : > { %v1756_v20 = vadd.f32 %v3937_v9, %v5587_v56  ;;  %v1855_v55 = vpop.f32.mrf.mxu1 }
 0x183   : > { %v3939_v44 = vpop.f32.mrf.mxu0 }
 0x184   : > { %v5732_v2 = vadd.f32 %v1852_v53, %v1756_v20  ;;  %v3940_v13 = vadd.f32 %v3939_v44, %v3938_v15  ;;  %v1857_v23 = vpop.f32.mrf.mxu1 }
 0x185   : > { %v3941_v46 = vpop.f32.mrf.mxu0  ;;  %2984 = vmatmul.mubr.bf16.gmra.mxu0 %v4542_v16  ;;  %v4554_v23 = vld [vmem:[%s5134_s20 + $0xf8] ss:$24 sps:$4 sm:$0xff]  }
 0x186   : > { %v1759_v43 = vadd.f32 %v3940_v13, %v5600_v45  ;;  %v1860_v56 = vpop.f32.mrf.mxu1  ;;  %3081 = vmatmul.mubr.bf16.gmra.mxu1 %v4547_v30  ;;  %2991 = vmatprep.mubr.bf16.mxu0 %v4550_v24  ;;  %v4553_v45 = vld [vmem:[%s5134_s20 + $0xd0] ss:$24 sps:$4 sm:$0xff]  }
 0x187   : > { %v3942_v35 = vpop.f32.mrf.mxu0  ;;  %3629 = vmatprep.mubr.msk.bf16.mxu1 %vm981_vm2, %v4551_v27 }
 0x188   : > { %v5738_v40 = vadd.f32 %v1855_v55, %v1759_v43  ;;  %v3943_v54 = vadd.f32 %v3942_v35, %v3941_v46  ;;  %v1862_v4 = vpop.f32.mrf.mxu1 }
 0x189   : > { %v3944_v10 = vpop.f32.mrf.mxu0  ;;  %v4563_v4 = vld [vmem:[%s5134_s20 + $0x134] ss:$24 sps:$4 sm:$0xff]  }
 0x18a   : > { %v1764_v51 = vadd.f32 %v3943_v54, %v5610_v59  ;;  %v1863_v25 = vpop.f32.mrf.mxu1 }
 0x18b   : > { %v3945_v53 = vpop.f32.mrf.mxu0 }
 0x18c   : > { %v5747_v9 = vadd.f32 %v1860_v56, %v1764_v51  ;;  %v3946_v57 = vadd.f32 %v3945_v53, %v3944_v10  ;;  %v1865_v15 = vpop.f32.mrf.mxu1  ;;  %v4562_v56 = vld [vmem:[%s5134_s20 + $0x12c] ss:$24 sps:$4 sm:$0xff]  }
 0x18d   : > { %v3947_v16 = vpop.f32.mrf.mxu0  ;;  %2992 = vmatmul.mubr.bf16.gmra.mxu0 %v4548_v0 }
 0x18e   : > { %v1767_v20 = vadd.f32 %v3946_v57, %v5622_v17  ;;  %v1868_v59 = vpop.f32.mrf.mxu1  ;;  %3089 = vmatmul.mubr.bf16.gmra.mxu1 %v4553_v45  ;;  %2999 = vmatprep.mubr.bf16.mxu0 %v4556_v32  ;;  %v4559_v17 = vld [vmem:[%s5134_s20 + $0x100] ss:$24 sps:$4 sm:$0xff]  }
 0x18f   : > { %v3948_v30 = vpop.f32.mrf.mxu0  ;;  %3630 = vmatprep.mubr.msk.bf16.mxu1 %vm981_vm2, %v4557_v3 }
 0x190   : > { %v5753_v24 = vadd.f32 %v1863_v25, %v1767_v20  ;;  %v3949_v44 = vadd.f32 %v3948_v30, %v3947_v16  ;;  %v1870_v27 = vpop.f32.mrf.mxu1  ;;  %v4560_v20 = vld [vmem:[%s5134_s20 + $0x128] ss:$24 sps:$4 sm:$0xff]  }
 0x191   : > { %v3950_v13 = vpop.f32.mrf.mxu0 }
 0x192   : > { %v1772_v46 = vadd.f32 %v3949_v44, %v5630_v62  ;;  %v1871_v43 = vpop.f32.mrf.mxu1  ;;  %v4568_v44 = vld [vmem:[%s5134_s20 + $0x15c] ss:$24 sps:$4 sm:$0xff]  }
 0x193   : > { %v3951_v54 = vpop.f32.mrf.mxu0 }
 0x194   : > { %v5762_v10 = vadd.f32 %v1868_v59, %v1772_v46  ;;  %v3952_v0 = vadd.f32 %v3951_v54, %v3950_v13  ;;  %v1873_v51 = vpop.f32.mrf.mxu1 }
 0x195   : > { %v3953_v25 = vpop.f32.mrf.mxu0  ;;  %3000 = vmatmul.mubr.bf16.gmra.mxu0 %v4554_v23  ;;  %v4569_v23 = vld [vmem:[%s5134_s20 + $0x164] ss:$24 sps:$4 sm:$0xff]  }
 0x196   : > { %v1775_v45 = vadd.f32 %v3952_v0, %v5641_v29  ;;  %v1876_v62 = vpop.f32.mrf.mxu1  ;;  %3097 = vmatmul.mubr.bf16.gmra.mxu1 %v4559_v17  ;;  %3007 = vmatprep.mubr.bf16.mxu0 %v4562_v56  ;;  %v4565_v29 = vld [vmem:[%s5134_s20 + $0x130] ss:$24 sps:$4 sm:$0xff]  }
 0x197   : > { %v3954_v53 = vpop.f32.mrf.mxu0  ;;  %3631 = vmatprep.mubr.msk.bf16.mxu1 %vm981_vm2, %v4563_v4 }
 0x198   : > { %v5768_v3 = vadd.f32 %v1871_v43, %v1775_v45  ;;  %v3955_v57 = vadd.f32 %v3954_v53, %v3953_v25  ;;  %v1878_v15 = vpop.f32.mrf.mxu1  ;;  %v4566_v53 = vld [vmem:[%s5134_s20 + $0x158] ss:$24 sps:$4 sm:$0xff]  }
 0x199   : > { %v3956_v16 = vpop.f32.mrf.mxu0 }
 0x19a   : > { %v1780_v59 = vadd.f32 %v3955_v57, %v5649_v63  ;;  %v1879_v30 = vpop.f32.mrf.mxu1 }
 0x19b   : > { %v3957_v13 = vpop.f32.mrf.mxu0 }
 0x19c   : > { %v5777_v46 = vadd.f32 %v1876_v62, %v1780_v59  ;;  %v3958_v17 = vadd.f32 %v3957_v13, %v3956_v16  ;;  %v1881_v43 = vpop.f32.mrf.mxu1  ;;  %v4571_v16 = vld [vmem:[%s5134_s20 + $0x160] ss:$24 sps:$4 sm:$0xff]  }
 0x19d   : > { %v3959_v56 = vpop.f32.mrf.mxu0  ;;  %3008 = vmatmul.mubr.bf16.gmra.mxu0 %v4560_v20 }
 0x19e   : > { %v1783_v54 = vadd.f32 %v3958_v17, %v5660_v52  ;;  %v1884_v4 = vpop.f32.mrf.mxu1  ;;  %3105 = vmatmul.mubr.bf16.gmra.mxu1 %v4565_v29  ;;  %3015 = vmatprep.mubr.bf16.mxu0 %v4568_v44 }
 0x19f   : > { %v3960_v0 = vpop.f32.mrf.mxu0  ;;  %3632 = vmatprep.mubr.msk.bf16.mxu1 %vm981_vm2, %v4569_v23 }
 0x1a0   : > { %v5783_v51 = vadd.f32 %v1879_v30, %v1783_v54  ;;  %v3961_v25 = vadd.f32 %v3960_v0, %v3959_v56  ;;  %v1886_v45 = vpop.f32.mrf.mxu1 }
 0x1a1   : > { %v3962_v62 = vpop.f32.mrf.mxu0 }
 0x1a2   : > { %v1788_v57 = vadd.f32 %v3961_v25, %v5668_v47  ;;  %v1887_v15 = vpop.f32.mrf.mxu1 }
 0x1a3   : > { %v3963_v20 = vpop.f32.mrf.mxu0 }
 0x1a4   : > { %v5790_v59 = vadd.f32 %v1884_v4, %v1788_v57  ;;  %v3964_v29 = vadd.f32 %v3963_v20, %v3962_v62  ;;  %v1889_v44 = vpop.f32.mrf.mxu1 }
 0x1a5   : > { %v3965_v13 = vpop.f32.mrf.mxu0  ;;  %3016 = vmatmul.mubr.bf16.gmra.mxu0 %v4566_v53 }
 0x1a6   : > { %v1791_v30 = vadd.f32 %v3964_v29, %v5679_v38  ;;  %v1892_v23 = vpop.f32.mrf.mxu1  ;;  %3113 = vmatmul.mubr.bf16.gmra.mxu1 %v4571_v16 }
 0x1a7   : > { %v3966_v47 = vpop.f32.mrf.mxu0 }
 0x1a8   : > { %v5795_v43 = vadd.f32 %v1887_v15, %v1791_v30  ;;  %v3967_v56 = vadd.f32 %v3966_v47, %v3965_v13  ;;  %v1894_v54 = vpop.f32.mrf.mxu1 }
 0x1a9   : > { %v3968_v0 = vpop.f32.mrf.mxu0 }
 0x1aa   : > { %v1796_v4 = vadd.f32 %v3967_v56, %v5685_v19  ;;  %v1895_v25 = vpop.f32.mrf.mxu1 }
 0x1ab   : > { %v3969_v62 = vpop.f32.mrf.mxu0 }
 0x1ac   : > { %v5800_v53 = vadd.f32 %v1892_v23, %v1796_v4  ;;  %v3970_v38 = vadd.f32 %v3969_v62, %v3968_v0  ;;  %v1897_v57 = vpop.f32.mrf.mxu1 }
 0x1ad   : > { %v3987_v16 = vpop.f32.mrf.mxu0 }
 0x1ae   : > { %v1799_v20 = vadd.f32 %v3970_v38, %v5694_v49  ;;  %v4051_v29 = vpop.f32.mrf.mxu1 }
 0x1af   : > { %v3988_v44 = vpop.f32.mrf.mxu0 }
 0x1b0   : > { %v5805_v13 = vadd.f32 %v1895_v25, %v1799_v20  ;;  %v3989_v19 = vadd.f32 %v3988_v44, %v3987_v16  ;;  %v4052_v30 = vpop.f32.mrf.mxu1 }
 0x1b1   : > { %v4053_v47 = vadd.f32 %v4052_v30, %v4051_v29  ;;  %v3990_v56 = vpop.f32.mrf.mxu0 }
 0x1b2   : > { %6076 = vst [vmem:[#allocation3_spill] sm:$0xff] %v5805_v13  ;;  %v4054_v54 = vpop.f32.mrf.mxu1 }
 0x1b3   : > { %v3991_v0 = vpop.f32.mrf.mxu0  ;;  %v5809_v4 = vadd.f32 %v4053_v47, %v3989_v19 }
 0x1b4   : > { %v3992_v62 = vadd.f32 %v3991_v0, %v3990_v56  ;;  %v4055_v49 = vpop.f32.mrf.mxu1 }
 0x1b5   : > { %v4056_v38 = vadd.f32 %v4055_v49, %v4054_v54  ;;  %v3993_v57 = vpop.f32.mrf.mxu0 }
 0x1b6   : > { %v4057_v45 = vpop.f32.mrf.mxu1 }
 0x1b7   : > { %v3994_v15 = vpop.f32.mrf.mxu0  ;;  %v5811_v17 = vadd.f32 %v4056_v38, %v3992_v62 }
 0x1b8   : > { %v3995_v25 = vadd.f32 %v3994_v15, %v3993_v57  ;;  %v4058_v16 = vpop.f32.mrf.mxu1 }
 0x1b9   : > { %v4059_v20 = vadd.f32 %v4058_v16, %v4057_v45  ;;  %v3996_v29 = vpop.f32.mrf.mxu0 }
 0x1ba   : > { %v4060_v44 = vpop.f32.mrf.mxu1 }
 0x1bb   : > { %v3997_v30 = vpop.f32.mrf.mxu0  ;;  %v5813_v52 = vadd.f32 %v4059_v20, %v3995_v25 }
 0x1bc   : > { %v3998_v23 = vadd.f32 %v3997_v30, %v3996_v29  ;;  %v4061_v63 = vpop.f32.mrf.mxu1 }
 0x1bd   : > { %v4062_v19 = vadd.f32 %v4061_v63, %v4060_v44  ;;  %v3999_v47 = vpop.f32.mrf.mxu0 }
 0x1be   : > { %v4063_v56 = vpop.f32.mrf.mxu1 }
 0x1bf   : > { %v4000_v0 = vpop.f32.mrf.mxu0  ;;  %v5815_v54 = vadd.f32 %v4062_v19, %v3998_v23 }
 0x1c0   : > { %v4001_v49 = vadd.f32 %v4000_v0, %v3999_v47  ;;  %v4064_v27 = vpop.f32.mrf.mxu1 }
 0x1c1   : > { %v4065_v62 = vadd.f32 %v4064_v27, %v4063_v56  ;;  %v4002_v38 = vpop.f32.mrf.mxu0 }
 0x1c2   : > { %v4066_v15 = vpop.f32.mrf.mxu1 }
 0x1c3   : > { %v4003_v57 = vpop.f32.mrf.mxu0  ;;  %v5817_v45 = vadd.f32 %v4065_v62, %v4001_v49 }
 0x1c4   : > { %v4004_v16 = vadd.f32 %v4003_v57, %v4002_v38  ;;  %v4067_v32 = vpop.f32.mrf.mxu1 }
 0x1c5   : > { %v4068_v25 = vadd.f32 %v4067_v32, %v4066_v15  ;;  %v4005_v20 = vpop.f32.mrf.mxu0 }
 0x1c6   : > { %v4069_v29 = vpop.f32.mrf.mxu1 }
 0x1c7   : > { %v4006_v30 = vpop.f32.mrf.mxu0  ;;  %v5819_v63 = vadd.f32 %v4068_v25, %v4004_v16 }
 0x1c8   : > { %v4007_v44 = vadd.f32 %v4006_v30, %v4005_v20  ;;  %v4070_v35 = vpop.f32.mrf.mxu1 }
 0x1c9   : > { %v4071_v23 = vadd.f32 %v4070_v35, %v4069_v29  ;;  %v4008_v19 = vpop.f32.mrf.mxu0 }
 0x1ca   : > { %v4072_v47 = vpop.f32.mrf.mxu1 }
 0x1cb   : > { %v4009_v0 = vpop.f32.mrf.mxu0  ;;  %v5821_v27 = vadd.f32 %v4071_v23, %v4007_v44 }
 0x1cc   : > { %v4010_v56 = vadd.f32 %v4009_v0, %v4008_v19  ;;  %v4073_v55 = vpop.f32.mrf.mxu1 }
 0x1cd   : > { %v4074_v49 = vadd.f32 %v4073_v55, %v4072_v47  ;;  %v4011_v62 = vpop.f32.mrf.mxu0 }
 0x1ce   : > { %v4075_v38 = vpop.f32.mrf.mxu1 }
 0x1cf   : > { %v4012_v57 = vpop.f32.mrf.mxu0  ;;  %v5823_v32 = vadd.f32 %v4074_v49, %v4010_v56 }
 0x1d0   : > { %v4013_v15 = vadd.f32 %v4012_v57, %v4011_v62  ;;  %v4076_v48 = vpop.f32.mrf.mxu1 }
 0x1d1   : > { %v4077_v16 = vadd.f32 %v4076_v48, %v4075_v38  ;;  %v4014_v25 = vpop.f32.mrf.mxu0 }
 0x1d2   : > { %v4078_v20 = vpop.f32.mrf.mxu1 }
 0x1d3   : > { %v4015_v30 = vpop.f32.mrf.mxu0  ;;  %v5825_v35 = vadd.f32 %v4077_v16, %v4013_v15 }
 0x1d4   : > { %v4016_v29 = vadd.f32 %v4015_v30, %v4014_v25  ;;  %v4079_v28 = vpop.f32.mrf.mxu1 }
 0x1d5   : > { %v4080_v44 = vadd.f32 %v4079_v28, %v4078_v20  ;;  %v4017_v23 = vpop.f32.mrf.mxu0 }
 0x1d6   : > { %v4081_v19 = vpop.f32.mrf.mxu1 }
 0x1d7   : > { %v4018_v0 = vpop.f32.mrf.mxu0  ;;  %v5827_v55 = vadd.f32 %v4080_v44, %v4016_v29 }
 0x1d8   : > { %v4019_v47 = vadd.f32 %v4018_v0, %v4017_v23  ;;  %v4082_v12 = vpop.f32.mrf.mxu1 }
 0x1d9   : > { %v4083_v56 = vadd.f32 %v4082_v12, %v4081_v19  ;;  %v4020_v49 = vpop.f32.mrf.mxu0 }
 0x1da   : > { %v4084_v62 = vpop.f32.mrf.mxu1 }
 0x1db   : > { %v4021_v57 = vpop.f32.mrf.mxu0  ;;  %v5829_v48 = vadd.f32 %v4083_v56, %v4019_v47 }
 0x1dc   : > { %v4022_v38 = vadd.f32 %v4021_v57, %v4020_v49  ;;  %v4085_v6 = vpop.f32.mrf.mxu1 }
 0x1dd   : > { %v4086_v15 = vadd.f32 %v4085_v6, %v4084_v62  ;;  %v4023_v16 = vpop.f32.mrf.mxu0 }
 0x1de   : > { %v4087_v25 = vpop.f32.mrf.mxu1 }
 0x1df   : > { %v4024_v30 = vpop.f32.mrf.mxu0  ;;  %v5831_v28 = vadd.f32 %v4086_v15, %v4022_v38 }
 0x1e0   : > { %v4025_v20 = vadd.f32 %v4024_v30, %v4023_v16  ;;  %v4088_v37 = vpop.f32.mrf.mxu1 }
 0x1e1   : > { %v4089_v29 = vadd.f32 %v4088_v37, %v4087_v25  ;;  %v4026_v44 = vpop.f32.mrf.mxu0 }
 0x1e2   : > { %v4090_v23 = vpop.f32.mrf.mxu1 }
 0x1e3   : > { %v4027_v0 = vpop.f32.mrf.mxu0  ;;  %v5833_v12 = vadd.f32 %v4089_v29, %v4025_v20 }
 0x1e4   : > { %v4028_v19 = vadd.f32 %v4027_v0, %v4026_v44  ;;  %v4091_v34 = vpop.f32.mrf.mxu1 }
 0x1e5   : > { %v4092_v47 = vadd.f32 %v4091_v34, %v4090_v23  ;;  %v4029_v56 = vpop.f32.mrf.mxu0 }
 0x1e6   : > { %v4093_v49 = vpop.f32.mrf.mxu1 }
 0x1e7   : > { %v4030_v57 = vpop.f32.mrf.mxu0  ;;  %v5835_v6 = vadd.f32 %v4092_v47, %v4028_v19  ;;  %v6077_v19 = vmax.f32 %v5533_v22, %v5702_v60 }
 0x1e8   : > { %v4031_v62 = vadd.f32 %v4030_v57, %v4029_v56  ;;  %v4094_v13 = vpop.f32.mrf.mxu1 }
 0x1e9   : > { %v4095_v38 = vadd.f32 %v4094_v13, %v4093_v49  ;;  %v4032_v15 = vpop.f32.mrf.mxu0 }
 0x1ea   : > { %v4096_v16 = vpop.f32.mrf.mxu1 }
 0x1eb   : > { %v4033_v30 = vpop.f32.mrf.mxu0  ;;  %v5837_v37 = vadd.f32 %v4095_v38, %v4031_v62 }
 0x1ec   : > { %v4034_v25 = vadd.f32 %v4033_v30, %v4032_v15  ;;  %v4097_v39 = vpop.f32.mrf.mxu1 }
 0x1ed   : > { %v4098_v20 = vadd.f32 %v4097_v39, %v4096_v16  ;;  %v2447_v29 = vpop.f32.mrf.mxu0 }
 0x1ee   : > { %v2448_v44 = vadd.f32 %v2447_v29, %v5809_v4  ;;  %v4115_v34 = vpop.f32.mrf.mxu1  ;;  %v6078_v4 = vmax.f32 %v5546_v61, %v5708_v1 }
 0x1ef   : > { %v2449_v23 = vpop.f32.mrf.mxu0  ;;  %v5840_v0 = vadd.f32 %v4098_v20, %v4034_v25  ;;  %v6079_v25 = vmax.f32 %v5558_v8, %v5717_v18 }
 0x1f0   : > { %v5845_v47 = vmax.f32 %v6077_v19, %v2448_v44  ;;  %v4116_v13 = vpop.f32.mrf.mxu1  ;;  %v6080_v23 = vmax.f32 %v5569_v5, %v5723_v7 }
 0x1f1   : > { %v5847_v56 = vadd.f32 %v4116_v13, %v4115_v34  ;;  %v2450_v49 = vpop.f32.mrf.mxu0 }
 0x1f2   : > { %v2451_v57 = vadd.f32 %v2450_v49, %v5811_v17  ;;  %v5850_v62 = vpop.f32.mrf.mxu1 }
 0x1f3   : > { %v2452_v39 = vpop.f32.mrf.mxu0 }
 0x1f4   : > { %v5855_v38 = vmax.f32 %v6078_v4, %v2451_v57  ;;  %v5857_v15 = vpop.f32.mrf.mxu1  ;;  %v6081_v57 = vmax.f32 %v5581_v33, %v5732_v2 }
 0x1f5   : > { %v2455_v16 = vpop.f32.mrf.mxu0 }
 0x1f6   : > { %v2456_v22 = vadd.f32 %v2455_v16, %v5813_v52  ;;  %v4121_v60 = vpop.f32.mrf.mxu1 }
 0x1f7   : > { %v2457_v30 = vpop.f32.mrf.mxu0 }
 0x1f8   : > { %v5863_v20 = vmax.f32 %v6079_v25, %v2456_v22  ;;  %v4122_v17 = vpop.f32.mrf.mxu1 }
 0x1f9   : > { %v5865_v29 = vadd.f32 %v4122_v17, %v4121_v60  ;;  %v2458_v44 = vpop.f32.mrf.mxu0  ;;  %v6082_v60 = vmax.f32 %v5592_v21, %v5738_v40 }
 0x1fa   : > { %v2459_v61 = vadd.f32 %v2458_v44, %v5815_v54  ;;  %v5868_v1 = vpop.f32.mrf.mxu1  ;;  %v6083_v44 = vmax.f32 %v5604_v50, %v5747_v9 }
 0x1fb   : > { %v2460_v34 = vpop.f32.mrf.mxu0 }
 0x1fc   : > { %v5873_v52 = vmax.f32 %v6080_v23, %v2459_v61  ;;  %v5875_v19 = vpop.f32.mrf.mxu1 }
 0x1fd   : > { %v2463_v13 = vpop.f32.mrf.mxu0 }
 0x1fe   : > { %v2464_v8 = vadd.f32 %v2463_v13, %v5817_v45  ;;  %v4127_v18 = vpop.f32.mrf.mxu1 }
 0x1ff   : > { %v2465_v49 = vpop.f32.mrf.mxu0 }
 0x200   : > { %v5881_v39 = vmax.f32 %v6081_v57, %v2464_v8  ;;  %v4128_v54 = vpop.f32.mrf.mxu1  ;;  %v6084_v8 = vmax.f32 %v5615_v14, %v5753_v24 }
 0x201   : > { %v5883_v4 = vadd.f32 %v4128_v54, %v4127_v18  ;;  %v2466_v16 = vpop.f32.mrf.mxu0  ;;  %v6085_v54 = vmax.f32 %v5626_v36, %v5762_v10 }
 0x202   : > { %v2467_v5 = vadd.f32 %v2466_v16, %v5819_v63  ;;  %v5886_v7 = vpop.f32.mrf.mxu1 }
 0x203   : > { %v2468_v22 = vpop.f32.mrf.mxu0 }
 0x204   : > { %v5891_v45 = vmax.f32 %v6082_v60, %v2467_v5  ;;  %v5893_v30 = vpop.f32.mrf.mxu1 }
 0x205   : > { %v2471_v25 = vpop.f32.mrf.mxu0 }
 0x206   : > { %v2472_v33 = vadd.f32 %v2471_v25, %v5821_v27  ;;  %v4133_v2 = vpop.f32.mrf.mxu1  ;;  %v6086_v25 = vmax.f32 %v5635_v26, %v5768_v3 }
 0x207   : > { %v2473_v17 = vpop.f32.mrf.mxu0 }
 0x208   : > { %v5899_v61 = vmax.f32 %v6083_v44, %v2472_v33  ;;  %v4134_v63 = vpop.f32.mrf.mxu1  ;;  %v6087_v44 = vmax.f32 %v5645_v58, %v5777_v46 }
 0x209   : > { %v5901_v34 = vadd.f32 %v4134_v63, %v4133_v2  ;;  %v2474_v23 = vpop.f32.mrf.mxu0 }
 0x20a   : > { %v2475_v21 = vadd.f32 %v2474_v23, %v5823_v32  ;;  %v5904_v40 = vpop.f32.mrf.mxu1 }
 0x20b   : > { %v2476_v13 = vpop.f32.mrf.mxu0 }
 0x20c   : > { %v5909_v27 = vmax.f32 %v6084_v8, %v2475_v21  ;;  %v5911_v18 = vpop.f32.mrf.mxu1  ;;  %v6088_v8 = vmax.f32 %v5654_v41, %v5783_v51 }
 0x20d   : > { %v2479_v49 = vpop.f32.mrf.mxu0 }
 0x20e   : > { %v2480_v50 = vadd.f32 %v2479_v49, %v5825_v35  ;;  %v4139_v9 = vpop.f32.mrf.mxu1 }
 0x20f   : > { %v2481_v57 = vpop.f32.mrf.mxu0 }
 0x210   : > { %v5917_v16 = vmax.f32 %v6085_v54, %v2480_v50  ;;  %v4140_v32 = vpop.f32.mrf.mxu1  ;;  %v6089_v57 = vmax.f32 %v5664_v42, %v5790_v59 }
 0x211   : > { %v5919_v5 = vadd.f32 %v4140_v32, %v4139_v9  ;;  %v2482_v22 = vpop.f32.mrf.mxu0 }
 0x212   : > { %v2483_v14 = vadd.f32 %v2482_v22, %v5827_v55  ;;  %v5922_v24 = vpop.f32.mrf.mxu1 }
 0x213   : > { %v2484_v60 = vpop.f32.mrf.mxu0 }
 0x214   : > { %v5927_v35 = vmax.f32 %v6086_v25, %v2483_v14  ;;  %v5929_v33 = vpop.f32.mrf.mxu1  ;;  %v6090_v60 = vmax.f32 %v5673_v11, %v5795_v43 }
 0x215   : > { %v2487_v2 = vpop.f32.mrf.mxu0 }
 0x216   : > { %v2488_v36 = vadd.f32 %v2487_v2, %v5829_v48  ;;  %v4145_v10 = vpop.f32.mrf.mxu1 }
 0x217   : > { %v2489_v17 = vpop.f32.mrf.mxu0 }
 0x218   : > { %v5935_v63 = vmax.f32 %v6087_v44, %v2488_v36  ;;  %v4146_v55 = vpop.f32.mrf.mxu1 }
 0x219   : > { %v5937_v23 = vadd.f32 %v4146_v55, %v4145_v10  ;;  %v2490_v21 = vpop.f32.mrf.mxu0  ;;  %v6091_v10 = vmax.f32 %v5682_v31, %v5800_v53 }
 0x21a   : > { %v2491_v26 = vadd.f32 %v2490_v21, %v5831_v28  ;;  %v5940_v3 = vpop.f32.mrf.mxu1 }
 0x21b   : > { %v2492_v13 = vpop.f32.mrf.mxu0 }
 0x21c   : > { %v5945_v48 = vmax.f32 %v6088_v8, %v2491_v26  ;;  %v5947_v49 = vpop.f32.mrf.mxu1  ;;  %v6092_v26 = vld [vmem:[#allocation2_spill] sm:$0xff]  ;;  %v6093_v13 = vld [vmem:[#allocation3_spill] sm:$0xff] }
 0x21d   : > { %v2495_v50 = vpop.f32.mrf.mxu0  ;;  %v6094_v8 = vmax.f32 %v6092_v26, %v6093_v13 }
 0x21e   : > { %v2496_v58 = vadd.f32 %v2495_v50, %v5833_v12  ;;  %v4151_v46 = vpop.f32.mrf.mxu1 }
 0x21f   : > { %v2497_v9 = vpop.f32.mrf.mxu0 }
 0x220   : > { %v5953_v54 = vmax.f32 %v6089_v57, %v2496_v58  ;;  %v4152_v28 = vpop.f32.mrf.mxu1 }
 0x221   : > { %v5955_v32 = vadd.f32 %v4152_v28, %v4151_v46  ;;  %v2498_v22 = vpop.f32.mrf.mxu0 }
 0x222   : > { %v2499_v41 = vadd.f32 %v2498_v22, %v5835_v6  ;;  %v5958_v51 = vpop.f32.mrf.mxu1 }
 0x223   : > { %v2500_v14 = vpop.f32.mrf.mxu0 }
 0x224   : > { %v5963_v12 = vmax.f32 %v6090_v60, %v2499_v41  ;;  %v5965_v25 = vpop.f32.mrf.mxu1  ;;  %v4120_v41 = vadd.f32 %v5857_v15, %v5850_v62 }
 0x225   : > { %v2503_v2 = vpop.f32.mrf.mxu0 }
 0x226   : > { %v2504_v42 = vadd.f32 %v2503_v2, %v5837_v37  ;;  %v4157_v59 = vpop.f32.mrf.mxu1 }
 0x227   : > { %v2505_v36 = vpop.f32.mrf.mxu0 }
 0x228   : > { %v5971_v17 = vmax.f32 %v6091_v10, %v2504_v42  ;;  %v4158_v6 = vpop.f32.mrf.mxu1 }
 0x229   : > { %v5973_v44 = vadd.f32 %v4158_v6, %v4157_v59  ;;  %v2506_v55 = vpop.f32.mrf.mxu0  ;;  %v5992_v6 = vld [vmem:[%s6068_s5] ss:$0 sm:$0xff] }
 0x22a   : > { %v2507_v11 = vadd.f32 %v2506_v55, %v5840_v0  ;;  %v5976_v43 = vpop.f32.mrf.mxu1 }
 0x22b   : > { %v2508_v21 = vpop.f32.mrf.mxu0 }
 0x22c   : > { %v5981_v37 = vmax.f32 %v6094_v8, %v2507_v11  ;;  %v5983_v50 = vpop.f32.mrf.mxu1 }
 0x22d   : > { %v4179_v58 = vpop.f32.mrf.mxu0 }
 0x22e   : > { %v3058_v31 = vpop.f32.mrf.mxu1 }
 0x22f   : > { %v4180_v53 = vpop.f32.mrf.mxu0 }
 0x230   : > { %v4181_v46 = vadd.f32 %v4180_v53, %v4179_v58  ;;  %v3060_v9 = vpop.f32.mrf.mxu1  ;;  %v4126_v58 = vadd.f32 %v5875_v19, %v5868_v1 }
 0x231   : > { %v4182_v57 = vpop.f32.mrf.mxu0 }
 0x232   : > { %v2962_v28 = vadd.f32 %v4181_v46, %v5847_v56  ;;  %v3061_v22 = vpop.f32.mrf.mxu1 }
 0x233   : > { %v4183_v0 = vpop.f32.mrf.mxu0 }
 0x234   : > { %v3059_v14 = vadd.f32 %v3058_v31, %v2962_v28  ;;  %v4184_v60 = vadd.f32 %v4183_v0, %v4182_v57  ;;  %v3063_v2 = vpop.f32.mrf.mxu1 }
 0x235   : > { %v4185_v42 = vpop.f32.mrf.mxu0 }
 0x236   : > { %v3121_v59 = vmax.f32 %v5845_v47, %v3059_v14  ;;  %v2965_v36 = vadd.f32 %v4184_v60, %v4120_v41  ;;  %v3066_v10 = vpop.f32.mrf.mxu1 }
 0x237   : > { %v4186_v56 = vpop.f32.mrf.mxu0 }
 0x238   : > { %v3062_v55 = vadd.f32 %v3061_v22, %v2965_v36  ;;  %v4187_v11 = vadd.f32 %v4186_v56, %v4185_v42  ;;  %v3068_v21 = vpop.f32.mrf.mxu1  ;;  %v3144_v62 = vadd.f32 %v5992_v6, %v3121_v59  ;;  %v4132_v56 = vadd.f32 %v5893_v30, %v5886_v7 }
 0x239   : > { %v4188_v26 = vpop.f32.mrf.mxu0 }
 0x23a   : > { %v3122_v15 = vmax.f32 %v5855_v38, %v3062_v55  ;;  %v2970_v13 = vadd.f32 %v4187_v11, %v5865_v29  ;;  %v3069_v8 = vpop.f32.mrf.mxu1  ;;  %v3160_v28 = vmax.f32 %v3144_v62, 0.0 }
 0x23b   : > { %v4189_v47 = vpop.f32.mrf.mxu0 }
 0x23c   : > { %v3145_v31 = vadd.f32 %v5992_v6, %v3122_v15  ;;  %v3067_v53 = vadd.f32 %v3066_v10, %v2970_v13  ;;  %v4190_v46 = vadd.f32 %v4189_v47, %v4188_v26  ;;  %v3071_v9 = vpop.f32.mrf.mxu1 }
 0x23d   : > { %v4191_v57 = vpop.f32.mrf.mxu0 }
 0x23e   : > { %v3161_v22 = vmax.f32 %v3145_v31, 0.0  ;;  %v3123_v0 = vmax.f32 %v5863_v20, %v3067_v53  ;;  %v2973_v41 = vadd.f32 %v4190_v46, %v4126_v58  ;;  %v3074_v38 = vpop.f32.mrf.mxu1 }
 0x23f   : > { %v4192_v29 = vpop.f32.mrf.mxu0 }
 0x240   : > { %v3671_v1 = vpack.c.bf16 %v3161_v22, %v3160_v28  ;;  %v3070_v19 = vadd.f32 %v3069_v8, %v2973_v41  ;;  %v4193_v14 = vadd.f32 %v4192_v29, %v4191_v57  ;;  %v3076_v60 = vpop.f32.mrf.mxu1  ;;  %v3146_v42 = vadd.f32 %v5992_v6, %v3123_v0 }
 0x241   : > { %v4194_v2 = vpop.f32.mrf.mxu0 }
 0x242   : > { %3672 = vst [vmem:[%s6005_s22] sm:$0xff] %v3671_v1   ;;  %v3124_v59 = vmax.f32 %v5873_v52, %v3070_v19  ;;  %v2978_v20 = vadd.f32 %v4193_v14, %v5883_v4  ;;  %v3077_v36 = vpop.f32.mrf.mxu1  ;;  %v3162_v15 = vmax.f32 %v3146_v42, 0.0 }
 0x243   : > { %v4195_v10 = vpop.f32.mrf.mxu0 }
 0x244   : > { %v3147_v55 = vadd.f32 %v5992_v6, %v3124_v59  ;;  %v3075_v11 = vadd.f32 %v3074_v38, %v2978_v20  ;;  %v4196_v21 = vadd.f32 %v4195_v10, %v4194_v2  ;;  %v3079_v26 = vpop.f32.mrf.mxu1 }
 0x245   : > { %v4197_v62 = vpop.f32.mrf.mxu0 }
 0x246   : > { %v3163_v13 = vmax.f32 %v3147_v55, 0.0  ;;  %v3125_v8 = vmax.f32 %v5881_v39, %v3075_v11  ;;  %v2981_v47 = vadd.f32 %v4196_v21, %v4132_v56  ;;  %v3082_v52 = vpop.f32.mrf.mxu1  ;;  %v4138_v39 = vadd.f32 %v5911_v18, %v5904_v40 }
 0x247   : > { %v4198_v58 = vpop.f32.mrf.mxu0 }
 0x248   : > { %v3676_v4 = vpack.c.bf16 %v3163_v13, %v3162_v15  ;;  %v3078_v31 = vadd.f32 %v3077_v36, %v2981_v47  ;;  %v4199_v53 = vadd.f32 %v4198_v58, %v4197_v62  ;;  %v3084_v46 = vpop.f32.mrf.mxu1  ;;  %v3148_v7 = vadd.f32 %v5992_v6, %v3125_v8 }
 0x249   : > { %v4200_v9 = vpop.f32.mrf.mxu0 }
 0x24a   : > { %3708 = vst [vmem:[%s6005_s22 + $0x8] sm:$0xff] %v3676_v4   ;;  %v3126_v30 = vmax.f32 %v5891_v45, %v3078_v31  ;;  %v2986_v57 = vadd.f32 %v4199_v53, %v5901_v34  ;;  %v3085_v28 = vpop.f32.mrf.mxu1  ;;  %v3164_v19 = vmax.f32 %v3148_v7, 0.0 }
 0x24b   : > { %v4201_v22 = vpop.f32.mrf.mxu0 }
 0x24c   : > { %v3149_v0 = vadd.f32 %v5992_v6, %v3126_v30  ;;  %v3083_v41 = vadd.f32 %v3082_v52, %v2986_v57  ;;  %v4202_v38 = vadd.f32 %v4201_v22, %v4200_v9  ;;  %v3087_v29 = vpop.f32.mrf.mxu1 }
 0x24d   : > { %v4203_v1 = vpop.f32.mrf.mxu0 }
 0x24e   : > { %v3165_v14 = vmax.f32 %v3149_v0, 0.0  ;;  %v3127_v60 = vmax.f32 %v5899_v61, %v3083_v41  ;;  %v2989_v2 = vadd.f32 %v4202_v38, %v4138_v39  ;;  %v3090_v45 = vpop.f32.mrf.mxu1  ;;  %v4144_v61 = vadd.f32 %v5929_v33, %v5922_v24 }
 0x24f   : > { %v4204_v42 = vpop.f32.mrf.mxu0 }
 0x250   : > { %v3681_v34 = vpack.c.bf16 %v3165_v14, %v3164_v19  ;;  %v3086_v59 = vadd.f32 %v3085_v28, %v2989_v2  ;;  %v4205_v20 = vadd.f32 %v4204_v42, %v4203_v1  ;;  %v3092_v36 = vpop.f32.mrf.mxu1  ;;  %v3150_v40 = vadd.f32 %v5992_v6, %v3127_v60 }
 0x251   : > { %v4206_v10 = vpop.f32.mrf.mxu0 }
 0x252   : > { %3709 = vst [vmem:[%s6005_s22 + $0x10] sm:$0xff] %v3681_v34   ;;  %v3128_v18 = vmax.f32 %v5909_v27, %v3086_v59  ;;  %v2994_v56 = vadd.f32 %v4205_v20, %v5919_v5  ;;  %v3093_v55 = vpop.f32.mrf.mxu1  ;;  %v3166_v8 = vmax.f32 %v3150_v40, 0.0 }
 0x253   : > { %v4207_v11 = vpop.f32.mrf.mxu0 }
 0x254   : > { %v3151_v21 = vadd.f32 %v5992_v6, %v3128_v18  ;;  %v3091_v26 = vadd.f32 %v3090_v45, %v2994_v56  ;;  %v4208_v62 = vadd.f32 %v4207_v11, %v4206_v10  ;;  %v3095_v15 = vpop.f32.mrf.mxu1 }
 0x255   : > { %v4209_v13 = vpop.f32.mrf.mxu0 }
 0x256   : > { %v3167_v47 = vmax.f32 %v3151_v21, 0.0  ;;  %v3129_v52 = vmax.f32 %v5917_v16, %v3091_v26  ;;  %v2997_v58 = vadd.f32 %v4208_v62, %v4144_v61  ;;  %v3098_v27 = vpop.f32.mrf.mxu1  ;;  %v4150_v16 = vadd.f32 %v5947_v49, %v5940_v3 }
 0x257   : > { %v4210_v4 = vpop.f32.mrf.mxu0 }
 0x258   : > { %v3686_v5 = vpack.c.bf16 %v3167_v47, %v3166_v8  ;;  %v3094_v31 = vadd.f32 %v3093_v55, %v2997_v58  ;;  %v4211_v53 = vadd.f32 %v4210_v4, %v4209_v13  ;;  %v3100_v46 = vpop.f32.mrf.mxu1  ;;  %v3152_v24 = vadd.f32 %v5992_v6, %v3129_v52 }
 0x259   : > { %v4212_v9 = vpop.f32.mrf.mxu0 }
 0x25a   : > { %3710 = vst [vmem:[%s6005_s22 + $0x18] sm:$0xff] %v3686_v5   ;;  %v3130_v33 = vmax.f32 %v5927_v35, %v3094_v31  ;;  %v3002_v7 = vadd.f32 %v4211_v53, %v5937_v23  ;;  %v3101_v30 = vpop.f32.mrf.mxu1  ;;  %v3168_v38 = vmax.f32 %v3152_v24, 0.0 }
 0x25b   : > { %v4213_v57 = vpop.f32.mrf.mxu0 }
 0x25c   : > { %v3153_v28 = vadd.f32 %v5992_v6, %v3130_v33  ;;  %v3099_v22 = vadd.f32 %v3098_v27, %v3002_v7  ;;  %v4214_v39 = vadd.f32 %v4213_v57, %v4212_v9  ;;  %v3103_v0 = vpop.f32.mrf.mxu1 }
 0x25d   : > { %v4215_v41 = vpop.f32.mrf.mxu0 }
 0x25e   : > { %v3169_v29 = vmax.f32 %v3153_v28, 0.0  ;;  %v3131_v1 = vmax.f32 %v5935_v63, %v3099_v22  ;;  %v3005_v19 = vadd.f32 %v4214_v39, %v4150_v16  ;;  %v3106_v35 = vpop.f32.mrf.mxu1  ;;  %v4156_v63 = vadd.f32 %v5965_v25, %v5958_v51 }
 0x25f   : > { %v4216_v14 = vpop.f32.mrf.mxu0 }
 0x260   : > { %v3691_v23 = vpack.c.bf16 %v3169_v29, %v3168_v38  ;;  %v3102_v60 = vadd.f32 %v3101_v30, %v3005_v19  ;;  %v4217_v2 = vadd.f32 %v4216_v14, %v4215_v41  ;;  %v3108_v45 = vpop.f32.mrf.mxu1  ;;  %v3154_v3 = vadd.f32 %v5992_v6, %v3131_v1 }
 0x261   : > { %v4218_v42 = vpop.f32.mrf.mxu0 }
 0x262   : > { %3711 = vst [vmem:[%s6005_s22 + $0x20] sm:$0xff] %v3691_v23   ;;  %v3132_v49 = vmax.f32 %v5945_v48, %v3102_v60  ;;  %v3010_v34 = vadd.f32 %v4217_v2, %v5955_v32  ;;  %v3109_v59 = vpop.f32.mrf.mxu1  ;;  %v3170_v55 = vmax.f32 %v3154_v3, 0.0 }
 0x263   : > { %v4219_v20 = vpop.f32.mrf.mxu0 }
 0x264   : > { %v3155_v36 = vadd.f32 %v5992_v6, %v3132_v49  ;;  %v3107_v10 = vadd.f32 %v3106_v35, %v3010_v34  ;;  %v4220_v40 = vadd.f32 %v4219_v20, %v4218_v42  ;;  %v3111_v18 = vpop.f32.mrf.mxu1 }
 0x265   : > { %v4221_v56 = vpop.f32.mrf.mxu0 }
 0x266   : > { %v3171_v11 = vmax.f32 %v3155_v36, 0.0  ;;  %v3133_v61 = vmax.f32 %v5953_v54, %v3107_v10  ;;  %v3013_v21 = vadd.f32 %v4220_v40, %v4156_v63  ;;  %v3114_v48 = vpop.f32.mrf.mxu1  ;;  %v4162_v54 = vadd.f32 %v5983_v50, %v5976_v43 }
 0x267   : > { %v4222_v26 = vpop.f32.mrf.mxu0 }
 0x268   : > { %v3696_v32 = vpack.c.bf16 %v3171_v11, %v3170_v55  ;;  %v3110_v62 = vadd.f32 %v3109_v59, %v3013_v21  ;;  %v4223_v15 = vadd.f32 %v4222_v26, %v4221_v56  ;;  %v3116_v13 = vpop.f32.mrf.mxu1  ;;  %v3156_v51 = vadd.f32 %v5992_v6, %v3133_v61 }
 0x269   : > { %v4224_v8 = vpop.f32.mrf.mxu0 }
 0x26a   : > { %3712 = vst [vmem:[%s6005_s22 + $0x28] sm:$0xff] %v3696_v32   ;;  %v3134_v25 = vmax.f32 %v5963_v12, %v3110_v62  ;;  %v3018_v47 = vadd.f32 %v4223_v15, %v5973_v44  ;;  %v3117_v52 = vpop.f32.mrf.mxu1  ;;  %v3172_v53 = vmax.f32 %v3156_v51, 0.0 }
 0x26b   : > { %v4225_v58 = vpop.f32.mrf.mxu0 }
 0x26c   : > { %v3157_v27 = vadd.f32 %v5992_v6, %v3134_v25  ;;  %v3115_v4 = vadd.f32 %v3114_v48, %v3018_v47  ;;  %v4226_v5 = vadd.f32 %v4225_v58, %v4224_v8  ;;  %v3119_v31 = vpop.f32.mrf.mxu1 }
 0x26e   : > { %v3173_v46 = vmax.f32 %v3157_v27, 0.0  ;;  %v3135_v9 = vmax.f32 %v5971_v17, %v3115_v4  ;;  %v3021_v24 = vadd.f32 %v4226_v5, %v4162_v54 }
 0x270   : > { %v3701_v33 = vpack.c.bf16 %v3173_v46, %v3172_v53  ;;  %v3118_v12 = vadd.f32 %v3117_v52, %v3021_v24  ;;  %v3158_v44 = vadd.f32 %v5992_v6, %v3135_v9 }
 0x272   : > { %3713 = vst [vmem:[%s6005_s22 + $0x30] sm:$0xff] %v3701_v33   ;;  %v3136_v7 = vmax.f32 %v5981_v37, %v3118_v12  ;;  %v3174_v50 = vmax.f32 %v3158_v44, 0.0 }
 0x274   : > { %v3159_v43 = vadd.f32 %v5992_v6, %v3136_v7 }
 0x276   : > { %v3175_v30 = vmax.f32 %v3159_v43, 0.0 }
 0x278   : > { %v3706_v57 = vpack.c.bf16 %v3175_v30, %v3174_v50 }
 0x27a   : > { %3714 = vst [vmem:[%s6005_s22 + $0x38] sm:$0xff] %v3706_v57  }
 0x27b PF: > { %s16_s21 = sadd.s32 1, %s4623_s21  }
 0x27c   : > { %p13_p4 = scmp.ge.s32.totalorder %s16_s21, 4  }
 0x27e   :  { %15 = sbr.rel (!%p13_p4) target bundleno = 1 (0x1), region = 83 }

// kernel: christoph_cnn_with_pcen_forward.7
= control target key start
LH: loop header
LB: loop body
LE: loop exit
PB: predicated region body
PF: predicated region fallthrough
CT: control target
= control target key end

     0   :  { %v482_v35 = vlaneseq  ;;  %v4908_v36 = vmov 1966171168   ;;  %s6524_s0 = inlined_call_operand.vmem [shape: bf16[2,3630], index: 0, kind: input, shape index: {}]   ;;  %s6525_s1 = inlined_call_operand.vmem [shape: bf16[3630,200], index: 1, kind: input, shape index: {}]   ;;  %s6526_s2 = inlined_call_operand.vmem [shape: f32[1,200], index: 2, kind: input, shape index: {}]   ;;  %s6527_s3 = inlined_call_operand.vmem [shape: f32[200,2], index: 3, kind: input, shape index: {}]   ;;  %s6528_s4 = inlined_call_operand.vmem [shape: f32[1,2], index: 4, kind: input, shape index: {}]   ;;  %s6529_s5 = inlined_call_operand.hbm [shape: f32[2,2], index: 5, kind: output, shape index: {}]  }
   0x1   :  { %v4197_v0 = vld [vmem:[%s6525_s1 + $0x74] ss:$8 sps:$4 sm:$0xff]   ;;  %v4199_v1 = vld [vmem:[%s6525_s1 + $0x70] ss:$8 sps:$4 sm:$0xff]   ;;  %v4203_v4 = vld [vmem:[%s6525_s1 + $0x64] ss:$8 sps:$4 sm:$0xff]   ;;  %v498_v37 = vunpack.c.l.s4 %v4908_v36 }
   0x2   :  { %2989 = vmatprep.subr.bf16.mxu0 %v4197_v0  ;;  %v4200_v2 = vld [vmem:[%s6525_s1 + $0x174] ss:$8 sps:$4 sm:$0xff]   ;;  %v4202_v3 = vld [vmem:[%s6525_s1 + $0x170] ss:$8 sps:$4 sm:$0xff]   ;;  %v4205_v5 = vld [vmem:[%s6525_s1 + $0x60] ss:$8 sps:$4 sm:$0xff]  }
   0x3   :  { %2990 = vmatpush1.bf16.msra.mxu0 %v4199_v1  ;;  %3030 = vmatprep.subr.bf16.mxu1 %v4200_v2  ;;  %v4206_v6 = vld [vmem:[%s6525_s1 + $0x164] ss:$8 sps:$4 sm:$0xff]   ;;  %v4208_v7 = vld [vmem:[%s6525_s1 + $0x160] ss:$8 sps:$4 sm:$0xff]   ;;  %v4209_v8 = vld [vmem:[%s6525_s1 + $0x54] ss:$8 sps:$4 sm:$0xff]   ;;  %v499_v43 = vunpack.c.0.s8 %v498_v37 }
   0x4   :  { %3031 = vmatpush1.bf16.msra.mxu1 %v4202_v3  ;;  %2991 = vmatprep.subr.bf16.mxu0 %v4203_v4  ;;  %v4211_v9 = vld [vmem:[%s6525_s1 + $0x50] ss:$8 sps:$4 sm:$0xff]   ;;  %v4212_v10 = vld [vmem:[%s6525_s1 + $0x154] ss:$8 sps:$4 sm:$0xff]   ;;  %v4215_v11 = vld [vmem:[%s6525_s1 + $0x44] ss:$8 sps:$4 sm:$0xff]  }
   0x5   :  { %3032 = vmatprep.subr.bf16.mxu1 %v4206_v6  ;;  %v4214_v12 = vld [vmem:[%s6525_s1 + $0x150] ss:$8 sps:$4 sm:$0xff]   ;;  %v4218_v13 = vld [vmem:[%s6525_s1 + $0x144] ss:$8 sps:$4 sm:$0xff]   ;;  %v4217_v14 = vld [vmem:[%s6525_s1 + $0x40] ss:$8 sps:$4 sm:$0xff]  }
   0x6   :  { %v4221_v15 = vld [vmem:[%s6525_s1 + $0x34] ss:$8 sps:$4 sm:$0xff]   ;;  %v4220_v16 = vld [vmem:[%s6525_s1 + $0x140] ss:$8 sps:$4 sm:$0xff]   ;;  %v4223_v18 = vld [vmem:[%s6525_s1 + $0x30] ss:$8 sps:$4 sm:$0xff]  }
   0x7   :  { %2992 = vmatpush1.bf16.msra.mxu0 %v4205_v5  ;;  %v4224_v17 = vld [vmem:[%s6525_s1 + $0x134] ss:$8 sps:$4 sm:$0xff]   ;;  %v4227_v19 = vld [vmem:[%s6525_s1 + $0x24] ss:$8 sps:$4 sm:$0xff]   ;;  %v4226_v20 = vld [vmem:[%s6525_s1 + $0x130] ss:$8 sps:$4 sm:$0xff]  }
   0x8   :  { %2993 = vmatprep.subr.bf16.mxu0 %v4209_v8  ;;  %3033 = vmatpush1.bf16.msra.mxu1 %v4208_v7  ;;  %v4230_v21 = vld [vmem:[%s6525_s1 + $0x124] ss:$8 sps:$4 sm:$0xff]   ;;  %v4229_v22 = vld [vmem:[%s6525_s1 + $0x20] ss:$8 sps:$4 sm:$0xff]   ;;  %v4233_v23 = vld [vmem:[%s6525_s1 + $0x14] ss:$8 sps:$4 sm:$0xff]  }
   0x9   :  { %3034 = vmatprep.subr.bf16.mxu1 %v4212_v10  ;;  %v4232_v24 = vld [vmem:[%s6525_s1 + $0x120] ss:$8 sps:$4 sm:$0xff]   ;;  %v4236_v25 = vld [vmem:[%s6525_s1 + $0x114] ss:$8 sps:$4 sm:$0xff]   ;;  %v4235_v26 = vld [vmem:[%s6525_s1 + $0x10] ss:$8 sps:$4 sm:$0xff]  }
   0xa   :  { %v4239_v27 = vld [vmem:[%s6525_s1 + $0x4] ss:$8 sps:$4 sm:$0xff]   ;;  %v4238_v28 = vld [vmem:[%s6525_s1 + $0x110] ss:$8 sps:$4 sm:$0xff]   ;;  %v4241_v30 = vld [vmem:[%s6525_s1] ss:$8 sps:$4 sm:$0xff]  }
   0xb   :  { %2994 = vmatpush1.bf16.msra.mxu0 %v4211_v9  ;;  %v4242_v29 = vld [vmem:[%s6525_s1 + $0x104] ss:$8 sps:$4 sm:$0xff]   ;;  %v4245_v31 = vld [vmem:[%s6525_s1 + $0xf4] ss:$8 sps:$4 sm:$0xff]   ;;  %v4244_v32 = vld [vmem:[%s6525_s1 + $0x100] ss:$8 sps:$4 sm:$0xff]  }
   0xc   :  { %2995 = vmatprep.subr.bf16.mxu0 %v4215_v11  ;;  %3035 = vmatpush1.bf16.msra.mxu1 %v4214_v12  ;;  %v4248_v33 = vld [vmem:[%s6525_s1 + $0x1f4] ss:$8 sps:$4 sm:$0xff]   ;;  %v4247_v34 = vld [vmem:[%s6525_s1 + $0xf0] ss:$8 sps:$4 sm:$0xff]   ;;  %v4251_v38 = vld [vmem:[%s6525_s1 + $0xe4] ss:$8 sps:$4 sm:$0xff]  }
   0xd   :  { %3036 = vmatprep.subr.bf16.mxu1 %v4218_v13  ;;  %v4250_v39 = vld [vmem:[%s6525_s1 + $0x1f0] ss:$8 sps:$4 sm:$0xff]   ;;  %v4254_v40 = vld [vmem:[%s6525_s1 + $0x1e4] ss:$8 sps:$4 sm:$0xff]   ;;  %v4253_v41 = vld [vmem:[%s6525_s1 + $0xe0] ss:$8 sps:$4 sm:$0xff]  }
   0xe   :  { %v5059_v42 = vshrl.u32 %v482_v35, 7  ;;  %v4257_v44 = vld [vmem:[%s6525_s1 + $0xd4] ss:$8 sps:$4 sm:$0xff]   ;;  %v4256_v45 = vld [vmem:[%s6525_s1 + $0x1e0] ss:$8 sps:$4 sm:$0xff]  }
   0xf   :  { %2996 = vmatpush1.bf16.msra.mxu0 %v4217_v14  ;;  %v4260_v46 = vld [vmem:[%s6525_s1 + $0x1d4] ss:$8 sps:$4 sm:$0xff]   ;;  %v4259_v47 = vld [vmem:[%s6525_s1 + $0xd0] ss:$8 sps:$4 sm:$0xff]   ;;  %v4263_v49 = vld [vmem:[%s6525_s1 + $0xc4] ss:$8 sps:$4 sm:$0xff]  }
  0x10   :  { %2997 = vmatprep.subr.bf16.mxu0 %v4221_v15  ;;  %3037 = vmatpush1.bf16.msra.mxu1 %v4220_v16  ;;  %v5074_v48 = vsub.s32 %v499_v43, %v5059_v42  ;;  %v4262_v50 = vld [vmem:[%s6525_s1 + $0x1d0] ss:$8 sps:$4 sm:$0xff]   ;;  %v4266_v51 = vld [vmem:[%s6525_s1 + $0x1c4] ss:$8 sps:$4 sm:$0xff]   ;;  %v4265_v53 = vld [vmem:[%s6525_s1 + $0xc0] ss:$8 sps:$4 sm:$0xff]  }
  0x11   :  { %3038 = vmatprep.subr.bf16.mxu1 %v4224_v17  ;;  %v22_v52 = vld [vmem:[%s6524_s0] sm:$0xff]  ;;  %v4269_v55 = vld [vmem:[%s6525_s1 + $0xb4] ss:$8 sps:$4 sm:$0xff]   ;;  %v4271_v59 = vld [vmem:[%s6525_s1 + $0xb0] ss:$8 sps:$4 sm:$0xff]  }
  0x12   :  { %v503_v54 = vrot.slane %v22_v52, %v5074_v48  ;;  %v4268_v56 = vld [vmem:[%s6525_s1 + $0x1c0] ss:$8 sps:$4 sm:$0xff]   ;;  %v4272_v58 = vld [vmem:[%s6525_s1 + $0x1b4] ss:$8 sps:$4 sm:$0xff]   ;;  %v4275_v61 = vld [vmem:[%s6525_s1 + $0xa4] ss:$8 sps:$4 sm:$0xff]   ;;  %v496_v63 = vcombine.high %v22_v52, %v22_v52 }
  0x13   :  { %2998 = vmatpush1.bf16.msra.mxu0 %v4223_v18  ;;  %v4274_v62 = vld [vmem:[%s6525_s1 + $0x1b0] ss:$8 sps:$4 sm:$0xff]   ;;  %v4278_v1 = vld [vmem:[%s6525_s1 + $0x1a4] ss:$8 sps:$4 sm:$0xff]   ;;  %v4277_v2 = vld [vmem:[%s6525_s1 + $0xa0] ss:$8 sps:$4 sm:$0xff]  }
  0x14   :  { %2999 = vmatprep.subr.bf16.mxu0 %v4227_v19  ;;  %3039 = vmatpush1.bf16.msra.mxu1 %v4226_v20  ;;  %v511_v57 = vcombine.high %v503_v54, %v503_v54  ;;  %v4281_v3 = vld [vmem:[%s6525_s1 + $0x94] ss:$8 sps:$4 sm:$0xff]   ;;  %v4280_v4 = vld [vmem:[%s6525_s1 + $0x1a0] ss:$8 sps:$4 sm:$0xff]   ;;  %v5124_v5 = vrot.slane %v496_v63, %v5074_v48  ;;  %v4283_v7 = vld [vmem:[%s6525_s1 + $0x90] ss:$8 sps:$4 sm:$0xff]   ;;  %v519_v13 = vrot.slane %v503_v54, %v5074_v48 }
  0x15   :  { %3040 = vmatprep.subr.bf16.mxu1 %v4230_v21  ;;  %v4284_v6 = vld [vmem:[%s6525_s1 + $0x194] ss:$8 sps:$4 sm:$0xff]   ;;  %v4287_v8 = vld [vmem:[%s6525_s1 + $0x84] ss:$8 sps:$4 sm:$0xff]   ;;  %v4286_v9 = vld [vmem:[%s6525_s1 + $0x190] ss:$8 sps:$4 sm:$0xff]  }
  0x16   :  { %v533_v60 = vrot.slane %v511_v57, %v5074_v48  ;;  %v512_v10 = vcombine.high %v5124_v5, %v5124_v5  ;;  %v4290_v11 = vld [vmem:[%s6525_s1 + $0x184] ss:$8 sps:$4 sm:$0xff]   ;;  %v4289_v12 = vld [vmem:[%s6525_s1 + $0x80] ss:$8 sps:$4 sm:$0xff]   ;;  %v4296_v14 = vld [vmem:[%s6525_s1 + $0x274] ss:$8 sps:$4 sm:$0xff]   ;;  %v541_v19 = vcombine.high %v519_v13, %v519_v13 }
  0x17   :  { %3000 = vmatpush1.bf16.msra.mxu0 %v4229_v22  ;;  %v4293_v15 = vld [vmem:[%s6525_s1 + $0x180] ss:$8 sps:$4 sm:$0xff]   ;;  %v4299_v17 = vld [vmem:[%s6525_s1 + $0x374] ss:$8 sps:$4 sm:$0xff]   ;;  %v4294_v18 = vld [vmem:[%s6525_s1 + $0x270] ss:$8 sps:$4 sm:$0xff]  }
  0x18   :  { %3001 = vmatprep.subr.bf16.mxu0 %v4233_v23  ;;  %3041 = vmatpush1.bf16.msra.mxu1 %v4232_v24  ;;  %v543_v0 = vcombine.high %v533_v60, %v533_v60  ;;  %v540_v16 = vrot.slane %v512_v10, %v5074_v48  ;;  %v4302_v20 = vld [vmem:[%s6525_s1 + $0x264] ss:$8 sps:$4 sm:$0xff]   ;;  %v4297_v21 = vld [vmem:[%s6525_s1 + $0x370] ss:$8 sps:$4 sm:$0xff]   ;;  %v4300_v24 = vld [vmem:[%s6525_s1 + $0x260] ss:$8 sps:$4 sm:$0xff]  }
  0x19   :  { %3042 = vmatprep.subr.bf16.mxu1 %v4236_v25  ;;  %3021 = vmatprep.mubr.bf16.mxu0 %v533_v60  ;;  %v4305_v23 = vld [vmem:[%s6525_s1 + $0x364] ss:$8 sps:$4 sm:$0xff]   ;;  %v4308_v25 = vld [vmem:[%s6525_s1 + $0x254] ss:$8 sps:$4 sm:$0xff]   ;;  %v4318_v36 = vld [vmem:[%s6525_s1 + $0x230] ss:$8 sps:$4 sm:$0xff]  }
  0x1a   :  { %3062 = vmatprep.mubr.bf16.mxu1 %v543_v0  ;;  %v544_v22 = vcombine.high %v540_v16, %v540_v16  ;;  %v4323_v35 = vld [vmem:[%s6525_s1 + $0x334] ss:$8 sps:$4 sm:$0xff]   ;;  %v4326_v37 = vld [vmem:[%s6525_s1 + $0x224] ss:$8 sps:$4 sm:$0xff]   ;;  %v4327_v43 = vld [vmem:[%s6525_s1 + $0x320] ss:$8 sps:$4 sm:$0xff]  }
  0x1b   :  { %3002 = vmatpush1.bf16.msra.mxu0 %v4235_v26  ;;  %v4303_v26 = vld [vmem:[%s6525_s1 + $0x360] ss:$8 sps:$4 sm:$0xff]   ;;  %v4342_v54 = vld [vmem:[%s6525_s1 + $0x2f0] ss:$8 sps:$4 sm:$0xff]   ;;  %v4353_v57 = vld [vmem:[%s6525_s1 + $0x3e4] ss:$8 sps:$4 sm:$0xff]  }
  0x1c   :  { %3003 = vmatprep.subr.bf16.mxu0 %v4239_v27  ;;  %3043 = vmatpush1.bf16.msra.mxu1 %v4238_v28  ;;  %v4311_v27 = vld [vmem:[%s6525_s1 + $0x354] ss:$8 sps:$4 sm:$0xff]   ;;  %v4306_v28 = vld [vmem:[%s6525_s1 + $0x250] ss:$8 sps:$4 sm:$0xff]   ;;  %v4339_v52 = vld [vmem:[%s6525_s1 + $0x300] ss:$8 sps:$4 sm:$0xff]  }
  0x1d   :  { %3044 = vmatprep.subr.bf16.mxu1 %v4242_v29  ;;  %v4314_v29 = vld [vmem:[%s6525_s1 + $0x244] ss:$8 sps:$4 sm:$0xff]   ;;  %v4351_v60 = vld [vmem:[%s6525_s1 + $0x3e0] ss:$8 sps:$4 sm:$0xff]   ;;  %v4357_v0 = vld [vmem:[%s6525_s1 + $0x3d0] ss:$8 sps:$4 sm:$0xff]  }
  0x1e   :  { %v4362_v63 = vld [vmem:[%s6525_s1 + $0x2c4] ss:$8 sps:$4 sm:$0xff]  }
  0x1f   :  { %3004 = vmatpush1.bf16.msra.mxu0 %v4241_v30  ;;  %v4309_v30 = vld [vmem:[%s6525_s1 + $0x350] ss:$8 sps:$4 sm:$0xff]   ;;  %v4377_v10 = vld [vmem:[%s6525_s1 + $0x3a4] ss:$8 sps:$4 sm:$0xff]  }
  0x20   :  { %3005 = vmatprep.subr.bf16.mxu0 %v4245_v31  ;;  %3045 = vmatpush1.bf16.msra.mxu1 %v4244_v32  ;;  %v4317_v31 = vld [vmem:[%s6525_s1 + $0x344] ss:$8 sps:$4 sm:$0xff]   ;;  %v4312_v32 = vld [vmem:[%s6525_s1 + $0x240] ss:$8 sps:$4 sm:$0xff]  }
  0x21   :  { %3046 = vmatprep.subr.bf16.mxu1 %v4248_v33  ;;  %v4320_v33 = vld [vmem:[%s6525_s1 + $0x234] ss:$8 sps:$4 sm:$0xff]  }
  0x23   :  { %3006 = vmatpush2.bf16.msra.mxu0 %v4247_v34  ;;  %v4315_v34 = vld [vmem:[%s6525_s1 + $0x340] ss:$8 sps:$4 sm:$0xff]  }
  0x24   :  { %3007 = vmatprep.subr.bf16.mxu0 %v4251_v38  ;;  %3047 = vmatpush2.bf16.msra.mxu1 %v4250_v39  ;;  %v4321_v38 = vld [vmem:[%s6525_s1 + $0x330] ss:$8 sps:$4 sm:$0xff]   ;;  %v4329_v39 = vld [vmem:[%s6525_s1 + $0x324] ss:$8 sps:$4 sm:$0xff]  }
  0x25   :  { %3048 = vmatprep.subr.bf16.mxu1 %v4254_v40  ;;  %v4324_v40 = vld [vmem:[%s6525_s1 + $0x220] ss:$8 sps:$4 sm:$0xff]  }
  0x27   :  { %3008 = vmatpush2.bf16.msra.mxu0 %v4253_v41  ;;  %v4332_v41 = vld [vmem:[%s6525_s1 + $0x214] ss:$8 sps:$4 sm:$0xff]  }
  0x28   :  { %3009 = vmatprep.subr.bf16.mxu0 %v4257_v44  ;;  %3049 = vmatpush2.bf16.msra.mxu1 %v4256_v45  ;;  %v4335_v44 = vld [vmem:[%s6525_s1 + $0x314] ss:$8 sps:$4 sm:$0xff]   ;;  %v4330_v45 = vld [vmem:[%s6525_s1 + $0x210] ss:$8 sps:$4 sm:$0xff]  }
  0x29   :  { %3050 = vmatprep.subr.bf16.mxu1 %v4260_v46  ;;  %v4338_v46 = vld [vmem:[%s6525_s1 + $0x204] ss:$8 sps:$4 sm:$0xff]  }
  0x2b   :  { %3010 = vmatpush2.bf16.msra.mxu0 %v4259_v47  ;;  %v4333_v47 = vld [vmem:[%s6525_s1 + $0x310] ss:$8 sps:$4 sm:$0xff]  }
  0x2c   :  { %3011 = vmatprep.subr.bf16.mxu0 %v4263_v49  ;;  %3051 = vmatpush2.bf16.msra.mxu1 %v4262_v50  ;;  %v4341_v49 = vld [vmem:[%s6525_s1 + $0x304] ss:$8 sps:$4 sm:$0xff]   ;;  %v4336_v50 = vld [vmem:[%s6525_s1 + $0x200] ss:$8 sps:$4 sm:$0xff]  }
  0x2d   :  { %3052 = vmatprep.subr.bf16.mxu1 %v4266_v51  ;;  %v4344_v51 = vld [vmem:[%s6525_s1 + $0x2f4] ss:$8 sps:$4 sm:$0xff]  }
  0x2f   :  { %3012 = vmatpush2.bf16.msra.mxu0 %v4265_v53  ;;  %v4347_v53 = vld [vmem:[%s6525_s1 + $0x3f4] ss:$8 sps:$4 sm:$0xff]  }
  0x30   :  { %3013 = vmatprep.subr.bf16.mxu0 %v4269_v55  ;;  %3053 = vmatpush2.bf16.msra.mxu1 %v4268_v56  ;;  %v4350_v55 = vld [vmem:[%s6525_s1 + $0x2e4] ss:$8 sps:$4 sm:$0xff]   ;;  %v4345_v56 = vld [vmem:[%s6525_s1 + $0x3f0] ss:$8 sps:$4 sm:$0xff]  }
  0x31   :  { %3054 = vmatprep.subr.bf16.mxu1 %v4272_v58  ;;  %v4348_v58 = vld [vmem:[%s6525_s1 + $0x2e0] ss:$8 sps:$4 sm:$0xff]  }
  0x33   :  { %3014 = vmatpush2.bf16.msra.mxu0 %v4271_v59  ;;  %v4356_v59 = vld [vmem:[%s6525_s1 + $0x2d4] ss:$8 sps:$4 sm:$0xff]  }
  0x34   :  { %3015 = vmatprep.subr.bf16.mxu0 %v4275_v61  ;;  %3055 = vmatpush2.bf16.msra.mxu1 %v4274_v62  ;;  %v4359_v61 = vld [vmem:[%s6525_s1 + $0x3d4] ss:$8 sps:$4 sm:$0xff]   ;;  %v4354_v62 = vld [vmem:[%s6525_s1 + $0x2d0] ss:$8 sps:$4 sm:$0xff]  }
  0x35   :  { %3056 = vmatprep.subr.bf16.mxu1 %v4278_v1  ;;  %v4365_v1 = vld [vmem:[%s6525_s1 + $0x3c4] ss:$8 sps:$4 sm:$0xff]  }
  0x37   :  { %3016 = vmatpush2.bf16.msra.mxu0 %v4277_v2  ;;  %v4360_v2 = vld [vmem:[%s6525_s1 + $0x2c0] ss:$8 sps:$4 sm:$0xff]  }
  0x38   :  { %3017 = vmatprep.subr.bf16.mxu0 %v4281_v3  ;;  %3057 = vmatpush2.bf16.msra.mxu1 %v4280_v4  ;;  %v4368_v3 = vld [vmem:[%s6525_s1 + $0x2b4] ss:$8 sps:$4 sm:$0xff]   ;;  %v4363_v4 = vld [vmem:[%s6525_s1 + $0x3c0] ss:$8 sps:$4 sm:$0xff]  }
  0x39   :  { %3058 = vmatprep.subr.bf16.mxu1 %v4284_v6  ;;  %v4371_v6 = vld [vmem:[%s6525_s1 + $0x3b4] ss:$8 sps:$4 sm:$0xff]  }
  0x3b   :  { %3018 = vmatpush2.bf16.msra.mxu0 %v4283_v7  ;;  %v4366_v7 = vld [vmem:[%s6525_s1 + $0x2b0] ss:$8 sps:$4 sm:$0xff]  }
  0x3c   :  { %3019 = vmatprep.subr.bf16.mxu0 %v4287_v8  ;;  %3059 = vmatpush2.bf16.msra.mxu1 %v4286_v9  ;;  %v4374_v8 = vld [vmem:[%s6525_s1 + $0x2a4] ss:$8 sps:$4 sm:$0xff]   ;;  %v4369_v9 = vld [vmem:[%s6525_s1 + $0x3b0] ss:$8 sps:$4 sm:$0xff]  }
  0x3d   :  { %3060 = vmatprep.subr.bf16.mxu1 %v4290_v11  ;;  %v4372_v11 = vld [vmem:[%s6525_s1 + $0x2a0] ss:$8 sps:$4 sm:$0xff]  }
  0x3f   :  { %3020 = vmatpush2.bf16.msra.mxu0 %v4289_v12  ;;  %v4380_v12 = vld [vmem:[%s6525_s1 + $0x294] ss:$8 sps:$4 sm:$0xff]  }
  0x40   :  { %3071 = vmatprep.subr.bf16.mxu0 %v4296_v14  ;;  %3061 = vmatpush2.bf16.msra.mxu1 %v4293_v15  ;;  %v4383_v14 = vld [vmem:[%s6525_s1 + $0x394] ss:$8 sps:$4 sm:$0xff]   ;;  %v4378_v15 = vld [vmem:[%s6525_s1 + $0x290] ss:$8 sps:$4 sm:$0xff]  }
  0x41   :  { %3112 = vmatprep.subr.bf16.mxu1 %v4299_v17  ;;  %v4381_v17 = vld [vmem:[%s6525_s1 + $0x390] ss:$8 sps:$4 sm:$0xff]  }
  0x42   :  { %3022 = vmatmul.mubr.bf16.vlgmr.msra.gmra.mxu0 %v519_v13  ;;  %v4375_v13 = vld [vmem:[%s6525_s1 + $0x3a0] ss:$8 sps:$4 sm:$0xff]  }
  0x43   :  { %3072 = vmatpush1.bf16.msra.mxu0 %v4294_v18  ;;  %3103 = vmatprep.mubr.bf16.mxu0 %v540_v16  ;;  %v4386_v16 = vld [vmem:[%s6525_s1 + $0x284] ss:$8 sps:$4 sm:$0xff]  }
  0x44   :  { %3063 = vmatmul.mubr.bf16.vlgmr.msra.gmra.mxu1 %v541_v19  ;;  %3073 = vmatprep.subr.bf16.mxu0 %v4302_v20  ;;  %v4389_v18 = vld [vmem:[%s6525_s1 + $0x384] ss:$8 sps:$4 sm:$0xff]   ;;  %v4384_v19 = vld [vmem:[%s6525_s1 + $0x280] ss:$8 sps:$4 sm:$0xff]   ;;  %v526_v20 = vrot.slane %v5124_v5, %v5074_v48 }
  0x45   :  { %3113 = vmatpush1.bf16.msra.mxu1 %v4297_v21  ;;  %3144 = vmatprep.mubr.bf16.mxu1 %v544_v22  ;;  %v4392_v21 = vld [vmem:[%s6525_s1 + $0x474] ss:$8 sps:$4 sm:$0xff]   ;;  %v4387_v22 = vld [vmem:[%s6525_s1 + $0x380] ss:$8 sps:$4 sm:$0xff]  }
  0x46   :  { %3114 = vmatprep.subr.bf16.mxu1 %v4305_v23  ;;  %v4395_v23 = vld [vmem:[%s6525_s1 + $0x574] ss:$8 sps:$4 sm:$0xff]   ;;  %v542_v5 = vcombine.high %v526_v20, %v526_v20 }
  0x47   :  { %3074 = vmatpush1.bf16.msra.mxu0 %v4300_v24  ;;  %v4390_v24 = vld [vmem:[%s6525_s1 + $0x470] ss:$8 sps:$4 sm:$0xff]  }
  0x48   :  { %3075 = vmatprep.subr.bf16.mxu0 %v4308_v25  ;;  %v4398_v25 = vld [vmem:[%s6525_s1 + $0x464] ss:$8 sps:$4 sm:$0xff]  }
  0x49   :  { %3115 = vmatpush1.bf16.msra.mxu1 %v4303_v26  ;;  %v5360_v26 = vld [vmem:[%s6524_s0 + $0x8] sm:$0xff] }
  0x4a   :  { %3116 = vmatprep.subr.bf16.mxu1 %v4311_v27  ;;  %v4393_v27 = vld [vmem:[%s6525_s1 + $0x570] ss:$8 sps:$4 sm:$0xff]  }
  0x4b   :  { %3076 = vmatpush1.bf16.msra.mxu0 %v4306_v28  ;;  %v5367_v28 = vrot.slane %v5360_v26, %v5074_v48 }
  0x4c   :  { %3077 = vmatprep.subr.bf16.mxu0 %v4314_v29  ;;  %v4401_v29 = vld [vmem:[%s6525_s1 + $0x564] ss:$8 sps:$4 sm:$0xff]  }
  0x4d   :  { %3117 = vmatpush1.bf16.msra.mxu1 %v4309_v30  ;;  %v4396_v30 = vld [vmem:[%s6525_s1 + $0x460] ss:$8 sps:$4 sm:$0xff]  }
  0x4e   :  { %3118 = vmatprep.subr.bf16.mxu1 %v4317_v31  ;;  %v560_v31 = vcombine.high %v5367_v28, %v5367_v28 }
  0x4f   :  { %3078 = vmatpush1.bf16.msra.mxu0 %v4312_v32  ;;  %v4404_v32 = vld [vmem:[%s6525_s1 + $0x454] ss:$8 sps:$4 sm:$0xff]  }
  0x50   :  { %3079 = vmatprep.subr.bf16.mxu0 %v4320_v33  ;;  %v4399_v33 = vld [vmem:[%s6525_s1 + $0x560] ss:$8 sps:$4 sm:$0xff]  }
  0x51   :  { %3119 = vmatpush1.bf16.msra.mxu1 %v4315_v34  ;;  %v582_v34 = vrot.slane %v560_v31, %v5074_v48  ;;  %v4480_v31 = vld [vmem:[%s6525_s1 + $0x480] ss:$8 sps:$4 sm:$0xff]  }
  0x52   :  { %3120 = vmatprep.subr.bf16.mxu1 %v4323_v35  ;;  %v4407_v35 = vld [vmem:[%s6525_s1 + $0x554] ss:$8 sps:$4 sm:$0xff]  }
  0x53   :  { %3080 = vmatpush1.bf16.msra.mxu0 %v4318_v36  ;;  %v4402_v36 = vld [vmem:[%s6525_s1 + $0x450] ss:$8 sps:$4 sm:$0xff]  }
  0x54   :  { %3081 = vmatprep.subr.bf16.mxu0 %v4326_v37  ;;  %v592_v37 = vcombine.high %v582_v34, %v582_v34 }
  0x55   :  { %3121 = vmatpush1.bf16.msra.mxu1 %v4321_v38  ;;  %v4410_v38 = vld [vmem:[%s6525_s1 + $0x444] ss:$8 sps:$4 sm:$0xff]  }
  0x56   :  { %3122 = vmatprep.subr.bf16.mxu1 %v4329_v39  ;;  %v4405_v39 = vld [vmem:[%s6525_s1 + $0x550] ss:$8 sps:$4 sm:$0xff]  }
  0x57   :  { %3082 = vmatpush1.bf16.msra.mxu0 %v4324_v40  ;;  %v4413_v40 = vld [vmem:[%s6525_s1 + $0x544] ss:$8 sps:$4 sm:$0xff]  }
  0x58   :  { %3083 = vmatprep.subr.bf16.mxu0 %v4332_v41  ;;  %v4408_v41 = vld [vmem:[%s6525_s1 + $0x440] ss:$8 sps:$4 sm:$0xff]  }
  0x59   :  { %3123 = vmatpush1.bf16.msra.mxu1 %v4327_v43  ;;  %v4416_v43 = vld [vmem:[%s6525_s1 + $0x434] ss:$8 sps:$4 sm:$0xff]  }
  0x5a   :  { %3124 = vmatprep.subr.bf16.mxu1 %v4335_v44  ;;  %v4411_v44 = vld [vmem:[%s6525_s1 + $0x540] ss:$8 sps:$4 sm:$0xff]  }
  0x5b   :  { %3084 = vmatpush1.bf16.msra.mxu0 %v4330_v45  ;;  %v4419_v45 = vld [vmem:[%s6525_s1 + $0x534] ss:$8 sps:$4 sm:$0xff]  }
  0x5c   :  { %3085 = vmatprep.subr.bf16.mxu0 %v4338_v46  ;;  %v4414_v46 = vld [vmem:[%s6525_s1 + $0x430] ss:$8 sps:$4 sm:$0xff]  }
  0x5d   :  { %3125 = vmatpush1.bf16.msra.mxu1 %v4333_v47  ;;  %v4422_v47 = vld [vmem:[%s6525_s1 + $0x424] ss:$8 sps:$4 sm:$0xff]  }
  0x5e   :  { %3126 = vmatprep.subr.bf16.mxu1 %v4341_v49  ;;  %v4417_v49 = vld [vmem:[%s6525_s1 + $0x530] ss:$8 sps:$4 sm:$0xff]  }
  0x5f   :  { %3086 = vmatpush1.bf16.msra.mxu0 %v4336_v50  ;;  %v4425_v50 = vld [vmem:[%s6525_s1 + $0x524] ss:$8 sps:$4 sm:$0xff]  }
  0x60   :  { %3087 = vmatprep.subr.bf16.mxu0 %v4344_v51  ;;  %v4420_v51 = vld [vmem:[%s6525_s1 + $0x420] ss:$8 sps:$4 sm:$0xff]  }
  0x61   :  { %3127 = vmatpush1.bf16.msra.mxu1 %v4339_v52  ;;  %v4428_v52 = vld [vmem:[%s6525_s1 + $0x414] ss:$8 sps:$4 sm:$0xff]  }
  0x62   :  { %3128 = vmatprep.subr.bf16.mxu1 %v4347_v53  ;;  %v4423_v53 = vld [vmem:[%s6525_s1 + $0x520] ss:$8 sps:$4 sm:$0xff]  }
  0x63   :  { %3088 = vmatpush2.bf16.msra.mxu0 %v4342_v54  ;;  %v4431_v54 = vld [vmem:[%s6525_s1 + $0x514] ss:$8 sps:$4 sm:$0xff]  }
  0x64   :  { %3089 = vmatprep.subr.bf16.mxu0 %v4350_v55  ;;  %v4426_v55 = vld [vmem:[%s6525_s1 + $0x410] ss:$8 sps:$4 sm:$0xff]  }
  0x65   :  { %3129 = vmatpush2.bf16.msra.mxu1 %v4345_v56  ;;  %v4434_v56 = vld [vmem:[%s6525_s1 + $0x404] ss:$8 sps:$4 sm:$0xff]  }
  0x66   :  { %3130 = vmatprep.subr.bf16.mxu1 %v4353_v57  ;;  %v4429_v57 = vld [vmem:[%s6525_s1 + $0x510] ss:$8 sps:$4 sm:$0xff]  }
  0x67   :  { %3090 = vmatpush2.bf16.msra.mxu0 %v4348_v58  ;;  %v4437_v58 = vld [vmem:[%s6525_s1 + $0x504] ss:$8 sps:$4 sm:$0xff]  }
  0x68   :  { %3091 = vmatprep.subr.bf16.mxu0 %v4356_v59  ;;  %v4432_v59 = vld [vmem:[%s6525_s1 + $0x400] ss:$8 sps:$4 sm:$0xff]  }
  0x69   :  { %3131 = vmatpush2.bf16.msra.mxu1 %v4351_v60  ;;  %v4440_v60 = vld [vmem:[%s6525_s1 + $0x4f4] ss:$8 sps:$4 sm:$0xff]  }
  0x6a   :  { %3132 = vmatprep.subr.bf16.mxu1 %v4359_v61  ;;  %v4435_v61 = vld [vmem:[%s6525_s1 + $0x500] ss:$8 sps:$4 sm:$0xff]  }
  0x6b   :  { %3092 = vmatpush2.bf16.msra.mxu0 %v4354_v62  ;;  %v4443_v62 = vld [vmem:[%s6525_s1 + $0x5f4] ss:$8 sps:$4 sm:$0xff]  }
  0x6c   :  { %3093 = vmatprep.subr.bf16.mxu0 %v4362_v63  ;;  %v4438_v63 = vld [vmem:[%s6525_s1 + $0x4f0] ss:$8 sps:$4 sm:$0xff]  }
  0x6d   :  { %3133 = vmatpush2.bf16.msra.mxu1 %v4357_v0  ;;  %v4446_v0 = vld [vmem:[%s6525_s1 + $0x4e4] ss:$8 sps:$4 sm:$0xff]  }
  0x6e   :  { %3134 = vmatprep.subr.bf16.mxu1 %v4365_v1  ;;  %v4441_v1 = vld [vmem:[%s6525_s1 + $0x5f0] ss:$8 sps:$4 sm:$0xff]  }
  0x6f   :  { %3094 = vmatpush2.bf16.msra.mxu0 %v4360_v2  ;;  %v4449_v2 = vld [vmem:[%s6525_s1 + $0x5e4] ss:$8 sps:$4 sm:$0xff]  }
  0x70   :  { %3095 = vmatprep.subr.bf16.mxu0 %v4368_v3  ;;  %v4444_v3 = vld [vmem:[%s6525_s1 + $0x4e0] ss:$8 sps:$4 sm:$0xff]  }
  0x71   :  { %3135 = vmatpush2.bf16.msra.mxu1 %v4363_v4  ;;  %v4452_v4 = vld [vmem:[%s6525_s1 + $0x4d4] ss:$8 sps:$4 sm:$0xff]  }
  0x72   :  { %3136 = vmatprep.subr.bf16.mxu1 %v4371_v6  ;;  %v4447_v6 = vld [vmem:[%s6525_s1 + $0x5e0] ss:$8 sps:$4 sm:$0xff]  }
  0x73   :  { %3096 = vmatpush2.bf16.msra.mxu0 %v4366_v7  ;;  %v4455_v7 = vld [vmem:[%s6525_s1 + $0x5d4] ss:$8 sps:$4 sm:$0xff]  }
  0x74   :  { %3097 = vmatprep.subr.bf16.mxu0 %v4374_v8  ;;  %v4450_v8 = vld [vmem:[%s6525_s1 + $0x4d0] ss:$8 sps:$4 sm:$0xff]  }
  0x75   :  { %3137 = vmatpush2.bf16.msra.mxu1 %v4369_v9  ;;  %v4458_v9 = vld [vmem:[%s6525_s1 + $0x4c4] ss:$8 sps:$4 sm:$0xff]  }
  0x76   :  { %3138 = vmatprep.subr.bf16.mxu1 %v4377_v10  ;;  %v4453_v10 = vld [vmem:[%s6525_s1 + $0x5d0] ss:$8 sps:$4 sm:$0xff]  }
  0x77   :  { %3098 = vmatpush2.bf16.msra.mxu0 %v4372_v11  ;;  %v4461_v11 = vld [vmem:[%s6525_s1 + $0x5c4] ss:$8 sps:$4 sm:$0xff]  }
  0x78   :  { %3099 = vmatprep.subr.bf16.mxu0 %v4380_v12  ;;  %v4456_v12 = vld [vmem:[%s6525_s1 + $0x4c0] ss:$8 sps:$4 sm:$0xff]  }
  0x79   :  { %3139 = vmatpush2.bf16.msra.mxu1 %v4375_v13  ;;  %v4464_v13 = vld [vmem:[%s6525_s1 + $0x4b4] ss:$8 sps:$4 sm:$0xff]  }
  0x7a   :  { %3140 = vmatprep.subr.bf16.mxu1 %v4383_v14  ;;  %v4459_v14 = vld [vmem:[%s6525_s1 + $0x5c0] ss:$8 sps:$4 sm:$0xff]  }
  0x7b   :  { %3100 = vmatpush2.bf16.msra.mxu0 %v4378_v15  ;;  %v4467_v15 = vld [vmem:[%s6525_s1 + $0x5b4] ss:$8 sps:$4 sm:$0xff]  }
  0x7c   :  { %3101 = vmatprep.subr.bf16.mxu0 %v4386_v16  ;;  %v4462_v16 = vld [vmem:[%s6525_s1 + $0x4b0] ss:$8 sps:$4 sm:$0xff]  }
  0x7d   :  { %3141 = vmatpush2.bf16.msra.mxu1 %v4381_v17  ;;  %v4470_v17 = vld [vmem:[%s6525_s1 + $0x4a4] ss:$8 sps:$4 sm:$0xff]  }
  0x7e   :  { %3142 = vmatprep.subr.bf16.mxu1 %v4389_v18  ;;  %v4465_v18 = vld [vmem:[%s6525_s1 + $0x5b0] ss:$8 sps:$4 sm:$0xff]  }
  0x7f   :  { %3102 = vmatpush2.bf16.msra.mxu0 %v4384_v19  ;;  %v545_v19 = vcombine.high %v5360_v26, %v5360_v26  ;;  %v4482_v26 = vld [vmem:[%s6525_s1 + $0x484] ss:$8 sps:$4 sm:$0xff]  }
  0x80   :  { %3153 = vmatprep.subr.bf16.mxu0 %v4392_v21  ;;  %v4468_v21 = vld [vmem:[%s6525_s1 + $0x4a0] ss:$8 sps:$4 sm:$0xff]  }
  0x81   :  { %3143 = vmatpush2.bf16.msra.mxu1 %v4387_v22  ;;  %v4476_v22 = vld [vmem:[%s6525_s1 + $0x494] ss:$8 sps:$4 sm:$0xff]  }
  0x82   :  { %3104 = vmatmul.mubr.bf16.vlgmr.msra.gmra.mxu0 %v526_v20  ;;  %3194 = vmatprep.subr.bf16.mxu1 %v4395_v23  ;;  %v4473_v20 = vld [vmem:[%s6525_s1 + $0x5a4] ss:$8 sps:$4 sm:$0xff]   ;;  %v4471_v23 = vld [vmem:[%s6525_s1 + $0x5a0] ss:$8 sps:$4 sm:$0xff]  }
  0x83   :  { %3154 = vmatpush1.bf16.msra.mxu0 %v4390_v24  ;;  %3185 = vmatprep.mubr.bf16.mxu0 %v582_v34  ;;  %v5531_v24 = vrot.slane %v545_v19, %v5074_v48  ;;  %v4483_v34 = vld [vmem:[%s6525_s1 + $0x580] ss:$8 sps:$4 sm:$0xff]   ;;  %v4549_v19 = vld [vmem:[%s6525_s1 + $0x7d0] ss:$8 sps:$4 sm:$0xff]  }
  0x84   :  { %3145 = vmatmul.mubr.bf16.vlgmr.msra.gmra.mxu1 %v542_v5  ;;  %3155 = vmatprep.subr.bf16.mxu0 %v4398_v25  ;;  %v4479_v5 = vld [vmem:[%s6525_s1 + $0x594] ss:$8 sps:$4 sm:$0xff]   ;;  %v4474_v25 = vld [vmem:[%s6525_s1 + $0x490] ss:$8 sps:$4 sm:$0xff]  }
  0x85   :  { %3195 = vmatpush1.bf16.msra.mxu1 %v4393_v27  ;;  %3226 = vmatprep.mubr.bf16.mxu1 %v592_v37  ;;  %v4477_v27 = vld [vmem:[%s6525_s1 + $0x590] ss:$8 sps:$4 sm:$0xff]  }
  0x86   :  { %3196 = vmatprep.subr.bf16.mxu1 %v4401_v29  ;;  %v561_v29 = vcombine.high %v5531_v24, %v5531_v24 }
  0x87   :  { %3156 = vmatpush1.bf16.msra.mxu0 %v4396_v30  ;;  %v4485_v30 = vld [vmem:[%s6525_s1 + $0x584] ss:$8 sps:$4 sm:$0xff]  }
  0x88   :  { %3157 = vmatprep.subr.bf16.mxu0 %v4404_v32  ;;  %v568_v32 = vrot.slane %v5367_v28, %v5074_v48  ;;  %v4486_v28 = vld [vmem:[%s6525_s1 + $0x670] ss:$8 sps:$4 sm:$0xff]  }
  0x89   :  { %3197 = vmatpush1.bf16.msra.mxu1 %v4399_v33  ;;  %v4488_v33 = vld [vmem:[%s6525_s1 + $0x674] ss:$8 sps:$4 sm:$0xff]  }
  0x8a   :  { %3198 = vmatprep.subr.bf16.mxu1 %v4407_v35  ;;  %v589_v35 = vrot.slane %v561_v29, %v5074_v48  ;;  %v590_v37 = vcombine.high %v568_v32, %v568_v32  ;;  %v4569_v29 = vld [vmem:[%s6525_s1 + $0x7a4] ss:$8 sps:$4 sm:$0xff]  }
  0x8b   :  { %3158 = vmatpush1.bf16.msra.mxu0 %v4402_v36  ;;  %v4491_v36 = vld [vmem:[%s6525_s1 + $0x774] ss:$8 sps:$4 sm:$0xff]  }
  0x8c   :  { %3159 = vmatprep.subr.bf16.mxu0 %v4410_v38  ;;  %v4494_v38 = vld [vmem:[%s6525_s1 + $0x664] ss:$8 sps:$4 sm:$0xff]  }
  0x8d   :  { %3199 = vmatpush1.bf16.msra.mxu1 %v4405_v39  ;;  %v4489_v39 = vld [vmem:[%s6525_s1 + $0x770] ss:$8 sps:$4 sm:$0xff]  }
  0x8e   :  { %3200 = vmatprep.subr.bf16.mxu1 %v4413_v40  ;;  %v593_v40 = vcombine.high %v589_v35, %v589_v35 }
  0x8f   :  { %3160 = vmatpush1.bf16.msra.mxu0 %v4408_v41  ;;  %v4497_v41 = vld [vmem:[%s6525_s1 + $0x764] ss:$8 sps:$4 sm:$0xff]  }
  0x90   :  { %3161 = vmatprep.subr.bf16.mxu0 %v4416_v43  ;;  %v4492_v43 = vld [vmem:[%s6525_s1 + $0x660] ss:$8 sps:$4 sm:$0xff]  }
  0x91   :  { %3201 = vmatpush1.bf16.msra.mxu1 %v4411_v44  ;;  %v4500_v44 = vld [vmem:[%s6525_s1 + $0x654] ss:$8 sps:$4 sm:$0xff]  }
  0x92   :  { %3202 = vmatprep.subr.bf16.mxu1 %v4419_v45  ;;  %v4495_v45 = vld [vmem:[%s6525_s1 + $0x760] ss:$8 sps:$4 sm:$0xff]  }
  0x93   :  { %3162 = vmatpush1.bf16.msra.mxu0 %v4414_v46  ;;  %v4503_v46 = vld [vmem:[%s6525_s1 + $0x754] ss:$8 sps:$4 sm:$0xff]  }
  0x94   :  { %3163 = vmatprep.subr.bf16.mxu0 %v4422_v47  ;;  %v4498_v47 = vld [vmem:[%s6525_s1 + $0x650] ss:$8 sps:$4 sm:$0xff]  }
  0x95   :  { %3203 = vmatpush1.bf16.msra.mxu1 %v4417_v49  ;;  %v4506_v49 = vld [vmem:[%s6525_s1 + $0x644] ss:$8 sps:$4 sm:$0xff]  }
  0x96   :  { %3204 = vmatprep.subr.bf16.mxu1 %v4425_v50  ;;  %v4501_v50 = vld [vmem:[%s6525_s1 + $0x750] ss:$8 sps:$4 sm:$0xff]  }
  0x97   :  { %3164 = vmatpush1.bf16.msra.mxu0 %v4420_v51  ;;  %v4509_v51 = vld [vmem:[%s6525_s1 + $0x744] ss:$8 sps:$4 sm:$0xff]  }
  0x98   :  { %3165 = vmatprep.subr.bf16.mxu0 %v4428_v52  ;;  %v4504_v52 = vld [vmem:[%s6525_s1 + $0x640] ss:$8 sps:$4 sm:$0xff]  }
  0x99   :  { %3205 = vmatpush1.bf16.msra.mxu1 %v4423_v53  ;;  %v4512_v53 = vld [vmem:[%s6525_s1 + $0x634] ss:$8 sps:$4 sm:$0xff]  }
  0x9a   :  { %3206 = vmatprep.subr.bf16.mxu1 %v4431_v54  ;;  %v4507_v54 = vld [vmem:[%s6525_s1 + $0x740] ss:$8 sps:$4 sm:$0xff]  }
  0x9b   :  { %3166 = vmatpush1.bf16.msra.mxu0 %v4426_v55  ;;  %v4515_v55 = vld [vmem:[%s6525_s1 + $0x734] ss:$8 sps:$4 sm:$0xff]  }
  0x9c   :  { %3167 = vmatprep.subr.bf16.mxu0 %v4434_v56  ;;  %v4510_v56 = vld [vmem:[%s6525_s1 + $0x630] ss:$8 sps:$4 sm:$0xff]  }
  0x9d   :  { %3207 = vmatpush1.bf16.msra.mxu1 %v4429_v57  ;;  %v4518_v57 = vld [vmem:[%s6525_s1 + $0x624] ss:$8 sps:$4 sm:$0xff]  }
  0x9e   :  { %3208 = vmatprep.subr.bf16.mxu1 %v4437_v58  ;;  %v4513_v58 = vld [vmem:[%s6525_s1 + $0x730] ss:$8 sps:$4 sm:$0xff]  }
  0x9f   :  { %3168 = vmatpush1.bf16.msra.mxu0 %v4432_v59  ;;  %v4521_v59 = vld [vmem:[%s6525_s1 + $0x724] ss:$8 sps:$4 sm:$0xff]  }
  0xa0   :  { %3169 = vmatprep.subr.bf16.mxu0 %v4440_v60  ;;  %v4516_v60 = vld [vmem:[%s6525_s1 + $0x620] ss:$8 sps:$4 sm:$0xff]  }
  0xa1   :  { %3209 = vmatpush1.bf16.msra.mxu1 %v4435_v61  ;;  %v4524_v61 = vld [vmem:[%s6525_s1 + $0x614] ss:$8 sps:$4 sm:$0xff]  }
  0xa2   :  { %3210 = vmatprep.subr.bf16.mxu1 %v4443_v62  ;;  %v4519_v62 = vld [vmem:[%s6525_s1 + $0x720] ss:$8 sps:$4 sm:$0xff]  }
  0xa3   :  { %3170 = vmatpush2.bf16.msra.mxu0 %v4438_v63  ;;  %v4527_v63 = vld [vmem:[%s6525_s1 + $0x714] ss:$8 sps:$4 sm:$0xff]  }
  0xa4   :  { %3171 = vmatprep.subr.bf16.mxu0 %v4446_v0  ;;  %v4522_v0 = vld [vmem:[%s6525_s1 + $0x610] ss:$8 sps:$4 sm:$0xff]  }
  0xa5   :  { %3211 = vmatpush2.bf16.msra.mxu1 %v4441_v1  ;;  %v4530_v1 = vld [vmem:[%s6525_s1 + $0x604] ss:$8 sps:$4 sm:$0xff]  }
  0xa6   :  { %3212 = vmatprep.subr.bf16.mxu1 %v4449_v2  ;;  %v4525_v2 = vld [vmem:[%s6525_s1 + $0x710] ss:$8 sps:$4 sm:$0xff]  }
  0xa7   :  { %3172 = vmatpush2.bf16.msra.mxu0 %v4444_v3  ;;  %v4533_v3 = vld [vmem:[%s6525_s1 + $0x704] ss:$8 sps:$4 sm:$0xff]  }
  0xa8   :  { %3173 = vmatprep.subr.bf16.mxu0 %v4452_v4  ;;  %v4528_v4 = vld [vmem:[%s6525_s1 + $0x600] ss:$8 sps:$4 sm:$0xff]  }
  0xa9   :  { %3213 = vmatpush2.bf16.msra.mxu1 %v4447_v6  ;;  %v4536_v6 = vld [vmem:[%s6525_s1 + $0x6f4] ss:$8 sps:$4 sm:$0xff]  }
  0xaa   :  { %3214 = vmatprep.subr.bf16.mxu1 %v4455_v7  ;;  %v4531_v7 = vld [vmem:[%s6525_s1 + $0x700] ss:$8 sps:$4 sm:$0xff]  }
  0xab   :  { %3174 = vmatpush2.bf16.msra.mxu0 %v4450_v8  ;;  %v4539_v8 = vld [vmem:[%s6525_s1 + $0x7f4] ss:$8 sps:$4 sm:$0xff]  }
  0xac   :  { %3175 = vmatprep.subr.bf16.mxu0 %v4458_v9  ;;  %v4534_v9 = vld [vmem:[%s6525_s1 + $0x6f0] ss:$8 sps:$4 sm:$0xff]  }
  0xad   :  { %3215 = vmatpush2.bf16.msra.mxu1 %v4453_v10  ;;  %v4542_v10 = vld [vmem:[%s6525_s1 + $0x6e4] ss:$8 sps:$4 sm:$0xff]  }
  0xae   :  { %3216 = vmatprep.subr.bf16.mxu1 %v4461_v11  ;;  %v4537_v11 = vld [vmem:[%s6525_s1 + $0x7f0] ss:$8 sps:$4 sm:$0xff]  }
  0xaf   :  { %3176 = vmatpush2.bf16.msra.mxu0 %v4456_v12  ;;  %v4545_v12 = vld [vmem:[%s6525_s1 + $0x7e4] ss:$8 sps:$4 sm:$0xff]  }
  0xb0   :  { %3177 = vmatprep.subr.bf16.mxu0 %v4464_v13  ;;  %v4540_v13 = vld [vmem:[%s6525_s1 + $0x6e0] ss:$8 sps:$4 sm:$0xff]  }
  0xb1   :  { %3217 = vmatpush2.bf16.msra.mxu1 %v4459_v14  ;;  %v4548_v14 = vld [vmem:[%s6525_s1 + $0x6d4] ss:$8 sps:$4 sm:$0xff]  }
  0xb2   :  { %3218 = vmatprep.subr.bf16.mxu1 %v4467_v15  ;;  %v4543_v15 = vld [vmem:[%s6525_s1 + $0x7e0] ss:$8 sps:$4 sm:$0xff]  }
  0xb3   :  { %3178 = vmatpush2.bf16.msra.mxu0 %v4462_v16  ;;  %v4551_v16 = vld [vmem:[%s6525_s1 + $0x7d4] ss:$8 sps:$4 sm:$0xff]  }
  0xb4   :  { %3179 = vmatprep.subr.bf16.mxu0 %v4470_v17  ;;  %v4546_v17 = vld [vmem:[%s6525_s1 + $0x6d0] ss:$8 sps:$4 sm:$0xff]  }
  0xb5   :  { %3219 = vmatpush2.bf16.msra.mxu1 %v4465_v18  ;;  %v4554_v18 = vld [vmem:[%s6525_s1 + $0x6c4] ss:$8 sps:$4 sm:$0xff]  }
  0xb6   :  { %3220 = vmatprep.subr.bf16.mxu1 %v4473_v20  ;;  %v4557_v20 = vld [vmem:[%s6525_s1 + $0x7c4] ss:$8 sps:$4 sm:$0xff]  }
  0xb7   :  { %3180 = vmatpush2.bf16.msra.mxu0 %v4468_v21  ;;  %v4552_v21 = vld [vmem:[%s6525_s1 + $0x6c0] ss:$8 sps:$4 sm:$0xff]  }
  0xb8   :  { %3181 = vmatprep.subr.bf16.mxu0 %v4476_v22  ;;  %v4560_v22 = vld [vmem:[%s6525_s1 + $0x6b4] ss:$8 sps:$4 sm:$0xff]  }
  0xb9   :  { %3221 = vmatpush2.bf16.msra.mxu1 %v4471_v23  ;;  %v4555_v23 = vld [vmem:[%s6525_s1 + $0x7c0] ss:$8 sps:$4 sm:$0xff]  }
  0xba   :  { %3222 = vmatprep.subr.bf16.mxu1 %v4479_v5  ;;  %v4563_v5 = vld [vmem:[%s6525_s1 + $0x7b4] ss:$8 sps:$4 sm:$0xff]  }
  0xbb   :  { %3182 = vmatpush2.bf16.msra.mxu0 %v4474_v25  ;;  %v4558_v25 = vld [vmem:[%s6525_s1 + $0x6b0] ss:$8 sps:$4 sm:$0xff]  }
  0xbc   :  { %3183 = vmatprep.subr.bf16.mxu0 %v4482_v26  ;;  %v4566_v26 = vld [vmem:[%s6525_s1 + $0x6a4] ss:$8 sps:$4 sm:$0xff]  }
  0xbd   :  { %3223 = vmatpush2.bf16.msra.mxu1 %v4477_v27  ;;  %v4561_v27 = vld [vmem:[%s6525_s1 + $0x7b0] ss:$8 sps:$4 sm:$0xff]  }
  0xbe   :  { %3224 = vmatprep.subr.bf16.mxu1 %v4485_v30  ;;  %v5724_v30 = vld [vmem:[%s6524_s0 + $0x10] sm:$0xff] }
  0xbf   :  { %3184 = vmatpush2.bf16.msra.mxu0 %v4480_v31  ;;  %v4564_v31 = vld [vmem:[%s6525_s1 + $0x6a0] ss:$8 sps:$4 sm:$0xff]  }
  0xc0   :  { %3235 = vmatprep.subr.bf16.mxu0 %v4488_v33  ;;  %v4567_v33 = vld [vmem:[%s6525_s1 + $0x7a0] ss:$8 sps:$4 sm:$0xff]  }
  0xc1   :  { %3225 = vmatpush2.bf16.msra.mxu1 %v4483_v34  ;;  %v5737_v34 = vrot.slane %v5724_v30, %v5074_v48 }
  0xc2   :  { %3186 = vmatmul.mubr.bf16.vlgmr.msra.gmra.mxu0 %v568_v32  ;;  %3276 = vmatprep.subr.bf16.mxu1 %v4491_v36  ;;  %v4572_v32 = vld [vmem:[%s6525_s1 + $0x694] ss:$8 sps:$4 sm:$0xff]   ;;  %v4570_v36 = vld [vmem:[%s6525_s1 + $0x690] ss:$8 sps:$4 sm:$0xff]  }
  0xc3   :  { %3236 = vmatpush1.bf16.msra.mxu0 %v4486_v28  ;;  %3267 = vmatprep.mubr.bf16.mxu0 %v589_v35  ;;  %v4575_v35 = vld [vmem:[%s6525_s1 + $0x794] ss:$8 sps:$4 sm:$0xff]   ;;  %v4578_v28 = vld [vmem:[%s6525_s1 + $0x684] ss:$8 sps:$4 sm:$0xff]  }
  0xc4   :  { %3227 = vmatmul.mubr.bf16.vlgmr.msra.gmra.mxu1 %v590_v37  ;;  %3237 = vmatprep.subr.bf16.mxu0 %v4494_v38  ;;  %v4573_v37 = vld [vmem:[%s6525_s1 + $0x790] ss:$8 sps:$4 sm:$0xff]   ;;  %v609_v38 = vcombine.high %v5737_v34, %v5737_v34 }
  0xc5   :  { %3277 = vmatpush1.bf16.msra.mxu1 %v4489_v39  ;;  %3308 = vmatprep.mubr.bf16.mxu1 %v593_v40  ;;  %v4581_v39 = vld [vmem:[%s6525_s1 + $0x784] ss:$8 sps:$4 sm:$0xff]   ;;  %v4576_v40 = vld [vmem:[%s6525_s1 + $0x680] ss:$8 sps:$4 sm:$0xff]  }
  0xc6   :  { %3278 = vmatprep.subr.bf16.mxu1 %v4497_v41  ;;  %v480_v41 = vld [vmem:[%s6526_s2] sm:$0x3] }
  0xc7   :  { %3238 = vmatpush1.bf16.msra.mxu0 %v4492_v43  ;;  %v484_v43 = vsub.s32 0, %v5059_v42 }
  0xc8   :  { %3239 = vmatprep.subr.bf16.mxu0 %v4500_v44  ;;  %v575_v44 = vrot.slane %v5531_v24, %v5074_v48 }
  0xc9   :  { %3279 = vmatpush1.bf16.msra.mxu1 %v4495_v45  ;;  %v4585_v45 = vld [vmem:[%s6525_s1 + $0x874] ss:$8 sps:$4 sm:$0xff]   ;;  %v485_v24 = vrot.slane %v480_v41, %v484_v43  ;;  %v4640_v43 = vld [vmem:[%s6525_s1 + $0x9e0] ss:$8 sps:$4 sm:$0xff]  }
  0xca   :  { %3280 = vmatprep.subr.bf16.mxu1 %v4503_v46  ;;  %v4579_v46 = vld [vmem:[%s6525_s1 + $0x780] ss:$8 sps:$4 sm:$0xff]  }
  0xcb   :  { %3240 = vmatpush1.bf16.msra.mxu0 %v4498_v47  ;;  %v488_v47 = vsub.s32 1, %v5059_v42 }
  0xcc   :  { %3241 = vmatprep.subr.bf16.mxu0 %v4506_v49  ;;  %v631_v49 = vrot.slane %v609_v38, %v5074_v48  ;;  %v4634_v38 = vld [vmem:[%s6525_s1 + $0x9f0] ss:$8 sps:$4 sm:$0xff]  }
  0xcd   :  { %3281 = vmatpush1.bf16.msra.mxu1 %v4501_v50  ;;  %v4588_v50 = vld [vmem:[%s6525_s1 + $0x974] ss:$8 sps:$4 sm:$0xff]   ;;  %v489_v42 = vrot.slane %v480_v41, %v488_v47 }
  0xce   :  { %3282 = vmatprep.subr.bf16.mxu1 %v4509_v51  ;;  %v4583_v51 = vld [vmem:[%s6525_s1 + $0x870] ss:$8 sps:$4 sm:$0xff]   ;;  %v4645_v41 = vld [vmem:[%s6525_s1 + $0x8d4] ss:$8 sps:$4 sm:$0xff]  }
  0xcf   :  { %3242 = vmatpush1.bf16.msra.mxu0 %v4504_v52  ;;  %v591_v52 = vcombine.high %v575_v44, %v575_v44 }
  0xd0   :  { %3243 = vmatprep.subr.bf16.mxu0 %v4512_v53  ;;  %v4591_v53 = vld [vmem:[%s6525_s1 + $0x864] ss:$8 sps:$4 sm:$0xff]  }
  0xd1   :  { %3283 = vmatpush1.bf16.msra.mxu1 %v4507_v54  ;;  %v4586_v54 = vld [vmem:[%s6525_s1 + $0x970] ss:$8 sps:$4 sm:$0xff]  }
  0xd2   :  { %3284 = vmatprep.subr.bf16.mxu1 %v4515_v55  ;;  %v641_v55 = vcombine.high %v631_v49, %v631_v49 }
  0xd3   :  { %3244 = vmatpush1.bf16.msra.mxu0 %v4510_v56 }
  0xd4   :  { %3245 = vmatprep.subr.bf16.mxu0 %v4518_v57  ;;  %v4594_v57 = vld [vmem:[%s6525_s1 + $0x964] ss:$8 sps:$4 sm:$0xff]  }
  0xd5   :  { %3285 = vmatpush1.bf16.msra.mxu1 %v4513_v58 }
  0xd6   :  { %3286 = vmatprep.subr.bf16.mxu1 %v4521_v59  ;;  %v4589_v59 = vld [vmem:[%s6525_s1 + $0x860] ss:$8 sps:$4 sm:$0xff]  }
  0xd7   :  { %3246 = vmatpush1.bf16.msra.mxu0 %v4516_v60 }
  0xd8   :  { %3247 = vmatprep.subr.bf16.mxu0 %v4524_v61 }
  0xd9   :  { %3287 = vmatpush1.bf16.msra.mxu1 %v4519_v62  ;;  %v4597_v62 = vld [vmem:[%s6525_s1 + $0x854] ss:$8 sps:$4 sm:$0xff]  }
  0xda   :  { %3288 = vmatprep.subr.bf16.mxu1 %v4527_v63 }
  0xdb   :  { %3248 = vmatpush1.bf16.msra.mxu0 %v4522_v0 }
  0xdc   :  { %3249 = vmatprep.subr.bf16.mxu0 %v4530_v1  ;;  %v4592_v1 = vld [vmem:[%s6525_s1 + $0x960] ss:$8 sps:$4 sm:$0xff]  }
  0xdd   :  { %3289 = vmatpush1.bf16.msra.mxu1 %v4525_v2 }
  0xde   :  { %3290 = vmatprep.subr.bf16.mxu1 %v4533_v3 }
  0xdf   :  { %3250 = vmatpush1.bf16.msra.mxu0 %v4528_v4  ;;  %v4600_v4 = vld [vmem:[%s6525_s1 + $0x954] ss:$8 sps:$4 sm:$0xff]  }
  0xe0   :  { %3251 = vmatprep.subr.bf16.mxu0 %v4536_v6 }
  0xe1   :  { %3291 = vmatpush1.bf16.msra.mxu1 %v4531_v7  ;;  %v4595_v7 = vld [vmem:[%s6525_s1 + $0x850] ss:$8 sps:$4 sm:$0xff]  }
  0xe2   :  { %3292 = vmatprep.subr.bf16.mxu1 %v4539_v8 }
  0xe3   :  { %3252 = vmatpush2.bf16.msra.mxu0 %v4534_v9 }
  0xe4   :  { %3253 = vmatprep.subr.bf16.mxu0 %v4542_v10  ;;  %v4603_v10 = vld [vmem:[%s6525_s1 + $0x844] ss:$8 sps:$4 sm:$0xff]  }
  0xe5   :  { %3293 = vmatpush2.bf16.msra.mxu1 %v4537_v11  ;;  %v4598_v11 = vld [vmem:[%s6525_s1 + $0x950] ss:$8 sps:$4 sm:$0xff]  }
  0xe6   :  { %3294 = vmatprep.subr.bf16.mxu1 %v4545_v12 }
  0xe7   :  { %3254 = vmatpush2.bf16.msra.mxu0 %v4540_v13  ;;  %v4606_v13 = vld [vmem:[%s6525_s1 + $0x944] ss:$8 sps:$4 sm:$0xff]  }
  0xe8   :  { %3255 = vmatprep.subr.bf16.mxu0 %v4548_v14  ;;  %v4601_v14 = vld [vmem:[%s6525_s1 + $0x840] ss:$8 sps:$4 sm:$0xff]  }
  0xe9   :  { %3295 = vmatpush2.bf16.msra.mxu1 %v4543_v15  ;;  %v4609_v15 = vld [vmem:[%s6525_s1 + $0x834] ss:$8 sps:$4 sm:$0xff]  }
  0xea   :  { %3296 = vmatprep.subr.bf16.mxu1 %v4551_v16  ;;  %v4604_v16 = vld [vmem:[%s6525_s1 + $0x940] ss:$8 sps:$4 sm:$0xff]  }
  0xeb   :  { %3256 = vmatpush2.bf16.msra.mxu0 %v4546_v17  ;;  %v4612_v17 = vld [vmem:[%s6525_s1 + $0x934] ss:$8 sps:$4 sm:$0xff]  }
  0xec   :  { %3257 = vmatprep.subr.bf16.mxu0 %v4554_v18  ;;  %v4607_v18 = vld [vmem:[%s6525_s1 + $0x830] ss:$8 sps:$4 sm:$0xff]  }
  0xed   :  { %3297 = vmatpush2.bf16.msra.mxu1 %v4549_v19  ;;  %v4615_v19 = vld [vmem:[%s6525_s1 + $0x824] ss:$8 sps:$4 sm:$0xff]  }
  0xee   :  { %3298 = vmatprep.subr.bf16.mxu1 %v4557_v20  ;;  %v4610_v20 = vld [vmem:[%s6525_s1 + $0x930] ss:$8 sps:$4 sm:$0xff]  }
  0xef   :  { %3258 = vmatpush2.bf16.msra.mxu0 %v4552_v21  ;;  %v4618_v21 = vld [vmem:[%s6525_s1 + $0x924] ss:$8 sps:$4 sm:$0xff]  }
  0xf0   :  { %3259 = vmatprep.subr.bf16.mxu0 %v4560_v22  ;;  %v4613_v22 = vld [vmem:[%s6525_s1 + $0x820] ss:$8 sps:$4 sm:$0xff]  }
  0xf1   :  { %3299 = vmatpush2.bf16.msra.mxu1 %v4555_v23  ;;  %v4621_v23 = vld [vmem:[%s6525_s1 + $0x814] ss:$8 sps:$4 sm:$0xff]  }
  0xf2   :  { %3300 = vmatprep.subr.bf16.mxu1 %v4563_v5  ;;  %v4616_v5 = vld [vmem:[%s6525_s1 + $0x920] ss:$8 sps:$4 sm:$0xff]  }
  0xf3   :  { %3260 = vmatpush2.bf16.msra.mxu0 %v4558_v25  ;;  %v4624_v25 = vld [vmem:[%s6525_s1 + $0x914] ss:$8 sps:$4 sm:$0xff]  }
  0xf4   :  { %3261 = vmatprep.subr.bf16.mxu0 %v4566_v26  ;;  %v4619_v26 = vld [vmem:[%s6525_s1 + $0x810] ss:$8 sps:$4 sm:$0xff]  }
  0xf5   :  { %3301 = vmatpush2.bf16.msra.mxu1 %v4561_v27  ;;  %v4627_v27 = vld [vmem:[%s6525_s1 + $0x804] ss:$8 sps:$4 sm:$0xff]  }
  0xf6   :  { %3302 = vmatprep.subr.bf16.mxu1 %v4569_v29  ;;  %v4622_v29 = vld [vmem:[%s6525_s1 + $0x910] ss:$8 sps:$4 sm:$0xff]  }
  0xf7   :  { %3262 = vmatpush2.bf16.msra.mxu0 %v4564_v31  ;;  %v4630_v31 = vld [vmem:[%s6525_s1 + $0x904] ss:$8 sps:$4 sm:$0xff]  }
  0xf8   :  { %3263 = vmatprep.subr.bf16.mxu0 %v4572_v32  ;;  %v4625_v32 = vld [vmem:[%s6525_s1 + $0x800] ss:$8 sps:$4 sm:$0xff]  }
  0xf9   :  { %3303 = vmatpush2.bf16.msra.mxu1 %v4567_v33  ;;  %v4633_v33 = vld [vmem:[%s6525_s1 + $0x8f4] ss:$8 sps:$4 sm:$0xff]  }
  0xfa   :  { %3304 = vmatprep.subr.bf16.mxu1 %v4575_v35  ;;  %v4628_v35 = vld [vmem:[%s6525_s1 + $0x900] ss:$8 sps:$4 sm:$0xff]  }
  0xfb   :  { %3264 = vmatpush2.bf16.msra.mxu0 %v4570_v36  ;;  %v4636_v36 = vld [vmem:[%s6525_s1 + $0x9f4] ss:$8 sps:$4 sm:$0xff]  }
  0xfc   :  { %3265 = vmatprep.subr.bf16.mxu0 %v4578_v28  ;;  %v4631_v28 = vld [vmem:[%s6525_s1 + $0x8f0] ss:$8 sps:$4 sm:$0xff]  }
  0xfd   :  { %3305 = vmatpush2.bf16.msra.mxu1 %v4573_v37  ;;  %v4639_v37 = vld [vmem:[%s6525_s1 + $0x8e4] ss:$8 sps:$4 sm:$0xff]  }
  0xfe   :  { %3306 = vmatprep.subr.bf16.mxu1 %v4581_v39  ;;  %v4642_v39 = vld [vmem:[%s6525_s1 + $0x9e4] ss:$8 sps:$4 sm:$0xff]  }
  0xff   :  { %3266 = vmatpush2.bf16.msra.mxu0 %v4576_v40  ;;  %v4637_v40 = vld [vmem:[%s6525_s1 + $0x8e0] ss:$8 sps:$4 sm:$0xff]  }
 0x100   :  { %3317 = vmatprep.subr.bf16.mxu0 %v4585_v45 }
 0x101   :  { %3307 = vmatpush2.bf16.msra.mxu1 %v4579_v46 }
 0x102   :  { %v3023_v56 = vpop.f32.mrf.mxu0  ;;  %3268 = vmatmul.mubr.bf16.vlgmr.msra.gmra.mxu0 %v575_v44  ;;  %3358 = vmatprep.subr.bf16.mxu1 %v4588_v50 }
 0x103   :  { %v3024_v58 = vadd.f32 %v3023_v56, %v485_v24  ;;  %3318 = vmatpush1.bf16.msra.mxu0 %v4583_v51  ;;  %3349 = vmatprep.mubr.bf16.mxu0 %v631_v49 }
 0x104   :  { %v3025_v60 = vpop.f32.mrf.mxu0  ;;  %v3064_v61 = vpop.f32.mrf.mxu1  ;;  %3309 = vmatmul.mubr.bf16.vlgmr.msra.gmra.mxu1 %v591_v52  ;;  %3319 = vmatprep.subr.bf16.mxu0 %v4591_v53 }
 0x105   :  { %v3026_v63 = vadd.f32 %v3025_v60, %v489_v42  ;;  %v5794_v0 = vadd.f32 %v3064_v61, %v3024_v58  ;;  %3359 = vmatpush1.bf16.msra.mxu1 %v4586_v54  ;;  %3390 = vmatprep.mubr.bf16.mxu1 %v641_v55 }
 0x106   :  { %v3027_v2 = vpop.f32.mrf.mxu0  ;;  %v3066_v3 = vpop.f32.mrf.mxu1  ;;  %3360 = vmatprep.subr.bf16.mxu1 %v4594_v57 }
 0x107   :  { %v5802_v6 = vadd.f32 %v3066_v3, %v3026_v63  ;;  %3320 = vmatpush1.bf16.msra.mxu0 %v4589_v59 }
 0x108   :  { %v3028_v8 = vpop.f32.mrf.mxu0  ;;  %3321 = vmatprep.subr.bf16.mxu0 %v4597_v62  ;;  %v3068_v9 = vpop.f32.mrf.mxu1 }
 0x109   :  { %3361 = vmatpush1.bf16.msra.mxu1 %v4592_v1 }
 0x10a   :  { %3362 = vmatprep.subr.bf16.mxu1 %v4600_v4  ;;  %v3069_v12 = vpop.f32.mrf.mxu1 }
 0x10b   :  { %3322 = vmatpush1.bf16.msra.mxu0 %v4595_v7 }
 0x10c   :  { %3323 = vmatprep.subr.bf16.mxu0 %v4603_v10 }
 0x10d   :  { %3363 = vmatpush1.bf16.msra.mxu1 %v4598_v11 }
 0x10e   :  { %3364 = vmatprep.subr.bf16.mxu1 %v4606_v13 }
 0x10f   :  { %3324 = vmatpush1.bf16.msra.mxu0 %v4601_v14 }
 0x110   :  { %3325 = vmatprep.subr.bf16.mxu0 %v4609_v15 }
 0x111   :  { %3365 = vmatpush1.bf16.msra.mxu1 %v4604_v16 }
 0x112   :  { %3366 = vmatprep.subr.bf16.mxu1 %v4612_v17 }
 0x113   :  { %3326 = vmatpush1.bf16.msra.mxu0 %v4607_v18 }
 0x114   :  { %3327 = vmatprep.subr.bf16.mxu0 %v4615_v19 }
 0x115   :  { %3367 = vmatpush1.bf16.msra.mxu1 %v4610_v20 }
 0x116   :  { %3368 = vmatprep.subr.bf16.mxu1 %v4618_v21 }
 0x117   :  { %3328 = vmatpush1.bf16.msra.mxu0 %v4613_v22 }
 0x118   :  { %3329 = vmatprep.subr.bf16.mxu0 %v4621_v23 }
 0x119   :  { %3369 = vmatpush1.bf16.msra.mxu1 %v4616_v5 }
 0x11a   :  { %3370 = vmatprep.subr.bf16.mxu1 %v4624_v25 }
 0x11b   :  { %3330 = vmatpush1.bf16.msra.mxu0 %v4619_v26 }
 0x11c   :  { %3331 = vmatprep.subr.bf16.mxu0 %v4627_v27 }
 0x11d   :  { %3371 = vmatpush1.bf16.msra.mxu1 %v4622_v29 }
 0x11e   :  { %3372 = vmatprep.subr.bf16.mxu1 %v4630_v31 }
 0x11f   :  { %3332 = vmatpush1.bf16.msra.mxu0 %v4625_v32 }
 0x120   :  { %3333 = vmatprep.subr.bf16.mxu0 %v4633_v33 }
 0x121   :  { %3373 = vmatpush1.bf16.msra.mxu1 %v4628_v35 }
 0x122   :  { %3374 = vmatprep.subr.bf16.mxu1 %v4636_v36 }
 0x123   :  { %3334 = vmatpush2.bf16.msra.mxu0 %v4631_v28 }
 0x124   :  { %3335 = vmatprep.subr.bf16.mxu0 %v4639_v37 }
 0x125   :  { %3375 = vmatpush2.bf16.msra.mxu1 %v4634_v38 }
 0x126   :  { %10 = vsyncpa [#allocation3], 0  ;;  %3376 = vmatprep.subr.bf16.mxu1 %v4642_v39  ;;  %v4648_v44 = vld [vmem:[%s6525_s1 + $0x9d4] ss:$8 sps:$4 sm:$0xff]   ;;  %v4643_v45 = vld [vmem:[%s6525_s1 + $0x8d0] ss:$8 sps:$4 sm:$0xff]   ;;  %v594_v55 = vcombine.high %v5724_v30, %v5724_v30  ;;  %v617_v4 = vrot.slane %v5737_v34, %v5074_v48 }
 0x127   :  { %3336 = vmatpush2.bf16.msra.mxu0 %v4637_v40  ;;  %v4651_v46 = vld [vmem:[%s6525_s1 + $0x8c4] ss:$8 sps:$4 sm:$0xff]   ;;  %v4646_v47 = vld [vmem:[%s6525_s1 + $0x9d0] ss:$8 sps:$4 sm:$0xff]   ;;  %v4649_v50 = vld [vmem:[%s6525_s1 + $0x8c0] ss:$8 sps:$4 sm:$0xff]  }
 0x128   :  { %3337 = vmatprep.subr.bf16.mxu0 %v4645_v41  ;;  %v4654_v49 = vld [vmem:[%s6525_s1 + $0x9c4] ss:$8 sps:$4 sm:$0xff]   ;;  %v4657_v24 = vld [vmem:[%s6525_s1 + $0x8b4] ss:$8 sps:$4 sm:$0xff]   ;;  %v4652_v51 = vld [vmem:[%s6525_s1 + $0x9c0] ss:$8 sps:$4 sm:$0xff]   ;;  %v5948_v59 = vrot.slane %v594_v55, %v5074_v48  ;;  %v639_v11 = vcombine.high %v617_v4, %v617_v4 }
 0x129   :  { %3377 = vmatpush2.bf16.msra.mxu1 %v4640_v43  ;;  %v4660_v52 = vld [vmem:[%s6525_s1 + $0x9b4] ss:$8 sps:$4 sm:$0xff]   ;;  %v4655_v53 = vld [vmem:[%s6525_s1 + $0x8b0] ss:$8 sps:$4 sm:$0xff]   ;;  %v4663_v42 = vld [vmem:[%s6525_s1 + $0x8a4] ss:$8 sps:$4 sm:$0xff]  }
 0x12a   :  { %3378 = vmatprep.subr.bf16.mxu1 %v4648_v44  ;;  %v4658_v54 = vld [vmem:[%s6525_s1 + $0x9b0] ss:$8 sps:$4 sm:$0xff]   ;;  %v4666_v56 = vld [vmem:[%s6525_s1 + $0x9a4] ss:$8 sps:$4 sm:$0xff]   ;;  %v4661_v57 = vld [vmem:[%s6525_s1 + $0x8a0] ss:$8 sps:$4 sm:$0xff]   ;;  %v610_v1 = vcombine.high %v5948_v59, %v5948_v59 }
 0x12b   :  { %3338 = vmatpush2.bf16.msra.mxu0 %v4643_v45  ;;  %v4669_v58 = vld [vmem:[%s6525_s1 + $0x894] ss:$8 sps:$4 sm:$0xff]   ;;  %v4664_v30 = vld [vmem:[%s6525_s1 + $0x9a0] ss:$8 sps:$4 sm:$0xff]   ;;  %v4667_v61 = vld [vmem:[%s6525_s1 + $0x890] ss:$8 sps:$4 sm:$0xff]  }
 0x12c   :  { %3339 = vmatprep.subr.bf16.mxu0 %v4651_v46  ;;  %v4672_v60 = vld [vmem:[%s6525_s1 + $0x994] ss:$8 sps:$4 sm:$0xff]   ;;  %v4675_v62 = vld [vmem:[%s6525_s1 + $0x884] ss:$8 sps:$4 sm:$0xff]   ;;  %v4670_v63 = vld [vmem:[%s6525_s1 + $0x990] ss:$8 sps:$4 sm:$0xff]   ;;  %v638_v9 = vrot.slane %v610_v1, %v5074_v48 }
 0x12d   :  { %3379 = vmatpush2.bf16.msra.mxu1 %v4646_v47  ;;  %v4678_v2 = vld [vmem:[%s6525_s1 + $0x984] ss:$8 sps:$4 sm:$0xff]   ;;  %v4673_v3 = vld [vmem:[%s6525_s1 + $0x880] ss:$8 sps:$4 sm:$0xff]   ;;  %v4681_v7 = vld [vmem:[%s6525_s1 + $0xa74] ss:$8 sps:$4 sm:$0xff]  }
 0x12e   :  { %3380 = vmatprep.subr.bf16.mxu1 %v4654_v49  ;;  %v4676_v8 = vld [vmem:[%s6525_s1 + $0x980] ss:$8 sps:$4 sm:$0xff]   ;;  %v4684_v10 = vld [vmem:[%s6525_s1 + $0xb74] ss:$8 sps:$4 sm:$0xff]   ;;  %v4679_v34 = vld [vmem:[%s6525_s1 + $0xa70] ss:$8 sps:$4 sm:$0xff]   ;;  %v642_v14 = vcombine.high %v638_v9, %v638_v9 }
 0x12f   :  { %3340 = vmatpush2.bf16.msra.mxu0 %v4649_v50  ;;  %v4687_v12 = vld [vmem:[%s6525_s1 + $0xa64] ss:$8 sps:$4 sm:$0xff]   ;;  %v4682_v13 = vld [vmem:[%s6525_s1 + $0xb70] ss:$8 sps:$4 sm:$0xff]   ;;  %v4685_v18 = vld [vmem:[%s6525_s1 + $0xa60] ss:$8 sps:$4 sm:$0xff]  }
 0x130   :  { %3341 = vmatprep.subr.bf16.mxu0 %v4657_v24  ;;  %v4690_v16 = vld [vmem:[%s6525_s1 + $0xb64] ss:$8 sps:$4 sm:$0xff]   ;;  %v4693_v21 = vld [vmem:[%s6525_s1 + $0xa54] ss:$8 sps:$4 sm:$0xff]   ;;  %v4694_v33 = vld [vmem:[%s6525_s1 + $0xb50] ss:$8 sps:$4 sm:$0xff]  }
 0x131   :  { %3381 = vmatpush2.bf16.msra.mxu1 %v4652_v51  ;;  %v4696_v26 = vld [vmem:[%s6525_s1 + $0xb54] ss:$8 sps:$4 sm:$0xff]   ;;  %v4699_v32 = vld [vmem:[%s6525_s1 + $0xa44] ss:$8 sps:$4 sm:$0xff]   ;;  %v4697_v28 = vld [vmem:[%s6525_s1 + $0xa40] ss:$8 sps:$4 sm:$0xff]  }
 0x132   :  { %3382 = vmatprep.subr.bf16.mxu1 %v4660_v52  ;;  %v4702_v36 = vld [vmem:[%s6525_s1 + $0xb44] ss:$8 sps:$4 sm:$0xff]   ;;  %v4705_v37 = vld [vmem:[%s6525_s1 + $0xa34] ss:$8 sps:$4 sm:$0xff]   ;;  %v4700_v38 = vld [vmem:[%s6525_s1 + $0xb40] ss:$8 sps:$4 sm:$0xff]  }
 0x133   :  { %3342 = vmatpush2.bf16.msra.mxu0 %v4655_v53  ;;  %v4708_v39 = vld [vmem:[%s6525_s1 + $0xb34] ss:$8 sps:$4 sm:$0xff]   ;;  %v4703_v40 = vld [vmem:[%s6525_s1 + $0xa30] ss:$8 sps:$4 sm:$0xff]   ;;  %v4711_v41 = vld [vmem:[%s6525_s1 + $0xa24] ss:$8 sps:$4 sm:$0xff]  }
 0x134   :  { %3343 = vmatprep.subr.bf16.mxu0 %v4663_v42  ;;  %v4706_v43 = vld [vmem:[%s6525_s1 + $0xb30] ss:$8 sps:$4 sm:$0xff]   ;;  %v4714_v44 = vld [vmem:[%s6525_s1 + $0xb24] ss:$8 sps:$4 sm:$0xff]   ;;  %v4709_v45 = vld [vmem:[%s6525_s1 + $0xa20] ss:$8 sps:$4 sm:$0xff]  }
 0x135   :  { %3383 = vmatpush2.bf16.msra.mxu1 %v4658_v54  ;;  %v4717_v46 = vld [vmem:[%s6525_s1 + $0xa14] ss:$8 sps:$4 sm:$0xff]   ;;  %v4712_v47 = vld [vmem:[%s6525_s1 + $0xb20] ss:$8 sps:$4 sm:$0xff]   ;;  %v4715_v50 = vld [vmem:[%s6525_s1 + $0xa10] ss:$8 sps:$4 sm:$0xff]  }
 0x136   :  { %3384 = vmatprep.subr.bf16.mxu1 %v4666_v56  ;;  %v4720_v49 = vld [vmem:[%s6525_s1 + $0xb14] ss:$8 sps:$4 sm:$0xff]   ;;  %v4723_v24 = vld [vmem:[%s6525_s1 + $0xa04] ss:$8 sps:$4 sm:$0xff]   ;;  %v4718_v51 = vld [vmem:[%s6525_s1 + $0xb10] ss:$8 sps:$4 sm:$0xff]  }
 0x137   :  { %3344 = vmatpush2.bf16.msra.mxu0 %v4661_v57  ;;  %v4726_v52 = vld [vmem:[%s6525_s1 + $0xb04] ss:$8 sps:$4 sm:$0xff]   ;;  %v4721_v53 = vld [vmem:[%s6525_s1 + $0xa00] ss:$8 sps:$4 sm:$0xff]   ;;  %v4729_v42 = vld [vmem:[%s6525_s1 + $0xaf4] ss:$8 sps:$4 sm:$0xff]  }
 0x138   :  { %3345 = vmatprep.subr.bf16.mxu0 %v4669_v58  ;;  %v4724_v54 = vld [vmem:[%s6525_s1 + $0xb00] ss:$8 sps:$4 sm:$0xff]   ;;  %v4732_v55 = vld [vmem:[%s6525_s1 + $0xbf4] ss:$8 sps:$4 sm:$0xff]   ;;  %v4727_v56 = vld [vmem:[%s6525_s1 + $0xaf0] ss:$8 sps:$4 sm:$0xff]  }
 0x139   :  { %3385 = vmatpush2.bf16.msra.mxu1 %v4664_v30  ;;  %v4735_v57 = vld [vmem:[%s6525_s1 + $0xae4] ss:$8 sps:$4 sm:$0xff]   ;;  %v4730_v58 = vld [vmem:[%s6525_s1 + $0xbf0] ss:$8 sps:$4 sm:$0xff]   ;;  %vm2982_vm0 = vcmask 1046528   ;;  %vm2978_vm1 = vcmask 375808  }
 0x13a   :  { %3386 = vmatprep.subr.bf16.mxu1 %v4672_v60  ;;  %v4738_v30 = vld [vmem:[%s6525_s1 + $0xbe4] ss:$8 sps:$4 sm:$0xff]   ;;  %v4733_v60 = vld [vmem:[%s6525_s1 + $0xae0] ss:$8 sps:$4 sm:$0xff]   ;;  %v4739_v1 = vld [vmem:[%s6525_s1 + $0xad0] ss:$8 sps:$4 sm:$0xff]  }
 0x13b   :  { %3346 = vmatpush2.bf16.msra.mxu0 %v4667_v61  ;;  %v4741_v61 = vld [vmem:[%s6525_s1 + $0xad4] ss:$8 sps:$4 sm:$0xff]   ;;  %vm3638_vm2 = vcmask 588800   ;;  %s4911_s10 = smov [#allocation2]   ;;  %vm3718_vm3 = vcmask 9216  }
 0x13c   :  { %3347 = vmatprep.subr.bf16.mxu0 %v4675_v62  ;;  %v4736_v62 = vld [vmem:[%s6525_s1 + $0xbe0] ss:$8 sps:$4 sm:$0xff]   ;;  %s3726_s11 = sshll.u32 %s4911_s10, 4  ;;  %s3727_s11 = int_to_ptr.vmem [resolvable:$true] %s3726_s11 }
 0x13d   :  { %3387 = vmatpush2.bf16.msra.mxu1 %v4670_v63  ;;  %v4744_v63 = vld [vmem:[%s6525_s1 + $0xbd4] ss:$8 sps:$4 sm:$0xff]   ;;  %s4886_s12 = scalar_lea.vmem %s3727_s11, 32  ;;  %p4891_p1 = scmp.lt.s32.totalorder %s3727_s11, %s3727_s11 }
 0x13e   :  { %3388 = vmatprep.subr.bf16.mxu1 %v4678_v2  ;;  %v4747_v2 = vld [vmem:[%s6525_s1 + $0xac4] ss:$8 sps:$4 sm:$0xff]   ;;  %p4887_p0 = scmp.ne.s32.totalorder %s3727_s11, %s4886_s12  ;;  %p4892_p2 = scmp.lt.s32.totalorder %s4886_s12, %s4886_s12 }
 0x13f   :  { %3348 = vmatpush2.bf16.msra.mxu0 %v4673_v3  ;;  %v4742_v3 = vld [vmem:[%s6525_s1 + $0xbd0] ss:$8 sps:$4 sm:$0xff]  }
 0x140   :  { %3399 = vmatprep.subr.bf16.mxu0 %v4681_v7  ;;  %v4745_v7 = vld [vmem:[%s6525_s1 + $0xac0] ss:$8 sps:$4 sm:$0xff]   ;;  %p4893_p3 = por %p4892_p2, %p4891_p1 }
 0x141   :  { %3389 = vmatpush2.bf16.msra.mxu1 %v4676_v8  ;;  %v4753_v8 = vld [vmem:[%s6525_s1 + $0xab4] ss:$8 sps:$4 sm:$0xff]  }
 0x142   :  { %v3105_v15 = vpop.f32.mrf.mxu0  ;;  %3350 = vmatmul.mubr.bf16.vlgmr.msra.gmra.mxu0 %v617_v4  ;;  %3440 = vmatprep.subr.bf16.mxu1 %v4684_v10  ;;  %v4750_v4 = vld [vmem:[%s6525_s1 + $0xbc4] ss:$8 sps:$4 sm:$0xff]   ;;  %v4756_v10 = vld [vmem:[%s6525_s1 + $0xbb4] ss:$8 sps:$4 sm:$0xff]   ;;  %p4894_p4 = pnand %p4893_p3, %p4887_p0 }
 0x143   :  { %v3106_v17 = vadd.f32 %v3105_v15, %v5794_v0  ;;  %3400 = vmatpush1.bf16.msra.mxu0 %v4679_v34  ;;  %3431 = vmatprep.mubr.bf16.mxu0 %v638_v9  ;;  %v4688_v0 = vld [vmem:[%s6525_s1 + $0xb60] ss:$8 sps:$4 sm:$0xff]   ;;  %v4751_v34 = vld [vmem:[%s6525_s1 + $0xab0] ss:$8 sps:$4 sm:$0xff]  }
 0x144   :  { %v3107_v19 = vpop.f32.mrf.mxu0  ;;  %v3146_v20 = vpop.f32.mrf.mxu1  ;;  %3391 = vmatmul.mubr.bf16.vlgmr.msra.gmra.mxu1 %v639_v11  ;;  %3401 = vmatprep.subr.bf16.mxu0 %v4687_v12  ;;  %v4748_v9 = vld [vmem:[%s6525_s1 + $0xbc0] ss:$8 sps:$4 sm:$0xff]   ;;  %v4759_v11 = vld [vmem:[%s6525_s1 + $0xaa4] ss:$8 sps:$4 sm:$0xff]   ;;  %v4754_v12 = vld [vmem:[%s6525_s1 + $0xbb0] ss:$8 sps:$4 sm:$0xff]  }
 0x145   :  { %v3108_v22 = vadd.f32 %v3107_v19, %v5802_v6  ;;  %v6002_v23 = vadd.f32 %v3146_v20, %v3106_v17  ;;  %3441 = vmatpush1.bf16.msra.mxu1 %v4682_v13  ;;  %3472 = vmatprep.mubr.bf16.mxu1 %v642_v14  ;;  %v4691_v6 = vld [vmem:[%s6525_s1 + $0xa50] ss:$8 sps:$4 sm:$0xff]   ;;  %v4762_v13 = vld [vmem:[%s6525_s1 + $0xba4] ss:$8 sps:$4 sm:$0xff]   ;;  %v4757_v15 = vld [vmem:[%s6525_s1 + $0xaa0] ss:$8 sps:$4 sm:$0xff]  }
 0x146   :  { %v3109_v5 = vpop.f32.mrf.mxu0  ;;  %v3148_v25 = vpop.f32.mrf.mxu1  ;;  %3442 = vmatprep.subr.bf16.mxu1 %v4690_v16  ;;  %v6147_v14 = vld [vmem:[%s6524_s0 + $0x18] sm:$0x1f]  ;;  %v4760_v17 = vld [vmem:[%s6525_s1 + $0xba0] ss:$8 sps:$4 sm:$0xff]  }
 0x147   :  { %v6010_v27 = vadd.f32 %v3148_v25, %v3108_v22  ;;  %3402 = vmatpush1.bf16.msra.mxu0 %v4685_v18  ;;  %v4765_v16 = vld [vmem:[%s6525_s1 + $0xa94] ss:$8 sps:$4 sm:$0xff]   ;;  %v6160_v18 = vrot.slane %v6147_v14, %v5074_v48  ;;  %v4763_v20 = vld [vmem:[%s6525_s1 + $0xa90] ss:$8 sps:$4 sm:$0xff]   ;;  %v4774_v5 = vld [vmem:[%s6525_s1 + $0xb84] ss:$8 sps:$4 sm:$0xff]  }
 0x148   :  { %v3110_v29 = vpop.f32.mrf.mxu0  ;;  %3403 = vmatprep.subr.bf16.mxu0 %v4693_v21  ;;  %v3150_v31 = vpop.f32.mrf.mxu1  ;;  %v4768_v19 = vld [vmem:[%s6525_s1 + $0xb94] ss:$8 sps:$4 sm:$0xff]   ;;  %v4771_v21 = vld [vmem:[%s6525_s1 + $0xa84] ss:$8 sps:$4 sm:$0xff]   ;;  %v4766_v22 = vld [vmem:[%s6525_s1 + $0xb90] ss:$8 sps:$4 sm:$0xff]  }
 0x149   :  { %3443 = vmatpush1.bf16.msra.mxu1 %v4688_v0  ;;  %v658_v0 = vcombine.high %v6160_v18, %v6160_v18  ;;  %v4769_v25 = vld [vmem:[%s6525_s1 + $0xa80] ss:$8 sps:$4 sm:$0xff]  }
 0x14a   :  { %3444 = vmatprep.subr.bf16.mxu1 %v4696_v26  ;;  %v3151_v35 = vpop.f32.mrf.mxu1  ;;  %v624_v26 = vrot.slane %v5948_v59, %v5074_v48  ;;  %v4772_v29 = vld [vmem:[%s6525_s1 + $0xb80] ss:$8 sps:$4 sm:$0xff]   ;;  %v4776_v59 = vld [vmem:[%s6525_s1 + $0xc70] ss:$8 sps:$4 sm:$0xff]  }
 0x14b   :  { %3404 = vmatpush1.bf16.msra.mxu0 %v4691_v6  ;;  %v4778_v6 = vld [vmem:[%s6525_s1 + $0xc74] ss:$8 sps:$4 sm:$0xff]   ;;  %v679_v31 = vrot.slane %v658_v0, %v5074_v48  ;;  %v4784_v35 = vld [vmem:[%s6525_s1 + $0xc64] ss:$8 sps:$4 sm:$0xff]  }
 0x14c   :  { %3405 = vmatprep.subr.bf16.mxu0 %v4699_v32  ;;  %v4781_v32 = vld [vmem:[%s6525_s1 + $0xd74] ss:$8 sps:$4 sm:$0xff]  }
 0x14d   :  { %3445 = vmatpush1.bf16.msra.mxu1 %v4694_v33  ;;  %v640_v33 = vcombine.high %v624_v26, %v624_v26  ;;  %v4841_v0 = vld [vmem:[%s6525_s1 + $0xdd4] ss:$8 sps:$4 sm:$0xff]  }
 0x14e   :  { %3446 = vmatprep.subr.bf16.mxu1 %v4702_v36  ;;  %v4779_v36 = vld [vmem:[%s6525_s1 + $0xd70] ss:$8 sps:$4 sm:$0xff]  }
 0x14f   :  { %3406 = vmatpush1.bf16.msra.mxu0 %v4697_v28  ;;  %v681_v28 = vcombine.high %v679_v31, %v679_v31 }
 0x150   :  { %3407 = vmatprep.subr.bf16.mxu0 %v4705_v37 }
 0x151   :  { %3447 = vmatpush1.bf16.msra.mxu1 %v4700_v38  ;;  %v4787_v38 = vld [vmem:[%s6525_s1 + $0xd64] ss:$8 sps:$4 sm:$0xff]  }
 0x152   :  { %3448 = vmatprep.subr.bf16.mxu1 %v4708_v39 }
 0x153   :  { %3408 = vmatpush1.bf16.msra.mxu0 %v4703_v40  ;;  %v4782_v40 = vld [vmem:[%s6525_s1 + $0xc60] ss:$8 sps:$4 sm:$0xff]  }
 0x154   :  { %3409 = vmatprep.subr.bf16.mxu0 %v4711_v41 }
 0x155   :  { %3449 = vmatpush1.bf16.msra.mxu1 %v4706_v43 }
 0x156   :  { %3450 = vmatprep.subr.bf16.mxu1 %v4714_v44  ;;  %v4790_v44 = vld [vmem:[%s6525_s1 + $0xc54] ss:$8 sps:$4 sm:$0xff]  }
 0x157   :  { %3410 = vmatpush1.bf16.msra.mxu0 %v4709_v45 }
 0x158   :  { %3411 = vmatprep.subr.bf16.mxu0 %v4717_v46 }
 0x159   :  { %3451 = vmatpush1.bf16.msra.mxu1 %v4712_v47 }
 0x15a   :  { %3452 = vmatprep.subr.bf16.mxu1 %v4720_v49 }
 0x15b   :  { %3412 = vmatpush1.bf16.msra.mxu0 %v4715_v50  ;;  %v4793_v50 = vld [vmem:[%s6525_s1 + $0xd54] ss:$8 sps:$4 sm:$0xff]  }
 0x15c   :  { %3413 = vmatprep.subr.bf16.mxu0 %v4723_v24 }
 0x15d   :  { %3453 = vmatpush1.bf16.msra.mxu1 %v4718_v51 }
 0x15e   :  { %3454 = vmatprep.subr.bf16.mxu1 %v4726_v52 }
 0x15f   :  { %3414 = vmatpush1.bf16.msra.mxu0 %v4721_v53  ;;  %v4796_v53 = vld [vmem:[%s6525_s1 + $0xc44] ss:$8 sps:$4 sm:$0xff]  }
 0x160   :  { %3415 = vmatprep.subr.bf16.mxu0 %v4729_v42  ;;  %v4791_v42 = vld [vmem:[%s6525_s1 + $0xd50] ss:$8 sps:$4 sm:$0xff]  }
 0x161   :  { %3455 = vmatpush1.bf16.msra.mxu1 %v4724_v54 }
 0x162   :  { %3456 = vmatprep.subr.bf16.mxu1 %v4732_v55  ;;  %v4799_v55 = vld [vmem:[%s6525_s1 + $0xd44] ss:$8 sps:$4 sm:$0xff]  }
 0x163   :  { %3416 = vmatpush2.bf16.msra.mxu0 %v4727_v56  ;;  %v4794_v56 = vld [vmem:[%s6525_s1 + $0xc40] ss:$8 sps:$4 sm:$0xff]  }
 0x164   :  { %3417 = vmatprep.subr.bf16.mxu0 %v4735_v57  ;;  %v4802_v57 = vld [vmem:[%s6525_s1 + $0xc34] ss:$8 sps:$4 sm:$0xff]  }
 0x165   :  { %3457 = vmatpush2.bf16.msra.mxu1 %v4730_v58  ;;  %v4797_v58 = vld [vmem:[%s6525_s1 + $0xd40] ss:$8 sps:$4 sm:$0xff]  }
 0x166   :  { %3458 = vmatprep.subr.bf16.mxu1 %v4738_v30  ;;  %v4805_v30 = vld [vmem:[%s6525_s1 + $0xd34] ss:$8 sps:$4 sm:$0xff]  }
 0x167   :  { %3418 = vmatpush2.bf16.msra.mxu0 %v4733_v60  ;;  %v4800_v60 = vld [vmem:[%s6525_s1 + $0xc30] ss:$8 sps:$4 sm:$0xff]  }
 0x168   :  { %3419 = vmatprep.subr.bf16.mxu0 %v4741_v61  ;;  %v4808_v61 = vld [vmem:[%s6525_s1 + $0xc24] ss:$8 sps:$4 sm:$0xff]  }
 0x169   :  { %3459 = vmatpush2.bf16.msra.mxu1 %v4736_v62  ;;  %v4803_v62 = vld [vmem:[%s6525_s1 + $0xd30] ss:$8 sps:$4 sm:$0xff]  }
 0x16a   :  { %3460 = vmatprep.subr.bf16.mxu1 %v4744_v63  ;;  %v4811_v63 = vld [vmem:[%s6525_s1 + $0xd24] ss:$8 sps:$4 sm:$0xff]  }
 0x16b   :  { %3420 = vmatpush2.bf16.msra.mxu0 %v4739_v1  ;;  %v4806_v1 = vld [vmem:[%s6525_s1 + $0xc20] ss:$8 sps:$4 sm:$0xff]  }
 0x16c   :  { %3421 = vmatprep.subr.bf16.mxu0 %v4747_v2  ;;  %v4814_v2 = vld [vmem:[%s6525_s1 + $0xc14] ss:$8 sps:$4 sm:$0xff]  }
 0x16d   :  { %3461 = vmatpush2.bf16.msra.mxu1 %v4742_v3  ;;  %v4809_v3 = vld [vmem:[%s6525_s1 + $0xd20] ss:$8 sps:$4 sm:$0xff]  }
 0x16e   :  { %3462 = vmatprep.subr.bf16.mxu1 %v4750_v4  ;;  %v4817_v4 = vld [vmem:[%s6525_s1 + $0xd14] ss:$8 sps:$4 sm:$0xff]  }
 0x16f   :  { %3422 = vmatpush2.bf16.msra.mxu0 %v4745_v7  ;;  %v4812_v7 = vld [vmem:[%s6525_s1 + $0xc10] ss:$8 sps:$4 sm:$0xff]  }
 0x170   :  { %3423 = vmatprep.subr.bf16.mxu0 %v4753_v8  ;;  %v4820_v8 = vld [vmem:[%s6525_s1 + $0xc04] ss:$8 sps:$4 sm:$0xff]  }
 0x171   :  { %3463 = vmatpush2.bf16.msra.mxu1 %v4748_v9  ;;  %v4815_v9 = vld [vmem:[%s6525_s1 + $0xd10] ss:$8 sps:$4 sm:$0xff]  }
 0x172   :  { %3464 = vmatprep.subr.bf16.mxu1 %v4756_v10  ;;  %v4823_v10 = vld [vmem:[%s6525_s1 + $0xd04] ss:$8 sps:$4 sm:$0xff]  }
 0x173   :  { %3424 = vmatpush2.bf16.msra.mxu0 %v4751_v34  ;;  %v4818_v34 = vld [vmem:[%s6525_s1 + $0xc00] ss:$8 sps:$4 sm:$0xff]  }
 0x174   :  { %3425 = vmatprep.subr.bf16.mxu0 %v4759_v11  ;;  %v4826_v11 = vld [vmem:[%s6525_s1 + $0xcf4] ss:$8 sps:$4 sm:$0xff]  }
 0x175   :  { %3465 = vmatpush2.bf16.msra.mxu1 %v4754_v12  ;;  %v4821_v12 = vld [vmem:[%s6525_s1 + $0xd00] ss:$8 sps:$4 sm:$0xff]  }
 0x176   :  { %3466 = vmatprep.subr.bf16.mxu1 %v4762_v13  ;;  %v4829_v13 = vld [vmem:[%s6525_s1 + $0xdf4] ss:$8 sps:$4 sm:$0xff]  }
 0x177   :  { %3426 = vmatpush2.bf16.msra.mxu0 %v4757_v15  ;;  %v4824_v15 = vld [vmem:[%s6525_s1 + $0xcf0] ss:$8 sps:$4 sm:$0xff]  }
 0x178   :  { %3427 = vmatprep.subr.bf16.mxu0 %v4765_v16  ;;  %v4832_v16 = vld [vmem:[%s6525_s1 + $0xce4] ss:$8 sps:$4 sm:$0xff]  }
 0x179   :  { %3467 = vmatpush2.bf16.msra.mxu1 %v4760_v17  ;;  %v4827_v17 = vld [vmem:[%s6525_s1 + $0xdf0] ss:$8 sps:$4 sm:$0xff]  }
 0x17a   :  { %3468 = vmatprep.subr.bf16.mxu1 %v4768_v19  ;;  %v4835_v19 = vld [vmem:[%s6525_s1 + $0xde4] ss:$8 sps:$4 sm:$0xff]  }
 0x17b   :  { %3428 = vmatpush2.bf16.msra.mxu0 %v4763_v20  ;;  %v4830_v20 = vld [vmem:[%s6525_s1 + $0xce0] ss:$8 sps:$4 sm:$0xff]  }
 0x17c   :  { %3429 = vmatprep.subr.bf16.mxu0 %v4771_v21  ;;  %v4838_v21 = vld [vmem:[%s6525_s1 + $0xcd4] ss:$8 sps:$4 sm:$0xff]  }
 0x17d   :  { %3469 = vmatpush2.bf16.msra.mxu1 %v4766_v22  ;;  %v4833_v22 = vld [vmem:[%s6525_s1 + $0xde0] ss:$8 sps:$4 sm:$0xff]  }
 0x17e   :  { %3470 = vmatprep.subr.bf16.mxu1 %v4774_v5  ;;  %v4836_v5 = vld [vmem:[%s6525_s1 + $0xcd0] ss:$8 sps:$4 sm:$0xff]  }
 0x17f   :  { %3430 = vmatpush2.bf16.msra.mxu0 %v4769_v25  ;;  %v4844_v25 = vld [vmem:[%s6525_s1 + $0xcc4] ss:$8 sps:$4 sm:$0xff]  }
 0x180   :  { %3481 = vmatprep.subr.bf16.mxu0 %v4778_v6  ;;  %v4847_v6 = vld [vmem:[%s6525_s1 + $0xdc4] ss:$8 sps:$4 sm:$0xff]  }
 0x181   :  { %3471 = vmatpush2.bf16.msra.mxu1 %v4772_v29  ;;  %v4842_v29 = vld [vmem:[%s6525_s1 + $0xcc0] ss:$8 sps:$4 sm:$0xff]  }
 0x182   :  { %v3187_v37 = vpop.f32.mrf.mxu0  ;;  %3432 = vmatmul.mubr.bf16.vlgmr.msra.gmra.mxu0 %v624_v26  ;;  %3522 = vmatprep.subr.bf16.mxu1 %v4781_v32  ;;  %v4839_v26 = vld [vmem:[%s6525_s1 + $0xdd0] ss:$8 sps:$4 sm:$0xff]   ;;  %v4845_v32 = vld [vmem:[%s6525_s1 + $0xdc0] ss:$8 sps:$4 sm:$0xff]  }
 0x183   :  { %v3188_v39 = vadd.f32 %v3187_v37, %v6002_v23  ;;  %3482 = vmatpush1.bf16.msra.mxu0 %v4776_v59  ;;  %3513 = vmatprep.mubr.bf16.mxu0 %v679_v31  ;;  %v4785_v23 = vld [vmem:[%s6525_s1 + $0xd60] ss:$8 sps:$4 sm:$0xff]   ;;  %v4850_v31 = vld [vmem:[%s6525_s1 + $0xcb4] ss:$8 sps:$4 sm:$0xff]  }
 0x184   :  { %v3189_v41 = vpop.f32.mrf.mxu0  ;;  %v3228_v43 = vpop.f32.mrf.mxu1  ;;  %3473 = vmatmul.mubr.bf16.vlgmr.msra.gmra.mxu1 %v640_v33  ;;  %3483 = vmatprep.subr.bf16.mxu0 %v4784_v35  ;;  %v4853_v59 = vld [vmem:[%s6525_s1 + $0xdb4] ss:$8 sps:$4 sm:$0xff]   ;;  %v4848_v33 = vld [vmem:[%s6525_s1 + $0xcb0] ss:$8 sps:$4 sm:$0xff]   ;;  %v4856_v35 = vld [vmem:[%s6525_s1 + $0xca4] ss:$8 sps:$4 sm:$0xff]  }
 0x185   :  { %v3190_v45 = vadd.f32 %v3189_v41, %v6010_v27  ;;  %v6214_v46 = vadd.f32 %v3228_v43, %v3188_v39  ;;  %3523 = vmatpush1.bf16.msra.mxu1 %v4779_v36  ;;  %3554 = vmatprep.mubr.bf16.mxu1 %v681_v28  ;;  %v4788_v27 = vld [vmem:[%s6525_s1 + $0xc50] ss:$8 sps:$4 sm:$0xff]   ;;  %v4859_v28 = vld [vmem:[%s6525_s1 + $0xda4] ss:$8 sps:$4 sm:$0xff]   ;;  %v4854_v37 = vld [vmem:[%s6525_s1 + $0xca0] ss:$8 sps:$4 sm:$0xff]  }
 0x186   :  { %v3191_v47 = vpop.f32.mrf.mxu0  ;;  %v3230_v49 = vpop.f32.mrf.mxu1  ;;  %3524 = vmatprep.subr.bf16.mxu1 %v4787_v38  ;;  %v4851_v36 = vld [vmem:[%s6525_s1 + $0xdb0] ss:$8 sps:$4 sm:$0xff]   ;;  %v4862_v38 = vld [vmem:[%s6525_s1 + $0xc94] ss:$8 sps:$4 sm:$0xff]   ;;  %v4857_v39 = vld [vmem:[%s6525_s1 + $0xda0] ss:$8 sps:$4 sm:$0xff]  }
 0x187   :  { %v6222_v24 = vadd.f32 %v3230_v49, %v3190_v45  ;;  %3484 = vmatpush1.bf16.msra.mxu0 %v4782_v40  ;;  %v4865_v40 = vld [vmem:[%s6525_s1 + $0xd94] ss:$8 sps:$4 sm:$0xff]   ;;  %v4860_v41 = vld [vmem:[%s6525_s1 + $0xc90] ss:$8 sps:$4 sm:$0xff]   ;;  %v4868_v43 = vld [vmem:[%s6525_s1 + $0xc84] ss:$8 sps:$4 sm:$0xff]   ;;  %v665_v47 = vrot.slane %v6160_v18, %v5074_v48 }
 0x188   :  { %v3192_v51 = vpop.f32.mrf.mxu0  ;;  %3485 = vmatprep.subr.bf16.mxu0 %v4790_v44  ;;  %v3232_v52 = vpop.f32.mrf.mxu1  ;;  %v4863_v44 = vld [vmem:[%s6525_s1 + $0xd90] ss:$8 sps:$4 sm:$0xff]   ;;  %v4871_v45 = vld [vmem:[%s6525_s1 + $0xd84] ss:$8 sps:$4 sm:$0xff]   ;;  %v4878_v18 = vld [vmem:[%s6525_s1 + $0xe14] ss:$8 sps:$4 sm:$0xff]  }
 0x189   :  { %3525 = vmatpush1.bf16.msra.mxu1 %v4785_v23  ;;  %v4866_v23 = vld [vmem:[%s6525_s1 + $0xc80] ss:$8 sps:$4 sm:$0xff]   ;;  %v4873_v49 = vld [vmem:[%s6525_s1 + $0xe24] ss:$8 sps:$4 sm:$0x7f]   ;;  %v680_v52 = vcombine.high %v665_v47, %v665_v47 }
 0x18a   :  { %3526 = vmatprep.subr.bf16.mxu1 %v4793_v50  ;;  %v3233_v54 = vpop.f32.mrf.mxu1  ;;  %v4875_v50 = vld [vmem:[%s6525_s1 + $0xe20] ss:$8 sps:$4 sm:$0x7f]  }
 0x18b   :  { %3486 = vmatpush1.bf16.msra.mxu0 %v4788_v27  ;;  %v4869_v27 = vld [vmem:[%s6525_s1 + $0xd80] ss:$8 sps:$4 sm:$0xff]   ;;  %v2984_v51 = vsel %vm2982_vm0, %v4875_v50, 0 }
 0x18c   :  { %3487 = vmatprep.subr.bf16.mxu0 %v4796_v53  ;;  %v643_v53 = vcombine.high %v6147_v14, %v6147_v14 }
 0x18d   :  { %3527 = vmatpush1.bf16.msra.mxu1 %v4791_v42 }
 0x18e   :  { %3528 = vmatprep.subr.bf16.mxu1 %v4799_v55  ;;  %v4876_v55 = vld [vmem:[%s6525_s1 + $0xe10] ss:$8 sps:$4 sm:$0xff]  }
 0x18f   :  { %3488 = vmatpush1.bf16.msra.mxu0 %v4794_v56  ;;  %v4909_v56 = vmov 0  }
 0x190   :  { %3489 = vmatprep.subr.bf16.mxu0 %v4802_v57 }
 0x191   :  { %3529 = vmatpush1.bf16.msra.mxu1 %v4797_v58 }
 0x192   :  { %3530 = vmatprep.subr.bf16.mxu1 %v4805_v30  ;;  %v4881_v30 = vld [vmem:[%s6525_s1 + $0xe04] ss:$8 sps:$4 sm:$0xff]  }
 0x193   :  { %3490 = vmatpush1.bf16.msra.mxu0 %v4800_v60 }
 0x194   :  { %3491 = vmatprep.subr.bf16.mxu0 %v4808_v61 }
 0x195   :  { %3531 = vmatpush1.bf16.msra.mxu1 %v4803_v62 }
 0x196   :  { %3532 = vmatprep.subr.bf16.mxu1 %v4811_v63 }
 0x197   :  { %3492 = vmatpush1.bf16.msra.mxu0 %v4806_v1  ;;  %v4879_v1 = vld [vmem:[%s6525_s1 + $0xe00] ss:$8 sps:$4 sm:$0xff]  }
 0x198   :  { %3493 = vmatprep.subr.bf16.mxu0 %v4814_v2 }
 0x199   :  { %3533 = vmatpush1.bf16.msra.mxu1 %v4809_v3 }
 0x19a   :  { %3534 = vmatprep.subr.bf16.mxu1 %v4817_v4 }
 0x19b   :  { %3494 = vmatpush1.bf16.msra.mxu0 %v4812_v7 }
 0x19c   :  { %3495 = vmatprep.subr.bf16.mxu0 %v4820_v8  ;;  %v4910_v8 = vmov 0.0  }
 0x19d   :  { %3535 = vmatpush1.bf16.msra.mxu1 %v4815_v9  ;;  %v3620_v9 = vld [vmem:[%s6527_s3 + $0x70] sm:$0xff] }
 0x19e   :  { %3536 = vmatprep.subr.bf16.mxu1 %v4823_v10  ;;  %v3618_v10 = vld [vmem:[%s6527_s3 + $0x60] sm:$0xff] }
 0x19f   :  { %3496 = vmatpush1.bf16.msra.mxu0 %v4818_v34  ;;  %v3617_v34 = vld [vmem:[%s6527_s3 + $0x58] sm:$0xff] }
 0x1a0   :  { %3497 = vmatprep.subr.bf16.mxu0 %v4826_v11  ;;  %v3616_v11 = vld [vmem:[%s6527_s3 + $0x50] sm:$0xff] }
 0x1a1   :  { %3537 = vmatpush1.bf16.msra.mxu1 %v4821_v12  ;;  %v3615_v12 = vld [vmem:[%s6527_s3 + $0x48] sm:$0xff] }
 0x1a2   :  { %3538 = vmatprep.subr.bf16.mxu1 %v4829_v13  ;;  %v3614_v13 = vld [vmem:[%s6527_s3 + $0x40] sm:$0xff] }
 0x1a3   :  { %3498 = vmatpush2.bf16.msra.mxu0 %v4824_v15  ;;  %v3613_v15 = vld [vmem:[%s6527_s3 + $0x38] sm:$0xff] }
 0x1a4   :  { %3499 = vmatprep.subr.bf16.mxu0 %v4832_v16  ;;  %v3612_v16 = vld [vmem:[%s6527_s3 + $0x30] sm:$0xff] }
 0x1a5   :  { %3539 = vmatpush2.bf16.msra.mxu1 %v4827_v17  ;;  %v3611_v17 = vld [vmem:[%s6527_s3 + $0x28] sm:$0xff] }
 0x1a6   :  { %3540 = vmatprep.subr.bf16.mxu1 %v4835_v19  ;;  %v3610_v19 = vld [vmem:[%s6527_s3 + $0x20] sm:$0xff] }
 0x1a7   :  { %3500 = vmatpush2.bf16.msra.mxu0 %v4830_v20  ;;  %v3609_v20 = vld [vmem:[%s6527_s3 + $0x18] sm:$0xff] }
 0x1a8   :  { %3501 = vmatprep.subr.bf16.mxu0 %v4838_v21  ;;  %v3608_v21 = vld [vmem:[%s6527_s3 + $0x10] sm:$0xff] }
 0x1a9   :  { %3541 = vmatpush2.bf16.msra.mxu1 %v4833_v22  ;;  %v3607_v22 = vld [vmem:[%s6527_s3 + $0x8] sm:$0xff] }
 0x1aa   :  { %3542 = vmatprep.subr.bf16.mxu1 %v4841_v0 }
 0x1ab   :  { %3502 = vmatpush2.bf16.msra.mxu0 %v4836_v5  ;;  %v3606_v5 = vld [vmem:[%s6527_s3] sm:$0xff] }
 0x1ac   :  { %3503 = vmatprep.subr.bf16.mxu0 %v4844_v25 }
 0x1ad   :  { %3543 = vmatpush2.bf16.msra.mxu1 %v4839_v26 }
 0x1ae   :  { %3544 = vmatprep.subr.bf16.mxu1 %v4847_v6 }
 0x1af   :  { %3504 = vmatpush2.bf16.msra.mxu0 %v4842_v29  ;;  %v3630_v29 = vld [vmem:[%s6527_s3 + $0xc0] sm:$0xff] }
 0x1b0   :  { %3505 = vmatprep.subr.bf16.mxu0 %v4850_v31 }
 0x1b1   :  { %3545 = vmatpush2.bf16.msra.mxu1 %v4845_v32 }
 0x1b2   :  { %3546 = vmatprep.subr.bf16.mxu1 %v4853_v59 }
 0x1b3   :  { %3506 = vmatpush2.bf16.msra.mxu0 %v4848_v33 }
 0x1b4   :  { %3507 = vmatprep.subr.bf16.mxu0 %v4856_v35  ;;  %v3629_v35 = vld [vmem:[%s6527_s3 + $0xb8] sm:$0xff] }
 0x1b5   :  { %3547 = vmatpush2.bf16.msra.mxu1 %v4851_v36 }
 0x1b6   :  { %3548 = vmatprep.subr.bf16.mxu1 %v4859_v28 }
 0x1b7   :  { %3508 = vmatpush2.bf16.msra.mxu0 %v4854_v37 }
 0x1b8   :  { %3509 = vmatprep.subr.bf16.mxu0 %v4862_v38  ;;  %v3628_v38 = vld [vmem:[%s6527_s3 + $0xb0] sm:$0xff] }
 0x1b9   :  { %3549 = vmatpush2.bf16.msra.mxu1 %v4857_v39  ;;  %v3627_v39 = vld [vmem:[%s6527_s3 + $0xa8] sm:$0xff] }
 0x1ba   :  { %3550 = vmatprep.subr.bf16.mxu1 %v4865_v40 }
 0x1bb   :  { %3510 = vmatpush2.bf16.msra.mxu0 %v4860_v41  ;;  %v3626_v41 = vld [vmem:[%s6527_s3 + $0xa0] sm:$0xff] }
 0x1bc   :  { %3511 = vmatprep.subr.bf16.mxu0 %v4868_v43  ;;  %v3625_v43 = vld [vmem:[%s6527_s3 + $0x98] sm:$0xff] }
 0x1bd   :  { %3551 = vmatpush2.bf16.msra.mxu1 %v4863_v44  ;;  %v3624_v44 = vld [vmem:[%s6527_s3 + $0x90] sm:$0xff] }
 0x1be   :  { %3552 = vmatprep.subr.bf16.mxu1 %v4871_v45  ;;  %v3623_v45 = vld [vmem:[%s6527_s3 + $0x88] sm:$0xff] }
 0x1bf   :  { %3512 = vmatpush2.bf16.msra.mxu0 %v4866_v23  ;;  %v3622_v23 = vld [vmem:[%s6527_s3 + $0x80] sm:$0xff] }
 0x1c0   :  { %4188 = vmatprep.subr.msk.bf16.mxu0 %vm2982_vm0, %v4873_v49 }
 0x1c1   :  { %3553 = vmatpush2.bf16.msra.mxu1 %v4869_v27 }
 0x1c2   :  { %v3269_v42 = vpop.f32.mrf.mxu0  ;;  %3514 = vmatmul.mubr.bf16.vlgmr.msra.gmra.mxu0 %v665_v47  ;;  %3642 = vmatprep.subr.mxu1 %v4910_v8 }
 0x1c3   :  { %v3270_v54 = vadd.f32 %v3269_v42, %v6214_v46  ;;  %3574 = vmatpush1.bf16.msra.mxu0 %v2984_v51  ;;  %3595 = vmatprep.mubr.bf16.mxu0 %v4909_v56  ;;  %v657_v46 = vrot.slane %v643_v53, %v5074_v48 }
 0x1c4   :  { %v3271_v57 = vpop.f32.mrf.mxu0  ;;  %v3310_v58 = vpop.f32.mrf.mxu1  ;;  %3555 = vmatmul.mubr.bf16.vlgmr.msra.gmra.mxu1 %v680_v52  ;;  %3575 = vmatprep.subr.bf16.mxu0 %v4878_v18 }
 0x1c5   :  { %v3272_v14 = vadd.f32 %v3271_v57, %v6222_v24  ;;  %v6407_v60 = vadd.f32 %v3310_v58, %v3270_v54  ;;  %v672_v7 = vrot.slane %v657_v46, %v5074_v48  ;;  %v3621_v24 = vld [vmem:[%s6527_s3 + $0x78] sm:$0xff]  ;;  %v3619_v48 = vld [vmem:[%s6527_s3 + $0x68] sm:$0xff] }
 0x1c6   :  { %v3273_v61 = vpop.f32.mrf.mxu0  ;;  %v3312_v62 = vpop.f32.mrf.mxu1  ;;  %3643 = vmatpush1.msra.mxu1 %v3621_v24 }
 0x1c7   :  { %v6410_v63 = vadd.f32 %v3312_v62, %v3272_v14  ;;  %3576 = vmatpush1.bf16.msra.mxu0 %v4876_v55  ;;  %3644 = vmatprep.subr.mxu1 %v4910_v8 }
 0x1c8   :  { %v3274_v2 = vpop.f32.mrf.mxu0  ;;  %3577 = vmatprep.subr.bf16.mxu0 %v4881_v30  ;;  %v3314_v3 = vpop.f32.mrf.mxu1  ;;  %3645 = vmatpush1.msra.mxu1 %v3620_v9 }
 0x1c9   :  { %3646 = vmatprep.subr.mxu1 %v4910_v8 }
 0x1ca   :  { %v3315_v4 = vpop.f32.mrf.mxu1  ;;  %3647 = vmatpush1.msra.mxu1 %v3619_v48 }
 0x1cb   :  { %3578 = vmatpush1.bf16.msra.mxu0 %v4879_v1  ;;  %3648 = vmatprep.subr.mxu1 %v4910_v8 }
 0x1cc   :  { %3649 = vmatpush1.msra.mxu1 %v3618_v10 }
 0x1cd   :  { %3650 = vmatprep.subr.mxu1 %v4910_v8 }
 0x1ce   :  { %4189 = vmatmul.mubr.msk.bf16.vlgmr.msra.gmra.mxu0 %vm2978_vm1, %v672_v7  ;;  %3651 = vmatpush1.msra.mxu1 %v3617_v34 }
 0x1cf   :  { %3652 = vmatprep.subr.mxu1 %v4910_v8 }
 0x1d0   :  { %3653 = vmatpush1.msra.mxu1 %v3616_v11  ;;  %v4190_v11 = vld [vmem:[%s6528_s4] ss:$0 sm:$0xff] }
 0x1d1   :  { %3654 = vmatprep.subr.mxu1 %v4910_v8 }
 0x1d2   :  { %3655 = vmatpush1.msra.mxu1 %v3615_v12 }
 0x1d3   :  { %3656 = vmatprep.subr.mxu1 %v4910_v8 }
 0x1d4   :  { %3657 = vmatpush1.msra.mxu1 %v3614_v13 }
 0x1d5   :  { %3658 = vmatprep.subr.mxu1 %v4910_v8 }
 0x1d6   :  { %3659 = vmatpush1.msra.mxu1 %v3613_v15 }
 0x1d7   :  { %3660 = vmatprep.subr.mxu1 %v4910_v8 }
 0x1d8   :  { %3661 = vmatpush1.msra.mxu1 %v3612_v16 }
 0x1d9   :  { %3662 = vmatprep.subr.mxu1 %v4910_v8 }
 0x1da   :  { %3663 = vmatpush1.msra.mxu1 %v3611_v17 }
 0x1db   :  { %3664 = vmatprep.subr.mxu1 %v4910_v8 }
 0x1dc   :  { %3665 = vmatpush1.msra.mxu1 %v3610_v19 }
 0x1dd   :  { %3666 = vmatprep.subr.mxu1 %v4910_v8 }
 0x1de   :  { %3667 = vmatpush1.msra.mxu1 %v3609_v20 }
 0x1df   :  { %3668 = vmatprep.subr.mxu1 %v4910_v8 }
 0x1e0   :  { %3669 = vmatpush1.msra.mxu1 %v3608_v21 }
 0x1e1   :  { %3670 = vmatprep.subr.mxu1 %v4910_v8 }
 0x1e2   :  { %3671 = vmatpush1.msra.mxu1 %v3607_v22 }
 0x1e3   :  { %3672 = vmatprep.subr.mxu1 %v4910_v8 }
 0x1e4   :  { %3673 = vmatpush1.msra.mxu1 %v3606_v5 }
 0x1e5   :  { %3688 = vmatprep.subr.mxu1 %v4910_v8 }
 0x1e6   :  { %3689 = vmatpush2.msra.mxu1 %v3630_v29 }
 0x1e7   :  { %3690 = vmatprep.subr.mxu1 %v4910_v8 }
 0x1e8   :  { %3691 = vmatpush2.msra.mxu1 %v3629_v35 }
 0x1e9   :  { %3692 = vmatprep.subr.mxu1 %v4910_v8 }
 0x1ea   :  { %3693 = vmatpush2.msra.mxu1 %v3628_v38 }
 0x1eb   :  { %3694 = vmatprep.subr.mxu1 %v4910_v8 }
 0x1ec   :  { %3695 = vmatpush2.msra.mxu1 %v3627_v39 }
 0x1ed   :  { %3696 = vmatprep.subr.mxu1 %v4910_v8 }
 0x1ee   :  { %3697 = vmatpush2.msra.mxu1 %v3626_v41 }
 0x1ef   :  { %3698 = vmatprep.subr.mxu1 %v4910_v8 }
 0x1f0   :  { %3699 = vmatpush2.msra.mxu1 %v3625_v43 }
 0x1f1   :  { %3700 = vmatprep.subr.mxu1 %v4910_v8 }
 0x1f2   :  { %3701 = vmatpush2.msra.mxu1 %v3624_v44 }
 0x1f3   :  { %3702 = vmatprep.subr.mxu1 %v4910_v8 }
 0x1f4   :  { %3703 = vmatpush2.msra.mxu1 %v3623_v45 }
 0x1f5   :  { %3704 = vmatprep.subr.mxu1 %v4910_v8 }
 0x1f6   :  { %3705 = vmatpush2.msra.mxu1 %v3622_v23 }
 0x202   :  { %v3351_v0 = vpop.f32.mrf.mxu0 }
 0x203   :  { %v3352_v25 = vadd.f32 %v3351_v0, %v6407_v60 }
 0x204   :  { %v3353_v26 = vpop.f32.mrf.mxu0  ;;  %v3392_v6 = vpop.f32.mrf.mxu1 }
 0x205   :  { %v3354_v31 = vadd.f32 %v3353_v26, %v6410_v63  ;;  %v3393_v32 = vadd.f32 %v3392_v6, %v3352_v25 }
 0x206   :  { %v3355_v59 = vpop.f32.mrf.mxu0  ;;  %v3394_v33 = vpop.f32.mrf.mxu1 }
 0x207   :  { %v3395_v36 = vadd.f32 %v3394_v33, %v3354_v31 }
 0x208   :  { %v3356_v28 = vpop.f32.mrf.mxu0  ;;  %v3396_v37 = vpop.f32.mrf.mxu1 }
 0x20a   :  { %v3397_v40 = vpop.f32.mrf.mxu1 }
 0x242   :  { %v3433_v47 = vpop.f32.mrf.mxu0 }
 0x243   :  { %v3434_v49 = vadd.f32 %v3433_v47, %v3393_v32 }
 0x244   :  { %v3435_v50 = vpop.f32.mrf.mxu0  ;;  %v3474_v27 = vpop.f32.mrf.mxu1 }
 0x245   :  { %v3436_v51 = vadd.f32 %v3435_v50, %v3395_v36  ;;  %v3475_v52 = vadd.f32 %v3474_v27, %v3434_v49 }
 0x246   :  { %v3437_v18 = vpop.f32.mrf.mxu0  ;;  %v3476_v53 = vpop.f32.mrf.mxu1 }
 0x247   :  { %v3477_v42 = vadd.f32 %v3476_v53, %v3436_v51 }
 0x248   :  { %v3438_v54 = vpop.f32.mrf.mxu0  ;;  %v3478_v55 = vpop.f32.mrf.mxu1 }
 0x24a   :  { %v3479_v56 = vpop.f32.mrf.mxu1 }
 0x282   :  { %v3515_v57 = vpop.f32.mrf.mxu0 }
 0x283   :  { %v3516_v62 = vadd.f32 %v3515_v57, %v3475_v52 }
 0x284   :  { %v3517_v58 = vpop.f32.mrf.mxu0  ;;  %v3556_v30 = vpop.f32.mrf.mxu1 }
 0x285   :  { %v3518_v1 = vadd.f32 %v3517_v58, %v3477_v42  ;;  %v3557_v2 = vadd.f32 %v3556_v30, %v3516_v62 }
 0x286   :  { %v3519_v14 = vpop.f32.mrf.mxu0  ;;  %v3558_v60 = vpop.f32.mrf.mxu1 }
 0x287   :  { %v3559_v4 = vadd.f32 %v3558_v60, %v3518_v1 }
 0x288   :  { %v3520_v46 = vpop.f32.mrf.mxu0  ;;  %v3560_v61 = vpop.f32.mrf.mxu1 }
 0x28a   :  { %v3561_v63 = vpop.f32.mrf.mxu1 }
 0x28e   :  { %v3597_v3 = vpop.f32.mrf.mxu0 }
 0x28f   :  { %v3598_v7 = vadd.f32 %v3597_v3, %v3557_v2 }
 0x290   :  { %v3599_v24 = vpop.f32.mrf.mxu0 }
 0x291   :  { %v3600_v8 = vadd.f32 %v3599_v24, %v3559_v4  ;;  %v3604_v10 = vmax.f32 %v3598_v7, 0.0 }
 0x292   :  { %v3601_v9 = vpop.f32.mrf.mxu0 }
 0x293   :  { %v3605_v48 = vmax.f32 %v3600_v8, 0.0 }
 0x294   :  { %v3602_v34 = vpop.f32.mrf.mxu0 }
 0x295   :  { %4191 = vmatprep.mubr.msk.f32.mxu1 %vm3638_vm2, %v3605_v48 }
 0x296   :  { %3707 = vmatmul.mubr.f32.vlgmr.msra.gmra.mxu1 %v3604_v10 }
 0x356   :  { %v3708_v12 = vpop.f32.mrf.mxu1 }
 0x357   :  { %v3709_v13 = vadd.f32 %v4190_v11, %v3708_v12 }
 0x358   :  { %v3710_v15 = vpop.f32.mrf.mxu1 }
 0x359   :  { %v4192_v16 = vmul.f32 -1.442695, %v3709_v13 }
 0x35b   :  { %4882 = vpow2.f32 %v4192_v16 }
 0x368   :  { %v4883_v17 = vpop.eup %4882 }
 0x369   :  { %v3715_v19 = vadd.f32 1.0, %v4883_v17 }
 0x36b   :  { %4884 = vrcp.f32 %v3715_v19 }
 0x378   :  { %v4885_v20 = vpop.eup %4884 }
 0x379   :  { %3719 = vst.msk [vmem:[#allocation2] sm:$0x3] %vm3718_vm3, %v4885_v20 }
 0x37a   :  { %4897 = shalt.err (!%p4894_p4)
}
 0x37b   :  { %3729 = dma.vmem_to_hbm [thread:$0]  %s3727_s11, 32, %s6529_s5, [#allocation3]  }
 0x37c   :  { %4906 = dma.done.wait [#allocation3], 32  }
 0x37d   :  { %4907 = vsyncadd [#allocation3], 4294967264 }
 0x37e   :  { %3733 = vsyncpa [#allocation3], 1 }

</bundles_post_ra>
